<compile_context>
chip_gen: v5e
topology: v5e:2x2
jax: 0.10.0
libtpu: 0.0.40
codegen_flags: <defaults>
</compile_context>

<pallas_src>
import jax
import jax.numpy as jnp
from jax import lax
from jax.experimental import pallas as pl
from jax.experimental.pallas import tpu as pltpu


# ---------------- block-size selection --------------------------------------
_VMEM_X_BLOCK_BUDGET = 8 * 1024 * 1024  # double-buffered x block budget (bytes)


def _choose_blocks(N, cin, T, HW, budget_bytes=_VMEM_X_BLOCK_BUDGET):
    """Pick (Nb clips per grid step, t_blk timesteps per grid step).

    Keep >= 2 grid steps over clips when N allows (v7x: 2 TensorCores, the
    clip axis is "parallel"); only introduce a t (reduction) axis if the
    double-buffered x block would overflow the conservative VMEM budget
    (sized for v7x's 64 MiB VMEM)."""
    def divisors(v):
        return [d for d in range(1, v + 1) if v % d == 0]

    nb_cands = [d for d in divisors(N) if d <= max(N // 2, 1)] or [1]
    Nb = nb_cands[-1]

    def xbytes(nb, tb):
        return 2 * nb * cin * tb * HW * 4  # double-buffered f32 input block

    t_blk = T
    while xbytes(Nb, t_blk) > budget_bytes and Nb > 1:
        Nb = [d for d in divisors(N) if d < Nb][-1]
    while xbytes(Nb, t_blk) > budget_bytes and t_blk > 1:
        t_blk = [d for d in divisors(T) if d < t_blk][-1]
    return Nb, t_blk


# ---------------- Fused kernel: pointwise conv + ReLU + RoI avg pool --------
def _make_kernel(*, Nb, t_blk, HW, nt):
    def kernel(x_ref, w_ref, b_ref, rw_ref, o_ref):
        # x_ref : (Nb, cin, t_blk*HW) f32  clip-major block, T*H*W on lanes
        # w_ref : (cf, cin)           f32  pointwise conv weight (transposed)
        # b_ref : (cf, 1)             f32  conv bias
        # rw_ref: (1, Nb, HW)         f32  per-clip RoI weights = mask/(cnt*T)
        # o_ref : (1, cf, Nb)         f32  pooled features (resident over t axis)
        w = w_ref[...]
        b = b_ref[...]
        rw = rw_ref[0]                      # (Nb, HW)

        cols = []
        for nb in range(Nb):                # small static unroll, static slices
            # pointwise Conv3d(cin->cf) + bias + ReLU on the MXU
            z = jnp.dot(w, x_ref[nb],
                        precision=lax.Precision.HIGHEST,
                        preferred_element_type=jnp.float32)      # (cf, t_blk*HW)
            z = jnp.maximum(z + b, 0.0)
            # sum over the t_blk lane chunks (lane-aligned static slices, VPU adds)
            zs = z[:, 0:HW]
            for tt in range(1, t_blk):
                zs = zs + z[:, tt * HW:(tt + 1) * HW]            # (cf, HW)
            # RoI-masked average pool: weighted lane reduce
            col = jnp.sum(zs * rw[nb:nb + 1, :], axis=1,
                          keepdims=True)                          # (cf, 1)
            cols.append(col)
        part = cols[0] if Nb == 1 else jnp.concatenate(cols, axis=1)  # (cf, Nb)

        if nt == 1:
            # degenerate reduction axis: no scratch, no init/finalize
            o_ref[0] = part
        else:
            @pl.when(pl.program_id(1) == 0)
            def _init():
                o_ref[...] = jnp.zeros_like(o_ref)

            o_ref[0] += part

    return kernel


def fused_backbone_roi_pool(x5, wT, b_col, roi_w3, *, Nb, t_blk, HW):
    """x5: (N, cin, T*HW) f32, wT: (cf, cin), b_col: (cf, 1),
    roi_w3: (N//Nb, Nb, HW) f32 per-clip spatial weights (mask/(cnt*T)).
    Returns pooled features (N//Nb, cf, Nb)."""
    N, cin, LT = x5.shape
    cf = wT.shape[0]
    assert LT % HW == 0
    T = LT // HW
    assert N % Nb == 0 and T % t_blk == 0
    Ng = N // Nb
    nt = T // t_blk
    Lb = t_blk * HW
    # last block dim must be a multiple of 128 unless it spans the full array dim
    assert (t_blk == T) or (Lb % 128 == 0), (t_blk, HW)

    kernel = _make_kernel(Nb=Nb, t_blk=t_blk, HW=HW, nt=nt)

    return pl.pallas_call(
        kernel,
        out_shape=jax.ShapeDtypeStruct((Ng, cf, Nb), jnp.float32),
        grid=(Ng, nt),
        in_specs=[
            pl.BlockSpec((Nb, cin, Lb), lambda n, tb: (n, 0, tb)),
            pl.BlockSpec((cf, cin), lambda n, tb: (0, 0)),
            pl.BlockSpec((cf, 1), lambda n, tb: (0, 0)),
            pl.BlockSpec((1, Nb, HW), lambda n, tb: (n, 0, 0)),
        ],
        out_specs=pl.BlockSpec((1, cf, Nb), lambda n, tb: (n, 0, 0)),
        compiler_params=pltpu.CompilerParams(
            dimension_semantics=("parallel", "arbitrary"),
            vmem_limit_bytes=32 * 1024 * 1024),
    )(x5, wT, b_col, roi_w3)


# ---------------- Full forward ----------------------------------------------
def violence_detector_binary_forward(x, bbox, num_tubes, params,
                                     force_blocks=None):
    # x: (batch*num_tubes, C_in, T, H, W);  bbox: (N, 5) [idx, x1, y1, x2, y2]
    n, cin, t, h, w = x.shape
    assert n % num_tubes == 0
    batch = n // num_tubes
    cf = params["w_backbone"].shape[1]
    hw = h * w

    # --- RoI spatial weights (tiny, wrapper-side): mask / (cnt * T) ---------
    scale = 1.0 / float(params["roi_spatial_scale"])
    bb = bbox[:, 1:5].astype(jnp.float32) * scale
    h_idx = jnp.arange(h, dtype=jnp.float32)[None, :, None]
    w_idx = jnp.arange(w, dtype=jnp.float32)[None, None, :]
    x1 = bb[:, 0][:, None, None]
    y1 = bb[:, 1][:, None, None]
    x2 = bb[:, 2][:, None, None]
    y2 = bb[:, 3][:, None, None]
    mask = ((w_idx >= x1) & (w_idx <= x2) &
            (h_idx >= y1) & (h_idx <= y2)).astype(jnp.float32)     # (N, H, W)
    cnt = jnp.maximum(mask.sum(axis=(1, 2)), 1.0)                  # (N,)
    roi_w = (mask / (cnt[:, None, None] * float(t))).reshape(n, hw)

    # --- blocking ------------------------------------------------------------
    if force_blocks is None:
        Nb, t_blk = _choose_blocks(n, cin, t, hw)
    else:
        Nb, t_blk = force_blocks
    Ng = n // Nb

    # Free row-major reshapes (no NCTHW -> NTHWC transpose, no extra HBM pass).
    x5 = x.reshape(n, cin, t * hw)
    wT = params["w_backbone"].T                    # (cf, cin)
    b_col = params["b_backbone"].reshape(cf, 1)
    roi_w3 = roi_w.reshape(Ng, Nb, hw)

    pooled3 = fused_backbone_roi_pool(x5, wT, b_col, roi_w3,
                                      Nb=Nb, t_blk=t_blk, HW=hw)
    # (Ng, cf, Nb) -> (N, cf): 1 KiB transpose, fuses with the head in XLA.
    pooled = jnp.transpose(pooled3, (0, 2, 1)).reshape(n, cf)

    # Head: x.view(batch, 4, -1).max(dim=1).values ; Linear(fc_input_dim, 2).
    # Left in plain XLA: (batch, num_tubes, C_feat) is tiny — a pallas_call's
    # fixed cost would dominate.
    feats = pooled.reshape(batch, num_tubes, cf).max(axis=1)
    return feats @ params["w_cls"] + params["b_cls"]


# ---------------- Pure-JAX reference (for correctness check) ----------------
def reference_forward(x, bbox, num_tubes, params):
    n, cin, t, h, w = x.shape
    batch = n // num_tubes
    cf = params["w_backbone"].shape[1]
    xr = jnp.transpose(x, (0, 2, 3, 4, 1))
    feat = jnp.maximum(
        jnp.matmul(xr, params["w_backbone"],
                   precision=lax.Precision.HIGHEST) + params["b_backbone"],
        0.0)
    scale = 1.0 / float(params["roi_spatial_scale"])
    bb = bbox[:, 1:5] * scale
    h_idx = jnp.arange(h, dtype=jnp.float32)[None, :, None]
    w_idx = jnp.arange(w, dtype=jnp.float32)[None, None, :]
    x1 = bb[:, 0][:, None, None]
    y1 = bb[:, 1][:, None, None]
    x2 = bb[:, 2][:, None, None]
    y2 = bb[:, 3][:, None, None]
    mask = ((w_idx >= x1) & (w_idx <= x2) &
            (h_idx >= y1) & (h_idx <= y2)).astype(jnp.float32)
    cnt = jnp.maximum(mask.sum(axis=(1, 2)), 1.0)
    pooled = (feat * mask[:, None, :, :, None]).sum(axis=(1, 2, 3))
    pooled = pooled / (cnt[:, None] * t)
    feats = pooled.reshape(batch, num_tubes, cf).max(axis=1)
    return feats @ params["w_cls"] + params["b_cls"]


if __name__ == "__main__":
    key = jax.random.PRNGKey(0)
    k1, k2, k3, k4, k5 = jax.random.split(key, 5)

    batch, num_tubes = 2, 4           # forward hardcodes x.view(batch, 4, -1)
    n_clips = batch * num_tubes
    cin, t, h, w = 3, 8, 16, 16
    c_feat = 32                       # fc_input_dim (small synthetic size)

    params = {
        "w_backbone": (jax.random.normal(k1, (cin, c_feat), jnp.float32) * 0.1),
        "b_backbone": (jax.random.normal(k2, (c_feat,), jnp.float32) * 0.01),
        "w_cls": (jax.random.normal(k3, (c_feat, 2), jnp.float32) * 0.1),
        "b_cls": jnp.zeros((2,), jnp.float32),
        "roi_spatial_scale": 16,      # featmap stride -> spatial_scale = 1/16
    }

    x = jax.random.normal(k4, (n_clips, cin, t, h, w), jnp.float32)

    # bbox: (N, 5) = [batch_idx, x1, y1, x2, y2] in image coordinates
    kx, ky = jax.random.split(k5)
    bx1 = jax.random.uniform(kx, (n_clips,), minval=0.0, maxval=100.0)
    by1 = jax.random.uniform(ky, (n_clips,), minval=0.0, maxval=100.0)
    bx2 = jnp.clip(bx1 + 96.0, 0.0, 255.0)
    by2 = jnp.clip(by1 + 96.0, 0.0, 255.0)
    bbox = jnp.stack(
        [jnp.arange(n_clips, dtype=jnp.float32), bx1, by1, bx2, by2], axis=1)

    ref = reference_forward(x, bbox, num_tubes, params)

    # Main path: Nb=4 clips per step, full-T block (nt == 1, no accumulation).
    out = violence_detector_binary_forward(x, bbox, num_tubes, params)
    out = jax.block_until_ready(out)
    assert out.shape == (batch, 2), out.shape
    assert jnp.allclose(out, ref, rtol=1e-4, atol=1e-4), (out, ref)

    # Also exercise the nt > 1 accumulate path (t reduction axis) and a
    # different clip blocking: Nb=2, t_blk=4 -> grid (4, 2).
    out2 = violence_detector_binary_forward(x, bbox, num_tubes, params,
                                            force_blocks=(2, 4))
    out2 = jax.block_until_ready(out2)
    assert jnp.allclose(out2, ref, rtol=1e-4, atol=1e-4), (out2, ref)

    print("KERNEL_OK")
</pallas_src>

<mosaic_0001>
module attributes {stable_mosaic.version = 11 : i64} {
  func.func @kernel(%arg0: i32, %arg1: i32, %arg2: memref<4x3x2048xf32, #tpu.memory_space<vmem>>, %arg3: memref<32x3xf32, #tpu.memory_space<vmem>>, %arg4: memref<32x1xf32, #tpu.memory_space<vmem>>, %arg5: memref<1x4x256xf32, #tpu.memory_space<vmem>>, %arg6: memref<1x32x4xf32, #tpu.memory_space<vmem>>) attributes {dimension_semantics = [#tpu.dimension_semantics<parallel>, #tpu.dimension_semantics<arbitrary>], iteration_bounds = array<i64: 2, 1>, scalar_prefetch = 0 : i64, scratch_operands = 0 : i64, tpu.core_type = #tpu.core_type<tc>, window_params = [{transform_indices = @transform_0, window_bounds = array<i64: 4, 3, 2048>}, {pipeline_mode = #tpu.pipeline_mode<synchronous>, transform_indices = @transform_1, window_bounds = array<i64: 32, 3>}, {pipeline_mode = #tpu.pipeline_mode<synchronous>, transform_indices = @transform_2, window_bounds = array<i64: 32, 1>}, {transform_indices = @transform_3, window_bounds = array<i64: 1, 4, 256>}, {transform_indices = @transform_4, window_bounds = array<i64: 1, 32, 4>}]} {
    %c0 = arith.constant 0 : index
    %c0_0 = arith.constant 0 : index
    %0 = vector.load %arg3[%c0, %c0_0] : memref<32x3xf32, #tpu.memory_space<vmem>>, vector<32x3xf32>
    %c0_1 = arith.constant 0 : index
    %c0_2 = arith.constant 0 : index
    %1 = vector.load %arg4[%c0_1, %c0_2] : memref<32x1xf32, #tpu.memory_space<vmem>>, vector<32x1xf32>
    %c0_3 = arith.constant 0 : index
    %c0_4 = arith.constant 0 : index
    %c0_5 = arith.constant 0 : index
    %2 = vector.load %arg5[%c0_3, %c0_4, %c0_5] : memref<1x4x256xf32, #tpu.memory_space<vmem>>, vector<1x4x256xf32>
    %3 = vector.shape_cast %2 : vector<1x4x256xf32> to vector<4x256xf32>
    %c0_6 = arith.constant 0 : index
    %c0_7 = arith.constant 0 : index
    %c0_8 = arith.constant 0 : index
    %4 = vector.load %arg2[%c0_6, %c0_7, %c0_8] : memref<4x3x2048xf32, #tpu.memory_space<vmem>>, vector<1x3x2048xf32>
    %5 = vector.shape_cast %4 : vector<1x3x2048xf32> to vector<3x2048xf32>
    %cst = arith.constant dense<0.000000e+00> : vector<32x2048xf32>
    %6 = tpu.matmul %0, %5, %cst {dimension_numbers = #tpu.dot_dimension_numbers<[1], [0], [0], [1], [0, 0, 1, 1], [], []>, precision = #tpu.contract_precision<fp32>} : vector<32x3xf32>, vector<3x2048xf32>, vector<32x2048xf32> -> vector<32x2048xf32>
    %7 = vector.broadcast %1 : vector<32x1xf32> to vector<32x2048xf32>
    %8 = arith.addf %6, %7 : vector<32x2048xf32>
    %cst_9 = arith.constant 0.000000e+00 : f32
    %9 = vector.broadcast %cst_9 : f32 to vector<32x2048xf32>
    %10 = arith.maximumf %8, %9 : vector<32x2048xf32>
    %11 = vector.extract_strided_slice %10 {offsets = [0, 0], sizes = [32, 256], strides = [1, 1]} : vector<32x2048xf32> to vector<32x256xf32>
    %12 = vector.extract_strided_slice %10 {offsets = [0, 256], sizes = [32, 256], strides = [1, 1]} : vector<32x2048xf32> to vector<32x256xf32>
    %13 = arith.addf %11, %12 : vector<32x256xf32>
    %14 = vector.extract_strided_slice %10 {offsets = [0, 512], sizes = [32, 256], strides = [1, 1]} : vector<32x2048xf32> to vector<32x256xf32>
    %15 = arith.addf %13, %14 : vector<32x256xf32>
    %16 = vector.extract_strided_slice %10 {offsets = [0, 768], sizes = [32, 256], strides = [1, 1]} : vector<32x2048xf32> to vector<32x256xf32>
    %17 = arith.addf %15, %16 : vector<32x256xf32>
    %18 = vector.extract_strided_slice %10 {offsets = [0, 1024], sizes = [32, 256], strides = [1, 1]} : vector<32x2048xf32> to vector<32x256xf32>
    %19 = arith.addf %17, %18 : vector<32x256xf32>
    %20 = vector.extract_strided_slice %10 {offsets = [0, 1280], sizes = [32, 256], strides = [1, 1]} : vector<32x2048xf32> to vector<32x256xf32>
    %21 = arith.addf %19, %20 : vector<32x256xf32>
    %22 = vector.extract_strided_slice %10 {offsets = [0, 1536], sizes = [32, 256], strides = [1, 1]} : vector<32x2048xf32> to vector<32x256xf32>
    %23 = arith.addf %21, %22 : vector<32x256xf32>
    %24 = vector.extract_strided_slice %10 {offsets = [0, 1792], sizes = [32, 256], strides = [1, 1]} : vector<32x2048xf32> to vector<32x256xf32>
    %25 = arith.addf %23, %24 : vector<32x256xf32>
    %26 = vector.extract_strided_slice %3 {offsets = [0, 0], sizes = [1, 256], strides = [1, 1]} : vector<4x256xf32> to vector<1x256xf32>
    %27 = vector.broadcast %26 : vector<1x256xf32> to vector<32x256xf32>
    %28 = arith.mulf %25, %27 : vector<32x256xf32>
    %cst_10 = arith.constant dense<0.000000e+00> : vector<32xf32>
    %29 = vector.multi_reduction <add>, %28, %cst_10 [1] : vector<32x256xf32> to vector<32xf32>
    %30 = vector.shape_cast %29 : vector<32xf32> to vector<32x1xf32>
    %c1 = arith.constant 1 : index
    %c0_11 = arith.constant 0 : index
    %c0_12 = arith.constant 0 : index
    %31 = vector.load %arg2[%c1, %c0_11, %c0_12] : memref<4x3x2048xf32, #tpu.memory_space<vmem>>, vector<1x3x2048xf32>
    %32 = vector.shape_cast %31 : vector<1x3x2048xf32> to vector<3x2048xf32>
    %cst_13 = arith.constant dense<0.000000e+00> : vector<32x2048xf32>
    %33 = tpu.matmul %0, %32, %cst_13 {dimension_numbers = #tpu.dot_dimension_numbers<[1], [0], [0], [1], [0, 0, 1, 1], [], []>, precision = #tpu.contract_precision<fp32>} : vector<32x3xf32>, vector<3x2048xf32>, vector<32x2048xf32> -> vector<32x2048xf32>
    %34 = vector.broadcast %1 : vector<32x1xf32> to vector<32x2048xf32>
    %35 = arith.addf %33, %34 : vector<32x2048xf32>
    %cst_14 = arith.constant 0.000000e+00 : f32
    %36 = vector.broadcast %cst_14 : f32 to vector<32x2048xf32>
    %37 = arith.maximumf %35, %36 : vector<32x2048xf32>
    %38 = vector.extract_strided_slice %37 {offsets = [0, 0], sizes = [32, 256], strides = [1, 1]} : vector<32x2048xf32> to vector<32x256xf32>
    %39 = vector.extract_strided_slice %37 {offsets = [0, 256], sizes = [32, 256], strides = [1, 1]} : vector<32x2048xf32> to vector<32x256xf32>
    %40 = arith.addf %38, %39 : vector<32x256xf32>
    %41 = vector.extract_strided_slice %37 {offsets = [0, 512], sizes = [32, 256], strides = [1, 1]} : vector<32x2048xf32> to vector<32x256xf32>
    %42 = arith.addf %40, %41 : vector<32x256xf32>
    %43 = vector.extract_strided_slice %37 {offsets = [0, 768], sizes = [32, 256], strides = [1, 1]} : vector<32x2048xf32> to vector<32x256xf32>
    %44 = arith.addf %42, %43 : vector<32x256xf32>
    %45 = vector.extract_strided_slice %37 {offsets = [0, 1024], sizes = [32, 256], strides = [1, 1]} : vector<32x2048xf32> to vector<32x256xf32>
    %46 = arith.addf %44, %45 : vector<32x256xf32>
    %47 = vector.extract_strided_slice %37 {offsets = [0, 1280], sizes = [32, 256], strides = [1, 1]} : vector<32x2048xf32> to vector<32x256xf32>
    %48 = arith.addf %46, %47 : vector<32x256xf32>
    %49 = vector.extract_strided_slice %37 {offsets = [0, 1536], sizes = [32, 256], strides = [1, 1]} : vector<32x2048xf32> to vector<32x256xf32>
    %50 = arith.addf %48, %49 : vector<32x256xf32>
    %51 = vector.extract_strided_slice %37 {offsets = [0, 1792], sizes = [32, 256], strides = [1, 1]} : vector<32x2048xf32> to vector<32x256xf32>
    %52 = arith.addf %50, %51 : vector<32x256xf32>
    %53 = vector.extract_strided_slice %3 {offsets = [1, 0], sizes = [1, 256], strides = [1, 1]} : vector<4x256xf32> to vector<1x256xf32>
    %54 = vector.broadcast %53 : vector<1x256xf32> to vector<32x256xf32>
    %55 = arith.mulf %52, %54 : vector<32x256xf32>
    %cst_15 = arith.constant dense<0.000000e+00> : vector<32xf32>
    %56 = vector.multi_reduction <add>, %55, %cst_15 [1] : vector<32x256xf32> to vector<32xf32>
    %57 = vector.shape_cast %56 : vector<32xf32> to vector<32x1xf32>
    %c2 = arith.constant 2 : index
    %c0_16 = arith.constant 0 : index
    %c0_17 = arith.constant 0 : index
    %58 = vector.load %arg2[%c2, %c0_16, %c0_17] : memref<4x3x2048xf32, #tpu.memory_space<vmem>>, vector<1x3x2048xf32>
    %59 = vector.shape_cast %58 : vector<1x3x2048xf32> to vector<3x2048xf32>
    %cst_18 = arith.constant dense<0.000000e+00> : vector<32x2048xf32>
    %60 = tpu.matmul %0, %59, %cst_18 {dimension_numbers = #tpu.dot_dimension_numbers<[1], [0], [0], [1], [0, 0, 1, 1], [], []>, precision = #tpu.contract_precision<fp32>} : vector<32x3xf32>, vector<3x2048xf32>, vector<32x2048xf32> -> vector<32x2048xf32>
    %61 = vector.broadcast %1 : vector<32x1xf32> to vector<32x2048xf32>
    %62 = arith.addf %60, %61 : vector<32x2048xf32>
    %cst_19 = arith.constant 0.000000e+00 : f32
    %63 = vector.broadcast %cst_19 : f32 to vector<32x2048xf32>
    %64 = arith.maximumf %62, %63 : vector<32x2048xf32>
    %65 = vector.extract_strided_slice %64 {offsets = [0, 0], sizes = [32, 256], strides = [1, 1]} : vector<32x2048xf32> to vector<32x256xf32>
    %66 = vector.extract_strided_slice %64 {offsets = [0, 256], sizes = [32, 256], strides = [1, 1]} : vector<32x2048xf32> to vector<32x256xf32>
    %67 = arith.addf %65, %66 : vector<32x256xf32>
    %68 = vector.extract_strided_slice %64 {offsets = [0, 512], sizes = [32, 256], strides = [1, 1]} : vector<32x2048xf32> to vector<32x256xf32>
    %69 = arith.addf %67, %68 : vector<32x256xf32>
    %70 = vector.extract_strided_slice %64 {offsets = [0, 768], sizes = [32, 256], strides = [1, 1]} : vector<32x2048xf32> to vector<32x256xf32>
    %71 = arith.addf %69, %70 : vector<32x256xf32>
    %72 = vector.extract_strided_slice %64 {offsets = [0, 1024], sizes = [32, 256], strides = [1, 1]} : vector<32x2048xf32> to vector<32x256xf32>
    %73 = arith.addf %71, %72 : vector<32x256xf32>
    %74 = vector.extract_strided_slice %64 {offsets = [0, 1280], sizes = [32, 256], strides = [1, 1]} : vector<32x2048xf32> to vector<32x256xf32>
    %75 = arith.addf %73, %74 : vector<32x256xf32>
    %76 = vector.extract_strided_slice %64 {offsets = [0, 1536], sizes = [32, 256], strides = [1, 1]} : vector<32x2048xf32> to vector<32x256xf32>
    %77 = arith.addf %75, %76 : vector<32x256xf32>
    %78 = vector.extract_strided_slice %64 {offsets = [0, 1792], sizes = [32, 256], strides = [1, 1]} : vector<32x2048xf32> to vector<32x256xf32>
    %79 = arith.addf %77, %78 : vector<32x256xf32>
    %80 = vector.extract_strided_slice %3 {offsets = [2, 0], sizes = [1, 256], strides = [1, 1]} : vector<4x256xf32> to vector<1x256xf32>
    %81 = vector.broadcast %80 : vector<1x256xf32> to vector<32x256xf32>
    %82 = arith.mulf %79, %81 : vector<32x256xf32>
    %cst_20 = arith.constant dense<0.000000e+00> : vector<32xf32>
    %83 = vector.multi_reduction <add>, %82, %cst_20 [1] : vector<32x256xf32> to vector<32xf32>
    %84 = vector.shape_cast %83 : vector<32xf32> to vector<32x1xf32>
    %c3 = arith.constant 3 : index
    %c0_21 = arith.constant 0 : index
    %c0_22 = arith.constant 0 : index
    %85 = vector.load %arg2[%c3, %c0_21, %c0_22] : memref<4x3x2048xf32, #tpu.memory_space<vmem>>, vector<1x3x2048xf32>
    %86 = vector.shape_cast %85 : vector<1x3x2048xf32> to vector<3x2048xf32>
    %cst_23 = arith.constant dense<0.000000e+00> : vector<32x2048xf32>
    %87 = tpu.matmul %0, %86, %cst_23 {dimension_numbers = #tpu.dot_dimension_numbers<[1], [0], [0], [1], [0, 0, 1, 1], [], []>, precision = #tpu.contract_precision<fp32>} : vector<32x3xf32>, vector<3x2048xf32>, vector<32x2048xf32> -> vector<32x2048xf32>
    %88 = vector.broadcast %1 : vector<32x1xf32> to vector<32x2048xf32>
    %89 = arith.addf %87, %88 : vector<32x2048xf32>
    %cst_24 = arith.constant 0.000000e+00 : f32
    %90 = vector.broadcast %cst_24 : f32 to vector<32x2048xf32>
    %91 = arith.maximumf %89, %90 : vector<32x2048xf32>
    %92 = vector.extract_strided_slice %91 {offsets = [0, 0], sizes = [32, 256], strides = [1, 1]} : vector<32x2048xf32> to vector<32x256xf32>
    %93 = vector.extract_strided_slice %91 {offsets = [0, 256], sizes = [32, 256], strides = [1, 1]} : vector<32x2048xf32> to vector<32x256xf32>
    %94 = arith.addf %92, %93 : vector<32x256xf32>
    %95 = vector.extract_strided_slice %91 {offsets = [0, 512], sizes = [32, 256], strides = [1, 1]} : vector<32x2048xf32> to vector<32x256xf32>
    %96 = arith.addf %94, %95 : vector<32x256xf32>
    %97 = vector.extract_strided_slice %91 {offsets = [0, 768], sizes = [32, 256], strides = [1, 1]} : vector<32x2048xf32> to vector<32x256xf32>
    %98 = arith.addf %96, %97 : vector<32x256xf32>
    %99 = vector.extract_strided_slice %91 {offsets = [0, 1024], sizes = [32, 256], strides = [1, 1]} : vector<32x2048xf32> to vector<32x256xf32>
    %100 = arith.addf %98, %99 : vector<32x256xf32>
    %101 = vector.extract_strided_slice %91 {offsets = [0, 1280], sizes = [32, 256], strides = [1, 1]} : vector<32x2048xf32> to vector<32x256xf32>
    %102 = arith.addf %100, %101 : vector<32x256xf32>
    %103 = vector.extract_strided_slice %91 {offsets = [0, 1536], sizes = [32, 256], strides = [1, 1]} : vector<32x2048xf32> to vector<32x256xf32>
    %104 = arith.addf %102, %103 : vector<32x256xf32>
    %105 = vector.extract_strided_slice %91 {offsets = [0, 1792], sizes = [32, 256], strides = [1, 1]} : vector<32x2048xf32> to vector<32x256xf32>
    %106 = arith.addf %104, %105 : vector<32x256xf32>
    %107 = vector.extract_strided_slice %3 {offsets = [3, 0], sizes = [1, 256], strides = [1, 1]} : vector<4x256xf32> to vector<1x256xf32>
    %108 = vector.broadcast %107 : vector<1x256xf32> to vector<32x256xf32>
    %109 = arith.mulf %106, %108 : vector<32x256xf32>
    %cst_25 = arith.constant dense<0.000000e+00> : vector<32xf32>
    %110 = vector.multi_reduction <add>, %109, %cst_25 [1] : vector<32x256xf32> to vector<32xf32>
    %111 = vector.shape_cast %110 : vector<32xf32> to vector<32x1xf32>
    %112 = tpu.concatenate %30, %57, %84, %111 in 1 : vector<32x1xf32>, vector<32x1xf32>, vector<32x1xf32>, vector<32x1xf32> -> vector<32x4xf32>
    %c0_26 = arith.constant 0 : index
    %c0_27 = arith.constant 0 : index
    %c0_28 = arith.constant 0 : index
    %113 = vector.load %arg6[%c0_26, %c0_27, %c0_28] : memref<1x32x4xf32, #tpu.memory_space<vmem>>, vector<1x32x4xf32>
    %114 = vector.shape_cast %113 : vector<1x32x4xf32> to vector<32x4xf32>
    %115 = vector.shape_cast %112 : vector<32x4xf32> to vector<1x32x4xf32>
    tpu.vector_store %arg6[%c0_26, %c0_27, %c0_28], %115 {strides = array<i32>} : memref<1x32x4xf32, #tpu.memory_space<vmem>>, vector<1x32x4xf32>,
    return
  }
  func.func @transform_0(%arg0: i32, %arg1: i32) -> (i32, i32, i32) {
    %c0_i32 = arith.constant 0 : i32
    %c0_i32_0 = arith.constant 0 : i32
    return %arg0, %c0_i32, %arg1 : i32, i32, i32
  }
  func.func @transform_1(%arg0: i32, %arg1: i32) -> (i32, i32) {
    %c0_i32 = arith.constant 0 : i32
    %c0_i32_0 = arith.constant 0 : i32
    %c0_i32_1 = arith.constant 0 : i32
    return %c0_i32, %c0_i32_0 : i32, i32
  }
  func.func @transform_2(%arg0: i32, %arg1: i32) -> (i32, i32) {
    %c0_i32 = arith.constant 0 : i32
    %c0_i32_0 = arith.constant 0 : i32
    %c0_i32_1 = arith.constant 0 : i32
    return %c0_i32, %c0_i32_0 : i32, i32
  }
  func.func @transform_3(%arg0: i32, %arg1: i32) -> (i32, i32, i32) {
    %c0_i32 = arith.constant 0 : i32
    %c0_i32_0 = arith.constant 0 : i32
    %c0_i32_1 = arith.constant 0 : i32
    return %arg0, %c0_i32, %c0_i32_0 : i32, i32, i32
  }
  func.func @transform_4(%arg0: i32, %arg1: i32) -> (i32, i32, i32) {
    %c0_i32 = arith.constant 0 : i32
    %c0_i32_0 = arith.constant 0 : i32
    %c0_i32_1 = arith.constant 0 : i32
    return %arg0, %c0_i32, %c0_i32_0 : i32, i32, i32
  }
}

</mosaic_0001>

<bundles_post_ra>
// kernel: tpu_custom_call.1
= control target key start
LH: loop header
LB: loop body
LE: loop exit
PB: predicated region body
PF: predicated region fallthrough
CT: control target
= control target key end

     0   :  { %s16699_s15 = smov 0   ;;  %s16701_s16 = smov 0   ;;  %s19871_s0 = inlined_call_operand.vmem [shape: f32[8,3,2048], index: 0, kind: input, shape index: {}]   ;;  %s19872_s1 = inlined_call_operand.vmem [shape: f32[32,3], index: 1, kind: input, shape index: {}]   ;;  %s19873_s2 = inlined_call_operand.vmem [shape: f32[32,1], index: 2, kind: input, shape index: {}]   ;;  %s19874_s3 = inlined_call_operand.vmem [shape: f32[2,4,256], index: 3, kind: input, shape index: {}]   ;;  %s19875_s4 = inlined_call_operand.vmem [shape: f32[2,32,4], index: 4, kind: output, shape index: {}]  }
   0x1   :  { %s16703_s17 = smov 0  }
   0x2 LB: > { %s26_s18 = sadd.s32 1, %s16667_s16  ;;  %p16582_p0 = scmp.ge.s32.totalorder %s16671_s17, 1  ;;  %s16671_s17 = sphi %s16703_s17, %s14_s17   ;;  %s16667_s16 = sphi %s16701_s16, %s19935_s16   ;;  %s16663_s15 = sphi %s16699_s15, %s19934_s15  }
   0x3   : > { %p28_p1 = scmp.ge.s32.totalorder %s26_s18, 2  ;;  %p193_p2 = scmp.lt.s32.totalorder %s16671_s17, 3 }
   0x5   : > { %s19937_s18 = smov (%p28_p1, %s26_s18), 0  ;;  %p194_p3 = pnand %p16582_p0, %p193_p2 }
   0x7   : > { %197 = sbr.rel (%p194_p3) target bundleno = 3361 (0xd21), region = 36 }
   0xc   : > { %s16583_s19 = sshll.u32 %s16663_s15, 2  ;;  %v251_v0 = vld [vmem:[%s19872_s1] sm:$0xff]  ;;  %vm323_vm0 = vcmask 23552   ;;  %v252_v3 = vld [vmem:[%s19872_s1 + $0x8] sm:$0xff]  ;;  %v16673_v5 = vmov 0   ;;  %v253_v11 = vld [vmem:[%s19872_s1 + $0x10] sm:$0xff] }
   0xd   : > { %p231_p4 = scmp.lt.s32.totalorder %s16583_s19, 7  ;;  %v325_v1 = vsel %vm323_vm0, %v251_v0, 0  ;;  %16644 = vset.pattern.permute.xlu0 %v16673_v5  ;;  %v255_v6 = vld [vmem:[%s19873_s2] sm:$0xff]  ;;  %16645 = vset.pattern.permute.xlu1 %v16673_v5  ;;  %v328_v7 = vsel %vm323_vm0, %v252_v3, 0  ;;  %v331_v12 = vsel %vm323_vm0, %v253_v11, 0  ;;  %v256_v15 = vld [vmem:[%s19873_s2 + $0x8] sm:$0xff] }
   0xe   : > { %v16724_v2 = vand.u32 4294901760, %v325_v1  ;;  %270 = vperm.xlu0 %16644, %v255_v6   ;;  %v16745_v10 = vand.u32 4294901760, %v328_v7  ;;  %vm336_vm1 = vcmask 1042432   ;;  %v16760_v17 = vand.u32 4294901760, %v331_v12  ;;  %v254_v26 = vld [vmem:[%s19872_s1 + $0x18] sm:$0xff]  ;;  %v257_v31 = vld [vmem:[%s19873_s2 + $0x10] sm:$0xff] }
   0xf   : > { %s19939_s19 = smov (!%p231_p4, %s16583_s19), 7  ;;  %v334_v34 = vsel %vm323_vm0, %v254_v26, 0  ;;  %280 = vperm.xlu1 %16645, %v257_v31   ;;  %v258_v44 = vld [vmem:[%s19873_s2 + $0x18] sm:$0xff]  ;;  %p241_p5 = scmp.lt.s32.totalorder %s16663_s15, 1  ;;  %vm16478_vm2 = vcmask 7168   ;;  %vm16483_vm3 = vcmask 15360  }
  0x10   : > { %v16730_v4 = vsub.f32 %v325_v1, %v16724_v2  ;;  %s16616_s26 = sshll.u32 %s19939_s19, 6  ;;  %v16754_v14 = vsub.f32 %v328_v7, %v16745_v10  ;;  %v16777_v30 = vsub.f32 %v331_v12, %v16760_v17  ;;  %v16789_v39 = vand.u32 4294901760, %v334_v34 }
  0x11   : > { %s16739_s29 = scalar_lea.vmem %s19871_s0, %s16616_s26  ;;  %s19941_s15 = smov (!%p241_p5, %s16663_s15), 1  ;;  %vm16492_vm4 = vcmask 31744  }
  0x12   : > { %19894 = vst [vmem:[#allocation2_spill] sm:$0xff] %v16730_v4  ;;  %v260_v8 = vld [vmem:[%s16739_s29] sm:$0x77]  ;;  %v16743_v9 = vand.u32 4294901760, %v16730_v4  ;;  %v16767_v23 = vand.u32 4294901760, %v16754_v14  ;;  %v16787_v38 = vand.u32 4294901760, %v16777_v30  ;;  %v16796_v43 = vsub.f32 %v334_v34, %v16789_v39 }
  0x13   : > { %296 = vst [vmem:[#allocation1] ss:$2 sm:$0xff] %v260_v8  ;;  %v264_v16 = vld [vmem:[%s16739_s29 + $0x20] sm:$0x77]  ;;  %v261_v49 = vld [vmem:[%s16739_s29 + $0x8] sm:$0x77] }
  0x14   : > { %19895 = vst [vmem:[#allocation3_spill] sm:$0xff] %v16743_v9  ;;  %v389_v13 = vsub.f32 %v16730_v4, %v16743_v9  ;;  %v397_v29 = vsub.f32 %v16754_v14, %v16767_v23  ;;  %v405_v42 = vsub.f32 %v16777_v30, %v16787_v38  ;;  %v16806_v46 = vand.u32 4294901760, %v16796_v43  ;;  %v265_v57 = vld [vmem:[%s16739_s29 + $0x28] sm:$0x77]  ;;  %s16617_s14 = sshll.u32 %s19941_s15, 3  ;;  %s16618_s22 = sshll.u32 %s19941_s15, 5 }
  0x15   : > { %19897 = vst [vmem:[#allocation5_spill] sm:$0xff] %v16789_v39  ;;  %s17607_s21 = scalar_lea.vmem %s19874_s3, %s16617_s14  ;;  %s250_s25 = scalar_lea.vmem %s19875_s4, %s16618_s22 }
  0x16   : > { %275 = vperm.xlu0 %16644, %v256_v15   ;;  %v16763_v21 = vand.u32 4294901760, %v389_v13  ;;  %v16784_v37 = vand.u32 4294901760, %v397_v29  ;;  %v16803_v45 = vand.u32 4294901760, %v405_v42  ;;  %v413_v47 = vsub.f32 %v16796_v43, %v16806_v46  ;;  %298 = vst [vmem:[#allocation1 + $0x10] ss:$2 sm:$0xff] %v261_v49 }
  0x17   : > { %285 = vperm.xlu1 %16645, %v258_v44  }
  0x18   : > { %19896 = vst [vmem:[#allocation4_spill] sm:$0xff] %v16763_v21  ;;  %v16814_v48 = vand.u32 4294901760, %v413_v47 }
  0x1a   : > { %v303_v18 = vld.sshfl [vmem:[#allocation1] sm:$0xff pattern:$0x75316420]  ;;  %v304_v19 = vld.sshfl [vmem:[#allocation1 + $0x8] sm:$0xff pattern:$0x75316420] }
  0x1b   : > { %v337_v20 = vsel %vm336_vm1, %v303_v18, 0  ;;  %311 = vst [vmem:[#allocation1] ss:$2 sm:$0xff] %v264_v16  ;;  %v339_v22 = vsel %vm336_vm1, %v304_v19, 0  ;;  %v262_v16 = vld [vmem:[%s16739_s29 + $0x10] sm:$0x77] }
  0x1c   : > { %v384_v24 = vand.u32 4294901760, %v337_v20  ;;  %v623_v25 = vand.u32 4294901760, %v339_v22  ;;  %300 = vst [vmem:[#allocation1 + $0x20] ss:$2 sm:$0xff] %v262_v16 }
  0x1d   : > { %v305_v50 = vld.sshfl [vmem:[#allocation1 + $0x10] sm:$0xff pattern:$0x75316420]  ;;  %v306_v58 = vld.sshfl [vmem:[#allocation1 + $0x18] sm:$0xff pattern:$0x75316420] }
  0x1e   : > { %385 = vmatpush.msra.mxu0 %v384_v24  ;;  %v435_v27 = vsub.f32 %v337_v20, %v384_v24  ;;  %512 = vmatpush.msra.mxu3 %v384_v24  ;;  %v674_v28 = vsub.f32 %v339_v22, %v623_v25  ;;  %v341_v51 = vsel %vm336_vm1, %v305_v50, 0  ;;  %312 = vst [vmem:[#allocation1 + $0x10] ss:$2 sm:$0xff] %v265_v57  ;;  %v343_v59 = vsel %vm336_vm1, %v306_v58, 0 }
  0x1f   : > { %391 = vmatmul.f32.vlgmr.msra.gmra.mxu0 %v16763_v21  ;;  %516 = vmatmul.f32.vlgmr.msra.gmra.mxu3 %v16743_v9  ;;  %v862_v52 = vand.u32 4294901760, %v341_v51  ;;  %v1101_v60 = vand.u32 4294901760, %v343_v59 }
  0x20   : > { %474 = vmatpush.msra.mxu2 %v435_v27  ;;  %v436_v32 = vand.u32 4294901760, %v435_v27  ;;  %v675_v33 = vand.u32 4294901760, %v674_v28 }
  0x21   : > { %477 = vmatmul.f32.vlgmr.msra.gmra.mxu2 %v16730_v4  ;;  %v913_v53 = vsub.f32 %v341_v51, %v862_v52  ;;  %v1152_v61 = vsub.f32 %v343_v59, %v1101_v60 }
  0x22   : > { %624 = vmatpush.msrb.mxu2 %v623_v25  ;;  %v437_v35 = vsub.f32 %v435_v27, %v436_v32  ;;  %556 = vmatpush.msrb.mxu0 %v436_v32  ;;  %v676_v36 = vsub.f32 %v674_v28, %v675_v33 }
  0x23   : > { %v914_v54 = vand.u32 4294901760, %v913_v53  ;;  %v1153_v62 = vand.u32 4294901760, %v1152_v61  ;;  %v307_v29 = vld.sshfl [vmem:[#allocation1 + $0x20] sm:$0xff pattern:$0x75316420] }
  0x24   : > { %795 = vmatpush.msra.mxu2 %v675_v33  ;;  %713 = vmatpush.msra.mxu0 %v674_v28  ;;  %v438_v40 = vand.u32 4294901760, %v437_v35  ;;  %v677_v41 = vand.u32 4294901760, %v676_v36  ;;  %v345_v31 = vsel %vm336_vm1, %v307_v29, 0 }
  0x25   : > { %v915_v55 = vsub.f32 %v913_v53, %v914_v54  ;;  %v1154_v63 = vsub.f32 %v1152_v61, %v1153_v62  ;;  %v1340_v34 = vand.u32 4294901760, %v345_v31 }
  0x26   : > { %439 = vmatpush.msra.mxu1 %v438_v40  ;;  %678 = vmatpush.msrb.mxu3 %v677_v41 }
  0x27   : > { %399 = vmatmul.f32.gmra.mxu0 %v16784_v37  ;;  %441 = vmatmul.f32.vlgmr.msra.gmra.mxu1 %v16724_v2  ;;  %v916_v56 = vand.u32 4294901760, %v915_v55  ;;  %v1155_v0 = vand.u32 4294901760, %v1154_v63  ;;  %v1391_v36 = vsub.f32 %v345_v31, %v1340_v34 }
  0x28   : > { %590 = vmatpush.msrb.mxu1 %v384_v24  ;;  %522 = vmatmul.f32.gmra.mxu3 %v16767_v23 }
  0x29   : > { %482 = vmatmul.f32.gmra.mxu2 %v16754_v14  ;;  %829 = vmatpush.msra.mxu3 %v623_v25  ;;  %v1392_v47 = vand.u32 4294901760, %v1391_v36 }
  0x2a   : > { %751 = vmatpush.msra.mxu1 %v623_v25 }
  0x2b   : > { %v1393_v51 = vsub.f32 %v1391_v36, %v1392_v47 }
  0x2f   : > { %407 = vmatmul.f32.gmra.mxu0 %v16803_v45  ;;  %445 = vmatmul.f32.gmra.mxu1 %v16745_v10 }
  0x30   : > { %528 = vmatmul.f32.gmra.mxu3 %v16787_v38 }
  0x31   : > { %487 = vmatmul.f32.gmra.mxu2 %v16777_v30 }
  0x37   : > { %415 = vmatmul.f32.gmra.mxu0 %v16814_v48  ;;  %449 = vmatmul.f32.gmra.mxu1 %v16760_v17 }
  0x38   : > { %534 = vmatmul.f32.gmra.mxu3 %v16806_v46 }
  0x39   : > { %492 = vmatmul.f32.gmra.mxu2 %v16796_v43 }
  0x3f   : > { %453 = vmatmul.f32.gmra.mxu1 %v16789_v39  ;;  %558 = vmatmul.f32.vlgmr.msrb.gmra.mxu0 %v16724_v2 }
  0x40   : > { %680 = vmatmul.f32.vlgmr.msrb.gmra.mxu3 %v16724_v2  ;;  %863 = vmatpush.msrb.mxu0 %v862_v52 }
  0x41   : > { %630 = vmatmul.f32.vlgmr.msrb.gmra.mxu2 %v16763_v21  ;;  %990 = vmatpush.msrb.mxu3 %v862_v52 }
  0x42   : > { %952 = vmatpush.msrb.mxu2 %v913_v53 }
  0x47   : > { %562 = vmatmul.f32.gmra.mxu0 %v16745_v10  ;;  %592 = vmatmul.f32.vlgmr.msrb.gmra.mxu1 %v16724_v2 }
  0x48   : > { %684 = vmatmul.f32.gmra.mxu3 %v16745_v10  ;;  %917 = vmatpush.msrb.mxu1 %v916_v56 }
  0x49   : > { %638 = vmatmul.f32.gmra.mxu2 %v16784_v37 }
  0x4f   : > { %566 = vmatmul.f32.gmra.mxu0 %v16760_v17  ;;  %596 = vmatmul.f32.gmra.mxu1 %v16745_v10 }
  0x50   : > { %688 = vmatmul.f32.gmra.mxu3 %v16760_v17 }
  0x51   : > { %646 = vmatmul.f32.gmra.mxu2 %v16803_v45 }
  0x57   : > { %570 = vmatmul.f32.gmra.mxu0 %v16789_v39  ;;  %600 = vmatmul.f32.gmra.mxu1 %v16760_v17 }
  0x58   : > { %692 = vmatmul.f32.gmra.mxu3 %v16789_v39 }
  0x59   : > { %654 = vmatmul.f32.gmra.mxu2 %v16814_v48 }
  0x5f   : > { %604 = vmatmul.f32.gmra.mxu1 %v16789_v39  ;;  %716 = vmatmul.f32.vlgmr.msra.gmra.mxu0 %v16730_v4 }
  0x60   : > { %831 = vmatmul.f32.vlgmr.msra.gmra.mxu3 %v16724_v2  ;;  %1034 = vmatpush.msra.mxu0 %v914_v54  ;;  %v1394_v54 = vand.u32 4294901760, %v1393_v51 }
  0x61   : > { %797 = vmatmul.f32.vlgmr.msra.gmra.mxu2 %v16724_v2  ;;  %1156 = vmatpush.msra.mxu3 %v1155_v0 }
  0x62   : > { %1102 = vmatpush.msra.mxu2 %v1101_v60 }
  0x67   : > { %721 = vmatmul.f32.gmra.mxu0 %v16754_v14  ;;  %755 = vmatmul.f32.vlgmr.msra.gmra.mxu1 %v16743_v9 }
  0x68   : > { %835 = vmatmul.f32.gmra.mxu3 %v16745_v10  ;;  %1068 = vmatpush.msra.mxu1 %v862_v52 }
  0x69   : > { %801 = vmatmul.f32.gmra.mxu2 %v16745_v10 }
  0x6f   : > { %726 = vmatmul.f32.gmra.mxu0 %v16777_v30  ;;  %761 = vmatmul.f32.gmra.mxu1 %v16767_v23 }
  0x70   : > { %839 = vmatmul.f32.gmra.mxu3 %v16760_v17 }
  0x71   : > { %805 = vmatmul.f32.gmra.mxu2 %v16760_v17 }
  0x77   : > { %731 = vmatmul.f32.gmra.mxu0 %v16796_v43  ;;  %767 = vmatmul.f32.gmra.mxu1 %v16787_v38 }
  0x78   : > { %843 = vmatmul.f32.gmra.mxu3 %v16789_v39 }
  0x79   : > { %809 = vmatmul.f32.gmra.mxu2 %v16789_v39 }
  0x7f   : > { %773 = vmatmul.f32.gmra.mxu1 %v16806_v46  ;;  %869 = vmatmul.f32.vlgmr.msrb.gmra.mxu0 %v16763_v21 }
  0x80   : > { %994 = vmatmul.f32.vlgmr.msrb.gmra.mxu3 %v16743_v9  ;;  %1191 = vmatpush.msrb.mxu0 %v1152_v61  ;;  %v16872_v3 = vpop.permute.xlu0 %270 }
  0x81   : > { %955 = vmatmul.f32.vlgmr.msrb.gmra.mxu2 %v16730_v4  ;;  %1307 = vmatpush.msrb.mxu3 %v1101_v60  ;;  %19898 = vst [vmem:[#allocation6_spill] sm:$0xff] %v16872_v3  ;;  %v16889_v22 = vpop.permute.xlu1 %280 }
  0x82   : > { %1273 = vmatpush.msrb.mxu2 %v1153_v62 }
  0x87   : > { %877 = vmatmul.f32.gmra.mxu0 %v16784_v37  ;;  %919 = vmatmul.f32.vlgmr.msrb.gmra.mxu1 %v16724_v2 }
  0x88   : > { %1000 = vmatmul.f32.gmra.mxu3 %v16767_v23  ;;  %1229 = vmatpush.msrb.mxu1 %v1101_v60  ;;  %v16879_v13 = vpop.permute.xlu0 %275 }
  0x89   : > { %960 = vmatmul.f32.gmra.mxu2 %v16754_v14  ;;  %v16899_v49 = vpop.permute.xlu1 %285 }
  0x8f   : > { %885 = vmatmul.f32.gmra.mxu0 %v16803_v45  ;;  %923 = vmatmul.f32.gmra.mxu1 %v16745_v10 }
  0x90   : > { %1006 = vmatmul.f32.gmra.mxu3 %v16787_v38 }
  0x91   : > { %965 = vmatmul.f32.gmra.mxu2 %v16777_v30 }
  0x97   : > { %893 = vmatmul.f32.gmra.mxu0 %v16814_v48  ;;  %927 = vmatmul.f32.gmra.mxu1 %v16760_v17 }
  0x98   : > { %1012 = vmatmul.f32.gmra.mxu3 %v16806_v46 }
  0x99   : > { %970 = vmatmul.f32.gmra.mxu2 %v16796_v43 }
  0x9c   : > { %v392_v1 = vpop.f32.mrf.mxu0 }
  0x9d   : > { %v393_v5 = vadd.f32 %v392_v1, %v16872_v3 }
  0x9f   : > { %931 = vmatmul.f32.gmra.mxu1 %v16789_v39  ;;  %1036 = vmatmul.f32.vlgmr.msra.gmra.mxu0 %v16724_v2 }
  0xa0   : > { %1158 = vmatmul.f32.vlgmr.msra.gmra.mxu3 %v16724_v2  ;;  %1341 = vmatpush.msra.mxu0 %v1340_v34 }
  0xa1   : > { %1108 = vmatmul.f32.vlgmr.msra.gmra.mxu2 %v16763_v21  ;;  %1468 = vmatpush.msra.mxu3 %v1340_v34 }
  0xa2   : > { %v517_v6 = vpop.f32.mrf.mxu3  ;;  %1430 = vmatpush.msra.mxu2 %v1391_v36 }
  0xa4   : > { %v400_v7 = vpop.f32.mrf.mxu0  ;;  %v442_v8 = vpop.f32.mrf.mxu1 }
  0xa5   : > { %v443_v11 = vadd.f32 %v442_v8, %v393_v5  ;;  %v478_v12 = vpop.f32.mrf.mxu2  ;;  %v401_v19 = vadd.f32 %v400_v7, %v16879_v13  ;;  %v308_v7 = vld.sshfl [vmem:[#allocation1 + $0x28] sm:$0xff pattern:$0x75316420] }
  0xa7   : > { %v479_v15 = vadd.f32 %v478_v12, %v443_v11  ;;  %1040 = vmatmul.f32.gmra.mxu0 %v16745_v10  ;;  %1070 = vmatmul.f32.vlgmr.msra.gmra.mxu1 %v16724_v2  ;;  %v347_v11 = vsel %vm336_vm1, %v308_v7, 0 }
  0xa8   : > { %1162 = vmatmul.f32.gmra.mxu3 %v16745_v10  ;;  %1395 = vmatpush.msra.mxu1 %v1394_v54  ;;  %v1579_v12 = vand.u32 4294901760, %v347_v11 }
  0xa9   : > { %v16885_v18 = vadd.f32 %v517_v6, %v479_v15  ;;  %1116 = vmatmul.f32.gmra.mxu2 %v16784_v37  ;;  %v266_v6 = vld [vmem:[%s16739_s29 + $0x30] sm:$0x77] }
  0xaa   : > { %313 = vst [vmem:[#allocation1 + $0x20] ss:$2 sm:$0xff] %v266_v6  ;;  %v1630_v16 = vsub.f32 %v347_v11, %v1579_v12 }
  0xab   : > { %v523_v20 = vpop.f32.mrf.mxu3 }
  0xac   : > { %v408_v24 = vpop.f32.mrf.mxu0  ;;  %v446_v25 = vpop.f32.mrf.mxu1 }
  0xad   : > { %v447_v26 = vadd.f32 %v446_v25, %v401_v19  ;;  %v483_v27 = vpop.f32.mrf.mxu2  ;;  %v409_v33 = vadd.f32 %v408_v24, %v16889_v22  ;;  %v1631_v25 = vand.u32 4294901760, %v1630_v16 }
  0xaf   : > { %v484_v28 = vadd.f32 %v483_v27, %v447_v26  ;;  %1044 = vmatmul.f32.gmra.mxu0 %v16760_v17  ;;  %1074 = vmatmul.f32.gmra.mxu1 %v16745_v10  ;;  %v1632_v27 = vsub.f32 %v1630_v16, %v1631_v25 }
  0xb0   : > { %1166 = vmatmul.f32.gmra.mxu3 %v16760_v17 }
  0xb1   : > { %v16895_v32 = vadd.f32 %v523_v20, %v484_v28  ;;  %1124 = vmatmul.f32.gmra.mxu2 %v16803_v45  ;;  %v1633_v29 = vand.u32 4294901760, %v1632_v27 }
  0xb3   : > { %v529_v35 = vpop.f32.mrf.mxu3 }
  0xb4   : > { %v416_v40 = vpop.f32.mrf.mxu0  ;;  %v450_v41 = vpop.f32.mrf.mxu1 }
  0xb5   : > { %v451_v42 = vadd.f32 %v450_v41, %v409_v33  ;;  %v488_v44 = vpop.f32.mrf.mxu2  ;;  %v417_v53 = vadd.f32 %v416_v40, %v16899_v49 }
  0xb7   : > { %v489_v50 = vadd.f32 %v488_v44, %v451_v42  ;;  %1048 = vmatmul.f32.gmra.mxu0 %v16789_v39  ;;  %1078 = vmatmul.f32.gmra.mxu1 %v16760_v17 }
  0xb8   : > { %1170 = vmatmul.f32.gmra.mxu3 %v16789_v39 }
  0xb9   : > { %v16904_v52 = vadd.f32 %v529_v35, %v489_v50  ;;  %1132 = vmatmul.f32.gmra.mxu2 %v16814_v48 }
  0xbb   : > { %v535_v55 = vpop.f32.mrf.mxu3 }
  0xbc   : > { %v454_v56 = vpop.f32.mrf.mxu1  ;;  %v16908_v57 = vpop.f32.mrf.mxu0 }
  0xbd   : > { %v455_v58 = vadd.f32 %v454_v56, %v417_v53  ;;  %v493_v59 = vpop.f32.mrf.mxu2 }
  0xbf   : > { %v494_v60 = vadd.f32 %v493_v59, %v455_v58  ;;  %1082 = vmatmul.f32.gmra.mxu1 %v16789_v39  ;;  %1194 = vmatmul.f32.vlgmr.msrb.gmra.mxu0 %v16730_v4 }
  0xc0   : > { %1309 = vmatmul.f32.vlgmr.msrb.gmra.mxu3 %v16724_v2  ;;  %1512 = vmatpush.msrb.mxu0 %v1392_v47 }
  0xc1   : > { %v16913_v61 = vadd.f32 %v535_v55, %v494_v60  ;;  %1275 = vmatmul.f32.vlgmr.msrb.gmra.mxu2 %v16724_v2  ;;  %1634 = vmatpush.msrb.mxu3 %v1633_v29 }
  0xc2   : > { %1580 = vmatpush.msrb.mxu2 %v1579_v12 }
  0xc3   : > { %v681_v62 = vpop.f32.mrf.mxu3 }
  0xc4   : > { %v16916_v63 = vpop.f32.mrf.mxu0  ;;  %v16918_v0 = vpop.f32.mrf.mxu1 }
  0xc5   : > { %v631_v1 = vpop.f32.mrf.mxu2 }
  0xc6   : > { %v632_v5 = vadd.f32 %v631_v1, %v16872_v3 }
  0xc7   : > { %1199 = vmatmul.f32.gmra.mxu0 %v16754_v14  ;;  %1233 = vmatmul.f32.vlgmr.msrb.gmra.mxu1 %v16743_v9 }
  0xc8   : > { %v682_v8 = vadd.f32 %v681_v62, %v632_v5  ;;  %1313 = vmatmul.f32.gmra.mxu3 %v16745_v10  ;;  %1546 = vmatpush.msrb.mxu1 %v1340_v34 }
  0xc9   : > { %1279 = vmatmul.f32.gmra.mxu2 %v16745_v10 }
  0xcb   : > { %v685_v15 = vpop.f32.mrf.mxu3 }
  0xcc   : > { %v16927_v19 = vpop.f32.mrf.mxu0  ;;  %v16929_v20 = vpop.f32.mrf.mxu1 }
  0xcd   : > { %v639_v24 = vpop.f32.mrf.mxu2 }
  0xce   : > { %v640_v26 = vadd.f32 %v639_v24, %v16879_v13 }
  0xcf   : > { %1204 = vmatmul.f32.gmra.mxu0 %v16777_v30  ;;  %1239 = vmatmul.f32.gmra.mxu1 %v16767_v23 }
  0xd0   : > { %v686_v28 = vadd.f32 %v685_v15, %v640_v26  ;;  %1317 = vmatmul.f32.gmra.mxu3 %v16760_v17 }
  0xd1   : > { %1283 = vmatmul.f32.gmra.mxu2 %v16760_v17 }
  0xd3   : > { %v689_v31 = vpop.f32.mrf.mxu3 }
  0xd4   : > { %v16936_v33 = vpop.f32.mrf.mxu0  ;;  %v16938_v34 = vpop.f32.mrf.mxu1 }
  0xd5   : > { %v647_v35 = vpop.f32.mrf.mxu2 }
  0xd6   : > { %v648_v36 = vadd.f32 %v647_v35, %v16889_v22 }
  0xd7   : > { %1209 = vmatmul.f32.gmra.mxu0 %v16796_v43  ;;  %1245 = vmatmul.f32.gmra.mxu1 %v16787_v38 }
  0xd8   : > { %v690_v40 = vadd.f32 %v689_v31, %v648_v36  ;;  %1321 = vmatmul.f32.gmra.mxu3 %v16789_v39 }
  0xd9   : > { %1287 = vmatmul.f32.gmra.mxu2 %v16789_v39 }
  0xdb   : > { %v693_v41 = vpop.f32.mrf.mxu3 }
  0xdc   : > { %v16945_v42 = vpop.f32.mrf.mxu1  ;;  %v717_v44 = vpop.f32.mrf.mxu0 }
  0xdd   : > { %v655_v47 = vpop.f32.mrf.mxu2  ;;  %v718_v53 = vadd.f32 %v717_v44, %v682_v8 }
  0xde   : > { %v656_v50 = vadd.f32 %v655_v47, %v16899_v49 }
  0xdf   : > { %1251 = vmatmul.f32.gmra.mxu1 %v16806_v46  ;;  %1347 = vmatmul.f32.vlgmr.msra.gmra.mxu0 %v16763_v21 }
  0xe0   : > { %v694_v51 = vadd.f32 %v693_v41, %v656_v50  ;;  %1472 = vmatmul.f32.vlgmr.msra.gmra.mxu3 %v16743_v9  ;;  %1669 = vmatpush.msra.mxu0 %v1630_v16 }
  0xe1   : > { %1433 = vmatmul.f32.vlgmr.msra.gmra.mxu2 %v16730_v4  ;;  %1785 = vmatpush.msra.mxu3 %v1579_v12 }
  0xe2   : > { %1751 = vmatpush.msra.mxu2 %v1631_v25 }
  0xe3   : > { %v832_v54 = vpop.f32.mrf.mxu3 }
  0xe4   : > { %v722_v55 = vpop.f32.mrf.mxu0  ;;  %v756_v56 = vpop.f32.mrf.mxu1 }
  0xe5   : > { %v757_v58 = vadd.f32 %v756_v56, %v718_v53  ;;  %v798_v59 = vpop.f32.mrf.mxu2  ;;  %v723_v1 = vadd.f32 %v722_v55, %v686_v28 }
  0xe7   : > { %v799_v60 = vadd.f32 %v798_v59, %v757_v58  ;;  %1355 = vmatmul.f32.gmra.mxu0 %v16784_v37  ;;  %1397 = vmatmul.f32.vlgmr.msra.gmra.mxu1 %v16724_v2 }
  0xe8   : > { %1478 = vmatmul.f32.gmra.mxu3 %v16767_v23  ;;  %1707 = vmatpush.msra.mxu1 %v1579_v12 }
  0xe9   : > { %v16955_v62 = vadd.f32 %v832_v54, %v799_v60  ;;  %1438 = vmatmul.f32.gmra.mxu2 %v16754_v14 }
  0xeb   : > { %v836_v5 = vpop.f32.mrf.mxu3 }
  0xec   : > { %v727_v6 = vpop.f32.mrf.mxu0  ;;  %v762_v7 = vpop.f32.mrf.mxu1 }
  0xed   : > { %v763_v8 = vadd.f32 %v762_v7, %v723_v1  ;;  %v802_v11 = vpop.f32.mrf.mxu2  ;;  %v728_v12 = vadd.f32 %v727_v6, %v690_v40  ;;  %v263_v6 = vld [vmem:[%s16739_s29 + $0x18] sm:$0x77] }
  0xee   : > { %302 = vst [vmem:[#allocation1 + $0x30] ss:$2 sm:$0xff] %v263_v6 }
  0xef   : > { %v803_v15 = vadd.f32 %v802_v11, %v763_v8  ;;  %1363 = vmatmul.f32.gmra.mxu0 %v16803_v45  ;;  %1401 = vmatmul.f32.gmra.mxu1 %v16745_v10 }
  0xf0   : > { %1484 = vmatmul.f32.gmra.mxu3 %v16787_v38 }
  0xf1   : > { %v16961_v16 = vadd.f32 %v836_v5, %v803_v15  ;;  %1443 = vmatmul.f32.gmra.mxu2 %v16777_v30 }
  0xf3   : > { %v840_v24 = vpop.f32.mrf.mxu3 }
  0xf4   : > { %v732_v25 = vpop.f32.mrf.mxu0  ;;  %v768_v26 = vpop.f32.mrf.mxu1 }
  0xf5   : > { %v769_v27 = vadd.f32 %v768_v26, %v728_v12  ;;  %v806_v28 = vpop.f32.mrf.mxu2  ;;  %v733_v35 = vadd.f32 %v732_v25, %v694_v51 }
  0xf7   : > { %v807_v29 = vadd.f32 %v806_v28, %v769_v27  ;;  %1371 = vmatmul.f32.gmra.mxu0 %v16814_v48  ;;  %1405 = vmatmul.f32.gmra.mxu1 %v16760_v17  ;;  %v309_v27 = vld.sshfl [vmem:[#allocation1 + $0x30] sm:$0xff pattern:$0x75316420] }
  0xf8   : > { %1490 = vmatmul.f32.gmra.mxu3 %v16806_v46  ;;  %v349_v28 = vsel %vm336_vm1, %v309_v27, 0 }
  0xf9   : > { %v16967_v31 = vadd.f32 %v840_v24, %v807_v29  ;;  %1448 = vmatmul.f32.gmra.mxu2 %v16796_v43 }
  0xfb   : > { %v844_v36 = vpop.f32.mrf.mxu3 }
  0xfc   : > { %v774_v41 = vpop.f32.mrf.mxu1  ;;  %v870_v40 = vpop.f32.mrf.mxu0 }
  0xfd   : > { %v775_v44 = vadd.f32 %v774_v41, %v733_v35  ;;  %v810_v47 = vpop.f32.mrf.mxu2  ;;  %v871_v53 = vadd.f32 %v870_v40, %v16872_v3  ;;  %v1818_v35 = vand.u32 4294901760, %v349_v28 }
  0xff   : > { %v811_v50 = vadd.f32 %v810_v47, %v775_v44  ;;  %1409 = vmatmul.f32.gmra.mxu1 %v16789_v39  ;;  %1514 = vmatmul.f32.vlgmr.msrb.gmra.mxu0 %v16724_v2  ;;  %v1869_v47 = vsub.f32 %v349_v28, %v1818_v35 }
 0x100   : > { %1636 = vmatmul.f32.vlgmr.msrb.gmra.mxu3 %v16724_v2  ;;  %1819 = vmatpush.msrb.mxu0 %v1818_v35 }
 0x101   : > { %v16974_v54 = vadd.f32 %v844_v36, %v811_v50  ;;  %1586 = vmatmul.f32.vlgmr.msrb.gmra.mxu2 %v16763_v21  ;;  %1946 = vmatpush.msrb.mxu3 %v1818_v35 }
 0x102   : > { %1908 = vmatpush.msrb.mxu2 %v1869_v47 }
 0x103   : > { %v995_v51 = vpop.f32.mrf.mxu3 }
 0x104   : > { %v878_v55 = vpop.f32.mrf.mxu0  ;;  %v920_v56 = vpop.f32.mrf.mxu1 }
 0x105   : > { %v921_v58 = vadd.f32 %v920_v56, %v871_v53  ;;  %v956_v59 = vpop.f32.mrf.mxu2  ;;  %v879_v1 = vadd.f32 %v878_v55, %v16879_v13  ;;  %v1870_v53 = vand.u32 4294901760, %v1869_v47 }
 0x107   : > { %v957_v60 = vadd.f32 %v956_v59, %v921_v58  ;;  %1518 = vmatmul.f32.gmra.mxu0 %v16745_v10  ;;  %1548 = vmatmul.f32.vlgmr.msrb.gmra.mxu1 %v16724_v2  ;;  %v1871_v56 = vsub.f32 %v1869_v47, %v1870_v53 }
 0x108   : > { %1640 = vmatmul.f32.gmra.mxu3 %v16745_v10 }
 0x109   : > { %v996_v5 = vadd.f32 %v995_v51, %v957_v60  ;;  %1594 = vmatmul.f32.gmra.mxu2 %v16784_v37  ;;  %v1872_v59 = vand.u32 4294901760, %v1871_v56 }
 0x10b   : > { %v1001_v7 = vpop.f32.mrf.mxu3  ;;  %1873 = vmatpush.msrb.mxu1 %v1872_v59 }
 0x10c   : > { %v886_v8 = vpop.f32.mrf.mxu0  ;;  %v924_v11 = vpop.f32.mrf.mxu1 }
 0x10d   : > { %v925_v15 = vadd.f32 %v924_v11, %v879_v1  ;;  %v961_v12 = vpop.f32.mrf.mxu2  ;;  %v887_v25 = vadd.f32 %v886_v8, %v16889_v22  ;;  %v560_v11 = vadd.f32 %v16908_v57, %v16885_v18  ;;  %v267_v57 = vld [vmem:[%s16739_s29 + $0x38] sm:$0x77] }
 0x10f   : > { %v962_v24 = vadd.f32 %v961_v12, %v925_v15  ;;  %1522 = vmatmul.f32.gmra.mxu0 %v16760_v17  ;;  %1552 = vmatmul.f32.gmra.mxu1 %v16745_v10  ;;  %v594_v12 = vadd.f32 %v16918_v0, %v560_v11  ;;  %v568_v11 = vadd.f32 %v16927_v19, %v16904_v52 }
 0x110   : > { %1644 = vmatmul.f32.gmra.mxu3 %v16760_v17  ;;  %v572_v19 = vadd.f32 %v16936_v33, %v16913_v61 }
 0x111   : > { %v1002_v26 = vadd.f32 %v1001_v7, %v962_v24  ;;  %1602 = vmatmul.f32.gmra.mxu2 %v16803_v45 }
 0x113   : > { %v1007_v29 = vpop.f32.mrf.mxu3 }
 0x114   : > { %v894_v36 = vpop.f32.mrf.mxu0  ;;  %v928_v41 = vpop.f32.mrf.mxu1 }
 0x115   : > { %v929_v40 = vadd.f32 %v928_v41, %v887_v25  ;;  %v966_v44 = vpop.f32.mrf.mxu2  ;;  %v895_v51 = vadd.f32 %v894_v36, %v16899_v49  ;;  %v4193_v41 = vmax.f32 %v594_v12, 0.0 }
 0x117   : > { %v967_v50 = vadd.f32 %v966_v44, %v929_v40  ;;  %1526 = vmatmul.f32.gmra.mxu0 %v16789_v39  ;;  %1556 = vmatmul.f32.gmra.mxu1 %v16760_v17  ;;  %v310_v44 = vld.sshfl [vmem:[#allocation1 + $0x38] sm:$0xff pattern:$0x75316420] }
 0x118   : > { %1648 = vmatmul.f32.gmra.mxu3 %v16789_v39  ;;  %314 = vst [vmem:[#allocation1 + $0x30] ss:$2 sm:$0xff] %v267_v57  ;;  %v351_v0 = vsel %vm336_vm1, %v310_v44, 0 }
 0x119   : > { %v16993_v55 = vadd.f32 %v1007_v29, %v967_v50  ;;  %1610 = vmatmul.f32.gmra.mxu2 %v16814_v48 }
 0x11b   : > { %v1013_v58 = vpop.f32.mrf.mxu3 }
 0x11c   : > { %v932_v60 = vpop.f32.mrf.mxu1  ;;  %v1037_v1 = vpop.f32.mrf.mxu0 }
 0x11d   : > { %v933_v6 = vadd.f32 %v932_v60, %v895_v51  ;;  %v971_v7 = vpop.f32.mrf.mxu2  ;;  %v1038_v24 = vadd.f32 %v1037_v1, %v996_v5  ;;  %v564_v5 = vadd.f32 %v16916_v63, %v16895_v32 }
 0x11f   : > { %v972_v8 = vadd.f32 %v971_v7, %v933_v6  ;;  %1560 = vmatmul.f32.gmra.mxu1 %v16789_v39  ;;  %1672 = vmatmul.f32.vlgmr.msra.gmra.mxu0 %v16730_v4  ;;  %v598_v51 = vadd.f32 %v16929_v20, %v564_v5 }
 0x120   : > { %1787 = vmatmul.f32.vlgmr.msra.gmra.mxu3 %v16724_v2  ;;  %1990 = vmatpush.msra.mxu0 %v1870_v53  ;;  %v17018_v53 = vand.u32 4294901760, %v351_v0 }
 0x121   : > { %v17001_v15 = vadd.f32 %v1013_v58, %v972_v8  ;;  %1753 = vmatmul.f32.vlgmr.msra.gmra.mxu2 %v16724_v2  ;;  %v4209_v63 = vmax.f32 %v598_v51, 0.0 }
 0x122   : > { %2058 = vmatpush.msra.mxu2 %v17018_v53  ;;  %v2108_v59 = vsub.f32 %v351_v0, %v17018_v53 }
 0x123   : > { %v1159_v25 = vpop.f32.mrf.mxu3 }
 0x124   : > { %v1041_v27 = vpop.f32.mrf.mxu0  ;;  %v1071_v28 = vpop.f32.mrf.mxu1  ;;  %v2109_v7 = vand.u32 4294901760, %v2108_v59 }
 0x125   : > { %v1072_v29 = vadd.f32 %v1071_v28, %v1038_v24  ;;  %v1109_v36 = vpop.f32.mrf.mxu2  ;;  %v1042_v56 = vadd.f32 %v1041_v27, %v1002_v26 }
 0x126   : > { %v1110_v40 = vadd.f32 %v1109_v36, %v16872_v3  ;;  %v2110_v20 = vsub.f32 %v2108_v59, %v2109_v7 }
 0x127   : > { %v4195_v18 = vmax.f32 %v1072_v29, 0.0  ;;  %1677 = vmatmul.f32.gmra.mxu0 %v16754_v14  ;;  %1711 = vmatmul.f32.vlgmr.msra.gmra.mxu1 %v16743_v9 }
 0x128   : > { %v17009_v47 = vadd.f32 %v1159_v25, %v1110_v40  ;;  %1791 = vmatmul.f32.gmra.mxu3 %v16745_v10  ;;  %2024 = vmatpush.msra.mxu1 %v1818_v35  ;;  %v2111_v24 = vand.u32 4294901760, %v2110_v20  ;;  %v602_v25 = vadd.f32 %v16938_v34, %v568_v11 }
 0x129   : > { %v17015_v50 = vadd.f32 %v4195_v18, %v4193_v41  ;;  %1757 = vmatmul.f32.gmra.mxu2 %v16745_v10 }
 0x12a   : > { %2112 = vmatpush.msra.mxu3 %v2111_v24  ;;  %v4225_v57 = vmax.f32 %v602_v25, 0.0 }
 0x12b   : > { %v1163_v58 = vpop.f32.mrf.mxu3 }
 0x12c   : > { %v1045_v60 = vpop.f32.mrf.mxu0  ;;  %v1075_v1 = vpop.f32.mrf.mxu1 }
 0x12d   : > { %v1076_v35 = vadd.f32 %v1075_v1, %v1042_v56  ;;  %v1117_v6 = vpop.f32.mrf.mxu2  ;;  %v1046_v27 = vadd.f32 %v1045_v60, %v16993_v55  ;;  %v606_v55 = vadd.f32 %v16945_v42, %v572_v19 }
 0x12e   : > { %v1118_v32 = vadd.f32 %v1117_v6, %v16879_v13 }
 0x12f   : > { %v4211_v8 = vmax.f32 %v1076_v35, 0.0  ;;  %1682 = vmatmul.f32.gmra.mxu0 %v16777_v30  ;;  %1717 = vmatmul.f32.gmra.mxu1 %v16767_v23  ;;  %v4241_v35 = vmax.f32 %v606_v55, 0.0 }
 0x130   : > { %v1164_v26 = vadd.f32 %v1163_v58, %v1118_v32  ;;  %1795 = vmatmul.f32.gmra.mxu3 %v16760_v17 }
 0x131   : > { %v17029_v12 = vadd.f32 %v4211_v8, %v4209_v63  ;;  %1761 = vmatmul.f32.gmra.mxu2 %v16760_v17 }
 0x133   : > { %v1167_v28 = vpop.f32.mrf.mxu3 }
 0x134   : > { %v1049_v29 = vpop.f32.mrf.mxu0  ;;  %v1079_v36 = vpop.f32.mrf.mxu1 }
 0x135   : > { %v1080_v41 = vadd.f32 %v1079_v36, %v1046_v27  ;;  %v1125_v40 = vpop.f32.mrf.mxu2  ;;  %v1050_v0 = vadd.f32 %v1049_v29, %v17001_v15 }
 0x136   : > { %v1126_v18 = vadd.f32 %v1125_v40, %v16889_v22 }
 0x137   : > { %v4227_v44 = vmax.f32 %v1080_v41, 0.0  ;;  %1687 = vmatmul.f32.gmra.mxu0 %v16796_v43  ;;  %1723 = vmatmul.f32.gmra.mxu1 %v16787_v38 }
 0x138   : > { %v1168_v52 = vadd.f32 %v1167_v28, %v1126_v18  ;;  %1799 = vmatmul.f32.gmra.mxu3 %v16789_v39 }
 0x139   : > { %v17040_v34 = vadd.f32 %v4227_v44, %v4225_v57  ;;  %1765 = vmatmul.f32.gmra.mxu2 %v16789_v39 }
 0x13b   : > { %v1171_v5 = vpop.f32.mrf.mxu3 }
 0x13c   : > { %v1083_v51 = vpop.f32.mrf.mxu1  ;;  %v1195_v56 = vpop.f32.mrf.mxu0 }
 0x13d   : > { %v1084_v58 = vadd.f32 %v1083_v51, %v1050_v0  ;;  %v1133_v60 = vpop.f32.mrf.mxu2  ;;  %v1196_v42 = vadd.f32 %v1195_v56, %v17009_v47 }
 0x13e   : > { %v1134_v1 = vadd.f32 %v1133_v60, %v16899_v49 }
 0x13f   : > { %v4243_v6 = vmax.f32 %v1084_v58, 0.0  ;;  %1729 = vmatmul.f32.gmra.mxu1 %v16806_v46  ;;  %1825 = vmatmul.f32.vlgmr.msrb.gmra.mxu0 %v16763_v21 }
 0x140   : > { %v1172_v61 = vadd.f32 %v1171_v5, %v1134_v1  ;;  %1950 = vmatmul.f32.vlgmr.msrb.gmra.mxu3 %v16743_v9  ;;  %2147 = vmatpush.msrb.mxu0 %v2108_v59 }
 0x141   : > { %v17049_v33 = vadd.f32 %v4243_v6, %v4241_v35  ;;  %1911 = vmatmul.f32.vlgmr.msrb.gmra.mxu2 %v16730_v4  ;;  %2263 = vmatpush.msrb.mxu3 %v17018_v53 }
 0x142   : > { %2229 = vmatpush.msrb.mxu2 %v2109_v7  ;;  %v4194_v7 = vmax.f32 %v16955_v62, 0.0  ;;  %v4210_v62 = vmax.f32 %v16961_v16, 0.0  ;;  %v4226_v16 = vmax.f32 %v16967_v31, 0.0  ;;  %v4242_v31 = vmax.f32 %v16974_v54, 0.0 }
 0x143   : > { %v1310_v15 = vpop.f32.mrf.mxu3  ;;  %v315_v54 = vld.sshfl [vmem:[#allocation1] sm:$0xff pattern:$0x75316420] }
 0x144   : > { %v1200_v32 = vpop.f32.mrf.mxu0  ;;  %v1234_v63 = vpop.f32.mrf.mxu1 }
 0x145   : > { %v1235_v8 = vadd.f32 %v1234_v63, %v1196_v42  ;;  %v1276_v20 = vpop.f32.mrf.mxu2  ;;  %v1201_v47 = vadd.f32 %v1200_v32, %v1164_v26 }
 0x147   : > { %v1277_v11 = vadd.f32 %v1276_v20, %v1235_v8  ;;  %1833 = vmatmul.f32.gmra.mxu0 %v16784_v37  ;;  %1875 = vmatmul.f32.vlgmr.msrb.gmra.mxu1 %v16724_v2 }
 0x148   : > { %1956 = vmatmul.f32.gmra.mxu3 %v16767_v23  ;;  %2185 = vmatpush.msrb.mxu1 %v17018_v53 }
 0x149   : > { %v1311_v59 = vadd.f32 %v1310_v15, %v1277_v11  ;;  %1916 = vmatmul.f32.gmra.mxu2 %v16754_v14 }
 0x14b   : > { %v4196_v24 = vmax.f32 %v1311_v59, 0.0  ;;  %v1314_v25 = vpop.f32.mrf.mxu3 }
 0x14c   : > { %v1205_v27 = vpop.f32.mrf.mxu0  ;;  %v1240_v28 = vpop.f32.mrf.mxu1 }
 0x14d   : > { %v17060_v29 = vadd.f32 %v4196_v24, %v4194_v7  ;;  %v1241_v36 = vadd.f32 %v1240_v28, %v1201_v47  ;;  %v1280_v41 = vpop.f32.mrf.mxu2  ;;  %v1206_v26 = vadd.f32 %v1205_v27, %v1168_v52 }
 0x14f   : > { %v1281_v40 = vadd.f32 %v1280_v41, %v1241_v36  ;;  %1841 = vmatmul.f32.gmra.mxu0 %v16803_v45  ;;  %1879 = vmatmul.f32.gmra.mxu1 %v16745_v10  ;;  %v353_v36 = vsel %vm336_vm1, %v315_v54, 0 }
 0x150   : > { %1962 = vmatmul.f32.gmra.mxu3 %v16787_v38 }
 0x151   : > { %v1315_v53 = vadd.f32 %v1314_v25, %v1281_v40  ;;  %1921 = vmatmul.f32.gmra.mxu2 %v16777_v30  ;;  %v2296_v40 = vand.u32 4294901760, %v353_v36 }
 0x153   : > { %v4212_v18 = vmax.f32 %v1315_v53, 0.0  ;;  %v1318_v57 = vpop.f32.mrf.mxu3 }
 0x154   : > { %v1210_v44 = vpop.f32.mrf.mxu0  ;;  %v1246_v19 = vpop.f32.mrf.mxu1 }
 0x155   : > { %v17067_v55 = vadd.f32 %v4212_v18, %v4210_v62  ;;  %v1247_v0 = vadd.f32 %v1246_v19, %v1206_v26  ;;  %v1284_v5 = vpop.f32.mrf.mxu2  ;;  %v1211_v52 = vadd.f32 %v1210_v44, %v1172_v61 }
 0x157   : > { %v1285_v51 = vadd.f32 %v1284_v5, %v1247_v0  ;;  %1849 = vmatmul.f32.gmra.mxu0 %v16814_v48  ;;  %1883 = vmatmul.f32.gmra.mxu1 %v16760_v17 }
 0x158   : > { %1968 = vmatmul.f32.gmra.mxu3 %v16806_v46 }
 0x159   : > { %v1319_v56 = vadd.f32 %v1318_v57, %v1285_v51  ;;  %1926 = vmatmul.f32.gmra.mxu2 %v16796_v43  ;;  %v2347_v57 = vsub.f32 %v353_v36, %v2296_v40 }
 0x15b   : > { %v4228_v58 = vmax.f32 %v1319_v56, 0.0  ;;  %v1322_v60 = vpop.f32.mrf.mxu3  ;;  %v2348_v19 = vand.u32 4294901760, %v2347_v57 }
 0x15c   : > { %v1252_v1 = vpop.f32.mrf.mxu1  ;;  %v1348_v35 = vpop.f32.mrf.mxu0 }
 0x15d   : > { %v17074_v6 = vadd.f32 %v4228_v58, %v4226_v16  ;;  %v1253_v42 = vadd.f32 %v1252_v1, %v1211_v52  ;;  %v1288_v15 = vpop.f32.mrf.mxu2  ;;  %v1349_v63 = vadd.f32 %v1348_v35, %v16872_v3  ;;  %v2349_v51 = vsub.f32 %v2347_v57, %v2348_v19 }
 0x15f   : > { %v1289_v32 = vadd.f32 %v1288_v15, %v1253_v42  ;;  %1887 = vmatmul.f32.gmra.mxu1 %v16789_v39  ;;  %1992 = vmatmul.f32.vlgmr.msra.gmra.mxu0 %v16724_v2  ;;  %v2350_v16 = vand.u32 4294901760, %v2349_v51 }
 0x160   : > { %2114 = vmatmul.f32.vlgmr.msra.gmra.mxu3 %v16724_v2  ;;  %2297 = vmatpush.msra.mxu0 %v2296_v40 }
 0x161   : > { %v1323_v8 = vadd.f32 %v1322_v60, %v1289_v32  ;;  %2064 = vmatmul.f32.vlgmr.msra.gmra.mxu2 %v16763_v21  ;;  %2424 = vmatpush.msra.mxu3 %v2296_v40 }
 0x162   : > { %2386 = vmatpush.msra.mxu2 %v2347_v57 }
 0x163   : > { %v4244_v61 = vmax.f32 %v1323_v8, 0.0  ;;  %v1473_v20 = vpop.f32.mrf.mxu3 }
 0x164   : > { %v1356_v11 = vpop.f32.mrf.mxu0  ;;  %v1398_v59 = vpop.f32.mrf.mxu1 }
 0x165   : > { %v17082_v7 = vadd.f32 %v4244_v61, %v4242_v31  ;;  %v1399_v47 = vadd.f32 %v1398_v59, %v1349_v63  ;;  %v1434_v24 = vpop.f32.mrf.mxu2  ;;  %v1357_v27 = vadd.f32 %v1356_v11, %v16879_v13 }
 0x167   : > { %v1435_v25 = vadd.f32 %v1434_v24, %v1399_v47  ;;  %1996 = vmatmul.f32.gmra.mxu0 %v16745_v10  ;;  %2026 = vmatmul.f32.vlgmr.msra.gmra.mxu1 %v16724_v2 }
 0x168   : > { %2118 = vmatmul.f32.gmra.mxu3 %v16745_v10  ;;  %2351 = vmatpush.msra.mxu1 %v2350_v16 }
 0x169   : > { %v1474_v28 = vadd.f32 %v1473_v20, %v1435_v25  ;;  %2072 = vmatmul.f32.gmra.mxu2 %v16784_v37 }
 0x16b   : > { %v1479_v41 = vpop.f32.mrf.mxu3 }
 0x16c   : > { %v1364_v53 = vpop.f32.mrf.mxu0  ;;  %v1402_v62 = vpop.f32.mrf.mxu1 }
 0x16d   : > { %v1403_v26 = vadd.f32 %v1402_v62, %v1357_v27  ;;  %v1439_v18 = vpop.f32.mrf.mxu2  ;;  %v1365_v0 = vadd.f32 %v1364_v53, %v16889_v22  ;;  %v316_v53 = vld.sshfl [vmem:[#allocation1 + $0x8] sm:$0xff pattern:$0x75316420]  ;;  %v16590_v62 = vld [vmem:[%s16739_s29 + $0x40] sm:$0x77] }
 0x16e   : > { %4357 = vst [vmem:[#allocation1] ss:$2 sm:$0xff] %v16590_v62 }
 0x16f   : > { %v1440_v44 = vadd.f32 %v1439_v18, %v1403_v26  ;;  %2000 = vmatmul.f32.gmra.mxu0 %v16760_v17  ;;  %2030 = vmatmul.f32.gmra.mxu1 %v16745_v10  ;;  %v355_v18 = vsel %vm336_vm1, %v316_v53, 0 }
 0x170   : > { %2122 = vmatmul.f32.gmra.mxu3 %v16760_v17  ;;  %v2535_v57 = vand.u32 4294901760, %v355_v18 }
 0x171   : > { %v1480_v5 = vadd.f32 %v1479_v41, %v1440_v44  ;;  %2080 = vmatmul.f32.gmra.mxu2 %v16803_v45 }
 0x173   : > { %v1485_v56 = vpop.f32.mrf.mxu3 }
 0x174   : > { %v1372_v52 = vpop.f32.mrf.mxu0  ;;  %v1406_v58 = vpop.f32.mrf.mxu1 }
 0x175   : > { %v1407_v60 = vadd.f32 %v1406_v58, %v1365_v0  ;;  %v1444_v1 = vpop.f32.mrf.mxu2  ;;  %v1373_v42 = vadd.f32 %v1372_v52, %v16899_v49  ;;  %v2586_v0 = vsub.f32 %v355_v18, %v2535_v57 }
 0x177   : > { %v1445_v35 = vadd.f32 %v1444_v1, %v1407_v60  ;;  %2004 = vmatmul.f32.gmra.mxu0 %v16789_v39  ;;  %2034 = vmatmul.f32.gmra.mxu1 %v16760_v17  ;;  %v2587_v58 = vand.u32 4294901760, %v2586_v0 }
 0x178   : > { %2126 = vmatmul.f32.gmra.mxu3 %v16789_v39 }
 0x179   : > { %v1486_v15 = vadd.f32 %v1485_v56, %v1445_v35  ;;  %2088 = vmatmul.f32.gmra.mxu2 %v16814_v48 }
 0x17b   : > { %v1491_v32 = vpop.f32.mrf.mxu3 }
 0x17c   : > { %v1410_v63 = vpop.f32.mrf.mxu1  ;;  %v1515_v8 = vpop.f32.mrf.mxu0 }
 0x17d   : > { %v1411_v31 = vadd.f32 %v1410_v63, %v1373_v42  ;;  %v1449_v61 = vpop.f32.mrf.mxu2  ;;  %v1516_v59 = vadd.f32 %v1515_v8, %v1474_v28 }
 0x17f   : > { %v1450_v20 = vadd.f32 %v1449_v61, %v1411_v31  ;;  %2038 = vmatmul.f32.gmra.mxu1 %v16789_v39  ;;  %2150 = vmatmul.f32.vlgmr.msrb.gmra.mxu0 %v16730_v4 }
 0x180   : > { %2265 = vmatmul.f32.vlgmr.msrb.gmra.mxu3 %v16724_v2  ;;  %2468 = vmatpush.msrb.mxu0 %v2348_v19 }
 0x181   : > { %v1492_v11 = vadd.f32 %v1491_v32, %v1450_v20  ;;  %2231 = vmatmul.f32.vlgmr.msrb.gmra.mxu2 %v16724_v2 }
 0x182   : > { %2536 = vmatpush.msrb.mxu2 %v2535_v57 }
 0x183   : > { %v1637_v47 = vpop.f32.mrf.mxu3 }
 0x184   : > { %v1519_v24 = vpop.f32.mrf.mxu0  ;;  %v1549_v25 = vpop.f32.mrf.mxu1 }
 0x185   : > { %v1550_v27 = vadd.f32 %v1549_v25, %v1516_v59  ;;  %v1587_v54 = vpop.f32.mrf.mxu2  ;;  %v1520_v44 = vadd.f32 %v1519_v24, %v1480_v5 }
 0x186   : > { %v1588_v36 = vadd.f32 %v1587_v54, %v16872_v3 }
 0x187   : > { %v4197_v41 = vmax.f32 %v1550_v27, 0.0  ;;  %2155 = vmatmul.f32.gmra.mxu0 %v16754_v14  ;;  %2189 = vmatmul.f32.vlgmr.msrb.gmra.mxu1 %v16743_v9 }
 0x188   : > { %v1638_v26 = vadd.f32 %v1637_v47, %v1588_v36  ;;  %2269 = vmatmul.f32.gmra.mxu3 %v16745_v10  ;;  %2502 = vmatpush.msrb.mxu1 %v2296_v40 }
 0x189   : > { %v17111_v28 = vadd.f32 %v17015_v50, %v4197_v41  ;;  %2235 = vmatmul.f32.gmra.mxu2 %v16745_v10  ;;  %v2588_v50 = vsub.f32 %v2586_v0, %v2587_v58 }
 0x18b   : > { %v1641_v19 = vpop.f32.mrf.mxu3  ;;  %v2589_v35 = vand.u32 4294901760, %v2588_v50 }
 0x18c   : > { %v1523_v51 = vpop.f32.mrf.mxu0  ;;  %v1553_v56 = vpop.f32.mrf.mxu1 }
 0x18d   : > { %v1554_v16 = vadd.f32 %v1553_v56, %v1520_v44  ;;  %v1595_v52 = vpop.f32.mrf.mxu2  ;;  %v1524_v42 = vadd.f32 %v1523_v51, %v1486_v15  ;;  %2590 = vmatpush.msrb.mxu3 %v2589_v35 }
 0x18e   : > { %v1596_v60 = vadd.f32 %v1595_v52, %v16879_v13 }
 0x18f   : > { %v4213_v1 = vmax.f32 %v1554_v16, 0.0  ;;  %2160 = vmatmul.f32.gmra.mxu0 %v16777_v30  ;;  %2195 = vmatmul.f32.gmra.mxu1 %v16767_v23 }
 0x190   : > { %v1642_v40 = vadd.f32 %v1641_v19, %v1596_v60  ;;  %2273 = vmatmul.f32.gmra.mxu3 %v16760_v17 }
 0x191   : > { %v17119_v5 = vadd.f32 %v17029_v12, %v4213_v1  ;;  %2239 = vmatmul.f32.gmra.mxu2 %v16760_v17 }
 0x193   : > { %v1645_v32 = vpop.f32.mrf.mxu3 }
 0x194   : > { %v1527_v63 = vpop.f32.mrf.mxu0  ;;  %v1557_v8 = vpop.f32.mrf.mxu1 }
 0x195   : > { %v1558_v31 = vadd.f32 %v1557_v8, %v1524_v42  ;;  %v1603_v61 = vpop.f32.mrf.mxu2  ;;  %v1528_v15 = vadd.f32 %v1527_v63, %v1492_v11 }
 0x196   : > { %v1604_v20 = vadd.f32 %v1603_v61, %v16889_v22 }
 0x197   : > { %v4229_v59 = vmax.f32 %v1558_v31, 0.0  ;;  %2165 = vmatmul.f32.gmra.mxu0 %v16796_v43  ;;  %2201 = vmatmul.f32.gmra.mxu1 %v16787_v38 }
 0x198   : > { %v1646_v47 = vadd.f32 %v1645_v32, %v1604_v20  ;;  %2277 = vmatmul.f32.gmra.mxu3 %v16789_v39 }
 0x199   : > { %v17127_v12 = vadd.f32 %v17040_v34, %v4229_v59  ;;  %2243 = vmatmul.f32.gmra.mxu2 %v16789_v39 }
 0x19b   : > { %v1649_v24 = vpop.f32.mrf.mxu3 }
 0x19c   : > { %v1561_v25 = vpop.f32.mrf.mxu1  ;;  %v1673_v27 = vpop.f32.mrf.mxu0 }
 0x19d   : > { %v1562_v54 = vadd.f32 %v1561_v25, %v1528_v15  ;;  %v1611_v36 = vpop.f32.mrf.mxu2  ;;  %v1674_v11 = vadd.f32 %v1673_v27, %v1638_v26 }
 0x19e   : > { %v1612_v41 = vadd.f32 %v1611_v36, %v16899_v49 }
 0x19f   : > { %v4245_v53 = vmax.f32 %v1562_v54, 0.0  ;;  %2207 = vmatmul.f32.gmra.mxu1 %v16806_v46  ;;  %2303 = vmatmul.f32.vlgmr.msra.gmra.mxu0 %v16763_v21 }
 0x1a0   : > { %v1650_v62 = vadd.f32 %v1649_v24, %v1612_v41  ;;  %2428 = vmatmul.f32.vlgmr.msra.gmra.mxu3 %v16743_v9  ;;  %2625 = vmatpush.msra.mxu0 %v2586_v0 }
 0x1a1   : > { %v17135_v34 = vadd.f32 %v17049_v33, %v4245_v53  ;;  %2389 = vmatmul.f32.vlgmr.msra.gmra.mxu2 %v16730_v4  ;;  %2741 = vmatpush.msra.mxu3 %v2535_v57 }
 0x1a2   : > { %2707 = vmatpush.msra.mxu2 %v2587_v58 }
 0x1a3   : > { %v1788_v18 = vpop.f32.mrf.mxu3 }
 0x1a4   : > { %v1678_v44 = vpop.f32.mrf.mxu0  ;;  %v1712_v19 = vpop.f32.mrf.mxu1 }
 0x1a5   : > { %v1713_v51 = vadd.f32 %v1712_v19, %v1674_v11  ;;  %v1754_v56 = vpop.f32.mrf.mxu2  ;;  %v1679_v0 = vadd.f32 %v1678_v44, %v1642_v40 }
 0x1a7   : > { %v1755_v16 = vadd.f32 %v1754_v56, %v1713_v51  ;;  %2311 = vmatmul.f32.gmra.mxu0 %v16784_v37  ;;  %2353 = vmatmul.f32.vlgmr.msra.gmra.mxu1 %v16724_v2 }
 0x1a8   : > { %2434 = vmatmul.f32.gmra.mxu3 %v16767_v23  ;;  %2663 = vmatpush.msra.mxu1 %v2535_v57 }
 0x1a9   : > { %v1789_v33 = vadd.f32 %v1788_v18, %v1755_v16  ;;  %2394 = vmatmul.f32.gmra.mxu2 %v16754_v14 }
 0x1ab   : > { %v4198_v52 = vmax.f32 %v1789_v33, 0.0  ;;  %v1792_v58 = vpop.f32.mrf.mxu3 }
 0x1ac   : > { %v1683_v26 = vpop.f32.mrf.mxu0  ;;  %v1718_v60 = vpop.f32.mrf.mxu1 }
 0x1ad   : > { %v17143_v1 = vadd.f32 %v17060_v29, %v4198_v52  ;;  %v1719_v50 = vadd.f32 %v1718_v60, %v1679_v0  ;;  %v1758_v35 = vpop.f32.mrf.mxu2  ;;  %v1684_v40 = vadd.f32 %v1683_v26, %v1646_v47 }
 0x1af   : > { %v1759_v42 = vadd.f32 %v1758_v35, %v1719_v50  ;;  %2319 = vmatmul.f32.gmra.mxu0 %v16803_v45  ;;  %2357 = vmatmul.f32.gmra.mxu1 %v16745_v10 }
 0x1b0   : > { %2440 = vmatmul.f32.gmra.mxu3 %v16787_v38 }
 0x1b1   : > { %v1793_v57 = vadd.f32 %v1792_v58, %v1759_v42  ;;  %2399 = vmatmul.f32.gmra.mxu2 %v16777_v30  ;;  %v317_v58 = vld.sshfl [vmem:[#allocation1 + $0x10] sm:$0xff pattern:$0x75316420] }
 0x1b2   : > { %v357_v26 = vsel %vm336_vm1, %v317_v58, 0 }
 0x1b3   : > { %v4214_v32 = vmax.f32 %v1793_v57, 0.0  ;;  %v1796_v63 = vpop.f32.mrf.mxu3 }
 0x1b4   : > { %v1688_v8 = vpop.f32.mrf.mxu0  ;;  %v1724_v31 = vpop.f32.mrf.mxu1 }
 0x1b5   : > { %v17150_v29 = vadd.f32 %v17067_v55, %v4214_v32  ;;  %v1725_v61 = vadd.f32 %v1724_v31, %v1684_v40  ;;  %v1762_v20 = vpop.f32.mrf.mxu2  ;;  %v1689_v47 = vadd.f32 %v1688_v8, %v1650_v62 }
 0x1b7   : > { %v1763_v59 = vadd.f32 %v1762_v20, %v1725_v61  ;;  %2327 = vmatmul.f32.gmra.mxu0 %v16814_v48  ;;  %2361 = vmatmul.f32.gmra.mxu1 %v16760_v17 }
 0x1b8   : > { %2446 = vmatmul.f32.gmra.mxu3 %v16806_v46 }
 0x1b9   : > { %v1797_v15 = vadd.f32 %v1796_v63, %v1763_v59  ;;  %2404 = vmatmul.f32.gmra.mxu2 %v16796_v43 }
 0x1bb   : > { %v4230_v24 = vmax.f32 %v1797_v15, 0.0  ;;  %v1800_v25 = vpop.f32.mrf.mxu3 }
 0x1bc   : > { %v1730_v27 = vpop.f32.mrf.mxu1  ;;  %v1826_v54 = vpop.f32.mrf.mxu0 }
 0x1bd   : > { %v17157_v55 = vadd.f32 %v17074_v6, %v4230_v24  ;;  %v1731_v36 = vadd.f32 %v1730_v27, %v1689_v47  ;;  %v1766_v41 = vpop.f32.mrf.mxu2  ;;  %v1827_v11 = vadd.f32 %v1826_v54, %v16872_v3 }
 0x1bf   : > { %v1767_v53 = vadd.f32 %v1766_v41, %v1731_v36  ;;  %2365 = vmatmul.f32.gmra.mxu1 %v16789_v39  ;;  %2470 = vmatmul.f32.vlgmr.msrb.gmra.mxu0 %v16724_v2 }
 0x1c0   : > { %2592 = vmatmul.f32.vlgmr.msrb.gmra.mxu3 %v16724_v2 }
 0x1c1   : > { %v1801_v18 = vadd.f32 %v1800_v25, %v1767_v53  ;;  %2542 = vmatmul.f32.vlgmr.msrb.gmra.mxu2 %v16763_v21 }
 0x1c3   : > { %v4246_v62 = vmax.f32 %v1801_v18, 0.0  ;;  %v1951_v44 = vpop.f32.mrf.mxu3 }
 0x1c4   : > { %v1834_v19 = vpop.f32.mrf.mxu0  ;;  %v1876_v51 = vpop.f32.mrf.mxu1 }
 0x1c5   : > { %v17165_v6 = vadd.f32 %v17082_v7, %v4246_v62  ;;  %v1877_v56 = vadd.f32 %v1876_v51, %v1827_v11  ;;  %v1912_v16 = vpop.f32.mrf.mxu2  ;;  %v1835_v0 = vadd.f32 %v1834_v19, %v16879_v13  ;;  %v2774_v7 = vand.u32 4294901760, %v357_v26 }
 0x1c7   : > { %v1913_v33 = vadd.f32 %v1912_v16, %v1877_v56  ;;  %2474 = vmatmul.f32.gmra.mxu0 %v16745_v10  ;;  %2504 = vmatmul.f32.vlgmr.msrb.gmra.mxu1 %v16724_v2  ;;  %v2825_v40 = vsub.f32 %v357_v26, %v2774_v7 }
 0x1c8   : > { %2596 = vmatmul.f32.gmra.mxu3 %v16745_v10  ;;  %2775 = vmatpush.msrb.mxu0 %v2774_v7 }
 0x1c9   : > { %v1952_v52 = vadd.f32 %v1951_v44, %v1913_v33  ;;  %2550 = vmatmul.f32.gmra.mxu2 %v16784_v37  ;;  %2902 = vmatpush.msrb.mxu3 %v2774_v7  ;;  %v2826_v63 = vand.u32 4294901760, %v2825_v40 }
 0x1ca   : > { %2864 = vmatpush.msrb.mxu2 %v2825_v40 }
 0x1cb   : > { %v1957_v60 = vpop.f32.mrf.mxu3  ;;  %v2827_v61 = vsub.f32 %v2825_v40, %v2826_v63 }
 0x1cc   : > { %v1842_v50 = vpop.f32.mrf.mxu0  ;;  %v1880_v35 = vpop.f32.mrf.mxu1 }
 0x1cd   : > { %v1881_v42 = vadd.f32 %v1880_v35, %v1835_v0  ;;  %v1917_v57 = vpop.f32.mrf.mxu2  ;;  %v1843_v8 = vadd.f32 %v1842_v50, %v16889_v22  ;;  %v2828_v59 = vand.u32 4294901760, %v2827_v61  ;;  %v318_v50 = vld.sshfl [vmem:[#allocation1 + $0x18] sm:$0xff pattern:$0x75316420]  ;;  %v16591_v35 = vld [vmem:[%s16739_s29 + $0x48] sm:$0x77] }
 0x1ce   : > { %4359 = vst [vmem:[#allocation1 + $0x10] ss:$2 sm:$0xff] %v16591_v35 }
 0x1cf   : > { %v1918_v32 = vadd.f32 %v1917_v57, %v1881_v42  ;;  %2478 = vmatmul.f32.gmra.mxu0 %v16760_v17  ;;  %2508 = vmatmul.f32.gmra.mxu1 %v16745_v10  ;;  %v359_v57 = vsel %vm336_vm1, %v318_v50, 0 }
 0x1d0   : > { %2600 = vmatmul.f32.gmra.mxu3 %v16760_v17  ;;  %2829 = vmatpush.msrb.mxu1 %v2828_v59  ;;  %v3013_v40 = vand.u32 4294901760, %v359_v57 }
 0x1d1   : > { %v1958_v31 = vadd.f32 %v1957_v60, %v1918_v32  ;;  %2558 = vmatmul.f32.gmra.mxu2 %v16803_v45 }
 0x1d3   : > { %v1963_v20 = vpop.f32.mrf.mxu3 }
 0x1d4   : > { %v1850_v15 = vpop.f32.mrf.mxu0  ;;  %v1884_v47 = vpop.f32.mrf.mxu1 }
 0x1d5   : > { %v1885_v24 = vadd.f32 %v1884_v47, %v1843_v8  ;;  %v1922_v25 = vpop.f32.mrf.mxu2  ;;  %v1851_v54 = vadd.f32 %v1850_v15, %v16899_v49  ;;  %v3064_v8 = vsub.f32 %v359_v57, %v3013_v40 }
 0x1d7   : > { %v1923_v27 = vadd.f32 %v1922_v25, %v1885_v24  ;;  %2482 = vmatmul.f32.gmra.mxu0 %v16789_v39  ;;  %2512 = vmatmul.f32.gmra.mxu1 %v16760_v17  ;;  %v3065_v47 = vand.u32 4294901760, %v3064_v8 }
 0x1d8   : > { %2604 = vmatmul.f32.gmra.mxu3 %v16789_v39 }
 0x1d9   : > { %v1964_v36 = vadd.f32 %v1963_v20, %v1923_v27  ;;  %2566 = vmatmul.f32.gmra.mxu2 %v16814_v48 }
 0x1db   : > { %v1969_v41 = vpop.f32.mrf.mxu3 }
 0x1dc   : > { %v1888_v53 = vpop.f32.mrf.mxu1  ;;  %v1993_v11 = vpop.f32.mrf.mxu0 }
 0x1dd   : > { %v1889_v18 = vadd.f32 %v1888_v53, %v1851_v54  ;;  %v1927_v62 = vpop.f32.mrf.mxu2  ;;  %v1994_v51 = vadd.f32 %v1993_v11, %v1952_v52 }
 0x1df   : > { %v1928_v44 = vadd.f32 %v1927_v62, %v1889_v18  ;;  %2516 = vmatmul.f32.gmra.mxu1 %v16789_v39  ;;  %2628 = vmatmul.f32.vlgmr.msra.gmra.mxu0 %v16730_v4 }
 0x1e0   : > { %2743 = vmatmul.f32.vlgmr.msra.gmra.mxu3 %v16724_v2  ;;  %2946 = vmatpush.msra.mxu0 %v2826_v63 }
 0x1e1   : > { %v1970_v19 = vadd.f32 %v1969_v41, %v1928_v44  ;;  %2709 = vmatmul.f32.vlgmr.msra.gmra.mxu2 %v16724_v2 }
 0x1e2   : > { %3014 = vmatpush.msra.mxu2 %v3013_v40 }
 0x1e3   : > { %v2115_v56 = vpop.f32.mrf.mxu3 }
 0x1e4   : > { %v1997_v16 = vpop.f32.mrf.mxu0  ;;  %v2027_v33 = vpop.f32.mrf.mxu1 }
 0x1e5   : > { %v2028_v0 = vadd.f32 %v2027_v33, %v1994_v51  ;;  %v2065_v58 = vpop.f32.mrf.mxu2  ;;  %v1998_v32 = vadd.f32 %v1997_v16, %v1958_v31 }
 0x1e6   : > { %v2066_v26 = vadd.f32 %v2065_v58, %v16872_v3 }
 0x1e7   : > { %v4199_v60 = vmax.f32 %v2028_v0, 0.0  ;;  %2633 = vmatmul.f32.gmra.mxu0 %v16754_v14  ;;  %2667 = vmatmul.f32.vlgmr.msra.gmra.mxu1 %v16743_v9 }
 0x1e8   : > { %v2116_v42 = vadd.f32 %v2115_v56, %v2066_v26  ;;  %2747 = vmatmul.f32.gmra.mxu3 %v16745_v10  ;;  %2980 = vmatpush.msra.mxu1 %v2774_v7 }
 0x1e9   : > { %v17194_v52 = vadd.f32 %v17111_v28, %v4199_v60  ;;  %2713 = vmatmul.f32.gmra.mxu2 %v16745_v10  ;;  %v3066_v28 = vsub.f32 %v3064_v8, %v3065_v47 }
 0x1eb   : > { %v2119_v63 = vpop.f32.mrf.mxu3  ;;  %v3067_v27 = vand.u32 4294901760, %v3066_v28 }
 0x1ec   : > { %v2001_v61 = vpop.f32.mrf.mxu0  ;;  %v2031_v20 = vpop.f32.mrf.mxu1 }
 0x1ed   : > { %v2032_v59 = vadd.f32 %v2031_v20, %v1998_v32  ;;  %v2073_v15 = vpop.f32.mrf.mxu2  ;;  %v2002_v54 = vadd.f32 %v2001_v61, %v1964_v36  ;;  %3068 = vmatpush.msra.mxu3 %v3067_v27 }
 0x1ee   : > { %v2074_v24 = vadd.f32 %v2073_v15, %v16879_v13 }
 0x1ef   : > { %v4215_v25 = vmax.f32 %v2032_v59, 0.0  ;;  %2638 = vmatmul.f32.gmra.mxu0 %v16777_v30  ;;  %2673 = vmatmul.f32.gmra.mxu1 %v16767_v23 }
 0x1f0   : > { %v2120_v7 = vadd.f32 %v2119_v63, %v2074_v24  ;;  %2751 = vmatmul.f32.gmra.mxu3 %v16760_v17 }
 0x1f1   : > { %v17202_v31 = vadd.f32 %v17119_v5, %v4215_v25  ;;  %2717 = vmatmul.f32.gmra.mxu2 %v16760_v17 }
 0x1f3   : > { %v2123_v41 = vpop.f32.mrf.mxu3 }
 0x1f4   : > { %v2005_v53 = vpop.f32.mrf.mxu0  ;;  %v2035_v11 = vpop.f32.mrf.mxu1 }
 0x1f5   : > { %v2036_v18 = vadd.f32 %v2035_v11, %v2002_v54  ;;  %v2081_v62 = vpop.f32.mrf.mxu2  ;;  %v2006_v36 = vadd.f32 %v2005_v53, %v1970_v19 }
 0x1f6   : > { %v2082_v44 = vadd.f32 %v2081_v62, %v16889_v22 }
 0x1f7   : > { %v4231_v51 = vmax.f32 %v2036_v18, 0.0  ;;  %2643 = vmatmul.f32.gmra.mxu0 %v16796_v43  ;;  %2679 = vmatmul.f32.gmra.mxu1 %v16787_v38 }
 0x1f8   : > { %v2124_v56 = vadd.f32 %v2123_v41, %v2082_v44  ;;  %2755 = vmatmul.f32.gmra.mxu3 %v16789_v39 }
 0x1f9   : > { %v17210_v5 = vadd.f32 %v17127_v12, %v4231_v51  ;;  %2721 = vmatmul.f32.gmra.mxu2 %v16789_v39 }
 0x1fb   : > { %v2127_v16 = vpop.f32.mrf.mxu3 }
 0x1fc   : > { %v2039_v33 = vpop.f32.mrf.mxu1  ;;  %v2151_v0 = vpop.f32.mrf.mxu0 }
 0x1fd   : > { %v2040_v58 = vadd.f32 %v2039_v33, %v2006_v36  ;;  %v2089_v26 = vpop.f32.mrf.mxu2  ;;  %v2152_v19 = vadd.f32 %v2151_v0, %v2116_v42 }
 0x1fe   : > { %v2090_v60 = vadd.f32 %v2089_v26, %v16899_v49 }
 0x1ff   : > { %v4247_v50 = vmax.f32 %v2040_v58, 0.0  ;;  %2685 = vmatmul.f32.gmra.mxu1 %v16806_v46  ;;  %2781 = vmatmul.f32.vlgmr.msrb.gmra.mxu0 %v16763_v21 }
 0x200   : > { %v2128_v35 = vadd.f32 %v2127_v16, %v2090_v60  ;;  %2906 = vmatmul.f32.vlgmr.msrb.gmra.mxu3 %v16743_v9  ;;  %3103 = vmatpush.msrb.mxu0 %v3064_v8 }
 0x201   : > { %v17218_v12 = vadd.f32 %v17135_v34, %v4247_v50  ;;  %2867 = vmatmul.f32.vlgmr.msrb.gmra.mxu2 %v16730_v4  ;;  %3219 = vmatpush.msrb.mxu3 %v3013_v40 }
 0x202   : > { %3185 = vmatpush.msrb.mxu2 %v3065_v47 }
 0x203   : > { %v2266_v57 = vpop.f32.mrf.mxu3 }
 0x204   : > { %v2156_v32 = vpop.f32.mrf.mxu0  ;;  %v2190_v63 = vpop.f32.mrf.mxu1 }
 0x205   : > { %v2191_v61 = vadd.f32 %v2190_v63, %v2152_v19  ;;  %v2232_v20 = vpop.f32.mrf.mxu2  ;;  %v2157_v8 = vadd.f32 %v2156_v32, %v2120_v7 }
 0x207   : > { %v2233_v59 = vadd.f32 %v2232_v20, %v2191_v61  ;;  %2789 = vmatmul.f32.gmra.mxu0 %v16784_v37  ;;  %2831 = vmatmul.f32.vlgmr.msrb.gmra.mxu1 %v16724_v2 }
 0x208   : > { %2912 = vmatmul.f32.gmra.mxu3 %v16767_v23  ;;  %3141 = vmatpush.msrb.mxu1 %v3013_v40 }
 0x209   : > { %v2267_v34 = vadd.f32 %v2266_v57, %v2233_v59  ;;  %2872 = vmatmul.f32.gmra.mxu2 %v16754_v14 }
 0x20b   : > { %v4200_v15 = vmax.f32 %v2267_v34, 0.0  ;;  %v2270_v47 = vpop.f32.mrf.mxu3 }
 0x20c   : > { %v2161_v42 = vpop.f32.mrf.mxu0  ;;  %v2196_v24 = vpop.f32.mrf.mxu1 }
 0x20d   : > { %v17226_v25 = vadd.f32 %v17143_v1, %v4200_v15  ;;  %v2197_v28 = vadd.f32 %v2196_v24, %v2157_v8  ;;  %v2236_v27 = vpop.f32.mrf.mxu2  ;;  %v2162_v7 = vadd.f32 %v2161_v42, %v2124_v56 }
 0x20f   : > { %v2237_v54 = vadd.f32 %v2236_v27, %v2197_v28  ;;  %2797 = vmatmul.f32.gmra.mxu0 %v16803_v45  ;;  %2835 = vmatmul.f32.gmra.mxu1 %v16745_v10 }
 0x210   : > { %2918 = vmatmul.f32.gmra.mxu3 %v16787_v38 }
 0x211   : > { %v2271_v40 = vadd.f32 %v2270_v47, %v2237_v54  ;;  %2877 = vmatmul.f32.gmra.mxu2 %v16777_v30  ;;  %v319_v47 = vld.sshfl [vmem:[#allocation1 + $0x20] sm:$0xff pattern:$0x75316420] }
 0x212   : > { %v361_v42 = vsel %vm336_vm1, %v319_v47, 0 }
 0x213   : > { %v4216_v41 = vmax.f32 %v2271_v40, 0.0  ;;  %v2274_v53 = vpop.f32.mrf.mxu3 }
 0x214   : > { %v2166_v11 = vpop.f32.mrf.mxu0  ;;  %v2202_v18 = vpop.f32.mrf.mxu1 }
 0x215   : > { %v17233_v1 = vadd.f32 %v17150_v29, %v4216_v41  ;;  %v2203_v62 = vadd.f32 %v2202_v18, %v2162_v7  ;;  %v2240_v44 = vpop.f32.mrf.mxu2  ;;  %v2167_v56 = vadd.f32 %v2166_v11, %v2128_v35 }
 0x217   : > { %v2241_v51 = vadd.f32 %v2240_v44, %v2203_v62  ;;  %2805 = vmatmul.f32.gmra.mxu0 %v16814_v48  ;;  %2839 = vmatmul.f32.gmra.mxu1 %v16760_v17 }
 0x218   : > { %2924 = vmatmul.f32.gmra.mxu3 %v16806_v46 }
 0x219   : > { %v2275_v36 = vadd.f32 %v2274_v53, %v2241_v51  ;;  %2882 = vmatmul.f32.gmra.mxu2 %v16796_v43 }
 0x21b   : > { %v4232_v16 = vmax.f32 %v2275_v36, 0.0  ;;  %v2278_v33 = vpop.f32.mrf.mxu3 }
 0x21c   : > { %v2208_v0 = vpop.f32.mrf.mxu1  ;;  %v2304_v58 = vpop.f32.mrf.mxu0 }
 0x21d   : > { %v17240_v29 = vadd.f32 %v17157_v55, %v4232_v16  ;;  %v2209_v26 = vadd.f32 %v2208_v0, %v2167_v56  ;;  %v2244_v60 = vpop.f32.mrf.mxu2  ;;  %v2305_v19 = vadd.f32 %v2304_v58, %v16872_v3 }
 0x21f   : > { %v2245_v50 = vadd.f32 %v2244_v60, %v2209_v26  ;;  %2843 = vmatmul.f32.gmra.mxu1 %v16789_v39  ;;  %2948 = vmatmul.f32.vlgmr.msra.gmra.mxu0 %v16724_v2 }
 0x220   : > { %3070 = vmatmul.f32.vlgmr.msra.gmra.mxu3 %v16724_v2 }
 0x221   : > { %v2279_v57 = vadd.f32 %v2278_v33, %v2245_v50  ;;  %3020 = vmatmul.f32.vlgmr.msra.gmra.mxu2 %v16763_v21 }
 0x223   : > { %v4248_v35 = vmax.f32 %v2279_v57, 0.0  ;;  %v2429_v32 = vpop.f32.mrf.mxu3 }
 0x224   : > { %v2312_v63 = vpop.f32.mrf.mxu0  ;;  %v2354_v61 = vpop.f32.mrf.mxu1 }
 0x225   : > { %v17248_v55 = vadd.f32 %v17165_v6, %v4248_v35  ;;  %v2355_v20 = vadd.f32 %v2354_v61, %v2305_v19  ;;  %v2390_v59 = vpop.f32.mrf.mxu2  ;;  %v2313_v8 = vadd.f32 %v2312_v63, %v16879_v13  ;;  %v3252_v6 = vand.u32 4294901760, %v361_v42 }
 0x227   : > { %v2391_v34 = vadd.f32 %v2390_v59, %v2355_v20  ;;  %2952 = vmatmul.f32.gmra.mxu0 %v16745_v10  ;;  %2982 = vmatmul.f32.vlgmr.msra.gmra.mxu1 %v16724_v2  ;;  %v3303_v7 = vsub.f32 %v361_v42, %v3252_v6 }
 0x228   : > { %3074 = vmatmul.f32.gmra.mxu3 %v16745_v10  ;;  %3253 = vmatpush.msra.mxu0 %v3252_v6 }
 0x229   : > { %v2430_v15 = vadd.f32 %v2429_v32, %v2391_v34  ;;  %3028 = vmatmul.f32.gmra.mxu2 %v16784_v37  ;;  %3380 = vmatpush.msra.mxu3 %v3252_v6  ;;  %v3304_v53 = vand.u32 4294901760, %v3303_v7 }
 0x22a   : > { %3342 = vmatpush.msra.mxu2 %v3303_v7 }
 0x22b   : > { %v2435_v24 = vpop.f32.mrf.mxu3  ;;  %v3305_v62 = vsub.f32 %v3303_v7, %v3304_v53 }
 0x22c   : > { %v2320_v28 = vpop.f32.mrf.mxu0  ;;  %v2358_v27 = vpop.f32.mrf.mxu1 }
 0x22d   : > { %v2359_v54 = vadd.f32 %v2358_v27, %v2313_v8  ;;  %v2395_v40 = vpop.f32.mrf.mxu2  ;;  %v2321_v11 = vadd.f32 %v2320_v28, %v16889_v22  ;;  %v3306_v51 = vand.u32 4294901760, %v3305_v62  ;;  %v320_v28 = vld.sshfl [vmem:[#allocation1 + $0x28] sm:$0xff pattern:$0x75316420]  ;;  %v16592_v27 = vld [vmem:[%s16739_s29 + $0x50] sm:$0x77] }
 0x22e   : > { %4361 = vst [vmem:[#allocation1 + $0x20] ss:$2 sm:$0xff] %v16592_v27 }
 0x22f   : > { %v2396_v41 = vadd.f32 %v2395_v40, %v2359_v54  ;;  %2956 = vmatmul.f32.gmra.mxu0 %v16760_v17  ;;  %2986 = vmatmul.f32.gmra.mxu1 %v16745_v10  ;;  %v363_v40 = vsel %vm336_vm1, %v320_v28, 0 }
 0x230   : > { %3078 = vmatmul.f32.gmra.mxu3 %v16760_v17  ;;  %3307 = vmatpush.msra.mxu1 %v3306_v51  ;;  %v3491_v7 = vand.u32 4294901760, %v363_v40 }
 0x231   : > { %v2436_v18 = vadd.f32 %v2435_v24, %v2396_v41  ;;  %3036 = vmatmul.f32.gmra.mxu2 %v16803_v45 }
 0x233   : > { %v2441_v44 = vpop.f32.mrf.mxu3 }
 0x234   : > { %v2328_v36 = vpop.f32.mrf.mxu0  ;;  %v2362_v56 = vpop.f32.mrf.mxu1 }
 0x235   : > { %v2363_v16 = vadd.f32 %v2362_v56, %v2321_v11  ;;  %v2400_v33 = vpop.f32.mrf.mxu2  ;;  %v2329_v58 = vadd.f32 %v2328_v36, %v16899_v49  ;;  %v3542_v11 = vsub.f32 %v363_v40, %v3491_v7 }
 0x237   : > { %v2401_v0 = vadd.f32 %v2400_v33, %v2363_v16  ;;  %2960 = vmatmul.f32.gmra.mxu0 %v16789_v39  ;;  %2990 = vmatmul.f32.gmra.mxu1 %v16760_v17  ;;  %v3543_v56 = vand.u32 4294901760, %v3542_v11 }
 0x238   : > { %3082 = vmatmul.f32.gmra.mxu3 %v16789_v39 }
 0x239   : > { %v2442_v26 = vadd.f32 %v2441_v44, %v2401_v0  ;;  %3044 = vmatmul.f32.gmra.mxu2 %v16814_v48 }
 0x23b   : > { %v2447_v60 = vpop.f32.mrf.mxu3 }
 0x23c   : > { %v2366_v50 = vpop.f32.mrf.mxu1  ;;  %v2471_v19 = vpop.f32.mrf.mxu0 }
 0x23d   : > { %v2367_v57 = vadd.f32 %v2366_v50, %v2329_v58  ;;  %v2405_v35 = vpop.f32.mrf.mxu2  ;;  %v2472_v61 = vadd.f32 %v2471_v19, %v2430_v15 }
 0x23f   : > { %v2406_v32 = vadd.f32 %v2405_v35, %v2367_v57  ;;  %2994 = vmatmul.f32.gmra.mxu1 %v16789_v39  ;;  %3106 = vmatmul.f32.vlgmr.msrb.gmra.mxu0 %v16730_v4 }
 0x240   : > { %3221 = vmatmul.f32.vlgmr.msrb.gmra.mxu3 %v16724_v2  ;;  %3424 = vmatpush.msrb.mxu0 %v3304_v53 }
 0x241   : > { %v2448_v63 = vadd.f32 %v2447_v60, %v2406_v32  ;;  %3187 = vmatmul.f32.vlgmr.msrb.gmra.mxu2 %v16724_v2 }
 0x242   : > { %3492 = vmatpush.msrb.mxu2 %v3491_v7 }
 0x243   : > { %v2593_v20 = vpop.f32.mrf.mxu3 }
 0x244   : > { %v2475_v59 = vpop.f32.mrf.mxu0  ;;  %v2505_v34 = vpop.f32.mrf.mxu1 }
 0x245   : > { %v2506_v8 = vadd.f32 %v2505_v34, %v2472_v61  ;;  %v2543_v47 = vpop.f32.mrf.mxu2  ;;  %v2476_v41 = vadd.f32 %v2475_v59, %v2436_v18 }
 0x246   : > { %v2544_v42 = vadd.f32 %v2543_v47, %v16872_v3 }
 0x247   : > { %v4201_v24 = vmax.f32 %v2506_v8, 0.0  ;;  %3111 = vmatmul.f32.gmra.mxu0 %v16754_v14  ;;  %3145 = vmatmul.f32.vlgmr.msrb.gmra.mxu1 %v16743_v9 }
 0x248   : > { %v2594_v54 = vadd.f32 %v2593_v20, %v2544_v42  ;;  %3225 = vmatmul.f32.gmra.mxu3 %v16745_v10  ;;  %3458 = vmatpush.msrb.mxu1 %v3252_v6 }
 0x249   : > { %v17277_v15 = vadd.f32 %v17194_v52, %v4201_v24  ;;  %3191 = vmatmul.f32.gmra.mxu2 %v16745_v10  ;;  %v3544_v52 = vsub.f32 %v3542_v11, %v3543_v56 }
 0x24b   : > { %v2597_v53 = vpop.f32.mrf.mxu3  ;;  %v3545_v0 = vand.u32 4294901760, %v3544_v52 }
 0x24c   : > { %v2479_v62 = vpop.f32.mrf.mxu0  ;;  %v2509_v44 = vpop.f32.mrf.mxu1 }
 0x24d   : > { %v2510_v51 = vadd.f32 %v2509_v44, %v2476_v41  ;;  %v2551_v36 = vpop.f32.mrf.mxu2  ;;  %v2480_v58 = vadd.f32 %v2479_v62, %v2442_v26  ;;  %3546 = vmatpush.msrb.mxu3 %v3545_v0 }
 0x24e   : > { %v2552_v16 = vadd.f32 %v2551_v36, %v16879_v13 }
 0x24f   : > { %v4217_v33 = vmax.f32 %v2510_v51, 0.0  ;;  %3116 = vmatmul.f32.gmra.mxu0 %v16777_v30  ;;  %3151 = vmatmul.f32.gmra.mxu1 %v16767_v23 }
 0x250   : > { %v2598_v6 = vadd.f32 %v2597_v53, %v2552_v16  ;;  %3229 = vmatmul.f32.gmra.mxu3 %v16760_v17 }
 0x251   : > { %v17285_v18 = vadd.f32 %v17202_v31, %v4217_v33  ;;  %3195 = vmatmul.f32.gmra.mxu2 %v16760_v17 }
 0x253   : > { %v2601_v60 = vpop.f32.mrf.mxu3 }
 0x254   : > { %v2483_v50 = vpop.f32.mrf.mxu0  ;;  %v2513_v19 = vpop.f32.mrf.mxu1 }
 0x255   : > { %v2514_v57 = vadd.f32 %v2513_v19, %v2480_v58  ;;  %v2559_v35 = vpop.f32.mrf.mxu2  ;;  %v2484_v26 = vadd.f32 %v2483_v50, %v2448_v63 }
 0x256   : > { %v2560_v32 = vadd.f32 %v2559_v35, %v16889_v22 }
 0x257   : > { %v4233_v61 = vmax.f32 %v2514_v57, 0.0  ;;  %3121 = vmatmul.f32.gmra.mxu0 %v16796_v43  ;;  %3157 = vmatmul.f32.gmra.mxu1 %v16787_v38 }
 0x258   : > { %v2602_v20 = vadd.f32 %v2601_v60, %v2560_v32  ;;  %3233 = vmatmul.f32.gmra.mxu3 %v16789_v39 }
 0x259   : > { %v17293_v31 = vadd.f32 %v17210_v5, %v4233_v61  ;;  %3199 = vmatmul.f32.gmra.mxu2 %v16789_v39 }
 0x25b   : > { %v2605_v59 = vpop.f32.mrf.mxu3 }
 0x25c   : > { %v2517_v34 = vpop.f32.mrf.mxu1  ;;  %v2629_v8 = vpop.f32.mrf.mxu0 }
 0x25d   : > { %v2518_v47 = vadd.f32 %v2517_v34, %v2484_v26  ;;  %v2567_v42 = vpop.f32.mrf.mxu2  ;;  %v2630_v63 = vadd.f32 %v2629_v8, %v2594_v54 }
 0x25e   : > { %v2568_v24 = vadd.f32 %v2567_v42, %v16899_v49 }
 0x25f   : > { %v4249_v28 = vmax.f32 %v2518_v47, 0.0  ;;  %3163 = vmatmul.f32.gmra.mxu1 %v16806_v46  ;;  %3259 = vmatmul.f32.vlgmr.msra.gmra.mxu0 %v16763_v21 }
 0x260   : > { %v2606_v27 = vadd.f32 %v2605_v59, %v2568_v24  ;;  %3384 = vmatmul.f32.vlgmr.msra.gmra.mxu3 %v16743_v9  ;;  %3581 = vmatpush.msra.mxu0 %v3542_v11 }
 0x261   : > { %v17301_v5 = vadd.f32 %v17218_v12, %v4249_v28  ;;  %3345 = vmatmul.f32.vlgmr.msra.gmra.mxu2 %v16730_v4  ;;  %3697 = vmatpush.msra.mxu3 %v3491_v7 }
 0x262   : > { %3663 = vmatpush.msra.mxu2 %v3543_v56 }
 0x263   : > { %v2744_v40 = vpop.f32.mrf.mxu3 }
 0x264   : > { %v2634_v41 = vpop.f32.mrf.mxu0  ;;  %v2668_v53 = vpop.f32.mrf.mxu1 }
 0x265   : > { %v2669_v62 = vadd.f32 %v2668_v53, %v2630_v63  ;;  %v2710_v44 = vpop.f32.mrf.mxu2  ;;  %v2635_v11 = vadd.f32 %v2634_v41, %v2598_v6 }
 0x267   : > { %v2711_v51 = vadd.f32 %v2710_v44, %v2669_v62  ;;  %3267 = vmatmul.f32.gmra.mxu0 %v16784_v37  ;;  %3309 = vmatmul.f32.vlgmr.msra.gmra.mxu1 %v16724_v2 }
 0x268   : > { %3390 = vmatmul.f32.gmra.mxu3 %v16767_v23  ;;  %3619 = vmatpush.msra.mxu1 %v3491_v7 }
 0x269   : > { %v2745_v12 = vadd.f32 %v2744_v40, %v2711_v51  ;;  %3350 = vmatmul.f32.gmra.mxu2 %v16754_v14 }
 0x26b   : > { %v4202_v36 = vmax.f32 %v2745_v12, 0.0  ;;  %v2748_v56 = vpop.f32.mrf.mxu3 }
 0x26c   : > { %v2639_v54 = vpop.f32.mrf.mxu0  ;;  %v2674_v16 = vpop.f32.mrf.mxu1 }
 0x26d   : > { %v17309_v33 = vadd.f32 %v17226_v25, %v4202_v36  ;;  %v2675_v52 = vadd.f32 %v2674_v16, %v2635_v11  ;;  %v2714_v0 = vpop.f32.mrf.mxu2  ;;  %v2640_v6 = vadd.f32 %v2639_v54, %v2602_v20 }
 0x26f   : > { %v2715_v58 = vadd.f32 %v2714_v0, %v2675_v52  ;;  %3275 = vmatmul.f32.gmra.mxu0 %v16803_v45  ;;  %3313 = vmatmul.f32.gmra.mxu1 %v16745_v10 }
 0x270   : > { %3396 = vmatmul.f32.gmra.mxu3 %v16787_v38 }
 0x271   : > { %v2749_v7 = vadd.f32 %v2748_v56, %v2715_v58  ;;  %3355 = vmatmul.f32.gmra.mxu2 %v16777_v30  ;;  %v321_v56 = vld.sshfl [vmem:[#allocation1 + $0x30] sm:$0xff pattern:$0x75316420] }
 0x272   : > { %v365_v54 = vsel %vm336_vm1, %v321_v56, 0 }
 0x273   : > { %v4218_v60 = vmax.f32 %v2749_v7, 0.0  ;;  %v2752_v50 = vpop.f32.mrf.mxu3 }
 0x274   : > { %v2644_v19 = vpop.f32.mrf.mxu0  ;;  %v2680_v57 = vpop.f32.mrf.mxu1 }
 0x275   : > { %v17316_v25 = vadd.f32 %v17233_v1, %v4218_v60  ;;  %v2681_v35 = vadd.f32 %v2680_v57, %v2640_v6  ;;  %v2718_v32 = vpop.f32.mrf.mxu2  ;;  %v2645_v20 = vadd.f32 %v2644_v19, %v2606_v27 }
 0x277   : > { %v2719_v61 = vadd.f32 %v2718_v32, %v2681_v35  ;;  %3283 = vmatmul.f32.gmra.mxu0 %v16814_v48  ;;  %3317 = vmatmul.f32.gmra.mxu1 %v16760_v17 }
 0x278   : > { %3402 = vmatmul.f32.gmra.mxu3 %v16806_v46 }
 0x279   : > { %v2753_v26 = vadd.f32 %v2752_v50, %v2719_v61  ;;  %3360 = vmatmul.f32.gmra.mxu2 %v16796_v43 }
 0x27b   : > { %v4234_v59 = vmax.f32 %v2753_v26, 0.0  ;;  %v2756_v34 = vpop.f32.mrf.mxu3 }
 0x27c   : > { %v2686_v8 = vpop.f32.mrf.mxu1  ;;  %v2782_v47 = vpop.f32.mrf.mxu0 }
 0x27d   : > { %v17323_v1 = vadd.f32 %v17240_v29, %v4234_v59  ;;  %v2687_v42 = vadd.f32 %v2686_v8, %v2645_v20  ;;  %v2722_v24 = vpop.f32.mrf.mxu2  ;;  %v2783_v63 = vadd.f32 %v2782_v47, %v16872_v3 }
 0x27f   : > { %v2723_v28 = vadd.f32 %v2722_v24, %v2687_v42  ;;  %3321 = vmatmul.f32.gmra.mxu1 %v16789_v39  ;;  %3426 = vmatmul.f32.vlgmr.msrb.gmra.mxu0 %v16724_v2 }
 0x280   : > { %3548 = vmatmul.f32.vlgmr.msrb.gmra.mxu3 %v16724_v2 }
 0x281   : > { %v2757_v40 = vadd.f32 %v2756_v34, %v2723_v28  ;;  %3498 = vmatmul.f32.vlgmr.msrb.gmra.mxu2 %v16763_v21 }
 0x283   : > { %v4250_v27 = vmax.f32 %v2757_v40, 0.0  ;;  %v2907_v41 = vpop.f32.mrf.mxu3 }
 0x284   : > { %v2790_v53 = vpop.f32.mrf.mxu0  ;;  %v2832_v62 = vpop.f32.mrf.mxu1 }
 0x285   : > { %v17331_v29 = vadd.f32 %v17248_v55, %v4250_v27  ;;  %v2833_v44 = vadd.f32 %v2832_v62, %v2783_v63  ;;  %v2868_v51 = vpop.f32.mrf.mxu2  ;;  %v2791_v11 = vadd.f32 %v2790_v53, %v16879_v13  ;;  %v3730_v55 = vand.u32 4294901760, %v365_v54 }
 0x287   : > { %v2869_v12 = vadd.f32 %v2868_v51, %v2833_v44  ;;  %3430 = vmatmul.f32.gmra.mxu0 %v16745_v10  ;;  %3460 = vmatmul.f32.vlgmr.msrb.gmra.mxu1 %v16724_v2  ;;  %v3781_v6 = vsub.f32 %v365_v54, %v3730_v55 }
 0x288   : > { %3552 = vmatmul.f32.gmra.mxu3 %v16745_v10  ;;  %3731 = vmatpush.msrb.mxu0 %v3730_v55 }
 0x289   : > { %v2908_v36 = vadd.f32 %v2907_v41, %v2869_v12  ;;  %3506 = vmatmul.f32.gmra.mxu2 %v16784_v37  ;;  %3858 = vmatpush.msrb.mxu3 %v3730_v55  ;;  %v3782_v50 = vand.u32 4294901760, %v3781_v6 }
 0x28a   : > { %3820 = vmatpush.msrb.mxu2 %v3781_v6 }
 0x28b   : > { %v2913_v16 = vpop.f32.mrf.mxu3  ;;  %v3783_v35 = vsub.f32 %v3781_v6, %v3782_v50 }
 0x28c   : > { %v2798_v52 = vpop.f32.mrf.mxu0  ;;  %v2836_v0 = vpop.f32.mrf.mxu1 }
 0x28d   : > { %v2837_v58 = vadd.f32 %v2836_v0, %v2791_v11  ;;  %v2873_v7 = vpop.f32.mrf.mxu2  ;;  %v2799_v19 = vadd.f32 %v2798_v52, %v16889_v22  ;;  %v3784_v61 = vand.u32 4294901760, %v3783_v35  ;;  %v322_v52 = vld.sshfl [vmem:[#allocation1 + $0x38] sm:$0xff pattern:$0x75316420] }
 0x28e   : > { %v16593_v0 = vld [vmem:[%s16739_s29 + $0x58] sm:$0x77] }
 0x28f   : > { %v2874_v60 = vadd.f32 %v2873_v7, %v2837_v58  ;;  %3434 = vmatmul.f32.gmra.mxu0 %v16760_v17  ;;  %3464 = vmatmul.f32.gmra.mxu1 %v16745_v10  ;;  %v367_v7 = vsel %vm336_vm1, %v322_v52, 0  ;;  %4363 = vst [vmem:[#allocation1 + $0x30] ss:$2 sm:$0xff] %v16593_v0 }
 0x290   : > { %3556 = vmatmul.f32.gmra.mxu3 %v16760_v17  ;;  %3785 = vmatpush.msrb.mxu1 %v3784_v61  ;;  %v3969_v6 = vand.u32 4294901760, %v367_v7 }
 0x291   : > { %v2914_v57 = vadd.f32 %v2913_v16, %v2874_v60  ;;  %3514 = vmatmul.f32.gmra.mxu2 %v16803_v45 }
 0x293   : > { %v2919_v32 = vpop.f32.mrf.mxu3 }
 0x294   : > { %v2806_v26 = vpop.f32.mrf.mxu0  ;;  %v2840_v20 = vpop.f32.mrf.mxu1 }
 0x295   : > { %v2841_v59 = vadd.f32 %v2840_v20, %v2799_v19  ;;  %v2878_v34 = vpop.f32.mrf.mxu2  ;;  %v2807_v47 = vadd.f32 %v2806_v26, %v16899_v49  ;;  %v4020_v19 = vsub.f32 %v367_v7, %v3969_v6 }
 0x297   : > { %v2879_v8 = vadd.f32 %v2878_v34, %v2841_v59  ;;  %3438 = vmatmul.f32.gmra.mxu0 %v16789_v39  ;;  %3468 = vmatmul.f32.gmra.mxu1 %v16760_v17  ;;  %v4021_v20 = vand.u32 4294901760, %v4020_v19 }
 0x298   : > { %3560 = vmatmul.f32.gmra.mxu3 %v16789_v39 }
 0x299   : > { %v2920_v42 = vadd.f32 %v2919_v32, %v2879_v8  ;;  %3522 = vmatmul.f32.gmra.mxu2 %v16814_v48 }
 0x29b   : > { %v2925_v24 = vpop.f32.mrf.mxu3 }
 0x29c   : > { %v2844_v28 = vpop.f32.mrf.mxu1  ;;  %v2949_v63 = vpop.f32.mrf.mxu0 }
 0x29d   : > { %v2845_v40 = vadd.f32 %v2844_v28, %v2807_v47  ;;  %v2883_v27 = vpop.f32.mrf.mxu2  ;;  %v2950_v62 = vadd.f32 %v2949_v63, %v2908_v36 }
 0x29f   : > { %v2884_v41 = vadd.f32 %v2883_v27, %v2845_v40  ;;  %3472 = vmatmul.f32.gmra.mxu1 %v16789_v39  ;;  %3584 = vmatmul.f32.vlgmr.msra.gmra.mxu0 %v16730_v4 }
 0x2a0   : > { %3699 = vmatmul.f32.vlgmr.msra.gmra.mxu3 %v16724_v2  ;;  %3902 = vmatpush.msra.mxu0 %v3782_v50 }
 0x2a1   : > { %v2926_v53 = vadd.f32 %v2925_v24, %v2884_v41  ;;  %3665 = vmatmul.f32.vlgmr.msra.gmra.mxu2 %v16724_v2 }
 0x2a2   : > { %3970 = vmatpush.msra.mxu2 %v3969_v6 }
 0x2a3   : > { %v3071_v44 = vpop.f32.mrf.mxu3 }
 0x2a4   : > { %v2953_v51 = vpop.f32.mrf.mxu0  ;;  %v2983_v12 = vpop.f32.mrf.mxu1 }
 0x2a5   : > { %v2984_v11 = vadd.f32 %v2983_v12, %v2950_v62  ;;  %v3021_v56 = vpop.f32.mrf.mxu2  ;;  %v2954_v60 = vadd.f32 %v2953_v51, %v2914_v57 }
 0x2a6   : > { %v3022_v54 = vadd.f32 %v3021_v56, %v16872_v3 }
 0x2a7   : > { %v4203_v16 = vmax.f32 %v2984_v11, 0.0  ;;  %3589 = vmatmul.f32.gmra.mxu0 %v16754_v14  ;;  %3623 = vmatmul.f32.vlgmr.msra.gmra.mxu1 %v16743_v9 }
 0x2a8   : > { %v3072_v58 = vadd.f32 %v3071_v44, %v3022_v54  ;;  %3703 = vmatmul.f32.gmra.mxu3 %v16745_v10  ;;  %3936 = vmatpush.msra.mxu1 %v3730_v55 }
 0x2a9   : > { %v17360_v36 = vadd.f32 %v17277_v15, %v4203_v16  ;;  %3669 = vmatmul.f32.gmra.mxu2 %v16745_v10  ;;  %v4022_v15 = vsub.f32 %v4020_v19, %v4021_v20 }
 0x2ab   : > { %v3075_v50 = vpop.f32.mrf.mxu3  ;;  %v4023_v8 = vand.u32 4294901760, %v4022_v15 }
 0x2ac   : > { %v2957_v35 = vpop.f32.mrf.mxu0  ;;  %v2987_v32 = vpop.f32.mrf.mxu1 }
 0x2ad   : > { %v2988_v61 = vadd.f32 %v2987_v32, %v2954_v60  ;;  %v3029_v26 = vpop.f32.mrf.mxu2  ;;  %v2958_v47 = vadd.f32 %v2957_v35, %v2920_v42  ;;  %4024 = vmatpush.msra.mxu3 %v4023_v8 }
 0x2ae   : > { %v3030_v59 = vadd.f32 %v3029_v26, %v16879_v13 }
 0x2af   : > { %v4219_v34 = vmax.f32 %v2988_v61, 0.0  ;;  %3594 = vmatmul.f32.gmra.mxu0 %v16777_v30  ;;  %3629 = vmatmul.f32.gmra.mxu1 %v16767_v23 }
 0x2b0   : > { %v3076_v55 = vadd.f32 %v3075_v50, %v3030_v59  ;;  %3707 = vmatmul.f32.gmra.mxu3 %v16760_v17 }
 0x2b1   : > { %v17368_v57 = vadd.f32 %v17285_v18, %v4219_v34  ;;  %3673 = vmatmul.f32.gmra.mxu2 %v16760_v17 }
 0x2b3   : > { %v3079_v24 = vpop.f32.mrf.mxu3 }
 0x2b4   : > { %v2961_v28 = vpop.f32.mrf.mxu0  ;;  %v2991_v63 = vpop.f32.mrf.mxu1 }
 0x2b5   : > { %v2992_v40 = vadd.f32 %v2991_v63, %v2958_v47  ;;  %v3037_v27 = vpop.f32.mrf.mxu2  ;;  %v2962_v42 = vadd.f32 %v2961_v28, %v2926_v53 }
 0x2b6   : > { %v3038_v41 = vadd.f32 %v3037_v27, %v16889_v22 }
 0x2b7   : > { %v4235_v62 = vmax.f32 %v2992_v40, 0.0  ;;  %3599 = vmatmul.f32.gmra.mxu0 %v16796_v43  ;;  %3635 = vmatmul.f32.gmra.mxu1 %v16787_v38 }
 0x2b8   : > { %v3080_v44 = vadd.f32 %v3079_v24, %v3038_v41  ;;  %3711 = vmatmul.f32.gmra.mxu3 %v16789_v39 }
 0x2b9   : > { %v17376_v18 = vadd.f32 %v17293_v31, %v4235_v62  ;;  %3677 = vmatmul.f32.gmra.mxu2 %v16789_v39 }
 0x2bb   : > { %v3083_v51 = vpop.f32.mrf.mxu3 }
 0x2bc   : > { %v2995_v12 = vpop.f32.mrf.mxu1  ;;  %v3107_v11 = vpop.f32.mrf.mxu0 }
 0x2bd   : > { %v2996_v56 = vadd.f32 %v2995_v12, %v2962_v42  ;;  %v3045_v54 = vpop.f32.mrf.mxu2  ;;  %v3108_v53 = vadd.f32 %v3107_v11, %v3072_v58 }
 0x2be   : > { %v3046_v16 = vadd.f32 %v3045_v54, %v16899_v49 }
 0x2bf   : > { %v4251_v52 = vmax.f32 %v2996_v56, 0.0  ;;  %3641 = vmatmul.f32.gmra.mxu1 %v16806_v46  ;;  %3737 = vmatmul.f32.vlgmr.msrb.gmra.mxu0 %v16763_v21 }
 0x2c0   : > { %v3084_v0 = vadd.f32 %v3083_v51, %v3046_v16  ;;  %3862 = vmatmul.f32.vlgmr.msrb.gmra.mxu3 %v16743_v9  ;;  %4059 = vmatpush.msrb.mxu0 %v4020_v19 }
 0x2c1   : > { %v17384_v31 = vadd.f32 %v17301_v5, %v4251_v52  ;;  %3823 = vmatmul.f32.vlgmr.msrb.gmra.mxu2 %v16730_v4  ;;  %4175 = vmatpush.msrb.mxu3 %v3969_v6 }
 0x2c2   : > { %4141 = vmatpush.msrb.mxu2 %v4021_v20 }
 0x2c3   : > { %v3222_v7 = vpop.f32.mrf.mxu3 }
 0x2c4   : > { %v3112_v60 = vpop.f32.mrf.mxu0  ;;  %v3146_v50 = vpop.f32.mrf.mxu1 }
 0x2c5   : > { %v3147_v35 = vadd.f32 %v3146_v50, %v3108_v53  ;;  %v3188_v32 = vpop.f32.mrf.mxu2  ;;  %v3113_v19 = vadd.f32 %v3112_v60, %v3076_v55 }
 0x2c7   : > { %v3189_v61 = vadd.f32 %v3188_v32, %v3147_v35  ;;  %3745 = vmatmul.f32.gmra.mxu0 %v16784_v37  ;;  %3787 = vmatmul.f32.vlgmr.msrb.gmra.mxu1 %v16724_v2 }
 0x2c8   : > { %3868 = vmatmul.f32.gmra.mxu3 %v16767_v23  ;;  %4097 = vmatpush.msrb.mxu1 %v3969_v6 }
 0x2c9   : > { %v3223_v5 = vadd.f32 %v3222_v7, %v3189_v61  ;;  %3828 = vmatmul.f32.gmra.mxu2 %v16754_v14 }
 0x2cb   : > { %v4204_v26 = vmax.f32 %v3223_v5, 0.0  ;;  %v3226_v20 = vpop.f32.mrf.mxu3 }
 0x2cc   : > { %v3117_v58 = vpop.f32.mrf.mxu0  ;;  %v3152_v59 = vpop.f32.mrf.mxu1 }
 0x2cd   : > { %v17392_v34 = vadd.f32 %v17309_v33, %v4204_v26  ;;  %v3153_v15 = vadd.f32 %v3152_v59, %v3113_v19  ;;  %v3192_v8 = vpop.f32.mrf.mxu2  ;;  %v3118_v55 = vadd.f32 %v3117_v58, %v3080_v44 }
 0x2cf   : > { %v3193_v47 = vadd.f32 %v3192_v8, %v3153_v15  ;;  %3753 = vmatmul.f32.gmra.mxu0 %v16803_v45  ;;  %3791 = vmatmul.f32.gmra.mxu1 %v16745_v10 }
 0x2d0   : > { %3874 = vmatmul.f32.gmra.mxu3 %v16787_v38 }
 0x2d1   : > { %v3227_v6 = vadd.f32 %v3226_v20, %v3193_v47  ;;  %3833 = vmatmul.f32.gmra.mxu2 %v16777_v30  ;;  %v4364_v20 = vld.sshfl [vmem:[#allocation1] sm:$0xff pattern:$0x75316420] }
 0x2d2   : > { %v4384_v58 = vsel %vm336_vm1, %v4364_v20, 0 }
 0x2d3   : > { %v4220_v24 = vmax.f32 %v3227_v6, 0.0  ;;  %v3230_v28 = vpop.f32.mrf.mxu3 }
 0x2d4   : > { %v3122_v63 = vpop.f32.mrf.mxu0  ;;  %v3158_v40 = vpop.f32.mrf.mxu1 }
 0x2d5   : > { %v17399_v33 = vadd.f32 %v17316_v25, %v4220_v24  ;;  %v3159_v27 = vadd.f32 %v3158_v40, %v3118_v55  ;;  %v3196_v41 = vpop.f32.mrf.mxu2  ;;  %v3123_v44 = vadd.f32 %v3122_v63, %v3084_v0 }
 0x2d7   : > { %v3197_v62 = vadd.f32 %v3196_v41, %v3159_v27  ;;  %3761 = vmatmul.f32.gmra.mxu0 %v16814_v48  ;;  %3795 = vmatmul.f32.gmra.mxu1 %v16760_v17 }
 0x2d8   : > { %3880 = vmatmul.f32.gmra.mxu3 %v16806_v46 }
 0x2d9   : > { %v3231_v42 = vadd.f32 %v3230_v28, %v3197_v62  ;;  %3838 = vmatmul.f32.gmra.mxu2 %v16796_v43 }
 0x2db   : > { %v4236_v51 = vmax.f32 %v3231_v42, 0.0  ;;  %v3234_v12 = vpop.f32.mrf.mxu3 }
 0x2dc   : > { %v3164_v11 = vpop.f32.mrf.mxu1  ;;  %v3260_v56 = vpop.f32.mrf.mxu0 }
 0x2dd   : > { %v17406_v25 = vadd.f32 %v17323_v1, %v4236_v51  ;;  %v3165_v54 = vadd.f32 %v3164_v11, %v3123_v44  ;;  %v3200_v16 = vpop.f32.mrf.mxu2  ;;  %v3261_v53 = vadd.f32 %v3260_v56, %v16872_v3 }
 0x2df   : > { %v3201_v52 = vadd.f32 %v3200_v16, %v3165_v54  ;;  %3799 = vmatmul.f32.gmra.mxu1 %v16789_v39  ;;  %3904 = vmatmul.f32.vlgmr.msra.gmra.mxu0 %v16724_v2 }
 0x2e0   : > { %4026 = vmatmul.f32.vlgmr.msra.gmra.mxu3 %v16724_v2 }
 0x2e1   : > { %v3235_v7 = vadd.f32 %v3234_v12, %v3201_v52  ;;  %3976 = vmatmul.f32.vlgmr.msra.gmra.mxu2 %v16763_v21 }
 0x2e3   : > { %v4252_v0 = vmax.f32 %v3235_v7, 0.0  ;;  %v3385_v60 = vpop.f32.mrf.mxu3 }
 0x2e4   : > { %v3268_v50 = vpop.f32.mrf.mxu0  ;;  %v3310_v35 = vpop.f32.mrf.mxu1 }
 0x2e5   : > { %v17414_v1 = vadd.f32 %v17331_v29, %v4252_v0  ;;  %v3311_v32 = vadd.f32 %v3310_v35, %v3261_v53  ;;  %v3346_v61 = vpop.f32.mrf.mxu2  ;;  %v3269_v19 = vadd.f32 %v3268_v50, %v16879_v13  ;;  %v4431_v29 = vand.u32 4294901760, %v4384_v58 }
 0x2e7   : > { %v3347_v5 = vadd.f32 %v3346_v61, %v3311_v32  ;;  %3908 = vmatmul.f32.gmra.mxu0 %v16745_v10  ;;  %3938 = vmatmul.f32.vlgmr.msra.gmra.mxu1 %v16724_v2  ;;  %v4482_v55 = vsub.f32 %v4384_v58, %v4431_v29 }
 0x2e8   : > { %4030 = vmatmul.f32.gmra.mxu3 %v16745_v10  ;;  %4432 = vmatpush.msra.mxu0 %v4431_v29 }
 0x2e9   : > { %v3386_v26 = vadd.f32 %v3385_v60, %v3347_v5  ;;  %3984 = vmatmul.f32.gmra.mxu2 %v16784_v37  ;;  %4559 = vmatpush.msra.mxu3 %v4431_v29  ;;  %v4483_v28 = vand.u32 4294901760, %v4482_v55 }
 0x2ea   : > { %4521 = vmatpush.msra.mxu2 %v4482_v55 }
 0x2eb   : > { %v3391_v59 = vpop.f32.mrf.mxu3  ;;  %v4484_v27 = vsub.f32 %v4482_v55, %v4483_v28 }
 0x2ec   : > { %v3276_v15 = vpop.f32.mrf.mxu0  ;;  %v3314_v8 = vpop.f32.mrf.mxu1 }
 0x2ed   : > { %v3315_v47 = vadd.f32 %v3314_v8, %v3269_v19  ;;  %v3351_v6 = vpop.f32.mrf.mxu2  ;;  %v3277_v63 = vadd.f32 %v3276_v15, %v16889_v22  ;;  %v4485_v62 = vand.u32 4294901760, %v4484_v27  ;;  %v16594_v15 = vld [vmem:[%s16739_s29 + $0x60] sm:$0x77]  ;;  %v4365_v8 = vld.sshfl [vmem:[#allocation1 + $0x8] sm:$0xff pattern:$0x75316420] }
 0x2ee   : > { %4372 = vst [vmem:[#allocation1] ss:$2 sm:$0xff] %v16594_v15 }
 0x2ef   : > { %v3352_v24 = vadd.f32 %v3351_v6, %v3315_v47  ;;  %3912 = vmatmul.f32.gmra.mxu0 %v16760_v17  ;;  %3942 = vmatmul.f32.gmra.mxu1 %v16745_v10 }
 0x2f0   : > { %4034 = vmatmul.f32.gmra.mxu3 %v16760_v17  ;;  %4486 = vmatpush.msra.mxu1 %v4485_v62 }
 0x2f1   : > { %v3392_v40 = vadd.f32 %v3391_v59, %v3352_v24  ;;  %3992 = vmatmul.f32.gmra.mxu2 %v16803_v45 }
 0x2f3   : > { %v3397_v41 = vpop.f32.mrf.mxu3 }
 0x2f4   : > { %v3284_v42 = vpop.f32.mrf.mxu0  ;;  %v3318_v44 = vpop.f32.mrf.mxu1 }
 0x2f5   : > { %v3319_v51 = vadd.f32 %v3318_v44, %v3277_v63  ;;  %v3356_v12 = vpop.f32.mrf.mxu2  ;;  %v3285_v56 = vadd.f32 %v3284_v42, %v16899_v49 }
 0x2f7   : > { %v3357_v11 = vadd.f32 %v3356_v12, %v3319_v51  ;;  %3916 = vmatmul.f32.gmra.mxu0 %v16789_v39  ;;  %3946 = vmatmul.f32.gmra.mxu1 %v16760_v17 }
 0x2f8   : > { %4038 = vmatmul.f32.gmra.mxu3 %v16789_v39 }
 0x2f9   : > { %v3398_v54 = vadd.f32 %v3397_v41, %v3357_v11  ;;  %4000 = vmatmul.f32.gmra.mxu2 %v16814_v48 }
 0x2fb   : > { %v3403_v16 = vpop.f32.mrf.mxu3 }
 0x2fc   : > { %v3322_v52 = vpop.f32.mrf.mxu1  ;;  %v3427_v53 = vpop.f32.mrf.mxu0 }
 0x2fd   : > { %v3323_v7 = vadd.f32 %v3322_v52, %v3285_v56  ;;  %v3361_v0 = vpop.f32.mrf.mxu2  ;;  %v3428_v35 = vadd.f32 %v3427_v53, %v3386_v26  ;;  %v4386_v26 = vsel %vm336_vm1, %v4365_v8, 0 }
 0x2fe   : > { %v4670_v55 = vand.u32 4294901760, %v4386_v26 }
 0x2ff   : > { %v3362_v60 = vadd.f32 %v3361_v0, %v3323_v7  ;;  %3950 = vmatmul.f32.gmra.mxu1 %v16789_v39  ;;  %4062 = vmatmul.f32.vlgmr.msrb.gmra.mxu0 %v16730_v4 }
 0x300   : > { %4177 = vmatmul.f32.vlgmr.msrb.gmra.mxu3 %v16724_v2  ;;  %4603 = vmatpush.msrb.mxu0 %v4483_v28  ;;  %v4721_v63 = vsub.f32 %v4386_v26, %v4670_v55 }
 0x301   : > { %v3404_v50 = vadd.f32 %v3403_v16, %v3362_v60  ;;  %4143 = vmatmul.f32.vlgmr.msrb.gmra.mxu2 %v16724_v2 }
 0x302   : > { %4671 = vmatpush.msrb.mxu2 %v4670_v55  ;;  %v4722_v44 = vand.u32 4294901760, %v4721_v63 }
 0x303   : > { %v3549_v32 = vpop.f32.mrf.mxu3 }
 0x304   : > { %v3431_v61 = vpop.f32.mrf.mxu0  ;;  %v3461_v5 = vpop.f32.mrf.mxu1 }
 0x305   : > { %v3462_v19 = vadd.f32 %v3461_v5, %v3428_v35  ;;  %v3499_v20 = vpop.f32.mrf.mxu2  ;;  %v3432_v24 = vadd.f32 %v3431_v61, %v3392_v40 }
 0x306   : > { %v3500_v58 = vadd.f32 %v3499_v20, %v16872_v3 }
 0x307   : > { %v4205_v59 = vmax.f32 %v3462_v19, 0.0  ;;  %4067 = vmatmul.f32.gmra.mxu0 %v16754_v14  ;;  %4101 = vmatmul.f32.vlgmr.msrb.gmra.mxu1 %v16743_v9 }
 0x308   : > { %v3550_v47 = vadd.f32 %v3549_v32, %v3500_v58  ;;  %4181 = vmatmul.f32.gmra.mxu3 %v16745_v10  ;;  %4637 = vmatpush.msrb.mxu1 %v4431_v29 }
 0x309   : > { %v17443_v6 = vadd.f32 %v17360_v36, %v4205_v59  ;;  %4147 = vmatmul.f32.gmra.mxu2 %v16745_v10  ;;  %v4723_v36 = vsub.f32 %v4721_v63, %v4722_v44 }
 0x30b   : > { %v3553_v28 = vpop.f32.mrf.mxu3  ;;  %v4724_v11 = vand.u32 4294901760, %v4723_v36 }
 0x30c   : > { %v3435_v27 = vpop.f32.mrf.mxu0  ;;  %v3465_v41 = vpop.f32.mrf.mxu1 }
 0x30d   : > { %v3466_v62 = vadd.f32 %v3465_v41, %v3432_v24  ;;  %v3507_v42 = vpop.f32.mrf.mxu2  ;;  %v3436_v56 = vadd.f32 %v3435_v27, %v3398_v54  ;;  %4725 = vmatpush.msrb.mxu3 %v4724_v11 }
 0x30e   : > { %v3508_v51 = vadd.f32 %v3507_v42, %v16879_v13 }
 0x30f   : > { %v4221_v12 = vmax.f32 %v3466_v62, 0.0  ;;  %4072 = vmatmul.f32.gmra.mxu0 %v16777_v30  ;;  %4107 = vmatmul.f32.gmra.mxu1 %v16767_v23 }
 0x310   : > { %v3554_v29 = vadd.f32 %v3553_v28, %v3508_v51  ;;  %4185 = vmatmul.f32.gmra.mxu3 %v16760_v17 }
 0x311   : > { %v17451_v40 = vadd.f32 %v17368_v57, %v4221_v12  ;;  %4151 = vmatmul.f32.gmra.mxu2 %v16760_v17 }
 0x313   : > { %v3557_v16 = vpop.f32.mrf.mxu3 }
 0x314   : > { %v3439_v52 = vpop.f32.mrf.mxu0  ;;  %v3469_v53 = vpop.f32.mrf.mxu1 }
 0x315   : > { %v3470_v7 = vadd.f32 %v3469_v53, %v3436_v56  ;;  %v3515_v0 = vpop.f32.mrf.mxu2  ;;  %v3440_v54 = vadd.f32 %v3439_v52, %v3404_v50 }
 0x316   : > { %v3516_v60 = vadd.f32 %v3515_v0, %v16889_v22 }
 0x317   : > { %v4237_v35 = vmax.f32 %v3470_v7, 0.0  ;;  %4077 = vmatmul.f32.gmra.mxu0 %v16796_v43  ;;  %4113 = vmatmul.f32.gmra.mxu1 %v16787_v38 }
 0x318   : > { %v3558_v32 = vadd.f32 %v3557_v16, %v3516_v60  ;;  %4189 = vmatmul.f32.gmra.mxu3 %v16789_v39 }
 0x319   : > { %v17459_v57 = vadd.f32 %v17376_v18, %v4237_v35  ;;  %4155 = vmatmul.f32.gmra.mxu2 %v16789_v39 }
 0x31b   : > { %v3561_v61 = vpop.f32.mrf.mxu3 }
 0x31c   : > { %v3473_v5 = vpop.f32.mrf.mxu1  ;;  %v3585_v19 = vpop.f32.mrf.mxu0 }
 0x31d   : > { %v3474_v20 = vadd.f32 %v3473_v5, %v3440_v54  ;;  %v3523_v58 = vpop.f32.mrf.mxu2  ;;  %v3586_v50 = vadd.f32 %v3585_v19, %v3550_v47 }
 0x31e   : > { %v3524_v59 = vadd.f32 %v3523_v58, %v16899_v49 }
 0x31f   : > { %v4253_v15 = vmax.f32 %v3474_v20, 0.0  ;;  %4119 = vmatmul.f32.gmra.mxu1 %v16806_v46  ;;  %4438 = vmatmul.f32.vlgmr.msra.gmra.mxu0 %v16763_v21 }
 0x320   : > { %v3562_v8 = vadd.f32 %v3561_v61, %v3524_v59  ;;  %4563 = vmatmul.f32.vlgmr.msra.gmra.mxu3 %v16743_v9  ;;  %4760 = vmatpush.msra.mxu0 %v4721_v63 }
 0x321   : > { %v17467_v18 = vadd.f32 %v17384_v31, %v4253_v15  ;;  %4524 = vmatmul.f32.vlgmr.msra.gmra.mxu2 %v16730_v4  ;;  %4876 = vmatpush.msra.mxu3 %v4670_v55 }
 0x322   : > { %4842 = vmatpush.msra.mxu2 %v4722_v44 }
 0x323   : > { %19899 = vst [vmem:[#allocation7_spill] sm:$0xff] %v17467_v18  ;;  %v3700_v26 = vpop.f32.mrf.mxu3 }
 0x324   : > { %v3590_v24 = vpop.f32.mrf.mxu0  ;;  %v3624_v28 = vpop.f32.mrf.mxu1 }
 0x325   : > { %v3625_v27 = vadd.f32 %v3624_v28, %v3586_v50  ;;  %v3666_v41 = vpop.f32.mrf.mxu2  ;;  %v3591_v63 = vadd.f32 %v3590_v24, %v3554_v29 }
 0x327   : > { %v3667_v62 = vadd.f32 %v3666_v41, %v3625_v27  ;;  %4446 = vmatmul.f32.gmra.mxu0 %v16784_v37  ;;  %4488 = vmatmul.f32.vlgmr.msra.gmra.mxu1 %v16724_v2  ;;  %v4366_v41 = vld.sshfl [vmem:[#allocation1 + $0x10] sm:$0xff pattern:$0x75316420] }
 0x328   : > { %4569 = vmatmul.f32.gmra.mxu3 %v16767_v23  ;;  %4798 = vmatpush.msra.mxu1 %v4670_v55 }
 0x329   : > { %v3701_v31 = vadd.f32 %v3700_v26, %v3667_v62  ;;  %4529 = vmatmul.f32.gmra.mxu2 %v16754_v14  ;;  %v4388_v62 = vsel %vm336_vm1, %v4366_v41, 0 }
 0x32b   : > { %v4206_v42 = vmax.f32 %v3701_v31, 0.0  ;;  %v3704_v44 = vpop.f32.mrf.mxu3  ;;  %v4909_v31 = vand.u32 4294901760, %v4388_v62 }
 0x32c   : > { %v3595_v47 = vpop.f32.mrf.mxu0  ;;  %v3630_v51 = vpop.f32.mrf.mxu1 }
 0x32d   : > { %v17475_v12 = vadd.f32 %v17392_v34, %v4206_v42  ;;  %v3631_v36 = vadd.f32 %v3630_v51, %v3591_v63  ;;  %v3670_v11 = vpop.f32.mrf.mxu2  ;;  %v3596_v29 = vadd.f32 %v3595_v47, %v3558_v32  ;;  %v4960_v42 = vsub.f32 %v4388_v62, %v4909_v31 }
 0x32f   : > { %v3671_v56 = vadd.f32 %v3670_v11, %v3631_v36  ;;  %4454 = vmatmul.f32.gmra.mxu0 %v16803_v45  ;;  %4492 = vmatmul.f32.gmra.mxu1 %v16745_v10  ;;  %v4961_v51 = vand.u32 4294901760, %v4960_v42 }
 0x330   : > { %4575 = vmatmul.f32.gmra.mxu3 %v16787_v38 }
 0x331   : > { %v3705_v55 = vadd.f32 %v3704_v44, %v3671_v56  ;;  %4534 = vmatmul.f32.gmra.mxu2 %v16777_v30  ;;  %v4962_v36 = vsub.f32 %v4960_v42, %v4961_v51 }
 0x333   : > { %v4222_v16 = vmax.f32 %v3705_v55, 0.0  ;;  %v3708_v52 = vpop.f32.mrf.mxu3  ;;  %v4963_v11 = vand.u32 4294901760, %v4962_v36 }
 0x334   : > { %v3600_v53 = vpop.f32.mrf.mxu0  ;;  %v3636_v7 = vpop.f32.mrf.mxu1 }
 0x335   : > { %v17482_v34 = vadd.f32 %v17399_v33, %v4222_v16  ;;  %v3637_v0 = vadd.f32 %v3636_v7, %v3596_v29  ;;  %v3674_v60 = vpop.f32.mrf.mxu2  ;;  %v3601_v32 = vadd.f32 %v3600_v53, %v3562_v8 }
 0x337   : > { %v3675_v35 = vadd.f32 %v3674_v60, %v3637_v0  ;;  %4462 = vmatmul.f32.gmra.mxu0 %v16814_v48  ;;  %4496 = vmatmul.f32.gmra.mxu1 %v16760_v17 }
 0x338   : > { %4581 = vmatmul.f32.gmra.mxu3 %v16806_v46 }
 0x339   : > { %v3709_v54 = vadd.f32 %v3708_v52, %v3675_v35  ;;  %4539 = vmatmul.f32.gmra.mxu2 %v16796_v43 }
 0x33b   : > { %v4238_v61 = vmax.f32 %v3709_v54, 0.0  ;;  %v3712_v5 = vpop.f32.mrf.mxu3 }
 0x33c   : > { %v3642_v19 = vpop.f32.mrf.mxu1  ;;  %v17488_v20 = vpop.f32.mrf.mxu0 }
 0x33d   : > { %v17491_v33 = vadd.f32 %v17406_v25, %v4238_v61  ;;  %v3643_v58 = vadd.f32 %v3642_v19, %v3601_v32  ;;  %v3678_v59 = vpop.f32.mrf.mxu2  ;;  %v16595_v61 = vld [vmem:[%s16739_s29 + $0x68] sm:$0x77] }
 0x33f   : > { %19900 = vst [vmem:[#allocation8_spill] sm:$0xff] %v17491_v33  ;;  %v3679_v15 = vadd.f32 %v3678_v59, %v3643_v58  ;;  %4500 = vmatmul.f32.gmra.mxu1 %v16789_v39  ;;  %4605 = vmatmul.f32.vlgmr.msrb.gmra.mxu0 %v16724_v2 }
 0x340   : > { %4727 = vmatmul.f32.vlgmr.msrb.gmra.mxu3 %v16724_v2  ;;  %4910 = vmatpush.msrb.mxu0 %v4909_v31 }
 0x341   : > { %v3713_v50 = vadd.f32 %v3712_v5, %v3679_v15  ;;  %4677 = vmatmul.f32.vlgmr.msrb.gmra.mxu2 %v16763_v21  ;;  %5037 = vmatpush.msrb.mxu3 %v4909_v31  ;;  %v4367_v5 = vld.sshfl [vmem:[#allocation1 + $0x18] sm:$0xff pattern:$0x75316420] }
 0x342   : > { %4999 = vmatpush.msrb.mxu2 %v4960_v42  ;;  %4373 = vst [vmem:[#allocation1 + $0x10] ss:$2 sm:$0xff] %v16595_v61  ;;  %v4390_v19 = vsel %vm336_vm1, %v4367_v5, 0 }
 0x343   : > { %v4254_v8 = vmax.f32 %v3713_v50, 0.0  ;;  %v17497_v26 = vpop.f32.mrf.mxu3  ;;  %v17555_v58 = vand.u32 4294901760, %v4390_v19 }
 0x344   : > { %v17499_v24 = vpop.f32.mrf.mxu0  ;;  %v17501_v28 = vpop.f32.mrf.mxu1 }
 0x345   : > { %v17504_v25 = vadd.f32 %v17414_v1, %v4254_v8  ;;  %v17506_v27 = vpop.f32.mrf.mxu2  ;;  %v5199_v15 = vsub.f32 %v4390_v19, %v17555_v58 }
 0x347   : > { %19901 = vst [vmem:[#allocation9_spill] sm:$0xff] %v17504_v25  ;;  %4609 = vmatmul.f32.gmra.mxu0 %v16745_v10  ;;  %4639 = vmatmul.f32.vlgmr.msrb.gmra.mxu1 %v16724_v2  ;;  %v5200_v62 = vand.u32 4294901760, %v5199_v15 }
 0x348   : > { %4731 = vmatmul.f32.gmra.mxu3 %v16745_v10  ;;  %4964 = vmatpush.msrb.mxu1 %v4963_v11 }
 0x349   : > { %4685 = vmatmul.f32.gmra.mxu2 %v16784_v37 }
 0x34b   : > { %v17513_v63 = vpop.f32.mrf.mxu3 }
 0x34c   : > { %v17515_v1 = vpop.f32.mrf.mxu0  ;;  %v17517_v44 = vpop.f32.mrf.mxu1 }
 0x34d   : > { %v17519_v47 = vpop.f32.mrf.mxu2 }
 0x34f   : > { %4613 = vmatmul.f32.gmra.mxu0 %v16760_v17  ;;  %4643 = vmatmul.f32.gmra.mxu1 %v16745_v10 }
 0x350   : > { %4735 = vmatmul.f32.gmra.mxu3 %v16760_v17 }
 0x351   : > { %4693 = vmatmul.f32.gmra.mxu2 %v16803_v45 }
 0x353   : > { %v17525_v56 = vpop.f32.mrf.mxu3 }
 0x354   : > { %v17527_v55 = vpop.f32.mrf.mxu0  ;;  %v17529_v29 = vpop.f32.mrf.mxu1 }
 0x355   : > { %v17531_v16 = vpop.f32.mrf.mxu2 }
 0x357   : > { %4617 = vmatmul.f32.gmra.mxu0 %v16789_v39  ;;  %4647 = vmatmul.f32.gmra.mxu1 %v16760_v17 }
 0x358   : > { %4739 = vmatmul.f32.gmra.mxu3 %v16789_v39 }
 0x359   : > { %4701 = vmatmul.f32.gmra.mxu2 %v16814_v48 }
 0x35b   : > { %v17537_v52 = vpop.f32.mrf.mxu3 }
 0x35c   : > { %v17539_v53 = vpop.f32.mrf.mxu1  ;;  %v3905_v7 = vpop.f32.mrf.mxu0 }
 0x35d   : > { %v17541_v0 = vpop.f32.mrf.mxu2 }
 0x35f   : > { %4651 = vmatmul.f32.gmra.mxu1 %v16789_v39  ;;  %4763 = vmatmul.f32.vlgmr.msra.gmra.mxu0 %v16730_v4 }
 0x360   : > { %4878 = vmatmul.f32.vlgmr.msra.gmra.mxu3 %v16724_v2  ;;  %5081 = vmatpush.msra.mxu0 %v4961_v51  ;;  %v3739_v51 = vadd.f32 %v17488_v20, %v16872_v3 }
 0x361   : > { %4844 = vmatmul.f32.vlgmr.msra.gmra.mxu2 %v16724_v2 }
 0x362   : > { %5149 = vmatpush.msra.mxu2 %v17555_v58  ;;  %v3789_v19 = vadd.f32 %v17501_v28, %v3739_v51 }
 0x363   : > { %v4027_v60 = vpop.f32.mrf.mxu3 }
 0x364   : > { %v17547_v35 = vpop.f32.mrf.mxu0  ;;  %v3939_v54 = vpop.f32.mrf.mxu1  ;;  %v3825_v20 = vadd.f32 %v17506_v27, %v3789_v19  ;;  %v259_v19 = vld [vmem:[%s17607_s21] sm:$0xff] }
 0x365   : > { %v3977_v32 = vpop.f32.mrf.mxu2 }
 0x366   : > { %v3978_v51 = vadd.f32 %v3977_v32, %v16872_v3 }
 0x367   : > { %4768 = vmatmul.f32.gmra.mxu0 %v16754_v14  ;;  %4802 = vmatmul.f32.vlgmr.msra.gmra.mxu1 %v16743_v9 }
 0x368   : > { %4882 = vmatmul.f32.gmra.mxu3 %v16745_v10  ;;  %5115 = vmatpush.msra.mxu1 %v4909_v31  ;;  %v5201_v31 = vsub.f32 %v5199_v15, %v5200_v62 }
 0x369   : > { %4848 = vmatmul.f32.gmra.mxu2 %v16745_v10 }
 0x36a   : > { %v5202_v42 = vand.u32 4294901760, %v5201_v31  ;;  %v3747_v31 = vadd.f32 %v17499_v24, %v16879_v13  ;;  %v4028_v24 = vadd.f32 %v4027_v60, %v3978_v51 }
 0x36b   : > { %v17557_v59 = vpop.f32.mrf.mxu3 }
 0x36c   : > { %v17561_v50 = vpop.f32.mrf.mxu0  ;;  %v17563_v8 = vpop.f32.mrf.mxu1  ;;  %5203 = vmatpush.msra.mxu3 %v5202_v42  ;;  %v3793_v33 = vadd.f32 %v17517_v44, %v3747_v31 }
 0x36d   : > { %v3985_v41 = vpop.f32.mrf.mxu2 }
 0x36f   : > { %4773 = vmatmul.f32.gmra.mxu0 %v16777_v30  ;;  %4808 = vmatmul.f32.gmra.mxu1 %v16767_v23 }
 0x370   : > { %4886 = vmatmul.f32.gmra.mxu3 %v16760_v17 }
 0x371   : > { %4852 = vmatmul.f32.gmra.mxu2 %v16760_v17 }
 0x373   : > { %v17571_v36 = vpop.f32.mrf.mxu3 }
 0x374   : > { %v17573_v11 = vpop.f32.mrf.mxu0  ;;  %v17575_v61 = vpop.f32.mrf.mxu1 }
 0x375   : > { %v17577_v5 = vpop.f32.mrf.mxu2 }
 0x377   : > { %4778 = vmatmul.f32.gmra.mxu0 %v16796_v43  ;;  %4814 = vmatmul.f32.gmra.mxu1 %v16787_v38 }
 0x378   : > { %4890 = vmatmul.f32.gmra.mxu3 %v16789_v39 }
 0x379   : > { %4856 = vmatmul.f32.gmra.mxu2 %v16789_v39  ;;  %v3864_v39 = vadd.f32 %v17497_v26, %v3825_v20  ;;  %v3755_v26 = vadd.f32 %v17515_v1, %v16889_v22 }
 0x37b   : > { %v17591_v42 = vpop.f32.mrf.mxu3  ;;  %v3906_v27 = vadd.f32 %v3905_v7, %v3864_v39  ;;  %v3830_v39 = vadd.f32 %v17519_v47, %v3793_v33  ;;  %v3797_v51 = vadd.f32 %v17529_v29, %v3755_v26  ;;  %v4315_v33 = vperm.slane %v259_v19, 4 }
 0x37c   : > { %v17593_v25 = vpop.f32.mrf.mxu1  ;;  %v4063_v28 = vpop.f32.mrf.mxu0 }
 0x37d   : > { %v17596_v18 = vpop.f32.mrf.mxu2  ;;  %v3940_v44 = vadd.f32 %v3939_v54, %v3906_v27  ;;  %v4064_v7 = vadd.f32 %v4063_v28, %v4028_v24  ;;  %v3870_v3 = vadd.f32 %v17513_v63, %v3830_v39  ;;  %v3763_v63 = vadd.f32 %v17527_v55, %v16899_v49 }
 0x37e   : > { %v3835_v29 = vadd.f32 %v17531_v16, %v3797_v51 }
 0x37f   : > { %4820 = vmatmul.f32.gmra.mxu1 %v16806_v46  ;;  %4916 = vmatmul.f32.vlgmr.msrb.gmra.mxu0 %v16763_v21  ;;  %v4314_v21 = vperm.slane %v259_v19, 0  ;;  %v3910_v47 = vadd.f32 %v17547_v35, %v3870_v3  ;;  %v17632_v3 = vperm.slane %v4315_v33, 0 }
 0x380   : > { %5041 = vmatmul.f32.vlgmr.msrb.gmra.mxu3 %v16743_v9  ;;  %5238 = vmatpush.msrb.mxu0 %v5199_v15  ;;  %v3986_v9 = vadd.f32 %v3985_v41, %v16879_v13 }
 0x381   : > { %5002 = vmatmul.f32.vlgmr.msrb.gmra.mxu2 %v16730_v4  ;;  %5354 = vmatpush.msrb.mxu3 %v17555_v58  ;;  %v4207_v4 = vmax.f32 %v3940_v44, 0.0  ;;  %v17629_v28 = vperm.slane %v4314_v21, 0  ;;  %v3944_v27 = vadd.f32 %v17563_v8, %v3910_v47  ;;  %v3801_v21 = vadd.f32 %v17539_v53, %v3763_v63 }
 0x382   : > { %5320 = vmatpush.msrb.mxu2 %v5200_v62  ;;  %v4032_v54 = vadd.f32 %v17557_v59, %v3986_v9  ;;  %v3994_v59 = vadd.f32 %v17577_v5, %v16889_v22 }
 0x383   : > { %v4178_v32 = vpop.f32.mrf.mxu3  ;;  %v4305_v62 = vadd.f32 %v17443_v6, %v4207_v4  ;;  %v3876_v4 = vadd.f32 %v17525_v56, %v3835_v29  ;;  %v4223_v6 = vmax.f32 %v3944_v27, 0.0  ;;  %v3840_v53 = vadd.f32 %v17541_v0, %v3801_v21 }
 0x384   : > { %v4068_v20 = vpop.f32.mrf.mxu0  ;;  %v4102_v31 = vpop.f32.mrf.mxu1 }
 0x385   : > { %v4103_v15 = vadd.f32 %v4102_v31, %v4064_v7  ;;  %v4144_v60 = vpop.f32.mrf.mxu2  ;;  %v4069_v24 = vadd.f32 %v4068_v20, %v4032_v54  ;;  %v4320_v39 = vmul.f32 %v17629_v28, %v4305_v62  ;;  %v3914_v5 = vadd.f32 %v17561_v50, %v3876_v4  ;;  %v19904_v4 = vld [vmem:[#allocation6_spill] sm:$0xff] }
 0x386   : > { %v4307_v19 = vadd.f32 %v17451_v40, %v4223_v6  ;;  %v4002_v50 = vadd.f32 %v17596_v18, %v16899_v49  ;;  %v3882_v54 = vadd.f32 %v17537_v52, %v3840_v53 }
 0x387   : > { %v4145_v1 = vadd.f32 %v4144_v60, %v4103_v15  ;;  %4924 = vmatmul.f32.gmra.mxu0 %v16784_v37  ;;  %4966 = vmatmul.f32.vlgmr.msrb.gmra.mxu1 %v16724_v2  ;;  %v3948_v20 = vadd.f32 %v17575_v61, %v3914_v5 }
 0x388   : > { %5047 = vmatmul.f32.gmra.mxu3 %v16767_v23  ;;  %5276 = vmatpush.msrb.mxu1 %v17555_v58  ;;  %v4322_v40 = vmul.f32 %v17629_v28, %v4307_v19  ;;  %v3918_v18 = vadd.f32 %v17573_v11, %v3882_v54  ;;  %v19907_v19 = vld [vmem:[#allocation9_spill] sm:$0xff] }
 0x389   : > { %v4179_v41 = vadd.f32 %v4178_v32, %v4145_v1  ;;  %5007 = vmatmul.f32.gmra.mxu2 %v16754_v14  ;;  %v4239_v0 = vmax.f32 %v3948_v20, 0.0 }
 0x38a   : > { %v3952_v62 = vadd.f32 %v17593_v25, %v3918_v18 }
 0x38b   : > { %v4208_v58 = vmax.f32 %v4179_v41, 0.0  ;;  %v4182_v26 = vpop.f32.mrf.mxu3  ;;  %v4309_v29 = vadd.f32 %v17459_v57, %v4239_v0 }
 0x38c   : > { %v4073_v9 = vpop.f32.mrf.mxu0  ;;  %v4108_v35 = vpop.f32.mrf.mxu1 }
 0x38d   : > { %v4109_v44 = vadd.f32 %v4108_v35, %v4069_v24  ;;  %v4148_v55 = vpop.f32.mrf.mxu2  ;;  %v4306_v16 = vadd.f32 %v17475_v12, %v4208_v58  ;;  %v4036_v12 = vadd.f32 %v17571_v36, %v3994_v59  ;;  %v19902_v35 = vld [vmem:[#allocation8_spill] sm:$0xff]  ;;  %v4324_v57 = vmul.f32 %v17629_v28, %v4309_v29 }
 0x38f   : > { %v4149_v8 = vadd.f32 %v4148_v55, %v4109_v44  ;;  %4932 = vmatmul.f32.gmra.mxu0 %v16803_v45  ;;  %4970 = vmatmul.f32.gmra.mxu1 %v16745_v10  ;;  %v4321_v7 = vmul.f32 %v17632_v3, %v4306_v16  ;;  %v4074_v31 = vadd.f32 %v4073_v9, %v4036_v12  ;;  %v4255_v55 = vmax.f32 %v3952_v62, 0.0  ;;  %v19903_v16 = vld [vmem:[#allocation5_spill] sm:$0xff] }
 0x390   : > { %5053 = vmatmul.f32.gmra.mxu3 %v16787_v38 }
 0x391   : > { %v4183_v32 = vadd.f32 %v4182_v26, %v4149_v8  ;;  %5012 = vmatmul.f32.gmra.mxu2 %v16777_v30  ;;  %v4328_v56 = vadd.f32 %v4321_v7, %v4320_v39  ;;  %v19905_v8 = vld [vmem:[#allocation4_spill] sm:$0xff]  ;;  %v19906_v7 = vld [vmem:[#allocation7_spill] sm:$0xff] }
 0x392   : > { %v4311_v5 = vadd.f32 %v19906_v7, %v4255_v55 }
 0x393   : > { %v4224_v15 = vmax.f32 %v4183_v32, 0.0  ;;  %4329 = vadd.xlane.f32.xlu2 %v4328_v56  ;;  %v4186_v60 = vpop.f32.mrf.mxu3 }
 0x394   : > { %v4078_v51 = vpop.f32.mrf.mxu0  ;;  %v4114_v1 = vpop.f32.mrf.mxu1 }
 0x395   : > { %v4308_v36 = vadd.f32 %v17482_v34, %v4224_v15  ;;  %v4115_v33 = vadd.f32 %v4114_v1, %v4074_v31  ;;  %v4152_v47 = vpop.f32.mrf.mxu2  ;;  %v4040_v34 = vadd.f32 %v17591_v42, %v4002_v50  ;;  %v4368_v50 = vld.sshfl [vmem:[#allocation1 + $0x20] sm:$0xff pattern:$0x75316420] }
 0x397   : > { %v4153_v41 = vadd.f32 %v4152_v47, %v4115_v33  ;;  %4940 = vmatmul.f32.gmra.mxu0 %v16814_v48  ;;  %4974 = vmatmul.f32.gmra.mxu1 %v16760_v17  ;;  %v4323_v61 = vmul.f32 %v17632_v3, %v4308_v36  ;;  %v4079_v27 = vadd.f32 %v4078_v51, %v4040_v34  ;;  %v4392_v36 = vsel %vm336_vm1, %v4368_v50, 0 }
 0x398   : > { %5059 = vmatmul.f32.gmra.mxu3 %v16806_v46  ;;  %v4326_v51 = vmul.f32 %v17629_v28, %v4311_v5  ;;  %v5387_v0 = vand.u32 4294901760, %v4392_v36 }
 0x399   : > { %v4187_v63 = vadd.f32 %v4186_v60, %v4153_v41  ;;  %5017 = vmatmul.f32.gmra.mxu2 %v16796_v43  ;;  %v4331_v52 = vadd.f32 %v4323_v61, %v4322_v40 }
 0x39a   : > { %v5438_v40 = vsub.f32 %v4392_v36, %v5387_v0 }
 0x39b   : > { %v4240_v24 = vmax.f32 %v4187_v63, 0.0  ;;  %4332 = vadd.xlane.f32.xlu2 %v4331_v52  ;;  %v4190_v58 = vpop.f32.mrf.mxu3 }
 0x39c   : > { %v4120_v26 = vpop.f32.mrf.mxu1  ;;  %v4439_v9 = vpop.f32.mrf.mxu0  ;;  %v5439_v34 = vand.u32 4294901760, %v5438_v40 }
 0x39d   : > { %v4310_v59 = vadd.f32 %v19902_v35, %v4240_v24  ;;  %v4121_v44 = vadd.f32 %v4120_v26, %v4079_v27  ;;  %v4156_v11 = vpop.f32.mrf.mxu2  ;;  %v4440_v21 = vadd.f32 %v4439_v9, %v19904_v4 }
 0x39e   : > { %v5440_v52 = vsub.f32 %v5438_v40, %v5439_v34 }
 0x39f   : > { %v4157_v42 = vadd.f32 %v4156_v11, %v4121_v44  ;;  %4978 = vmatmul.f32.gmra.mxu1 %v19903_v16  ;;  %5083 = vmatmul.f32.vlgmr.msra.gmra.mxu0 %v16724_v2  ;;  %v4325_v25 = vmul.f32 %v17632_v3, %v4310_v59 }
 0x3a0   : > { %5205 = vmatmul.f32.vlgmr.msra.gmra.mxu3 %v16724_v2  ;;  %5388 = vmatpush.msra.mxu0 %v5387_v0  ;;  %v5441_v27 = vand.u32 4294901760, %v5440_v52 }
 0x3a1   : > { %v4191_v6 = vadd.f32 %v4190_v58, %v4157_v42  ;;  %5155 = vmatmul.f32.vlgmr.msra.gmra.mxu2 %v19905_v8  ;;  %v4334_v39 = vadd.f32 %v4325_v25, %v4324_v57  ;;  %5515 = vmatpush.msra.mxu3 %v5387_v0 }
 0x3a2   : > { %5477 = vmatpush.msra.mxu2 %v5438_v40 }
 0x3a3   : > { %v4256_v12 = vmax.f32 %v4191_v6, 0.0  ;;  %4335 = vadd.xlane.f32.xlu0 %v4334_v39  ;;  %v4564_v32 = vpop.f32.mrf.mxu3  ;;  %v19908_v39 = vld [vmem:[#allocation2_spill] sm:$0xff] }
 0x3a4   : > { %v4447_v56 = vpop.f32.mrf.mxu0  ;;  %v4489_v53 = vpop.f32.mrf.mxu1 }
 0x3a5   : > { %v4312_v20 = vadd.f32 %v19907_v19, %v4256_v12  ;;  %v4490_v31 = vadd.f32 %v4489_v53, %v4440_v21  ;;  %v4525_v15 = vpop.f32.mrf.mxu2  ;;  %v4448_v33 = vadd.f32 %v4447_v56, %v16879_v13  ;;  %v19909_v19 = vld [vmem:[#allocation3_spill] sm:$0xff] }
 0x3a7   : > { %v4526_v60 = vadd.f32 %v4525_v15, %v4490_v31  ;;  %5087 = vmatmul.f32.gmra.mxu0 %v16745_v10  ;;  %5117 = vmatmul.f32.vlgmr.msra.gmra.mxu1 %v16724_v2  ;;  %v4327_v1 = vmul.f32 %v17632_v3, %v4312_v20  ;;  %v16596_v20 = vld [vmem:[%s16739_s29 + $0x70] sm:$0x77]  ;;  %v4369_v31 = vld.sshfl [vmem:[#allocation1 + $0x28] sm:$0xff pattern:$0x75316420] }
 0x3a8   : > { %5209 = vmatmul.f32.gmra.mxu3 %v16745_v10  ;;  %5442 = vmatpush.msra.mxu1 %v5441_v27  ;;  %4374 = vst [vmem:[#allocation1 + $0x20] ss:$2 sm:$0xff] %v16596_v20 }
 0x3a9   : > { %v17681_v47 = vadd.f32 %v4564_v32, %v4526_v60  ;;  %5163 = vmatmul.f32.gmra.mxu2 %v16784_v37  ;;  %v4337_v54 = vadd.f32 %v4327_v1, %v4326_v51  ;;  %v4394_v60 = vsel %vm336_vm1, %v4369_v31, 0 }
 0x3aa   : > { %v5626_v51 = vand.u32 4294901760, %v4394_v60 }
 0x3ab   : > { %4338 = vadd.xlane.f32.xlu1 %v4337_v54  ;;  %v4570_v41 = vpop.f32.mrf.mxu3 }
 0x3ac   : > { %v4455_v28 = vpop.f32.mrf.mxu0  ;;  %v4493_v61 = vpop.f32.mrf.mxu1  ;;  %v5677_v50 = vsub.f32 %v4394_v60, %v5626_v51 }
 0x3ad   : > { %v4494_v3 = vadd.f32 %v4493_v61, %v4448_v33  ;;  %v4530_v18 = vpop.f32.mrf.mxu2  ;;  %v4456_v29 = vadd.f32 %v4455_v28, %v16889_v22 }
 0x3af   : > { %v4531_v63 = vadd.f32 %v4530_v18, %v4494_v3  ;;  %5091 = vmatmul.f32.gmra.mxu0 %v16760_v17  ;;  %5121 = vmatmul.f32.gmra.mxu1 %v16745_v10 }
 0x3b0   : > { %5213 = vmatmul.f32.gmra.mxu3 %v16760_v17 }
 0x3b1   : > { %v17688_v62 = vadd.f32 %v4570_v41, %v4531_v63  ;;  %5171 = vmatmul.f32.gmra.mxu2 %v16803_v45  ;;  %v5678_v41 = vand.u32 4294901760, %v5677_v50 }
 0x3b3   : > { %v4576_v24 = vpop.f32.mrf.mxu3  ;;  %v5679_v28 = vsub.f32 %v5677_v50, %v5678_v41 }
 0x3b4   : > { %v4463_v58 = vpop.f32.mrf.mxu0  ;;  %v4497_v26 = vpop.f32.mrf.mxu1 }
 0x3b5   : > { %v4498_v9 = vadd.f32 %v4497_v26, %v4456_v29  ;;  %v4535_v35 = vpop.f32.mrf.mxu2  ;;  %v4464_v44 = vadd.f32 %v4463_v58, %v16899_v49  ;;  %v5680_v61 = vand.u32 4294901760, %v5679_v28 }
 0x3b7   : > { %v4536_v59 = vadd.f32 %v4535_v35, %v4498_v9  ;;  %5095 = vmatmul.f32.gmra.mxu0 %v19903_v16  ;;  %5125 = vmatmul.f32.gmra.mxu1 %v16760_v17 }
 0x3b8   : > { %5217 = vmatmul.f32.gmra.mxu3 %v19903_v16 }
 0x3b9   : > { %v17695_v11 = vadd.f32 %v4576_v24, %v4536_v59  ;;  %5179 = vmatmul.f32.gmra.mxu2 %v16814_v48 }
 0x3bb   : > { %v4582_v55 = vpop.f32.mrf.mxu3 }
 0x3bc   : > { %v4501_v42 = vpop.f32.mrf.mxu1  ;;  %v17698_v57 = vpop.f32.mrf.mxu0 }
 0x3bd   : > { %v4502_v25 = vadd.f32 %v4501_v42, %v4464_v44  ;;  %v4540_v21 = vpop.f32.mrf.mxu2 }
 0x3bf   : > { %v4541_v6 = vadd.f32 %v4540_v21, %v4502_v25  ;;  %5129 = vmatmul.f32.gmra.mxu1 %v19903_v16  ;;  %5241 = vmatmul.f32.vlgmr.msrb.gmra.mxu0 %v19908_v39 }
 0x3c0   : > { %5356 = vmatmul.f32.vlgmr.msrb.gmra.mxu3 %v16724_v2  ;;  %5559 = vmatpush.msrb.mxu0 %v5439_v34 }
 0x3c1   : > { %v17703_v7 = vadd.f32 %v4582_v55, %v4541_v6  ;;  %5322 = vmatmul.f32.vlgmr.msrb.gmra.mxu2 %v16724_v2  ;;  %5681 = vmatpush.msrb.mxu3 %v5680_v61 }
 0x3c2   : > { %5627 = vmatpush.msrb.mxu2 %v5626_v51 }
 0x3c3   : > { %v4728_v5 = vpop.f32.mrf.mxu3 }
 0x3c4   : > { %v17706_v12 = vpop.f32.mrf.mxu0  ;;  %v17708_v32 = vpop.f32.mrf.mxu1 }
 0x3c5   : > { %v4678_v56 = vpop.f32.mrf.mxu2 }
 0x3c6   : > { %v4679_v53 = vadd.f32 %v4678_v56, %v19904_v4 }
 0x3c7   : > { %5246 = vmatmul.f32.gmra.mxu0 %v16754_v14  ;;  %5280 = vmatmul.f32.vlgmr.msrb.gmra.mxu1 %v19909_v19 }
 0x3c8   : > { %v4729_v15 = vadd.f32 %v4728_v5, %v4679_v53  ;;  %5360 = vmatmul.f32.gmra.mxu3 %v16745_v10  ;;  %5593 = vmatpush.msrb.mxu1 %v5387_v0 }
 0x3c9   : > { %5326 = vmatmul.f32.gmra.mxu2 %v16745_v10 }
 0x3cb   : > { %v4732_v1 = vpop.f32.mrf.mxu3 }
 0x3cc   : > { %v17717_v36 = vpop.f32.mrf.mxu0  ;;  %v17719_v33 = vpop.f32.mrf.mxu1 }
 0x3cd   : > { %v4686_v54 = vpop.f32.mrf.mxu2 }
 0x3ce   : > { %v4687_v40 = vadd.f32 %v4686_v54, %v16879_v13 }
 0x3cf   : > { %5251 = vmatmul.f32.gmra.mxu0 %v16777_v30  ;;  %5286 = vmatmul.f32.gmra.mxu1 %v16767_v23 }
 0x3d0   : > { %v4733_v0 = vadd.f32 %v4732_v1, %v4687_v40  ;;  %5364 = vmatmul.f32.gmra.mxu3 %v16760_v17 }
 0x3d1   : > { %5330 = vmatmul.f32.gmra.mxu2 %v16760_v17 }
 0x3d3   : > { %v4736_v3 = vpop.f32.mrf.mxu3 }
 0x3d4   : > { %v17726_v18 = vpop.f32.mrf.mxu0  ;;  %v17728_v34 = vpop.f32.mrf.mxu1 }
 0x3d5   : > { %v4694_v63 = vpop.f32.mrf.mxu2 }
 0x3d6   : > { %v4695_v52 = vadd.f32 %v4694_v63, %v16889_v22 }
 0x3d7   : > { %5256 = vmatmul.f32.gmra.mxu0 %v16796_v43  ;;  %5292 = vmatmul.f32.gmra.mxu1 %v16787_v38 }
 0x3d8   : > { %v4737_v29 = vadd.f32 %v4736_v3, %v4695_v52  ;;  %5368 = vmatmul.f32.gmra.mxu3 %v19903_v16 }
 0x3d9   : > { %5334 = vmatmul.f32.gmra.mxu2 %v19903_v16 }
 0x3db   : > { %v4740_v27 = vpop.f32.mrf.mxu3 }
 0x3dc   : > { %v17735_v24 = vpop.f32.mrf.mxu1  ;;  %v4764_v58 = vpop.f32.mrf.mxu0 }
 0x3dd   : > { %v4702_v26 = vpop.f32.mrf.mxu2  ;;  %v4765_v59 = vadd.f32 %v4764_v58, %v4729_v15 }
 0x3de   : > { %v4703_v9 = vadd.f32 %v4702_v26, %v16899_v49 }
 0x3df   : > { %5298 = vmatmul.f32.gmra.mxu1 %v16806_v46  ;;  %5394 = vmatmul.f32.vlgmr.msra.gmra.mxu0 %v19905_v8 }
 0x3e0   : > { %v4741_v35 = vadd.f32 %v4740_v27, %v4703_v9  ;;  %5519 = vmatmul.f32.vlgmr.msra.gmra.mxu3 %v19909_v19  ;;  %5716 = vmatpush.msra.mxu0 %v5677_v50 }
 0x3e1   : > { %5480 = vmatmul.f32.vlgmr.msra.gmra.mxu2 %v19908_v39  ;;  %5832 = vmatpush.msra.mxu3 %v5626_v51 }
 0x3e2   : > { %5798 = vmatpush.msra.mxu2 %v5678_v41 }
 0x3e3   : > { %v4879_v44 = vpop.f32.mrf.mxu3 }
 0x3e4   : > { %v4769_v55 = vpop.f32.mrf.mxu0  ;;  %v4803_v42 = vpop.f32.mrf.mxu1 }
 0x3e5   : > { %v4804_v25 = vadd.f32 %v4803_v42, %v4765_v59  ;;  %v4845_v21 = vpop.f32.mrf.mxu2  ;;  %v4770_v56 = vadd.f32 %v4769_v55, %v4733_v0 }
 0x3e7   : > { %v4846_v6 = vadd.f32 %v4845_v21, %v4804_v25  ;;  %5402 = vmatmul.f32.gmra.mxu0 %v16784_v37  ;;  %5444 = vmatmul.f32.vlgmr.msra.gmra.mxu1 %v16724_v2 }
 0x3e8   : > { %5525 = vmatmul.f32.gmra.mxu3 %v16767_v23  ;;  %5754 = vmatpush.msra.mxu1 %v5626_v51 }
 0x3e9   : > { %v17745_v5 = vadd.f32 %v4879_v44, %v4846_v6  ;;  %5485 = vmatmul.f32.gmra.mxu2 %v16754_v14 }
 0x3eb   : > { %v4883_v53 = vpop.f32.mrf.mxu3 }
 0x3ec   : > { %v4774_v20 = vpop.f32.mrf.mxu0  ;;  %v4809_v31 = vpop.f32.mrf.mxu1 }
 0x3ed   : > { %v4810_v15 = vadd.f32 %v4809_v31, %v4770_v56  ;;  %v4849_v60 = vpop.f32.mrf.mxu2  ;;  %v4775_v51 = vadd.f32 %v4774_v20, %v4737_v29  ;;  %v4370_v20 = vld.sshfl [vmem:[#allocation1 + $0x30] sm:$0xff pattern:$0x75316420] }
 0x3ee   : > { %v4396_v31 = vsel %vm336_vm1, %v4370_v20, 0 }
 0x3ef   : > { %v4850_v1 = vadd.f32 %v4849_v60, %v4810_v15  ;;  %5410 = vmatmul.f32.gmra.mxu0 %v16803_v45  ;;  %5448 = vmatmul.f32.gmra.mxu1 %v16745_v10  ;;  %v17773_v60 = vand.u32 4294901760, %v4396_v31 }
 0x3f0   : > { %5531 = vmatmul.f32.gmra.mxu3 %v16787_v38 }
 0x3f1   : > { %v17751_v50 = vadd.f32 %v4883_v53, %v4850_v1  ;;  %5490 = vmatmul.f32.gmra.mxu2 %v16777_v30 }
 0x3f3   : > { %v4887_v54 = vpop.f32.mrf.mxu3 }
 0x3f4   : > { %v4779_v41 = vpop.f32.mrf.mxu0  ;;  %v4815_v40 = vpop.f32.mrf.mxu1 }
 0x3f5   : > { %v4816_v28 = vadd.f32 %v4815_v40, %v4775_v51  ;;  %v4853_v0 = vpop.f32.mrf.mxu2  ;;  %v4780_v63 = vadd.f32 %v4779_v41, %v4741_v35  ;;  %v5916_v40 = vsub.f32 %v4396_v31, %v17773_v60 }
 0x3f7   : > { %v4854_v61 = vadd.f32 %v4853_v0, %v4816_v28  ;;  %5418 = vmatmul.f32.gmra.mxu0 %v16814_v48  ;;  %5452 = vmatmul.f32.gmra.mxu1 %v16760_v17  ;;  %v5917_v0 = vand.u32 4294901760, %v5916_v40 }
 0x3f8   : > { %5537 = vmatmul.f32.gmra.mxu3 %v16806_v46 }
 0x3f9   : > { %v17757_v3 = vadd.f32 %v4887_v54, %v4854_v61  ;;  %5495 = vmatmul.f32.gmra.mxu2 %v16796_v43 }
 0x3fb   : > { %v4891_v52 = vpop.f32.mrf.mxu3 }
 0x3fc   : > { %v4821_v27 = vpop.f32.mrf.mxu1  ;;  %v4917_v29 = vpop.f32.mrf.mxu0 }
 0x3fd   : > { %v4822_v58 = vadd.f32 %v4821_v27, %v4780_v63  ;;  %v4857_v26 = vpop.f32.mrf.mxu2  ;;  %v4918_v59 = vadd.f32 %v4917_v29, %v19904_v4 }
 0x3ff   : > { %v4858_v9 = vadd.f32 %v4857_v26, %v4822_v58  ;;  %5456 = vmatmul.f32.gmra.mxu1 %v19903_v16  ;;  %5561 = vmatmul.f32.vlgmr.msrb.gmra.mxu0 %v16724_v2 }
 0x400   : > { %5683 = vmatmul.f32.vlgmr.msrb.gmra.mxu3 %v16724_v2  ;;  %5866 = vmatpush.msrb.mxu0 %v17773_v60 }
 0x401   : > { %v17764_v44 = vadd.f32 %v4891_v52, %v4858_v9  ;;  %5633 = vmatmul.f32.vlgmr.msrb.gmra.mxu2 %v19905_v8  ;;  %5993 = vmatpush.msrb.mxu3 %v17773_v60  ;;  %v5918_v52 = vsub.f32 %v5916_v40, %v5917_v0 }
 0x402   : > { %5955 = vmatpush.msrb.mxu2 %v5916_v40 }
 0x403   : > { %v5042_v55 = vpop.f32.mrf.mxu3  ;;  %v5919_v29 = vand.u32 4294901760, %v5918_v52 }
 0x404   : > { %v4925_v35 = vpop.f32.mrf.mxu0  ;;  %v4967_v42 = vpop.f32.mrf.mxu1 }
 0x405   : > { %v4968_v25 = vadd.f32 %v4967_v42, %v4918_v59  ;;  %v5003_v21 = vpop.f32.mrf.mxu2  ;;  %v4926_v56 = vadd.f32 %v4925_v35, %v16879_v13 }
 0x407   : > { %v5004_v6 = vadd.f32 %v5003_v21, %v4968_v25  ;;  %5565 = vmatmul.f32.gmra.mxu0 %v16745_v10  ;;  %5595 = vmatmul.f32.vlgmr.msrb.gmra.mxu1 %v16724_v2 }
 0x408   : > { %5687 = vmatmul.f32.gmra.mxu3 %v16745_v10  ;;  %5920 = vmatpush.msrb.mxu1 %v5919_v29 }
 0x409   : > { %v5043_v53 = vadd.f32 %v5042_v55, %v5004_v6  ;;  %5641 = vmatmul.f32.gmra.mxu2 %v16784_v37 }
 0x40b   : > { %v5048_v15 = vpop.f32.mrf.mxu3 }
 0x40c   : > { %v4933_v1 = vpop.f32.mrf.mxu0  ;;  %v4971_v51 = vpop.f32.mrf.mxu1 }
 0x40d   : > { %v4972_v54 = vadd.f32 %v4971_v51, %v4926_v56  ;;  %v5008_v41 = vpop.f32.mrf.mxu2  ;;  %v4934_v61 = vadd.f32 %v4933_v1, %v16889_v22 }
 0x40f   : > { %v5009_v28 = vadd.f32 %v5008_v41, %v4972_v54  ;;  %5569 = vmatmul.f32.gmra.mxu0 %v16760_v17  ;;  %5599 = vmatmul.f32.gmra.mxu1 %v16745_v10 }
 0x410   : > { %5691 = vmatmul.f32.gmra.mxu3 %v16760_v17 }
 0x411   : > { %v5049_v63 = vadd.f32 %v5048_v15, %v5009_v28  ;;  %5649 = vmatmul.f32.gmra.mxu2 %v16803_v45  ;;  %v4607_v15 = vadd.f32 %v17698_v57, %v17681_v47  ;;  %v16597_v57 = vld [vmem:[%s16739_s29 + $0x78] sm:$0x77] }
 0x413   : > { %v5054_v27 = vpop.f32.mrf.mxu3  ;;  %v4641_v51 = vadd.f32 %v17708_v32, %v4607_v15  ;;  %v4615_v15 = vadd.f32 %v17717_v36, %v17695_v11  ;;  %v4619_v36 = vadd.f32 %v17726_v18, %v17703_v7 }
 0x414   : > { %v4941_v58 = vpop.f32.mrf.mxu0  ;;  %v4975_v26 = vpop.f32.mrf.mxu1 }
 0x415   : > { %v4976_v9 = vadd.f32 %v4975_v26, %v4934_v61  ;;  %v5013_v59 = vpop.f32.mrf.mxu2  ;;  %v4942_v35 = vadd.f32 %v4941_v58, %v16899_v49 }
 0x417   : > { %v5014_v55 = vadd.f32 %v5013_v59, %v4976_v9  ;;  %5573 = vmatmul.f32.gmra.mxu0 %v19903_v16  ;;  %5603 = vmatmul.f32.gmra.mxu1 %v16760_v17 }
 0x418   : > { %5695 = vmatmul.f32.gmra.mxu3 %v19903_v16 }
 0x419   : > { %v5055_v42 = vadd.f32 %v5054_v27, %v5014_v55  ;;  %5657 = vmatmul.f32.gmra.mxu2 %v16814_v48  ;;  %v8240_v27 = vmax.f32 %v4641_v51, 0.0 }
 0x41b   : > { %v5060_v25 = vpop.f32.mrf.mxu3 }
 0x41c   : > { %v4979_v21 = vpop.f32.mrf.mxu1  ;;  %v5084_v6 = vpop.f32.mrf.mxu0 }
 0x41d   : > { %v4980_v56 = vadd.f32 %v4979_v21, %v4942_v35  ;;  %v5018_v20 = vpop.f32.mrf.mxu2  ;;  %v5085_v54 = vadd.f32 %v5084_v6, %v5043_v53  ;;  %v4611_v53 = vadd.f32 %v17706_v12, %v17688_v62 }
 0x41f   : > { %v5019_v31 = vadd.f32 %v5018_v20, %v4980_v56  ;;  %5607 = vmatmul.f32.gmra.mxu1 %v19903_v16  ;;  %5719 = vmatmul.f32.vlgmr.msra.gmra.mxu0 %v19908_v39  ;;  %v4645_v59 = vadd.f32 %v17719_v33, %v4611_v53 }
 0x420   : > { %5834 = vmatmul.f32.vlgmr.msra.gmra.mxu3 %v16724_v2  ;;  %6037 = vmatpush.msra.mxu0 %v5917_v0  ;;  %v4371_v0 = vld.sshfl [vmem:[#allocation1 + $0x38] sm:$0xff pattern:$0x75316420] }
 0x421   : > { %v17793_v1 = vadd.f32 %v5060_v25, %v5019_v31  ;;  %5800 = vmatmul.f32.vlgmr.msra.gmra.mxu2 %v16724_v2  ;;  %4375 = vst [vmem:[#allocation1 + $0x30] ss:$2 sm:$0xff] %v16597_v57  ;;  %v4398_v32 = vsel %vm336_vm1, %v4371_v0, 0  ;;  %v8256_v12 = vmax.f32 %v4645_v59, 0.0 }
 0x422   : > { %v17811_v9 = vand.u32 4294901760, %v4398_v32 }
 0x423   : > { %v5206_v41 = vpop.f32.mrf.mxu3 }
 0x424   : > { %v5088_v40 = vpop.f32.mrf.mxu0  ;;  %v5118_v28 = vpop.f32.mrf.mxu1  ;;  %6105 = vmatpush.msra.mxu2 %v17811_v9  ;;  %v6155_v25 = vsub.f32 %v4398_v32, %v17811_v9 }
 0x425   : > { %v5119_v61 = vadd.f32 %v5118_v28, %v5085_v54  ;;  %v5156_v52 = vpop.f32.mrf.mxu2  ;;  %v5089_v55 = vadd.f32 %v5088_v40, %v5049_v63 }
 0x426   : > { %v5157_v29 = vadd.f32 %v5156_v52, %v19904_v4  ;;  %v6156_v20 = vand.u32 4294901760, %v6155_v25 }
 0x427   : > { %v8242_v47 = vmax.f32 %v5119_v61, 0.0  ;;  %5724 = vmatmul.f32.gmra.mxu0 %v16754_v14  ;;  %5758 = vmatmul.f32.vlgmr.msra.gmra.mxu1 %v19909_v19 }
 0x428   : > { %v17801_v58 = vadd.f32 %v5206_v41, %v5157_v29  ;;  %5838 = vmatmul.f32.gmra.mxu3 %v16745_v10  ;;  %6071 = vmatpush.msra.mxu1 %v17773_v60  ;;  %v6157_v33 = vsub.f32 %v6155_v25, %v6156_v20  ;;  %v4649_v41 = vadd.f32 %v17728_v34, %v4615_v15 }
 0x429   : > { %v17808_v26 = vadd.f32 %v8242_v47, %v8240_v27  ;;  %5804 = vmatmul.f32.gmra.mxu2 %v16745_v10 }
 0x42a   : > { %v6158_v54 = vand.u32 4294901760, %v6157_v33  ;;  %v8272_v57 = vmax.f32 %v4649_v41, 0.0 }
 0x42b   : > { %v5210_v35 = vpop.f32.mrf.mxu3 }
 0x42c   : > { %v5092_v21 = vpop.f32.mrf.mxu0  ;;  %v5122_v6 = vpop.f32.mrf.mxu1  ;;  %6159 = vmatpush.msra.mxu3 %v6158_v54 }
 0x42d   : > { %v5123_v60 = vadd.f32 %v5122_v6, %v5089_v55  ;;  %v5164_v56 = vpop.f32.mrf.mxu2  ;;  %v5093_v40 = vadd.f32 %v5092_v21, %v5055_v42  ;;  %v4653_v42 = vadd.f32 %v17735_v24, %v4619_v36 }
 0x42e   : > { %v5165_v62 = vadd.f32 %v5164_v56, %v16879_v13 }
 0x42f   : > { %v8258_v31 = vmax.f32 %v5123_v60, 0.0  ;;  %5729 = vmatmul.f32.gmra.mxu0 %v16777_v30  ;;  %5764 = vmatmul.f32.gmra.mxu1 %v16767_v23  ;;  %v8288_v60 = vmax.f32 %v4653_v42, 0.0 }
 0x430   : > { %v5211_v63 = vadd.f32 %v5210_v35, %v5165_v62  ;;  %5842 = vmatmul.f32.gmra.mxu3 %v16760_v17 }
 0x431   : > { %v17822_v51 = vadd.f32 %v8258_v31, %v8256_v12  ;;  %5808 = vmatmul.f32.gmra.mxu2 %v16760_v17 }
 0x433   : > { %v5214_v28 = vpop.f32.mrf.mxu3 }
 0x434   : > { %v5096_v61 = vpop.f32.mrf.mxu0  ;;  %v5126_v52 = vpop.f32.mrf.mxu1 }
 0x435   : > { %v5127_v27 = vadd.f32 %v5126_v52, %v5093_v40  ;;  %v5172_v29 = vpop.f32.mrf.mxu2  ;;  %v5097_v32 = vadd.f32 %v5096_v61, %v17793_v1 }
 0x436   : > { %v5173_v47 = vadd.f32 %v5172_v29, %v16889_v22 }
 0x437   : > { %v8274_v0 = vmax.f32 %v5127_v27, 0.0  ;;  %5734 = vmatmul.f32.gmra.mxu0 %v16796_v43  ;;  %5770 = vmatmul.f32.gmra.mxu1 %v16787_v38 }
 0x438   : > { %v5215_v11 = vadd.f32 %v5214_v28, %v5173_v47  ;;  %5846 = vmatmul.f32.gmra.mxu3 %v19903_v16 }
 0x439   : > { %v17832_v34 = vadd.f32 %v8274_v0, %v8272_v57  ;;  %5812 = vmatmul.f32.gmra.mxu2 %v19903_v16 }
 0x43b   : > { %v5218_v53 = vpop.f32.mrf.mxu3 }
 0x43c   : > { %v5130_v59 = vpop.f32.mrf.mxu1  ;;  %v5242_v55 = vpop.f32.mrf.mxu0 }
 0x43d   : > { %v5131_v35 = vadd.f32 %v5130_v59, %v5097_v32  ;;  %v5180_v21 = vpop.f32.mrf.mxu2  ;;  %v5243_v24 = vadd.f32 %v5242_v55, %v17801_v58 }
 0x43e   : > { %v5181_v6 = vadd.f32 %v5180_v21, %v16899_v49 }
 0x43f   : > { %v8290_v56 = vmax.f32 %v5131_v35, 0.0  ;;  %5776 = vmatmul.f32.gmra.mxu1 %v16806_v46  ;;  %5872 = vmatmul.f32.vlgmr.msrb.gmra.mxu0 %v19905_v8 }
 0x440   : > { %v5219_v7 = vadd.f32 %v5218_v53, %v5181_v6  ;;  %5997 = vmatmul.f32.vlgmr.msrb.gmra.mxu3 %v19909_v19  ;;  %6194 = vmatpush.msrb.mxu0 %v6155_v25 }
 0x441   : > { %v17841_v18 = vadd.f32 %v8290_v56, %v8288_v60  ;;  %5958 = vmatmul.f32.vlgmr.msrb.gmra.mxu2 %v19908_v39  ;;  %6310 = vmatpush.msrb.mxu3 %v17811_v9 }
 0x442   : > { %6276 = vmatpush.msrb.mxu2 %v6156_v20  ;;  %v8241_v20 = vmax.f32 %v17745_v5, 0.0  ;;  %v8257_v5 = vmax.f32 %v17751_v50, 0.0  ;;  %v8273_v50 = vmax.f32 %v17757_v3, 0.0  ;;  %v8289_v3 = vmax.f32 %v17764_v44, 0.0 }
 0x443   : > { %v5357_v1 = vpop.f32.mrf.mxu3  ;;  %v4376_v44 = vld.sshfl [vmem:[#allocation1] sm:$0xff pattern:$0x75316420] }
 0x444   : > { %v5247_v62 = vpop.f32.mrf.mxu0  ;;  %v5281_v12 = vpop.f32.mrf.mxu1 }
 0x445   : > { %v5282_v31 = vadd.f32 %v5281_v12, %v5243_v24  ;;  %v5323_v33 = vpop.f32.mrf.mxu2  ;;  %v5248_v58 = vadd.f32 %v5247_v62, %v5211_v63 }
 0x447   : > { %v5324_v15 = vadd.f32 %v5323_v33, %v5282_v31  ;;  %5880 = vmatmul.f32.gmra.mxu0 %v16784_v37  ;;  %5922 = vmatmul.f32.vlgmr.msrb.gmra.mxu1 %v16724_v2 }
 0x448   : > { %6003 = vmatmul.f32.gmra.mxu3 %v16767_v23  ;;  %6232 = vmatpush.msrb.mxu1 %v17811_v9 }
 0x449   : > { %v5358_v25 = vadd.f32 %v5357_v1, %v5324_v15  ;;  %5963 = vmatmul.f32.gmra.mxu2 %v16754_v14 }
 0x44b   : > { %v8243_v54 = vmax.f32 %v5358_v25, 0.0  ;;  %v5361_v41 = vpop.f32.mrf.mxu3 }
 0x44c   : > { %v5252_v40 = vpop.f32.mrf.mxu0  ;;  %v5287_v28 = vpop.f32.mrf.mxu1 }
 0x44d   : > { %v17852_v61 = vadd.f32 %v8243_v54, %v8241_v20  ;;  %v5288_v52 = vadd.f32 %v5287_v28, %v5248_v58  ;;  %v5327_v27 = vpop.f32.mrf.mxu2  ;;  %v5253_v63 = vadd.f32 %v5252_v40, %v5215_v11 }
 0x44f   : > { %v5328_v29 = vadd.f32 %v5327_v27, %v5288_v52  ;;  %5888 = vmatmul.f32.gmra.mxu0 %v16803_v45  ;;  %5926 = vmatmul.f32.gmra.mxu1 %v16745_v10  ;;  %v4400_v52 = vsel %vm336_vm1, %v4376_v44, 0 }
 0x450   : > { %6009 = vmatmul.f32.gmra.mxu3 %v16787_v38 }
 0x451   : > { %v5362_v9 = vadd.f32 %v5361_v41, %v5328_v29  ;;  %5968 = vmatmul.f32.gmra.mxu2 %v16777_v30  ;;  %v6343_v29 = vand.u32 4294901760, %v4400_v52 }
 0x453   : > { %v8259_v47 = vmax.f32 %v5362_v9, 0.0  ;;  %v5365_v57 = vpop.f32.mrf.mxu3 }
 0x454   : > { %v5257_v0 = vpop.f32.mrf.mxu0  ;;  %v5293_v36 = vpop.f32.mrf.mxu1 }
 0x455   : > { %v17859_v42 = vadd.f32 %v8259_v47, %v8257_v5  ;;  %v5294_v32 = vadd.f32 %v5293_v36, %v5253_v63  ;;  %v5331_v53 = vpop.f32.mrf.mxu2  ;;  %v5258_v11 = vadd.f32 %v5257_v0, %v5219_v7 }
 0x457   : > { %v5332_v59 = vadd.f32 %v5331_v53, %v5294_v32  ;;  %5896 = vmatmul.f32.gmra.mxu0 %v16814_v48  ;;  %5930 = vmatmul.f32.gmra.mxu1 %v16760_v17 }
 0x458   : > { %6015 = vmatmul.f32.gmra.mxu3 %v16806_v46 }
 0x459   : > { %v5366_v55 = vadd.f32 %v5365_v57, %v5332_v59  ;;  %5973 = vmatmul.f32.gmra.mxu2 %v16796_v43  ;;  %v6394_v57 = vsub.f32 %v4400_v52, %v6343_v29 }
 0x45b   : > { %v8275_v35 = vmax.f32 %v5366_v55, 0.0  ;;  %v5369_v21 = vpop.f32.mrf.mxu3  ;;  %v6395_v36 = vand.u32 4294901760, %v6394_v57 }
 0x45c   : > { %v5299_v6 = vpop.f32.mrf.mxu1  ;;  %v5395_v60 = vpop.f32.mrf.mxu0 }
 0x45d   : > { %v17866_v56 = vadd.f32 %v8275_v35, %v8273_v50  ;;  %v5300_v24 = vadd.f32 %v5299_v6, %v5258_v11  ;;  %v5335_v1 = vpop.f32.mrf.mxu2  ;;  %v5396_v12 = vadd.f32 %v5395_v60, %v19904_v4  ;;  %v6396_v59 = vsub.f32 %v6394_v57, %v6395_v36 }
 0x45f   : > { %v5336_v62 = vadd.f32 %v5335_v1, %v5300_v24  ;;  %5934 = vmatmul.f32.gmra.mxu1 %v19903_v16  ;;  %6039 = vmatmul.f32.vlgmr.msra.gmra.mxu0 %v16724_v2  ;;  %v6397_v50 = vand.u32 4294901760, %v6396_v59 }
 0x460   : > { %6161 = vmatmul.f32.vlgmr.msra.gmra.mxu3 %v16724_v2  ;;  %6344 = vmatpush.msra.mxu0 %v6343_v29 }
 0x461   : > { %v5370_v31 = vadd.f32 %v5369_v21, %v5336_v62  ;;  %6111 = vmatmul.f32.vlgmr.msra.gmra.mxu2 %v19905_v8  ;;  %6471 = vmatpush.msra.mxu3 %v6343_v29 }
 0x462   : > { %6433 = vmatpush.msra.mxu2 %v6394_v57 }
 0x463   : > { %v8291_v7 = vmax.f32 %v5370_v31, 0.0  ;;  %v5520_v33 = vpop.f32.mrf.mxu3 }
 0x464   : > { %v5403_v15 = vpop.f32.mrf.mxu0  ;;  %v5445_v25 = vpop.f32.mrf.mxu1 }
 0x465   : > { %v17874_v20 = vadd.f32 %v8291_v7, %v8289_v3  ;;  %v5446_v58 = vadd.f32 %v5445_v25, %v5396_v12  ;;  %v5481_v54 = vpop.f32.mrf.mxu2  ;;  %v5404_v40 = vadd.f32 %v5403_v15, %v16879_v13 }
 0x467   : > { %v5482_v41 = vadd.f32 %v5481_v54, %v5446_v58  ;;  %6043 = vmatmul.f32.gmra.mxu0 %v16745_v10  ;;  %6073 = vmatmul.f32.vlgmr.msra.gmra.mxu1 %v16724_v2 }
 0x468   : > { %6165 = vmatmul.f32.gmra.mxu3 %v16745_v10  ;;  %6398 = vmatpush.msra.mxu1 %v6397_v50 }
 0x469   : > { %v5521_v28 = vadd.f32 %v5520_v33, %v5482_v41  ;;  %6119 = vmatmul.f32.gmra.mxu2 %v16784_v37 }
 0x46b   : > { %v5526_v27 = vpop.f32.mrf.mxu3 }
 0x46c   : > { %v5411_v9 = vpop.f32.mrf.mxu0  ;;  %v5449_v5 = vpop.f32.mrf.mxu1 }
 0x46d   : > { %v5450_v63 = vadd.f32 %v5449_v5, %v5404_v40  ;;  %v5486_v47 = vpop.f32.mrf.mxu2  ;;  %v5412_v32 = vadd.f32 %v5411_v9, %v16889_v22  ;;  %v4377_v9 = vld.sshfl [vmem:[#allocation1 + $0x8] sm:$0xff pattern:$0x75316420]  ;;  %v16598_v5 = vld [vmem:[%s16739_s29 + $0x80] sm:$0x77] }
 0x46e   : > { %8403 = vst [vmem:[#allocation1] ss:$2 sm:$0xff] %v16598_v5 }
 0x46f   : > { %v5487_v0 = vadd.f32 %v5486_v47, %v5450_v63  ;;  %6047 = vmatmul.f32.gmra.mxu0 %v16760_v17  ;;  %6077 = vmatmul.f32.gmra.mxu1 %v16745_v10  ;;  %v4402_v47 = vsel %vm336_vm1, %v4377_v9, 0 }
 0x470   : > { %6169 = vmatmul.f32.gmra.mxu3 %v16760_v17  ;;  %v6582_v57 = vand.u32 4294901760, %v4402_v47 }
 0x471   : > { %v5527_v53 = vadd.f32 %v5526_v27, %v5487_v0  ;;  %6127 = vmatmul.f32.gmra.mxu2 %v16803_v45 }
 0x473   : > { %v5532_v55 = vpop.f32.mrf.mxu3 }
 0x474   : > { %v5419_v11 = vpop.f32.mrf.mxu0  ;;  %v5453_v35 = vpop.f32.mrf.mxu1 }
 0x475   : > { %v5454_v21 = vadd.f32 %v5453_v35, %v5412_v32  ;;  %v5491_v6 = vpop.f32.mrf.mxu2  ;;  %v5420_v24 = vadd.f32 %v5419_v11, %v16899_v49  ;;  %v6633_v32 = vsub.f32 %v4402_v47, %v6582_v57 }
 0x477   : > { %v5492_v60 = vadd.f32 %v5491_v6, %v5454_v21  ;;  %6051 = vmatmul.f32.gmra.mxu0 %v19903_v16  ;;  %6081 = vmatmul.f32.gmra.mxu1 %v16760_v17  ;;  %v6634_v35 = vand.u32 4294901760, %v6633_v32 }
 0x478   : > { %6173 = vmatmul.f32.gmra.mxu3 %v19903_v16 }
 0x479   : > { %v5533_v1 = vadd.f32 %v5532_v55, %v5492_v60  ;;  %6135 = vmatmul.f32.gmra.mxu2 %v16814_v48 }
 0x47b   : > { %v5538_v62 = vpop.f32.mrf.mxu3 }
 0x47c   : > { %v5457_v12 = vpop.f32.mrf.mxu1  ;;  %v5562_v31 = vpop.f32.mrf.mxu0 }
 0x47d   : > { %v5458_v3 = vadd.f32 %v5457_v12, %v5420_v24  ;;  %v5496_v7 = vpop.f32.mrf.mxu2  ;;  %v5563_v25 = vadd.f32 %v5562_v31, %v5521_v28 }
 0x47f   : > { %v5497_v33 = vadd.f32 %v5496_v7, %v5458_v3  ;;  %6085 = vmatmul.f32.gmra.mxu1 %v19903_v16  ;;  %6197 = vmatmul.f32.vlgmr.msrb.gmra.mxu0 %v19908_v39 }
 0x480   : > { %6312 = vmatmul.f32.vlgmr.msrb.gmra.mxu3 %v16724_v2  ;;  %6515 = vmatpush.msrb.mxu0 %v6395_v36 }
 0x481   : > { %v5539_v15 = vadd.f32 %v5538_v62, %v5497_v33  ;;  %6278 = vmatmul.f32.vlgmr.msrb.gmra.mxu2 %v16724_v2 }
 0x482   : > { %6583 = vmatpush.msrb.mxu2 %v6582_v57 }
 0x483   : > { %v5684_v58 = vpop.f32.mrf.mxu3 }
 0x484   : > { %v5566_v54 = vpop.f32.mrf.mxu0  ;;  %v5596_v41 = vpop.f32.mrf.mxu1 }
 0x485   : > { %v5597_v40 = vadd.f32 %v5596_v41, %v5563_v25  ;;  %v5634_v44 = vpop.f32.mrf.mxu2  ;;  %v5567_v0 = vadd.f32 %v5566_v54, %v5527_v53 }
 0x486   : > { %v5635_v52 = vadd.f32 %v5634_v44, %v19904_v4 }
 0x487   : > { %v8244_v27 = vmax.f32 %v5597_v40, 0.0  ;;  %6202 = vmatmul.f32.gmra.mxu0 %v16754_v14  ;;  %6236 = vmatmul.f32.vlgmr.msrb.gmra.mxu1 %v19909_v19 }
 0x488   : > { %v5685_v63 = vadd.f32 %v5684_v58, %v5635_v52  ;;  %6316 = vmatmul.f32.gmra.mxu3 %v16745_v10  ;;  %6549 = vmatpush.msrb.mxu1 %v6343_v29 }
 0x489   : > { %v17903_v28 = vadd.f32 %v17808_v26, %v8244_v27  ;;  %6282 = vmatmul.f32.gmra.mxu2 %v16745_v10  ;;  %v6635_v26 = vsub.f32 %v6633_v32, %v6634_v35 }
 0x48b   : > { %v5688_v36 = vpop.f32.mrf.mxu3  ;;  %v6636_v60 = vand.u32 4294901760, %v6635_v26 }
 0x48c   : > { %v5570_v59 = vpop.f32.mrf.mxu0  ;;  %v5600_v55 = vpop.f32.mrf.mxu1 }
 0x48d   : > { %v5601_v50 = vadd.f32 %v5600_v55, %v5567_v0  ;;  %v5642_v11 = vpop.f32.mrf.mxu2  ;;  %v5571_v24 = vadd.f32 %v5570_v59, %v5533_v1  ;;  %6637 = vmatpush.msrb.mxu3 %v6636_v60 }
 0x48e   : > { %v5643_v21 = vadd.f32 %v5642_v11, %v16879_v13 }
 0x48f   : > { %v8260_v6 = vmax.f32 %v5601_v50, 0.0  ;;  %6207 = vmatmul.f32.gmra.mxu0 %v16777_v30  ;;  %6242 = vmatmul.f32.gmra.mxu1 %v16767_v23 }
 0x490   : > { %v5689_v29 = vadd.f32 %v5688_v36, %v5643_v21  ;;  %6320 = vmatmul.f32.gmra.mxu3 %v16760_v17 }
 0x491   : > { %v17911_v53 = vadd.f32 %v17822_v51, %v8260_v6  ;;  %6286 = vmatmul.f32.gmra.mxu2 %v16760_v17 }
 0x493   : > { %v5692_v62 = vpop.f32.mrf.mxu3 }
 0x494   : > { %v5574_v12 = vpop.f32.mrf.mxu0  ;;  %v5604_v31 = vpop.f32.mrf.mxu1 }
 0x495   : > { %v5605_v3 = vadd.f32 %v5604_v31, %v5571_v24  ;;  %v5650_v7 = vpop.f32.mrf.mxu2  ;;  %v5575_v1 = vadd.f32 %v5574_v12, %v5539_v15 }
 0x496   : > { %v5651_v33 = vadd.f32 %v5650_v7, %v16889_v22 }
 0x497   : > { %v8276_v25 = vmax.f32 %v5605_v3, 0.0  ;;  %6212 = vmatmul.f32.gmra.mxu0 %v16796_v43  ;;  %6248 = vmatmul.f32.gmra.mxu1 %v16787_v38 }
 0x498   : > { %v5693_v58 = vadd.f32 %v5692_v62, %v5651_v33  ;;  %6324 = vmatmul.f32.gmra.mxu3 %v19903_v16 }
 0x499   : > { %v17919_v51 = vadd.f32 %v17832_v34, %v8276_v25  ;;  %6290 = vmatmul.f32.gmra.mxu2 %v19903_v16 }
 0x49b   : > { %v5696_v54 = vpop.f32.mrf.mxu3 }
 0x49c   : > { %v5608_v41 = vpop.f32.mrf.mxu1  ;;  %v5720_v40 = vpop.f32.mrf.mxu0 }
 0x49d   : > { %v5609_v44 = vadd.f32 %v5608_v41, %v5575_v1  ;;  %v5658_v52 = vpop.f32.mrf.mxu2  ;;  %v5721_v15 = vadd.f32 %v5720_v40, %v5685_v63 }
 0x49e   : > { %v5659_v27 = vadd.f32 %v5658_v52, %v16899_v49 }
 0x49f   : > { %v8292_v9 = vmax.f32 %v5609_v44, 0.0  ;;  %6254 = vmatmul.f32.gmra.mxu1 %v16806_v46  ;;  %6350 = vmatmul.f32.vlgmr.msra.gmra.mxu0 %v19905_v8 }
 0x4a0   : > { %v5697_v5 = vadd.f32 %v5696_v54, %v5659_v27  ;;  %6475 = vmatmul.f32.vlgmr.msra.gmra.mxu3 %v19909_v19  ;;  %6672 = vmatpush.msra.mxu0 %v6633_v32 }
 0x4a1   : > { %v17927_v34 = vadd.f32 %v17841_v18, %v8292_v9  ;;  %6436 = vmatmul.f32.vlgmr.msra.gmra.mxu2 %v19908_v39  ;;  %6788 = vmatpush.msra.mxu3 %v6582_v57 }
 0x4a2   : > { %6754 = vmatpush.msra.mxu2 %v6634_v35 }
 0x4a3   : > { %v5835_v47 = vpop.f32.mrf.mxu3 }
 0x4a4   : > { %v5725_v0 = vpop.f32.mrf.mxu0  ;;  %v5759_v36 = vpop.f32.mrf.mxu1 }
 0x4a5   : > { %v5760_v59 = vadd.f32 %v5759_v36, %v5721_v15  ;;  %v5801_v55 = vpop.f32.mrf.mxu2  ;;  %v5726_v32 = vadd.f32 %v5725_v0, %v5689_v29 }
 0x4a7   : > { %v5802_v50 = vadd.f32 %v5801_v55, %v5760_v59  ;;  %6358 = vmatmul.f32.gmra.mxu0 %v16784_v37  ;;  %6400 = vmatmul.f32.vlgmr.msra.gmra.mxu1 %v16724_v2 }
 0x4a8   : > { %6481 = vmatmul.f32.gmra.mxu3 %v16767_v23  ;;  %6710 = vmatpush.msra.mxu1 %v6582_v57 }
 0x4a9   : > { %v5836_v18 = vadd.f32 %v5835_v47, %v5802_v50  ;;  %6441 = vmatmul.f32.gmra.mxu2 %v16754_v14 }
 0x4ab   : > { %v8245_v11 = vmax.f32 %v5836_v18, 0.0  ;;  %v5839_v35 = vpop.f32.mrf.mxu3 }
 0x4ac   : > { %v5730_v63 = vpop.f32.mrf.mxu0  ;;  %v5765_v21 = vpop.f32.mrf.mxu1 }
 0x4ad   : > { %v17935_v6 = vadd.f32 %v17852_v61, %v8245_v11  ;;  %v5766_v26 = vadd.f32 %v5765_v21, %v5726_v32  ;;  %v5805_v60 = vpop.f32.mrf.mxu2  ;;  %v5731_v29 = vadd.f32 %v5730_v63, %v5693_v58 }
 0x4af   : > { %v5806_v24 = vadd.f32 %v5805_v60, %v5766_v26  ;;  %6366 = vmatmul.f32.gmra.mxu0 %v16803_v45  ;;  %6404 = vmatmul.f32.gmra.mxu1 %v16745_v10 }
 0x4b0   : > { %6487 = vmatmul.f32.gmra.mxu3 %v16787_v38 }
 0x4b1   : > { %v5840_v57 = vadd.f32 %v5839_v35, %v5806_v24  ;;  %6446 = vmatmul.f32.gmra.mxu2 %v16777_v30  ;;  %v4378_v35 = vld.sshfl [vmem:[#allocation1 + $0x10] sm:$0xff pattern:$0x75316420] }
 0x4b2   : > { %v4404_v63 = vsel %vm336_vm1, %v4378_v35, 0 }
 0x4b3   : > { %v8261_v62 = vmax.f32 %v5840_v57, 0.0  ;;  %v5843_v12 = vpop.f32.mrf.mxu3 }
 0x4b4   : > { %v5735_v31 = vpop.f32.mrf.mxu0  ;;  %v5771_v3 = vpop.f32.mrf.mxu1 }
 0x4b5   : > { %v17942_v61 = vadd.f32 %v17859_v42, %v8261_v62  ;;  %v5772_v7 = vadd.f32 %v5771_v3, %v5731_v29  ;;  %v5809_v33 = vpop.f32.mrf.mxu2  ;;  %v5736_v58 = vadd.f32 %v5735_v31, %v5697_v5 }
 0x4b7   : > { %v5810_v25 = vadd.f32 %v5809_v33, %v5772_v7  ;;  %6374 = vmatmul.f32.gmra.mxu0 %v16814_v48  ;;  %6408 = vmatmul.f32.gmra.mxu1 %v16760_v17 }
 0x4b8   : > { %6493 = vmatmul.f32.gmra.mxu3 %v16806_v46 }
 0x4b9   : > { %v5844_v1 = vadd.f32 %v5843_v12, %v5810_v25  ;;  %6451 = vmatmul.f32.gmra.mxu2 %v16796_v43 }
 0x4bb   : > { %v8277_v54 = vmax.f32 %v5844_v1, 0.0  ;;  %v5847_v41 = vpop.f32.mrf.mxu3 }
 0x4bc   : > { %v5777_v40 = vpop.f32.mrf.mxu1  ;;  %v5873_v44 = vpop.f32.mrf.mxu0 }
 0x4bd   : > { %v17949_v42 = vadd.f32 %v17866_v56, %v8277_v54  ;;  %v5778_v52 = vadd.f32 %v5777_v40, %v5736_v58  ;;  %v5813_v27 = vpop.f32.mrf.mxu2  ;;  %v5874_v15 = vadd.f32 %v5873_v44, %v19904_v4 }
 0x4bf   : > { %v5814_v9 = vadd.f32 %v5813_v27, %v5778_v52  ;;  %6412 = vmatmul.f32.gmra.mxu1 %v19903_v16  ;;  %6517 = vmatmul.f32.vlgmr.msrb.gmra.mxu0 %v16724_v2 }
 0x4c0   : > { %6639 = vmatmul.f32.vlgmr.msrb.gmra.mxu3 %v16724_v2 }
 0x4c1   : > { %v5848_v47 = vadd.f32 %v5847_v41, %v5814_v9  ;;  %6589 = vmatmul.f32.vlgmr.msrb.gmra.mxu2 %v19905_v8 }
 0x4c3   : > { %v8293_v5 = vmax.f32 %v5848_v47, 0.0  ;;  %v5998_v0 = vpop.f32.mrf.mxu3 }
 0x4c4   : > { %v5881_v36 = vpop.f32.mrf.mxu0  ;;  %v5923_v59 = vpop.f32.mrf.mxu1 }
 0x4c5   : > { %v17957_v56 = vadd.f32 %v17874_v20, %v8293_v5  ;;  %v5924_v55 = vadd.f32 %v5923_v59, %v5874_v15  ;;  %v5959_v50 = vpop.f32.mrf.mxu2  ;;  %v5882_v32 = vadd.f32 %v5881_v36, %v16879_v13  ;;  %v6821_v20 = vand.u32 4294901760, %v4404_v63 }
 0x4c7   : > { %v5960_v18 = vadd.f32 %v5959_v50, %v5924_v55  ;;  %6521 = vmatmul.f32.gmra.mxu0 %v16745_v10  ;;  %6551 = vmatmul.f32.vlgmr.msrb.gmra.mxu1 %v16724_v2  ;;  %v6872_v29 = vsub.f32 %v4404_v63, %v6821_v20 }
 0x4c8   : > { %6643 = vmatmul.f32.gmra.mxu3 %v16745_v10  ;;  %6822 = vmatpush.msrb.mxu0 %v6821_v20 }
 0x4c9   : > { %v5999_v11 = vadd.f32 %v5998_v0, %v5960_v18  ;;  %6597 = vmatmul.f32.gmra.mxu2 %v16784_v37  ;;  %6949 = vmatpush.msrb.mxu3 %v6821_v20  ;;  %v6873_v12 = vand.u32 4294901760, %v6872_v29 }
 0x4ca   : > { %6911 = vmatpush.msrb.mxu2 %v6872_v29 }
 0x4cb   : > { %v6004_v21 = vpop.f32.mrf.mxu3  ;;  %v6874_v7 = vsub.f32 %v6872_v29, %v6873_v12 }
 0x4cc   : > { %v5889_v26 = vpop.f32.mrf.mxu0  ;;  %v5927_v60 = vpop.f32.mrf.mxu1 }
 0x4cd   : > { %v5928_v24 = vadd.f32 %v5927_v60, %v5882_v32  ;;  %v5964_v57 = vpop.f32.mrf.mxu2  ;;  %v5890_v31 = vadd.f32 %v5889_v26, %v16889_v22  ;;  %v6875_v25 = vand.u32 4294901760, %v6874_v7  ;;  %v4379_v26 = vld.sshfl [vmem:[#allocation1 + $0x18] sm:$0xff pattern:$0x75316420]  ;;  %v16599_v60 = vld [vmem:[%s16739_s29 + $0x88] sm:$0x77] }
 0x4ce   : > { %8405 = vst [vmem:[#allocation1 + $0x10] ss:$2 sm:$0xff] %v16599_v60 }
 0x4cf   : > { %v5965_v62 = vadd.f32 %v5964_v57, %v5928_v24  ;;  %6525 = vmatmul.f32.gmra.mxu0 %v16760_v17  ;;  %6555 = vmatmul.f32.gmra.mxu1 %v16745_v10  ;;  %v4406_v57 = vsel %vm336_vm1, %v4379_v26, 0 }
 0x4d0   : > { %6647 = vmatmul.f32.gmra.mxu3 %v16760_v17  ;;  %6876 = vmatpush.msrb.mxu1 %v6875_v25  ;;  %v7060_v29 = vand.u32 4294901760, %v4406_v57 }
 0x4d1   : > { %v6005_v3 = vadd.f32 %v6004_v21, %v5965_v62  ;;  %6605 = vmatmul.f32.gmra.mxu2 %v16803_v45 }
 0x4d3   : > { %v6010_v33 = vpop.f32.mrf.mxu3 }
 0x4d4   : > { %v5897_v1 = vpop.f32.mrf.mxu0  ;;  %v5931_v58 = vpop.f32.mrf.mxu1 }
 0x4d5   : > { %v5932_v54 = vadd.f32 %v5931_v58, %v5890_v31  ;;  %v5969_v41 = vpop.f32.mrf.mxu2  ;;  %v5898_v44 = vadd.f32 %v5897_v1, %v16899_v49  ;;  %v7111_v31 = vsub.f32 %v4406_v57, %v7060_v29 }
 0x4d7   : > { %v5970_v40 = vadd.f32 %v5969_v41, %v5932_v54  ;;  %6529 = vmatmul.f32.gmra.mxu0 %v19903_v16  ;;  %6559 = vmatmul.f32.gmra.mxu1 %v16760_v17  ;;  %v7112_v58 = vand.u32 4294901760, %v7111_v31 }
 0x4d8   : > { %6651 = vmatmul.f32.gmra.mxu3 %v19903_v16 }
 0x4d9   : > { %v6011_v52 = vadd.f32 %v6010_v33, %v5970_v40  ;;  %6613 = vmatmul.f32.gmra.mxu2 %v16814_v48 }
 0x4db   : > { %v6016_v27 = vpop.f32.mrf.mxu3 }
 0x4dc   : > { %v5935_v9 = vpop.f32.mrf.mxu1  ;;  %v6040_v15 = vpop.f32.mrf.mxu0 }
 0x4dd   : > { %v5936_v47 = vadd.f32 %v5935_v9, %v5898_v44  ;;  %v5974_v5 = vpop.f32.mrf.mxu2  ;;  %v6041_v59 = vadd.f32 %v6040_v15, %v5999_v11 }
 0x4df   : > { %v5975_v0 = vadd.f32 %v5974_v5, %v5936_v47  ;;  %6563 = vmatmul.f32.gmra.mxu1 %v19903_v16  ;;  %6675 = vmatmul.f32.vlgmr.msra.gmra.mxu0 %v19908_v39 }
 0x4e0   : > { %6790 = vmatmul.f32.vlgmr.msra.gmra.mxu3 %v16724_v2  ;;  %6993 = vmatpush.msra.mxu0 %v6873_v12 }
 0x4e1   : > { %v6017_v36 = vadd.f32 %v6016_v27, %v5975_v0  ;;  %6756 = vmatmul.f32.vlgmr.msra.gmra.mxu2 %v16724_v2 }
 0x4e2   : > { %7061 = vmatpush.msra.mxu2 %v7060_v29 }
 0x4e3   : > { %v6162_v55 = vpop.f32.mrf.mxu3 }
 0x4e4   : > { %v6044_v50 = vpop.f32.mrf.mxu0  ;;  %v6074_v18 = vpop.f32.mrf.mxu1 }
 0x4e5   : > { %v6075_v32 = vadd.f32 %v6074_v18, %v6041_v59  ;;  %v6112_v35 = vpop.f32.mrf.mxu2  ;;  %v6045_v62 = vadd.f32 %v6044_v50, %v6005_v3 }
 0x4e6   : > { %v6113_v63 = vadd.f32 %v6112_v35, %v19904_v4 }
 0x4e7   : > { %v8246_v21 = vmax.f32 %v6075_v32, 0.0  ;;  %6680 = vmatmul.f32.gmra.mxu0 %v16754_v14  ;;  %6714 = vmatmul.f32.vlgmr.msra.gmra.mxu1 %v19909_v19 }
 0x4e8   : > { %v6163_v24 = vadd.f32 %v6162_v55, %v6113_v63  ;;  %6794 = vmatmul.f32.gmra.mxu3 %v16745_v10  ;;  %7027 = vmatpush.msra.mxu1 %v6821_v20 }
 0x4e9   : > { %v17986_v11 = vadd.f32 %v17903_v28, %v8246_v21  ;;  %6760 = vmatmul.f32.gmra.mxu2 %v16745_v10  ;;  %v7113_v28 = vsub.f32 %v7111_v31, %v7112_v58 }
 0x4eb   : > { %v6166_v12 = vpop.f32.mrf.mxu3  ;;  %v7114_v40 = vand.u32 4294901760, %v7113_v28 }
 0x4ec   : > { %v6048_v7 = vpop.f32.mrf.mxu0  ;;  %v6078_v33 = vpop.f32.mrf.mxu1 }
 0x4ed   : > { %v6079_v25 = vadd.f32 %v6078_v33, %v6045_v62  ;;  %v6120_v1 = vpop.f32.mrf.mxu2  ;;  %v6049_v44 = vadd.f32 %v6048_v7, %v6011_v52  ;;  %7115 = vmatpush.msra.mxu3 %v7114_v40 }
 0x4ee   : > { %v6121_v54 = vadd.f32 %v6120_v1, %v16879_v13 }
 0x4ef   : > { %v8262_v41 = vmax.f32 %v6079_v25, 0.0  ;;  %6685 = vmatmul.f32.gmra.mxu0 %v16777_v30  ;;  %6720 = vmatmul.f32.gmra.mxu1 %v16767_v23 }
 0x4f0   : > { %v6167_v20 = vadd.f32 %v6166_v12, %v6121_v54  ;;  %6798 = vmatmul.f32.gmra.mxu3 %v16760_v17 }
 0x4f1   : > { %v17994_v3 = vadd.f32 %v17911_v53, %v8262_v41  ;;  %6764 = vmatmul.f32.gmra.mxu2 %v16760_v17 }
 0x4f3   : > { %v6170_v27 = vpop.f32.mrf.mxu3 }
 0x4f4   : > { %v6052_v9 = vpop.f32.mrf.mxu0  ;;  %v6082_v15 = vpop.f32.mrf.mxu1 }
 0x4f5   : > { %v6083_v47 = vadd.f32 %v6082_v15, %v6049_v44  ;;  %v6128_v5 = vpop.f32.mrf.mxu2  ;;  %v6053_v52 = vadd.f32 %v6052_v9, %v6017_v36 }
 0x4f6   : > { %v6129_v0 = vadd.f32 %v6128_v5, %v16889_v22 }
 0x4f7   : > { %v8278_v59 = vmax.f32 %v6083_v47, 0.0  ;;  %6690 = vmatmul.f32.gmra.mxu0 %v16796_v43  ;;  %6726 = vmatmul.f32.gmra.mxu1 %v16787_v38 }
 0x4f8   : > { %v6171_v55 = vadd.f32 %v6170_v27, %v6129_v0  ;;  %6802 = vmatmul.f32.gmra.mxu3 %v19903_v16 }
 0x4f9   : > { %v18002_v53 = vadd.f32 %v17919_v51, %v8278_v59  ;;  %6768 = vmatmul.f32.gmra.mxu2 %v19903_v16 }
 0x4fb   : > { %v6174_v50 = vpop.f32.mrf.mxu3 }
 0x4fc   : > { %v6086_v18 = vpop.f32.mrf.mxu1  ;;  %v6198_v32 = vpop.f32.mrf.mxu0 }
 0x4fd   : > { %v6087_v35 = vadd.f32 %v6086_v18, %v6053_v52  ;;  %v6136_v63 = vpop.f32.mrf.mxu2  ;;  %v6199_v36 = vadd.f32 %v6198_v32, %v6163_v24 }
 0x4fe   : > { %v6137_v21 = vadd.f32 %v6136_v63, %v16899_v49 }
 0x4ff   : > { %v8294_v26 = vmax.f32 %v6087_v35, 0.0  ;;  %6732 = vmatmul.f32.gmra.mxu1 %v16806_v46  ;;  %6828 = vmatmul.f32.vlgmr.msrb.gmra.mxu0 %v19905_v8 }
 0x500   : > { %v6175_v60 = vadd.f32 %v6174_v50, %v6137_v21  ;;  %6953 = vmatmul.f32.vlgmr.msrb.gmra.mxu3 %v19909_v19  ;;  %7150 = vmatpush.msrb.mxu0 %v7111_v31 }
 0x501   : > { %v18010_v51 = vadd.f32 %v17927_v34, %v8294_v26  ;;  %6914 = vmatmul.f32.vlgmr.msrb.gmra.mxu2 %v19908_v39  ;;  %7266 = vmatpush.msrb.mxu3 %v7060_v29 }
 0x502   : > { %7232 = vmatpush.msrb.mxu2 %v7112_v58 }
 0x503   : > { %v6313_v57 = vpop.f32.mrf.mxu3 }
 0x504   : > { %v6203_v62 = vpop.f32.mrf.mxu0  ;;  %v6237_v12 = vpop.f32.mrf.mxu1 }
 0x505   : > { %v6238_v7 = vadd.f32 %v6237_v12, %v6199_v36  ;;  %v6279_v33 = vpop.f32.mrf.mxu2  ;;  %v6204_v31 = vadd.f32 %v6203_v62, %v6167_v20 }
 0x507   : > { %v6280_v25 = vadd.f32 %v6279_v33, %v6238_v7  ;;  %6836 = vmatmul.f32.gmra.mxu0 %v16784_v37  ;;  %6878 = vmatmul.f32.vlgmr.msrb.gmra.mxu1 %v16724_v2 }
 0x508   : > { %6959 = vmatmul.f32.gmra.mxu3 %v16767_v23  ;;  %7188 = vmatpush.msrb.mxu1 %v7060_v29 }
 0x509   : > { %v6314_v34 = vadd.f32 %v6313_v57, %v6280_v25  ;;  %6919 = vmatmul.f32.gmra.mxu2 %v16754_v14 }
 0x50b   : > { %v8247_v1 = vmax.f32 %v6314_v34, 0.0  ;;  %v6317_v58 = vpop.f32.mrf.mxu3 }
 0x50c   : > { %v6208_v24 = vpop.f32.mrf.mxu0  ;;  %v6243_v54 = vpop.f32.mrf.mxu1 }
 0x50d   : > { %v18018_v41 = vadd.f32 %v17935_v6, %v8247_v1  ;;  %v6244_v28 = vadd.f32 %v6243_v54, %v6204_v31  ;;  %v6283_v40 = vpop.f32.mrf.mxu2  ;;  %v6209_v20 = vadd.f32 %v6208_v24, %v6171_v55 }
 0x50f   : > { %v6284_v44 = vadd.f32 %v6283_v40, %v6244_v28  ;;  %6844 = vmatmul.f32.gmra.mxu0 %v16803_v45  ;;  %6882 = vmatmul.f32.gmra.mxu1 %v16745_v10 }
 0x510   : > { %6965 = vmatmul.f32.gmra.mxu3 %v16787_v38 }
 0x511   : > { %v6318_v29 = vadd.f32 %v6317_v58, %v6284_v44  ;;  %6924 = vmatmul.f32.gmra.mxu2 %v16777_v30  ;;  %v4380_v58 = vld.sshfl [vmem:[#allocation1 + $0x20] sm:$0xff pattern:$0x75316420] }
 0x512   : > { %v4408_v24 = vsel %vm336_vm1, %v4380_v58, 0 }
 0x513   : > { %v8263_v27 = vmax.f32 %v6318_v29, 0.0  ;;  %v6321_v9 = vpop.f32.mrf.mxu3 }
 0x514   : > { %v6213_v15 = vpop.f32.mrf.mxu0  ;;  %v6249_v47 = vpop.f32.mrf.mxu1 }
 0x515   : > { %v18025_v6 = vadd.f32 %v17942_v61, %v8263_v27  ;;  %v6250_v5 = vadd.f32 %v6249_v47, %v6209_v20  ;;  %v6287_v0 = vpop.f32.mrf.mxu2  ;;  %v6214_v55 = vadd.f32 %v6213_v15, %v6175_v60 }
 0x517   : > { %v6288_v59 = vadd.f32 %v6287_v0, %v6250_v5  ;;  %6852 = vmatmul.f32.gmra.mxu0 %v16814_v48  ;;  %6886 = vmatmul.f32.gmra.mxu1 %v16760_v17 }
 0x518   : > { %6971 = vmatmul.f32.gmra.mxu3 %v16806_v46 }
 0x519   : > { %v6322_v52 = vadd.f32 %v6321_v9, %v6288_v59  ;;  %6929 = vmatmul.f32.gmra.mxu2 %v16796_v43 }
 0x51b   : > { %v8279_v50 = vmax.f32 %v6322_v52, 0.0  ;;  %v6325_v18 = vpop.f32.mrf.mxu3 }
 0x51c   : > { %v6255_v32 = vpop.f32.mrf.mxu1  ;;  %v6351_v35 = vpop.f32.mrf.mxu0 }
 0x51d   : > { %v18032_v61 = vadd.f32 %v17949_v42, %v8279_v50  ;;  %v6256_v63 = vadd.f32 %v6255_v32, %v6214_v55  ;;  %v6291_v21 = vpop.f32.mrf.mxu2  ;;  %v6352_v36 = vadd.f32 %v6351_v35, %v19904_v4 }
 0x51f   : > { %v6292_v26 = vadd.f32 %v6291_v21, %v6256_v63  ;;  %6890 = vmatmul.f32.gmra.mxu1 %v19903_v16  ;;  %6995 = vmatmul.f32.vlgmr.msra.gmra.mxu0 %v16724_v2 }
 0x520   : > { %7117 = vmatmul.f32.vlgmr.msra.gmra.mxu3 %v16724_v2 }
 0x521   : > { %v6326_v57 = vadd.f32 %v6325_v18, %v6292_v26  ;;  %7067 = vmatmul.f32.vlgmr.msra.gmra.mxu2 %v19905_v8 }
 0x523   : > { %v8295_v60 = vmax.f32 %v6326_v57, 0.0  ;;  %v6476_v62 = vpop.f32.mrf.mxu3 }
 0x524   : > { %v6359_v12 = vpop.f32.mrf.mxu0  ;;  %v6401_v7 = vpop.f32.mrf.mxu1 }
 0x525   : > { %v18040_v42 = vadd.f32 %v17957_v56, %v8295_v60  ;;  %v6402_v33 = vadd.f32 %v6401_v7, %v6352_v36  ;;  %v6437_v25 = vpop.f32.mrf.mxu2  ;;  %v6360_v31 = vadd.f32 %v6359_v12, %v16879_v13  ;;  %v7299_v56 = vand.u32 4294901760, %v4408_v24 }
 0x527   : > { %v6438_v34 = vadd.f32 %v6437_v25, %v6402_v33  ;;  %6999 = vmatmul.f32.gmra.mxu0 %v16745_v10  ;;  %7029 = vmatmul.f32.vlgmr.msra.gmra.mxu1 %v16724_v2  ;;  %v7350_v20 = vsub.f32 %v4408_v24, %v7299_v56 }
 0x528   : > { %7121 = vmatmul.f32.gmra.mxu3 %v16745_v10  ;;  %7300 = vmatpush.msra.mxu0 %v7299_v56 }
 0x529   : > { %v6477_v1 = vadd.f32 %v6476_v62, %v6438_v34  ;;  %7075 = vmatmul.f32.gmra.mxu2 %v16784_v37  ;;  %7427 = vmatpush.msra.mxu3 %v7299_v56  ;;  %v7351_v9 = vand.u32 4294901760, %v7350_v20 }
 0x52a   : > { %7389 = vmatpush.msra.mxu2 %v7350_v20 }
 0x52b   : > { %v6482_v54 = vpop.f32.mrf.mxu3  ;;  %v7352_v5 = vsub.f32 %v7350_v20, %v7351_v9 }
 0x52c   : > { %v6367_v28 = vpop.f32.mrf.mxu0  ;;  %v6405_v40 = vpop.f32.mrf.mxu1 }
 0x52d   : > { %v6406_v44 = vadd.f32 %v6405_v40, %v6360_v31  ;;  %v6442_v29 = vpop.f32.mrf.mxu2  ;;  %v6368_v15 = vadd.f32 %v6367_v28, %v16889_v22  ;;  %v7353_v59 = vand.u32 4294901760, %v7352_v5  ;;  %v4381_v28 = vld.sshfl [vmem:[#allocation1 + $0x28] sm:$0xff pattern:$0x75316420]  ;;  %v16600_v40 = vld [vmem:[%s16739_s29 + $0x90] sm:$0x77] }
 0x52e   : > { %8407 = vst [vmem:[#allocation1 + $0x20] ss:$2 sm:$0xff] %v16600_v40 }
 0x52f   : > { %v6443_v27 = vadd.f32 %v6442_v29, %v6406_v44  ;;  %7003 = vmatmul.f32.gmra.mxu0 %v16760_v17  ;;  %7033 = vmatmul.f32.gmra.mxu1 %v16745_v10  ;;  %v4410_v29 = vsel %vm336_vm1, %v4381_v28, 0 }
 0x530   : > { %7125 = vmatmul.f32.gmra.mxu3 %v16760_v17  ;;  %7354 = vmatpush.msra.mxu1 %v7353_v59  ;;  %v7538_v20 = vand.u32 4294901760, %v4410_v29 }
 0x531   : > { %v6483_v47 = vadd.f32 %v6482_v54, %v6443_v27  ;;  %7083 = vmatmul.f32.gmra.mxu2 %v16803_v45 }
 0x533   : > { %v6488_v0 = vpop.f32.mrf.mxu3 }
 0x534   : > { %v6375_v52 = vpop.f32.mrf.mxu0  ;;  %v6409_v55 = vpop.f32.mrf.mxu1 }
 0x535   : > { %v6410_v50 = vadd.f32 %v6409_v55, %v6368_v15  ;;  %v6447_v18 = vpop.f32.mrf.mxu2  ;;  %v6376_v35 = vadd.f32 %v6375_v52, %v16899_v49  ;;  %v7589_v15 = vsub.f32 %v4410_v29, %v7538_v20 }
 0x537   : > { %v6448_v32 = vadd.f32 %v6447_v18, %v6410_v50  ;;  %7007 = vmatmul.f32.gmra.mxu0 %v19903_v16  ;;  %7037 = vmatmul.f32.gmra.mxu1 %v16760_v17  ;;  %v7590_v55 = vand.u32 4294901760, %v7589_v15 }
 0x538   : > { %7129 = vmatmul.f32.gmra.mxu3 %v19903_v16 }
 0x539   : > { %v6489_v63 = vadd.f32 %v6488_v0, %v6448_v32  ;;  %7091 = vmatmul.f32.gmra.mxu2 %v16814_v48 }
 0x53b   : > { %v6494_v21 = vpop.f32.mrf.mxu3 }
 0x53c   : > { %v6413_v26 = vpop.f32.mrf.mxu1  ;;  %v6518_v36 = vpop.f32.mrf.mxu0 }
 0x53d   : > { %v6414_v57 = vadd.f32 %v6413_v26, %v6376_v35  ;;  %v6452_v60 = vpop.f32.mrf.mxu2  ;;  %v6519_v7 = vadd.f32 %v6518_v36, %v6477_v1 }
 0x53f   : > { %v6453_v62 = vadd.f32 %v6452_v60, %v6414_v57  ;;  %7041 = vmatmul.f32.gmra.mxu1 %v19903_v16  ;;  %7153 = vmatmul.f32.vlgmr.msrb.gmra.mxu0 %v19908_v39 }
 0x540   : > { %7268 = vmatmul.f32.vlgmr.msrb.gmra.mxu3 %v16724_v2  ;;  %7471 = vmatpush.msrb.mxu0 %v7351_v9 }
 0x541   : > { %v6495_v12 = vadd.f32 %v6494_v21, %v6453_v62  ;;  %7234 = vmatmul.f32.vlgmr.msrb.gmra.mxu2 %v16724_v2 }
 0x542   : > { %7539 = vmatpush.msrb.mxu2 %v7538_v20 }
 0x543   : > { %v6640_v33 = vpop.f32.mrf.mxu3 }
 0x544   : > { %v6522_v25 = vpop.f32.mrf.mxu0  ;;  %v6552_v34 = vpop.f32.mrf.mxu1 }
 0x545   : > { %v6553_v31 = vadd.f32 %v6552_v34, %v6519_v7  ;;  %v6590_v58 = vpop.f32.mrf.mxu2  ;;  %v6523_v27 = vadd.f32 %v6522_v25, %v6483_v47 }
 0x546   : > { %v6591_v24 = vadd.f32 %v6590_v58, %v19904_v4 }
 0x547   : > { %v8248_v54 = vmax.f32 %v6553_v31, 0.0  ;;  %7158 = vmatmul.f32.gmra.mxu0 %v16754_v14  ;;  %7192 = vmatmul.f32.vlgmr.msrb.gmra.mxu1 %v19909_v19 }
 0x548   : > { %v6641_v44 = vadd.f32 %v6640_v33, %v6591_v24  ;;  %7272 = vmatmul.f32.gmra.mxu3 %v16745_v10  ;;  %7505 = vmatpush.msrb.mxu1 %v7299_v56 }
 0x549   : > { %v18069_v1 = vadd.f32 %v17986_v11, %v8248_v54  ;;  %7238 = vmatmul.f32.gmra.mxu2 %v16745_v10  ;;  %v7591_v11 = vsub.f32 %v7589_v15, %v7590_v55 }
 0x54b   : > { %v6644_v9 = vpop.f32.mrf.mxu3  ;;  %v7592_v32 = vand.u32 4294901760, %v7591_v11 }
 0x54c   : > { %v6526_v5 = vpop.f32.mrf.mxu0  ;;  %v6556_v0 = vpop.f32.mrf.mxu1 }
 0x54d   : > { %v6557_v59 = vadd.f32 %v6556_v0, %v6523_v27  ;;  %v6598_v52 = vpop.f32.mrf.mxu2  ;;  %v6527_v35 = vadd.f32 %v6526_v5, %v6489_v63  ;;  %7593 = vmatpush.msrb.mxu3 %v7592_v32 }
 0x54e   : > { %v6599_v50 = vadd.f32 %v6598_v52, %v16879_v13 }
 0x54f   : > { %v8264_v18 = vmax.f32 %v6557_v59, 0.0  ;;  %7163 = vmatmul.f32.gmra.mxu0 %v16777_v30  ;;  %7198 = vmatmul.f32.gmra.mxu1 %v16767_v23 }
 0x550   : > { %v6645_v56 = vadd.f32 %v6644_v9, %v6599_v50  ;;  %7276 = vmatmul.f32.gmra.mxu3 %v16760_v17 }
 0x551   : > { %v18077_v47 = vadd.f32 %v17994_v3, %v8264_v18  ;;  %7242 = vmatmul.f32.gmra.mxu2 %v16760_v17 }
 0x553   : > { %v6648_v21 = vpop.f32.mrf.mxu3 }
 0x554   : > { %v6530_v26 = vpop.f32.mrf.mxu0  ;;  %v6560_v36 = vpop.f32.mrf.mxu1 }
 0x555   : > { %v6561_v57 = vadd.f32 %v6560_v36, %v6527_v35  ;;  %v6606_v60 = vpop.f32.mrf.mxu2  ;;  %v6531_v63 = vadd.f32 %v6530_v26, %v6495_v12 }
 0x556   : > { %v6607_v62 = vadd.f32 %v6606_v60, %v16889_v22 }
 0x557   : > { %v8280_v7 = vmax.f32 %v6561_v57, 0.0  ;;  %7168 = vmatmul.f32.gmra.mxu0 %v16796_v43  ;;  %7204 = vmatmul.f32.gmra.mxu1 %v16787_v38 }
 0x558   : > { %v6649_v33 = vadd.f32 %v6648_v21, %v6607_v62  ;;  %7280 = vmatmul.f32.gmra.mxu3 %v19903_v16 }
 0x559   : > { %v18085_v3 = vadd.f32 %v18002_v53, %v8280_v7  ;;  %7246 = vmatmul.f32.gmra.mxu2 %v19903_v16 }
 0x55b   : > { %v6652_v25 = vpop.f32.mrf.mxu3 }
 0x55c   : > { %v6564_v34 = vpop.f32.mrf.mxu1  ;;  %v6676_v31 = vpop.f32.mrf.mxu0 }
 0x55d   : > { %v6565_v58 = vadd.f32 %v6564_v34, %v6531_v63  ;;  %v6614_v24 = vpop.f32.mrf.mxu2  ;;  %v6677_v12 = vadd.f32 %v6676_v31, %v6641_v44 }
 0x55e   : > { %v6615_v54 = vadd.f32 %v6614_v24, %v16899_v49 }
 0x55f   : > { %v8296_v28 = vmax.f32 %v6565_v58, 0.0  ;;  %7210 = vmatmul.f32.gmra.mxu1 %v16806_v46  ;;  %7306 = vmatmul.f32.vlgmr.msra.gmra.mxu0 %v19905_v8 }
 0x560   : > { %v6653_v40 = vadd.f32 %v6652_v25, %v6615_v54  ;;  %7431 = vmatmul.f32.vlgmr.msra.gmra.mxu3 %v19909_v19  ;;  %7628 = vmatpush.msra.mxu0 %v7589_v15 }
 0x561   : > { %v18093_v53 = vadd.f32 %v18010_v51, %v8296_v28  ;;  %7392 = vmatmul.f32.vlgmr.msra.gmra.mxu2 %v19908_v39  ;;  %7744 = vmatpush.msra.mxu3 %v7538_v20 }
 0x562   : > { %7710 = vmatpush.msra.mxu2 %v7590_v55 }
 0x563   : > { %v6791_v29 = vpop.f32.mrf.mxu3 }
 0x564   : > { %v6681_v27 = vpop.f32.mrf.mxu0  ;;  %v6715_v9 = vpop.f32.mrf.mxu1 }
 0x565   : > { %v6716_v5 = vadd.f32 %v6715_v9, %v6677_v12  ;;  %v6757_v0 = vpop.f32.mrf.mxu2  ;;  %v6682_v15 = vadd.f32 %v6681_v27, %v6645_v56 }
 0x567   : > { %v6758_v59 = vadd.f32 %v6757_v0, %v6716_v5  ;;  %7314 = vmatmul.f32.gmra.mxu0 %v16784_v37  ;;  %7356 = vmatmul.f32.vlgmr.msra.gmra.mxu1 %v16724_v2 }
 0x568   : > { %7437 = vmatmul.f32.gmra.mxu3 %v16767_v23  ;;  %7666 = vmatpush.msra.mxu1 %v7538_v20 }
 0x569   : > { %v6792_v51 = vadd.f32 %v6791_v29, %v6758_v59  ;;  %7397 = vmatmul.f32.gmra.mxu2 %v16754_v14 }
 0x56b   : > { %v8249_v52 = vmax.f32 %v6792_v51, 0.0  ;;  %v6795_v55 = vpop.f32.mrf.mxu3 }
 0x56c   : > { %v6686_v44 = vpop.f32.mrf.mxu0  ;;  %v6721_v50 = vpop.f32.mrf.mxu1 }
 0x56d   : > { %v18101_v18 = vadd.f32 %v18018_v41, %v8249_v52  ;;  %v6722_v11 = vadd.f32 %v6721_v50, %v6682_v15  ;;  %v6761_v32 = vpop.f32.mrf.mxu2  ;;  %v6687_v56 = vadd.f32 %v6686_v44, %v6649_v33 }
 0x56f   : > { %v6762_v35 = vadd.f32 %v6761_v32, %v6722_v11  ;;  %7322 = vmatmul.f32.gmra.mxu0 %v16803_v45  ;;  %7360 = vmatmul.f32.gmra.mxu1 %v16745_v10 }
 0x570   : > { %7443 = vmatmul.f32.gmra.mxu3 %v16787_v38 }
 0x571   : > { %v6796_v20 = vadd.f32 %v6795_v55, %v6762_v35  ;;  %7402 = vmatmul.f32.gmra.mxu2 %v16777_v30  ;;  %v4382_v55 = vld.sshfl [vmem:[#allocation1 + $0x30] sm:$0xff pattern:$0x75316420] }
 0x572   : > { %v4412_v44 = vsel %vm336_vm1, %v4382_v55, 0 }
 0x573   : > { %v8265_v21 = vmax.f32 %v6796_v20, 0.0  ;;  %v6799_v26 = vpop.f32.mrf.mxu3 }
 0x574   : > { %v6691_v36 = vpop.f32.mrf.mxu0  ;;  %v6727_v57 = vpop.f32.mrf.mxu1 }
 0x575   : > { %v18108_v41 = vadd.f32 %v18025_v6, %v8265_v21  ;;  %v6728_v60 = vadd.f32 %v6727_v57, %v6687_v56  ;;  %v6765_v62 = vpop.f32.mrf.mxu2  ;;  %v6692_v33 = vadd.f32 %v6691_v36, %v6653_v40 }
 0x577   : > { %v6766_v7 = vadd.f32 %v6765_v62, %v6728_v60  ;;  %7330 = vmatmul.f32.gmra.mxu0 %v16814_v48  ;;  %7364 = vmatmul.f32.gmra.mxu1 %v16760_v17 }
 0x578   : > { %7449 = vmatmul.f32.gmra.mxu3 %v16806_v46 }
 0x579   : > { %v6800_v63 = vadd.f32 %v6799_v26, %v6766_v7  ;;  %7407 = vmatmul.f32.gmra.mxu2 %v16796_v43 }
 0x57b   : > { %v8281_v25 = vmax.f32 %v6800_v63, 0.0  ;;  %v6803_v34 = vpop.f32.mrf.mxu3 }
 0x57c   : > { %v6733_v31 = vpop.f32.mrf.mxu1  ;;  %v6829_v58 = vpop.f32.mrf.mxu0 }
 0x57d   : > { %v18115_v6 = vadd.f32 %v18032_v61, %v8281_v25  ;;  %v6734_v24 = vadd.f32 %v6733_v31, %v6692_v33  ;;  %v6769_v54 = vpop.f32.mrf.mxu2  ;;  %v6830_v12 = vadd.f32 %v6829_v58, %v19904_v4 }
 0x57f   : > { %v6770_v28 = vadd.f32 %v6769_v54, %v6734_v24  ;;  %7368 = vmatmul.f32.gmra.mxu1 %v19903_v16  ;;  %7473 = vmatmul.f32.vlgmr.msrb.gmra.mxu0 %v16724_v2 }
 0x580   : > { %7595 = vmatmul.f32.vlgmr.msrb.gmra.mxu3 %v16724_v2 }
 0x581   : > { %v6804_v29 = vadd.f32 %v6803_v34, %v6770_v28  ;;  %7545 = vmatmul.f32.vlgmr.msrb.gmra.mxu2 %v19905_v8 }
 0x583   : > { %v8297_v40 = vmax.f32 %v6804_v29, 0.0  ;;  %v6954_v27 = vpop.f32.mrf.mxu3 }
 0x584   : > { %v6837_v9 = vpop.f32.mrf.mxu0  ;;  %v6879_v5 = vpop.f32.mrf.mxu1 }
 0x585   : > { %v18123_v61 = vadd.f32 %v18040_v42, %v8297_v40  ;;  %v6880_v0 = vadd.f32 %v6879_v5, %v6830_v12  ;;  %v6915_v59 = vpop.f32.mrf.mxu2  ;;  %v6838_v15 = vadd.f32 %v6837_v9, %v16879_v13  ;;  %v7777_v42 = vand.u32 4294901760, %v4412_v44 }
 0x587   : > { %v6916_v51 = vadd.f32 %v6915_v59, %v6880_v0  ;;  %7477 = vmatmul.f32.gmra.mxu0 %v16745_v10  ;;  %7507 = vmatmul.f32.vlgmr.msrb.gmra.mxu1 %v16724_v2  ;;  %v7828_v56 = vsub.f32 %v4412_v44, %v7777_v42 }
 0x588   : > { %7599 = vmatmul.f32.gmra.mxu3 %v16745_v10  ;;  %7778 = vmatpush.msrb.mxu0 %v7777_v42 }
 0x589   : > { %v6955_v52 = vadd.f32 %v6954_v27, %v6916_v51  ;;  %7553 = vmatmul.f32.gmra.mxu2 %v16784_v37  ;;  %7905 = vmatpush.msrb.mxu3 %v7777_v42  ;;  %v7829_v26 = vand.u32 4294901760, %v7828_v56 }
 0x58a   : > { %7867 = vmatpush.msrb.mxu2 %v7828_v56 }
 0x58b   : > { %v6960_v50 = vpop.f32.mrf.mxu3  ;;  %v7830_v60 = vsub.f32 %v7828_v56, %v7829_v26 }
 0x58c   : > { %v6845_v11 = vpop.f32.mrf.mxu0  ;;  %v6883_v32 = vpop.f32.mrf.mxu1 }
 0x58d   : > { %v6884_v35 = vadd.f32 %v6883_v32, %v6838_v15  ;;  %v6920_v20 = vpop.f32.mrf.mxu2  ;;  %v6846_v36 = vadd.f32 %v6845_v11, %v16889_v22  ;;  %v7831_v7 = vand.u32 4294901760, %v7830_v60  ;;  %v4383_v11 = vld.sshfl [vmem:[#allocation1 + $0x38] sm:$0xff pattern:$0x75316420] }
 0x58e   : > { %v16601_v32 = vld [vmem:[%s16739_s29 + $0x98] sm:$0x77] }
 0x58f   : > { %v6921_v21 = vadd.f32 %v6920_v20, %v6884_v35  ;;  %7481 = vmatmul.f32.gmra.mxu0 %v16760_v17  ;;  %7511 = vmatmul.f32.gmra.mxu1 %v16745_v10  ;;  %v4414_v20 = vsel %vm336_vm1, %v4383_v11, 0  ;;  %8409 = vst [vmem:[#allocation1 + $0x30] ss:$2 sm:$0xff] %v16601_v32 }
 0x590   : > { %7603 = vmatmul.f32.gmra.mxu3 %v16760_v17  ;;  %7832 = vmatpush.msrb.mxu1 %v7831_v7  ;;  %v8016_v56 = vand.u32 4294901760, %v4414_v20 }
 0x591   : > { %v6961_v57 = vadd.f32 %v6960_v50, %v6921_v21  ;;  %7561 = vmatmul.f32.gmra.mxu2 %v16803_v45 }
 0x593   : > { %v6966_v62 = vpop.f32.mrf.mxu3 }
 0x594   : > { %v6853_v63 = vpop.f32.mrf.mxu0  ;;  %v6887_v33 = vpop.f32.mrf.mxu1 }
 0x595   : > { %v6888_v25 = vadd.f32 %v6887_v33, %v6846_v36  ;;  %v6925_v34 = vpop.f32.mrf.mxu2  ;;  %v6854_v58 = vadd.f32 %v6853_v63, %v16899_v49  ;;  %v8067_v36 = vsub.f32 %v4414_v20, %v8016_v56 }
 0x597   : > { %v6926_v31 = vadd.f32 %v6925_v34, %v6888_v25  ;;  %7485 = vmatmul.f32.gmra.mxu0 %v19903_v16  ;;  %7515 = vmatmul.f32.gmra.mxu1 %v16760_v17  ;;  %v8068_v33 = vand.u32 4294901760, %v8067_v36 }
 0x598   : > { %7607 = vmatmul.f32.gmra.mxu3 %v19903_v16 }
 0x599   : > { %v6967_v24 = vadd.f32 %v6966_v62, %v6926_v31  ;;  %7569 = vmatmul.f32.gmra.mxu2 %v16814_v48 }
 0x59b   : > { %v6972_v54 = vpop.f32.mrf.mxu3 }
 0x59c   : > { %v6891_v28 = vpop.f32.mrf.mxu1  ;;  %v6996_v12 = vpop.f32.mrf.mxu0 }
 0x59d   : > { %v6892_v29 = vadd.f32 %v6891_v28, %v6854_v58  ;;  %v6930_v40 = vpop.f32.mrf.mxu2  ;;  %v6997_v5 = vadd.f32 %v6996_v12, %v6955_v52 }
 0x59f   : > { %v6931_v27 = vadd.f32 %v6930_v40, %v6892_v29  ;;  %7519 = vmatmul.f32.gmra.mxu1 %v19903_v16  ;;  %7631 = vmatmul.f32.vlgmr.msra.gmra.mxu0 %v19908_v39 }
 0x5a0   : > { %7746 = vmatmul.f32.vlgmr.msra.gmra.mxu3 %v16724_v2  ;;  %7949 = vmatpush.msra.mxu0 %v7829_v26 }
 0x5a1   : > { %v6973_v9 = vadd.f32 %v6972_v54, %v6931_v27  ;;  %7712 = vmatmul.f32.vlgmr.msra.gmra.mxu2 %v16724_v2 }
 0x5a2   : > { %8017 = vmatpush.msra.mxu2 %v8016_v56 }
 0x5a3   : > { %v7118_v0 = vpop.f32.mrf.mxu3 }
 0x5a4   : > { %v7000_v59 = vpop.f32.mrf.mxu0  ;;  %v7030_v51 = vpop.f32.mrf.mxu1 }
 0x5a5   : > { %v7031_v15 = vadd.f32 %v7030_v51, %v6997_v5  ;;  %v7068_v55 = vpop.f32.mrf.mxu2  ;;  %v7001_v21 = vadd.f32 %v7000_v59, %v6961_v57 }
 0x5a6   : > { %v7069_v44 = vadd.f32 %v7068_v55, %v19904_v4 }
 0x5a7   : > { %v8250_v50 = vmax.f32 %v7031_v15, 0.0  ;;  %7636 = vmatmul.f32.gmra.mxu0 %v16754_v14  ;;  %7670 = vmatmul.f32.vlgmr.msra.gmra.mxu1 %v19909_v19 }
 0x5a8   : > { %v7119_v35 = vadd.f32 %v7118_v0, %v7069_v44  ;;  %7750 = vmatmul.f32.gmra.mxu3 %v16745_v10  ;;  %7983 = vmatpush.msra.mxu1 %v7777_v42 }
 0x5a9   : > { %v18152_v52 = vadd.f32 %v18069_v1, %v8250_v50  ;;  %7716 = vmatmul.f32.gmra.mxu2 %v16745_v10  ;;  %v8069_v1 = vsub.f32 %v8067_v36, %v8068_v33 }
 0x5ab   : > { %v7122_v26 = vpop.f32.mrf.mxu3  ;;  %v8070_v31 = vand.u32 4294901760, %v8069_v1 }
 0x5ac   : > { %v7004_v60 = vpop.f32.mrf.mxu0  ;;  %v7034_v62 = vpop.f32.mrf.mxu1 }
 0x5ad   : > { %v7035_v7 = vadd.f32 %v7034_v62, %v7001_v21  ;;  %v7076_v63 = vpop.f32.mrf.mxu2  ;;  %v7005_v58 = vadd.f32 %v7004_v60, %v6967_v24  ;;  %8071 = vmatpush.msra.mxu3 %v8070_v31 }
 0x5ae   : > { %v7077_v25 = vadd.f32 %v7076_v63, %v16879_v13 }
 0x5af   : > { %v8266_v34 = vmax.f32 %v7035_v7, 0.0  ;;  %7641 = vmatmul.f32.gmra.mxu0 %v16777_v30  ;;  %7676 = vmatmul.f32.gmra.mxu1 %v16767_v23 }
 0x5b0   : > { %v7123_v42 = vadd.f32 %v7122_v26, %v7077_v25  ;;  %7754 = vmatmul.f32.gmra.mxu3 %v16760_v17 }
 0x5b1   : > { %v18160_v57 = vadd.f32 %v18077_v47, %v8266_v34  ;;  %7720 = vmatmul.f32.gmra.mxu2 %v16760_v17 }
 0x5b3   : > { %v7126_v54 = vpop.f32.mrf.mxu3 }
 0x5b4   : > { %v7008_v28 = vpop.f32.mrf.mxu0  ;;  %v7038_v12 = vpop.f32.mrf.mxu1 }
 0x5b5   : > { %v7039_v29 = vadd.f32 %v7038_v12, %v7005_v58  ;;  %v7084_v40 = vpop.f32.mrf.mxu2  ;;  %v7009_v24 = vadd.f32 %v7008_v28, %v6973_v9 }
 0x5b6   : > { %v7085_v27 = vadd.f32 %v7084_v40, %v16889_v22 }
 0x5b7   : > { %v8282_v5 = vmax.f32 %v7039_v29, 0.0  ;;  %7646 = vmatmul.f32.gmra.mxu0 %v16796_v43  ;;  %7682 = vmatmul.f32.gmra.mxu1 %v16787_v38 }
 0x5b8   : > { %v7127_v0 = vadd.f32 %v7126_v54, %v7085_v27  ;;  %7758 = vmatmul.f32.gmra.mxu3 %v19903_v16 }
 0x5b9   : > { %v18168_v47 = vadd.f32 %v18085_v3, %v8282_v5  ;;  %7724 = vmatmul.f32.gmra.mxu2 %v19903_v16 }
 0x5bb   : > { %v7130_v59 = vpop.f32.mrf.mxu3 }
 0x5bc   : > { %v7042_v51 = vpop.f32.mrf.mxu1  ;;  %v7154_v15 = vpop.f32.mrf.mxu0 }
 0x5bd   : > { %v7043_v55 = vadd.f32 %v7042_v51, %v7009_v24  ;;  %v7092_v44 = vpop.f32.mrf.mxu2  ;;  %v7155_v9 = vadd.f32 %v7154_v15, %v7119_v35 }
 0x5be   : > { %v7093_v50 = vadd.f32 %v7092_v44, %v16899_v49 }
 0x5bf   : > { %v8298_v11 = vmax.f32 %v7043_v55, 0.0  ;;  %7688 = vmatmul.f32.gmra.mxu1 %v16806_v46  ;;  %7784 = vmatmul.f32.vlgmr.msrb.gmra.mxu0 %v19905_v8 }
 0x5c0   : > { %v7131_v32 = vadd.f32 %v7130_v59, %v7093_v50  ;;  %7909 = vmatmul.f32.vlgmr.msrb.gmra.mxu3 %v19909_v19  ;;  %8106 = vmatpush.msrb.mxu0 %v8067_v36 }
 0x5c1   : > { %v18176_v3 = vadd.f32 %v18093_v53, %v8298_v11  ;;  %7870 = vmatmul.f32.vlgmr.msrb.gmra.mxu2 %v19908_v39  ;;  %8222 = vmatpush.msrb.mxu3 %v8016_v56 }
 0x5c2   : > { %8188 = vmatpush.msrb.mxu2 %v8068_v33 }
 0x5c3   : > { %v7269_v20 = vpop.f32.mrf.mxu3 }
 0x5c4   : > { %v7159_v21 = vpop.f32.mrf.mxu0  ;;  %v7193_v26 = vpop.f32.mrf.mxu1 }
 0x5c5   : > { %v7194_v60 = vadd.f32 %v7193_v26, %v7155_v9  ;;  %v7235_v62 = vpop.f32.mrf.mxu2  ;;  %v7160_v36 = vadd.f32 %v7159_v21, %v7123_v42 }
 0x5c7   : > { %v7236_v7 = vadd.f32 %v7235_v62, %v7194_v60  ;;  %7792 = vmatmul.f32.gmra.mxu0 %v16784_v37  ;;  %7834 = vmatmul.f32.vlgmr.msrb.gmra.mxu1 %v16724_v2 }
 0x5c8   : > { %7915 = vmatmul.f32.gmra.mxu3 %v16767_v23  ;;  %8144 = vmatpush.msrb.mxu1 %v8016_v56 }
 0x5c9   : > { %v7270_v53 = vadd.f32 %v7269_v20, %v7236_v7  ;;  %7875 = vmatmul.f32.gmra.mxu2 %v16754_v14 }
 0x5cb   : > { %v8251_v63 = vmax.f32 %v7270_v53, 0.0  ;;  %v7273_v33 = vpop.f32.mrf.mxu3 }
 0x5cc   : > { %v7164_v35 = vpop.f32.mrf.mxu0  ;;  %v7199_v25 = vpop.f32.mrf.mxu1 }
 0x5cd   : > { %v18184_v34 = vadd.f32 %v18101_v18, %v8251_v63  ;;  %v7200_v1 = vadd.f32 %v7199_v25, %v7160_v36  ;;  %v7239_v31 = vpop.f32.mrf.mxu2  ;;  %v7165_v42 = vadd.f32 %v7164_v35, %v7127_v0 }
 0x5cf   : > { %v7240_v58 = vadd.f32 %v7239_v31, %v7200_v1  ;;  %7800 = vmatmul.f32.gmra.mxu0 %v16803_v45  ;;  %7838 = vmatmul.f32.gmra.mxu1 %v16745_v10 }
 0x5d0   : > { %7921 = vmatmul.f32.gmra.mxu3 %v16787_v38 }
 0x5d1   : > { %v7274_v56 = vadd.f32 %v7273_v33, %v7240_v58  ;;  %7880 = vmatmul.f32.gmra.mxu2 %v16777_v30  ;;  %v8410_v33 = vld.sshfl [vmem:[#allocation1] sm:$0xff pattern:$0x75316420] }
 0x5d2   : > { %v8430_v35 = vsel %vm336_vm1, %v8410_v33, 0 }
 0x5d3   : > { %v8267_v54 = vmax.f32 %v7274_v56, 0.0  ;;  %v7277_v28 = vpop.f32.mrf.mxu3 }
 0x5d4   : > { %v7169_v12 = vpop.f32.mrf.mxu0  ;;  %v7205_v29 = vpop.f32.mrf.mxu1 }
 0x5d5   : > { %v18191_v18 = vadd.f32 %v18108_v41, %v8267_v54  ;;  %v7206_v40 = vadd.f32 %v7205_v29, %v7165_v42  ;;  %v7243_v27 = vpop.f32.mrf.mxu2  ;;  %v7170_v0 = vadd.f32 %v7169_v12, %v7131_v32 }
 0x5d7   : > { %v7244_v5 = vadd.f32 %v7243_v27, %v7206_v40  ;;  %7808 = vmatmul.f32.gmra.mxu0 %v16814_v48  ;;  %7842 = vmatmul.f32.gmra.mxu1 %v16760_v17 }
 0x5d8   : > { %7927 = vmatmul.f32.gmra.mxu3 %v16806_v46 }
 0x5d9   : > { %v7278_v24 = vadd.f32 %v7277_v28, %v7244_v5  ;;  %7885 = vmatmul.f32.gmra.mxu2 %v16796_v43 }
 0x5db   : > { %v8283_v59 = vmax.f32 %v7278_v24, 0.0  ;;  %v7281_v51 = vpop.f32.mrf.mxu3 }
 0x5dc   : > { %v7211_v15 = vpop.f32.mrf.mxu1  ;;  %v7307_v55 = vpop.f32.mrf.mxu0 }
 0x5dd   : > { %v18198_v41 = vadd.f32 %v18115_v6, %v8283_v59  ;;  %v7212_v44 = vadd.f32 %v7211_v15, %v7170_v0  ;;  %v7247_v50 = vpop.f32.mrf.mxu2  ;;  %v7308_v9 = vadd.f32 %v7307_v55, %v19904_v4 }
 0x5df   : > { %v7248_v11 = vadd.f32 %v7247_v50, %v7212_v44  ;;  %7846 = vmatmul.f32.gmra.mxu1 %v19903_v16  ;;  %7951 = vmatmul.f32.vlgmr.msra.gmra.mxu0 %v16724_v2 }
 0x5e0   : > { %8073 = vmatmul.f32.vlgmr.msra.gmra.mxu3 %v16724_v2 }
 0x5e1   : > { %v7282_v20 = vadd.f32 %v7281_v51, %v7248_v11  ;;  %8023 = vmatmul.f32.vlgmr.msra.gmra.mxu2 %v19905_v8 }
 0x5e3   : > { %v8299_v32 = vmax.f32 %v7282_v20, 0.0  ;;  %v7432_v21 = vpop.f32.mrf.mxu3 }
 0x5e4   : > { %v7315_v26 = vpop.f32.mrf.mxu0  ;;  %v7357_v60 = vpop.f32.mrf.mxu1 }
 0x5e5   : > { %v18206_v6 = vadd.f32 %v18123_v61, %v8299_v32  ;;  %v7358_v62 = vadd.f32 %v7357_v60, %v7308_v9  ;;  %v7393_v7 = vpop.f32.mrf.mxu2  ;;  %v7316_v36 = vadd.f32 %v7315_v26, %v16879_v13  ;;  %v8477_v61 = vand.u32 4294901760, %v8430_v35 }
 0x5e7   : > { %v7394_v53 = vadd.f32 %v7393_v7, %v7358_v62  ;;  %7955 = vmatmul.f32.gmra.mxu0 %v16745_v10  ;;  %7985 = vmatmul.f32.vlgmr.msra.gmra.mxu1 %v16724_v2  ;;  %v8528_v42 = vsub.f32 %v8430_v35, %v8477_v61 }
 0x5e8   : > { %8077 = vmatmul.f32.gmra.mxu3 %v16745_v10  ;;  %8478 = vmatpush.msra.mxu0 %v8477_v61 }
 0x5e9   : > { %v7433_v63 = vadd.f32 %v7432_v21, %v7394_v53  ;;  %8031 = vmatmul.f32.gmra.mxu2 %v16784_v37  ;;  %8605 = vmatpush.msra.mxu3 %v8477_v61  ;;  %v8529_v28 = vand.u32 4294901760, %v8528_v42 }
 0x5ea   : > { %8567 = vmatpush.msra.mxu2 %v8528_v42 }
 0x5eb   : > { %v7438_v25 = vpop.f32.mrf.mxu3  ;;  %v8530_v40 = vsub.f32 %v8528_v42, %v8529_v28 }
 0x5ec   : > { %v7323_v1 = vpop.f32.mrf.mxu0  ;;  %v7361_v31 = vpop.f32.mrf.mxu1 }
 0x5ed   : > { %v7362_v58 = vadd.f32 %v7361_v31, %v7316_v36  ;;  %v7398_v56 = vpop.f32.mrf.mxu2  ;;  %v7324_v12 = vadd.f32 %v7323_v1, %v16889_v22  ;;  %v8531_v5 = vand.u32 4294901760, %v8530_v40  ;;  %v8411_v1 = vld.sshfl [vmem:[#allocation1 + $0x8] sm:$0xff pattern:$0x75316420] }
 0x5ef   : > { %v7399_v54 = vadd.f32 %v7398_v56, %v7362_v58  ;;  %7959 = vmatmul.f32.gmra.mxu0 %v16760_v17  ;;  %7989 = vmatmul.f32.gmra.mxu1 %v16745_v10  ;;  %v8432_v58 = vsel %vm336_vm1, %v8411_v1, 0 }
 0x5f0   : > { %8081 = vmatmul.f32.gmra.mxu3 %v16760_v17  ;;  %8532 = vmatpush.msra.mxu1 %v8531_v5  ;;  %v8716_v56 = vand.u32 4294901760, %v8432_v58 }
 0x5f1   : > { %v7439_v29 = vadd.f32 %v7438_v25, %v7399_v54  ;;  %8039 = vmatmul.f32.gmra.mxu2 %v16803_v45 }
 0x5f3   : > { %v7444_v27 = vpop.f32.mrf.mxu3 }
 0x5f4   : > { %v7331_v24 = vpop.f32.mrf.mxu0  ;;  %v7365_v0 = vpop.f32.mrf.mxu1 }
 0x5f5   : > { %v7366_v59 = vadd.f32 %v7365_v0, %v7324_v12  ;;  %v7403_v51 = vpop.f32.mrf.mxu2  ;;  %v7332_v55 = vadd.f32 %v7331_v24, %v16899_v49 }
 0x5f7   : > { %v7404_v15 = vadd.f32 %v7403_v51, %v7366_v59  ;;  %7963 = vmatmul.f32.gmra.mxu0 %v19903_v16  ;;  %7993 = vmatmul.f32.gmra.mxu1 %v16760_v17 }
 0x5f8   : > { %8085 = vmatmul.f32.gmra.mxu3 %v19903_v16 }
 0x5f9   : > { %v7445_v44 = vadd.f32 %v7444_v27, %v7404_v15  ;;  %8047 = vmatmul.f32.gmra.mxu2 %v16814_v48 }
 0x5fb   : > { %v7450_v50 = vpop.f32.mrf.mxu3 }
 0x5fc   : > { %v7369_v11 = vpop.f32.mrf.mxu1  ;;  %v7474_v9 = vpop.f32.mrf.mxu0 }
 0x5fd   : > { %v7370_v20 = vadd.f32 %v7369_v11, %v7332_v55  ;;  %v7408_v32 = vpop.f32.mrf.mxu2  ;;  %v7475_v60 = vadd.f32 %v7474_v9, %v7433_v63 }
 0x5ff   : > { %v7409_v21 = vadd.f32 %v7408_v32, %v7370_v20  ;;  %7997 = vmatmul.f32.gmra.mxu1 %v19903_v16  ;;  %8109 = vmatmul.f32.vlgmr.msrb.gmra.mxu0 %v19908_v39 }
 0x600   : > { %8224 = vmatmul.f32.vlgmr.msrb.gmra.mxu3 %v16724_v2  ;;  %8649 = vmatpush.msrb.mxu0 %v8529_v28  ;;  %v8767_v28 = vsub.f32 %v8432_v58, %v8716_v56 }
 0x601   : > { %v7451_v26 = vadd.f32 %v7450_v50, %v7409_v21  ;;  %8190 = vmatmul.f32.vlgmr.msrb.gmra.mxu2 %v16724_v2 }
 0x602   : > { %8717 = vmatpush.msrb.mxu2 %v8716_v56  ;;  %v8768_v24 = vand.u32 4294901760, %v8767_v28 }
 0x603   : > { %v7596_v62 = vpop.f32.mrf.mxu3 }
 0x604   : > { %v7478_v7 = vpop.f32.mrf.mxu0  ;;  %v7508_v53 = vpop.f32.mrf.mxu1 }
 0x605   : > { %v7509_v36 = vadd.f32 %v7508_v53, %v7475_v60  ;;  %v7546_v33 = vpop.f32.mrf.mxu2  ;;  %v7479_v42 = vadd.f32 %v7478_v7, %v7439_v29 }
 0x606   : > { %v7547_v35 = vadd.f32 %v7546_v33, %v19904_v4 }
 0x607   : > { %v8252_v25 = vmax.f32 %v7509_v36, 0.0  ;;  %8114 = vmatmul.f32.gmra.mxu0 %v16754_v14  ;;  %8148 = vmatmul.f32.vlgmr.msrb.gmra.mxu1 %v19909_v19 }
 0x608   : > { %v7597_v31 = vadd.f32 %v7596_v62, %v7547_v35  ;;  %8228 = vmatmul.f32.gmra.mxu3 %v16745_v10  ;;  %8683 = vmatpush.msrb.mxu1 %v8477_v61 }
 0x609   : > { %v18234_v63 = vadd.f32 %v18152_v52, %v8252_v25  ;;  %8194 = vmatmul.f32.gmra.mxu2 %v16745_v10  ;;  %v8769_v52 = vsub.f32 %v8767_v28, %v8768_v24 }
 0x60b   : > { %v7600_v54 = vpop.f32.mrf.mxu3  ;;  %v8770_v51 = vand.u32 4294901760, %v8769_v52 }
 0x60c   : > { %v7482_v12 = vpop.f32.mrf.mxu0  ;;  %v7512_v40 = vpop.f32.mrf.mxu1 }
 0x60d   : > { %v7513_v27 = vadd.f32 %v7512_v40, %v7479_v42  ;;  %v7554_v5 = vpop.f32.mrf.mxu2  ;;  %v7483_v15 = vadd.f32 %v7482_v12, %v7445_v44  ;;  %8771 = vmatpush.msrb.mxu3 %v8770_v51 }
 0x60e   : > { %v7555_v0 = vadd.f32 %v7554_v5, %v16879_v13 }
 0x60f   : > { %v8268_v59 = vmax.f32 %v7513_v27, 0.0  ;;  %8119 = vmatmul.f32.gmra.mxu0 %v16777_v30  ;;  %8154 = vmatmul.f32.gmra.mxu1 %v16767_v23 }
 0x610   : > { %v7601_v61 = vadd.f32 %v7600_v54, %v7555_v0  ;;  %8232 = vmatmul.f32.gmra.mxu3 %v16760_v17 }
 0x611   : > { %v18242_v29 = vadd.f32 %v18160_v57, %v8268_v59  ;;  %8198 = vmatmul.f32.gmra.mxu2 %v16760_v17 }
 0x613   : > { %v7604_v55 = vpop.f32.mrf.mxu3 }
 0x614   : > { %v7486_v50 = vpop.f32.mrf.mxu0  ;;  %v7516_v11 = vpop.f32.mrf.mxu1 }
 0x615   : > { %v7517_v9 = vadd.f32 %v7516_v11, %v7483_v15  ;;  %v7562_v20 = vpop.f32.mrf.mxu2  ;;  %v7487_v44 = vadd.f32 %v7486_v50, %v7451_v26 }
 0x616   : > { %v7563_v32 = vadd.f32 %v7562_v20, %v16889_v22 }
 0x617   : > { %v8284_v21 = vmax.f32 %v7517_v9, 0.0  ;;  %8124 = vmatmul.f32.gmra.mxu0 %v16796_v43  ;;  %8160 = vmatmul.f32.gmra.mxu1 %v16787_v38 }
 0x618   : > { %v7605_v60 = vadd.f32 %v7604_v55, %v7563_v32  ;;  %8236 = vmatmul.f32.gmra.mxu3 %v19903_v16 }
 0x619   : > { %v18250_v57 = vadd.f32 %v18168_v47, %v8284_v21  ;;  %8202 = vmatmul.f32.gmra.mxu2 %v19903_v16 }
 0x61b   : > { %19910 = vst [vmem:[#allocation8_spill] sm:$0xff] %v18250_v57  ;;  %v7608_v62 = vpop.f32.mrf.mxu3 }
 0x61c   : > { %v7520_v7 = vpop.f32.mrf.mxu1  ;;  %v7632_v53 = vpop.f32.mrf.mxu0 }
 0x61d   : > { %v7521_v36 = vadd.f32 %v7520_v7, %v7487_v44  ;;  %v7570_v33 = vpop.f32.mrf.mxu2  ;;  %v7633_v26 = vadd.f32 %v7632_v53, %v7597_v31 }
 0x61e   : > { %v7571_v35 = vadd.f32 %v7570_v33, %v16899_v49 }
 0x61f   : > { %v8300_v25 = vmax.f32 %v7521_v36, 0.0  ;;  %8166 = vmatmul.f32.gmra.mxu1 %v16806_v46  ;;  %8484 = vmatmul.f32.vlgmr.msra.gmra.mxu0 %v19905_v8 }
 0x620   : > { %v7609_v1 = vadd.f32 %v7608_v62, %v7571_v35  ;;  %8609 = vmatmul.f32.vlgmr.msra.gmra.mxu3 %v19909_v19  ;;  %8806 = vmatpush.msra.mxu0 %v8767_v28 }
 0x621   : > { %v18258_v47 = vadd.f32 %v18176_v3, %v8300_v25  ;;  %8570 = vmatmul.f32.vlgmr.msra.gmra.mxu2 %v19908_v39  ;;  %8922 = vmatpush.msra.mxu3 %v8716_v56 }
 0x622   : > { %8888 = vmatpush.msra.mxu2 %v8768_v24 }
 0x623   : > { %19911 = vst [vmem:[#allocation5_spill] sm:$0xff] %v18258_v47  ;;  %v7747_v58 = vpop.f32.mrf.mxu3 }
 0x624   : > { %v7637_v42 = vpop.f32.mrf.mxu0  ;;  %v7671_v54 = vpop.f32.mrf.mxu1 }
 0x625   : > { %v7672_v12 = vadd.f32 %v7671_v54, %v7633_v26  ;;  %v7713_v40 = vpop.f32.mrf.mxu2  ;;  %v7638_v28 = vadd.f32 %v7637_v42, %v7601_v61 }
 0x627   : > { %v7714_v27 = vadd.f32 %v7713_v40, %v7672_v12  ;;  %8492 = vmatmul.f32.gmra.mxu0 %v16784_v37  ;;  %8534 = vmatmul.f32.vlgmr.msra.gmra.mxu1 %v16724_v2  ;;  %v8412_v40 = vld.sshfl [vmem:[#allocation1 + $0x10] sm:$0xff pattern:$0x75316420] }
 0x628   : > { %8615 = vmatmul.f32.gmra.mxu3 %v16767_v23  ;;  %8844 = vmatpush.msra.mxu1 %v8716_v56 }
 0x629   : > { %v7748_v3 = vadd.f32 %v7747_v58, %v7714_v27  ;;  %8575 = vmatmul.f32.gmra.mxu2 %v16754_v14  ;;  %v8434_v27 = vsel %vm336_vm1, %v8412_v40, 0 }
 0x62b   : > { %v8253_v5 = vmax.f32 %v7748_v3, 0.0  ;;  %v7751_v24 = vpop.f32.mrf.mxu3 }
 0x62c   : > { %v7642_v31 = vpop.f32.mrf.mxu0  ;;  %v7677_v0 = vpop.f32.mrf.mxu1 }
 0x62d   : > { %v18266_v59 = vadd.f32 %v18184_v34, %v8253_v5  ;;  %v7678_v52 = vadd.f32 %v7677_v0, %v7638_v28  ;;  %v7717_v51 = vpop.f32.mrf.mxu2  ;;  %v7643_v61 = vadd.f32 %v7642_v31, %v7605_v60  ;;  %v8955_v28 = vand.u32 4294901760, %v8434_v27 }
 0x62f   : > { %v7718_v15 = vadd.f32 %v7717_v51, %v7678_v52  ;;  %8500 = vmatmul.f32.gmra.mxu0 %v16803_v45  ;;  %8538 = vmatmul.f32.gmra.mxu1 %v16745_v10  ;;  %v9006_v31 = vsub.f32 %v8434_v27, %v8955_v28 }
 0x630   : > { %8621 = vmatmul.f32.gmra.mxu3 %v16787_v38 }
 0x631   : > { %v7752_v56 = vadd.f32 %v7751_v24, %v7718_v15  ;;  %8580 = vmatmul.f32.gmra.mxu2 %v16777_v30  ;;  %v9007_v0 = vand.u32 4294901760, %v9006_v31 }
 0x633   : > { %v8269_v55 = vmax.f32 %v7752_v56, 0.0  ;;  %v7755_v50 = vpop.f32.mrf.mxu3  ;;  %v9008_v52 = vsub.f32 %v9006_v31, %v9007_v0 }
 0x634   : > { %v7647_v11 = vpop.f32.mrf.mxu0  ;;  %v7683_v9 = vpop.f32.mrf.mxu1 }
 0x635   : > { %v18273_v34 = vadd.f32 %v18191_v18, %v8269_v55  ;;  %v7684_v20 = vadd.f32 %v7683_v9, %v7643_v61  ;;  %v7721_v32 = vpop.f32.mrf.mxu2  ;;  %v7648_v60 = vadd.f32 %v7647_v11, %v7609_v1  ;;  %v9009_v15 = vand.u32 4294901760, %v9008_v52 }
 0x637   : > { %v7722_v21 = vadd.f32 %v7721_v32, %v7684_v20  ;;  %8508 = vmatmul.f32.gmra.mxu0 %v16814_v48  ;;  %8542 = vmatmul.f32.gmra.mxu1 %v16760_v17 }
 0x638   : > { %8627 = vmatmul.f32.gmra.mxu3 %v16806_v46 }
 0x639   : > { %v7756_v44 = vadd.f32 %v7755_v50, %v7722_v21  ;;  %8585 = vmatmul.f32.gmra.mxu2 %v16796_v43 }
 0x63b   : > { %v8285_v62 = vmax.f32 %v7756_v44, 0.0  ;;  %v7759_v7 = vpop.f32.mrf.mxu3 }
 0x63c   : > { %v7689_v53 = vpop.f32.mrf.mxu1  ;;  %v18279_v36 = vpop.f32.mrf.mxu0 }
 0x63d   : > { %v18282_v18 = vadd.f32 %v18198_v41, %v8285_v62  ;;  %v7690_v33 = vadd.f32 %v7689_v53, %v7648_v60  ;;  %v7725_v35 = vpop.f32.mrf.mxu2  ;;  %v8413_v62 = vld.sshfl [vmem:[#allocation1 + $0x18] sm:$0xff pattern:$0x75316420] }
 0x63f   : > { %19912 = vst [vmem:[#allocation7_spill] sm:$0xff] %v18282_v18  ;;  %v7726_v25 = vadd.f32 %v7725_v35, %v7690_v33  ;;  %8546 = vmatmul.f32.gmra.mxu1 %v19903_v16  ;;  %8651 = vmatmul.f32.vlgmr.msrb.gmra.mxu0 %v16724_v2 }
 0x640   : > { %8773 = vmatmul.f32.vlgmr.msrb.gmra.mxu3 %v16724_v2  ;;  %8956 = vmatpush.msrb.mxu0 %v8955_v28 }
 0x641   : > { %v7760_v26 = vadd.f32 %v7759_v7, %v7726_v25  ;;  %8723 = vmatmul.f32.vlgmr.msrb.gmra.mxu2 %v19905_v8  ;;  %9083 = vmatpush.msrb.mxu3 %v8955_v28  ;;  %v8436_v7 = vsel %vm336_vm1, %v8413_v62, 0 }
 0x642   : > { %9045 = vmatpush.msrb.mxu2 %v9006_v31  ;;  %v9194_v53 = vand.u32 4294901760, %v8436_v7  ;;  %v7786_v31 = vadd.f32 %v18279_v36, %v19904_v4 }
 0x643   : > { %v8301_v1 = vmax.f32 %v7760_v26, 0.0  ;;  %v18288_v58 = vpop.f32.mrf.mxu3 }
 0x644   : > { %v18290_v42 = vpop.f32.mrf.mxu0  ;;  %v18292_v54 = vpop.f32.mrf.mxu1  ;;  %v9245_v35 = vsub.f32 %v8436_v7, %v9194_v53 }
 0x645   : > { %v18295_v41 = vadd.f32 %v18206_v6, %v8301_v1  ;;  %v18297_v12 = vpop.f32.mrf.mxu2  ;;  %v7836_v7 = vadd.f32 %v18292_v54, %v7786_v31 }
 0x646   : > { %v9246_v40 = vand.u32 4294901760, %v9245_v35 }
 0x647   : > { %19913 = vst [vmem:[#allocation9_spill] sm:$0xff] %v18295_v41  ;;  %8655 = vmatmul.f32.gmra.mxu0 %v16745_v10  ;;  %8685 = vmatmul.f32.vlgmr.msrb.gmra.mxu1 %v16724_v2  ;;  %v7872_v36 = vadd.f32 %v18297_v12, %v7836_v7 }
 0x648   : > { %8777 = vmatmul.f32.gmra.mxu3 %v16745_v10  ;;  %9010 = vmatpush.msrb.mxu1 %v9009_v15  ;;  %v9247_v27 = vsub.f32 %v9245_v35, %v9246_v40 }
 0x649   : > { %8731 = vmatmul.f32.gmra.mxu2 %v16784_v37  ;;  %v7911_v18 = vadd.f32 %v18288_v58, %v7872_v36 }
 0x64b   : > { %v18304_v3 = vpop.f32.mrf.mxu3 }
 0x64c   : > { %v18306_v5 = vpop.f32.mrf.mxu0  ;;  %v18308_v6 = vpop.f32.mrf.mxu1 }
 0x64d   : > { %v18310_v24 = vpop.f32.mrf.mxu2 }
 0x64f   : > { %8659 = vmatmul.f32.gmra.mxu0 %v16760_v17  ;;  %8689 = vmatmul.f32.gmra.mxu1 %v16745_v10 }
 0x650   : > { %8781 = vmatmul.f32.gmra.mxu3 %v16760_v17 }
 0x651   : > { %8739 = vmatmul.f32.gmra.mxu2 %v16803_v45 }
 0x653   : > { %v18316_v51 = vpop.f32.mrf.mxu3 }
 0x654   : > { %v18318_v56 = vpop.f32.mrf.mxu0  ;;  %v18320_v61 = vpop.f32.mrf.mxu1 }
 0x655   : > { %v18322_v55 = vpop.f32.mrf.mxu2 }
 0x657   : > { %8663 = vmatmul.f32.gmra.mxu0 %v19903_v16  ;;  %8693 = vmatmul.f32.gmra.mxu1 %v16760_v17 }
 0x658   : > { %8785 = vmatmul.f32.gmra.mxu3 %v19903_v16 }
 0x659   : > { %8747 = vmatmul.f32.gmra.mxu2 %v16814_v48 }
 0x65b   : > { %v18328_v50 = vpop.f32.mrf.mxu3 }
 0x65c   : > { %v18330_v11 = vpop.f32.mrf.mxu1  ;;  %v7952_v9 = vpop.f32.mrf.mxu0 }
 0x65d   : > { %v18332_v20 = vpop.f32.mrf.mxu2  ;;  %v7953_v12 = vadd.f32 %v7952_v9, %v7911_v18 }
 0x65f   : > { %8697 = vmatmul.f32.gmra.mxu1 %v19903_v16  ;;  %8809 = vmatmul.f32.vlgmr.msra.gmra.mxu0 %v19908_v39 }
 0x660   : > { %8924 = vmatmul.f32.vlgmr.msra.gmra.mxu3 %v16724_v2  ;;  %9127 = vmatpush.msra.mxu0 %v9007_v0 }
 0x661   : > { %8890 = vmatmul.f32.vlgmr.msra.gmra.mxu2 %v16724_v2 }
 0x662   : > { %9195 = vmatpush.msra.mxu2 %v9194_v53 }
 0x663   : > { %v8074_v32 = vpop.f32.mrf.mxu3 }
 0x664   : > { %v18338_v21 = vpop.f32.mrf.mxu0  ;;  %v7986_v44 = vpop.f32.mrf.mxu1 }
 0x665   : > { %v8024_v60 = vpop.f32.mrf.mxu2  ;;  %v7987_v7 = vadd.f32 %v7986_v44, %v7953_v12 }
 0x666   : > { %v8025_v54 = vadd.f32 %v8024_v60, %v19904_v4  ;;  %v7802_v60 = vadd.f32 %v18306_v5, %v16889_v22 }
 0x667   : > { %8814 = vmatmul.f32.gmra.mxu0 %v16754_v14  ;;  %8848 = vmatmul.f32.vlgmr.msra.gmra.mxu1 %v19909_v19 }
 0x668   : > { %8928 = vmatmul.f32.gmra.mxu3 %v16745_v10  ;;  %9161 = vmatpush.msra.mxu1 %v8955_v28  ;;  %v9248_v28 = vand.u32 4294901760, %v9247_v27  ;;  %v7794_v27 = vadd.f32 %v18290_v42, %v16879_v13  ;;  %v8075_v42 = vadd.f32 %v8074_v32, %v8025_v54  ;;  %v7844_v32 = vadd.f32 %v18320_v61, %v7802_v60 }
 0x669   : > { %8894 = vmatmul.f32.gmra.mxu2 %v16745_v10  ;;  %v8254_v54 = vmax.f32 %v7987_v7, 0.0  ;;  %v7810_v61 = vadd.f32 %v18318_v56, %v16899_v49 }
 0x66a   : > { %9249 = vmatpush.msra.mxu3 %v9248_v28  ;;  %v7840_v57 = vadd.f32 %v18308_v6, %v7794_v27 }
 0x66b   : > { %v18345_v33 = vpop.f32.mrf.mxu3  ;;  %v8352_v44 = vadd.f32 %v18234_v63, %v8254_v54 }
 0x66c   : > { %v18347_v25 = vpop.f32.mrf.mxu0  ;;  %v18349_v26 = vpop.f32.mrf.mxu1  ;;  %v7877_v58 = vadd.f32 %v18310_v24, %v7840_v57 }
 0x66d   : > { %v8032_v1 = vpop.f32.mrf.mxu2 }
 0x66e   : > { %v8033_v18 = vadd.f32 %v8032_v1, %v16879_v13  ;;  %v7917_v4 = vadd.f32 %v18304_v3, %v7877_v58  ;;  %v7882_v3 = vadd.f32 %v18322_v55, %v7844_v32 }
 0x66f   : > { %8819 = vmatmul.f32.gmra.mxu0 %v16777_v30  ;;  %8854 = vmatmul.f32.gmra.mxu1 %v16767_v23 }
 0x670   : > { %8932 = vmatmul.f32.gmra.mxu3 %v16760_v17  ;;  %v7923_v55 = vadd.f32 %v18316_v51, %v7882_v3  ;;  %v19914_v3 = vld [vmem:[#allocation8_spill] sm:$0xff] }
 0x671   : > { %8898 = vmatmul.f32.gmra.mxu2 %v16760_v17 }
 0x673   : > { %v18357_v0 = vpop.f32.mrf.mxu3 }
 0x674   : > { %v18359_v52 = vpop.f32.mrf.mxu0  ;;  %v18361_v15 = vpop.f32.mrf.mxu1 }
 0x675   : > { %v8040_v62 = vpop.f32.mrf.mxu2 }
 0x677   : > { %8824 = vmatmul.f32.gmra.mxu0 %v16796_v43  ;;  %8860 = vmatmul.f32.gmra.mxu1 %v16787_v38 }
 0x678   : > { %8936 = vmatmul.f32.gmra.mxu3 %v19903_v16 }
 0x679   : > { %8902 = vmatmul.f32.gmra.mxu2 %v19903_v16 }
 0x67b   : > { %v18371_v28 = vpop.f32.mrf.mxu3 }
 0x67c   : > { %v18373_v41 = vpop.f32.mrf.mxu1  ;;  %v8110_v47 = vpop.f32.mrf.mxu0 }
 0x67d   : > { %v18376_v31 = vpop.f32.mrf.mxu2  ;;  %v8111_v6 = vadd.f32 %v8110_v47, %v8075_v42  ;;  %v7957_v47 = vadd.f32 %v18338_v21, %v7917_v4  ;;  %v8041_v42 = vadd.f32 %v8040_v62, %v16889_v22 }
 0x67f   : > { %8866 = vmatmul.f32.gmra.mxu1 %v16806_v46  ;;  %8962 = vmatmul.f32.vlgmr.msrb.gmra.mxu0 %v19905_v8  ;;  %v8083_v62 = vadd.f32 %v18357_v0, %v8041_v42  ;;  %v19915_v42 = vld [vmem:[#allocation7_spill] sm:$0xff] }
 0x680   : > { %9087 = vmatmul.f32.vlgmr.msrb.gmra.mxu3 %v19909_v19  ;;  %9284 = vmatpush.msrb.mxu0 %v9245_v35  ;;  %v16646_v19 = vld [vmem:[%s17607_s21] sm:$0xff] }
 0x681   : > { %9048 = vmatmul.f32.vlgmr.msrb.gmra.mxu2 %v19908_v39  ;;  %9400 = vmatpush.msrb.mxu3 %v9194_v53  ;;  %v8360_v39 = vperm.slane %v16646_v19, 1  ;;  %v8361_v57 = vperm.slane %v16646_v19, 5  ;;  %v7991_v19 = vadd.f32 %v18349_v26, %v7957_v47 }
 0x682   : > { %9366 = vmatpush.msrb.mxu2 %v9246_v40 }
 0x683   : > { %v8225_v36 = vpop.f32.mrf.mxu3  ;;  %v18401_v1 = vperm.slane %v8360_v39, 1  ;;  %v18404_v4 = vperm.slane %v8361_v57, 1  ;;  %v7848_v39 = vadd.f32 %v18330_v11, %v7810_v61  ;;  %v8270_v63 = vmax.f32 %v7991_v19, 0.0 }
 0x684   : > { %v8115_v27 = vpop.f32.mrf.mxu0  ;;  %v8149_v8 = vpop.f32.mrf.mxu1 }
 0x685   : > { %v8150_v9 = vadd.f32 %v8149_v8, %v8111_v6  ;;  %v8191_v35 = vpop.f32.mrf.mxu2  ;;  %v8079_v8 = vadd.f32 %v18345_v33, %v8033_v18  ;;  %v8366_v26 = vmul.f32 %v18401_v1, %v8352_v44  ;;  %v7887_v11 = vadd.f32 %v18332_v20, %v7848_v39  ;;  %v19916_v39 = vld [vmem:[#allocation6_spill] sm:$0xff] }
 0x687   : > { %v8192_v5 = vadd.f32 %v8191_v35, %v8150_v9  ;;  %8970 = vmatmul.f32.gmra.mxu0 %v16784_v37  ;;  %9012 = vmatmul.f32.vlgmr.msrb.gmra.mxu1 %v16724_v2  ;;  %v8116_v40 = vadd.f32 %v8115_v27, %v8079_v8  ;;  %v8354_v27 = vadd.f32 %v18242_v29, %v8270_v63 }
 0x688   : > { %9093 = vmatmul.f32.gmra.mxu3 %v16767_v23  ;;  %9322 = vmatpush.msrb.mxu1 %v9194_v53  ;;  %v7929_v8 = vadd.f32 %v18328_v50, %v7887_v11 }
 0x689   : > { %v8226_v24 = vadd.f32 %v8225_v36, %v8192_v5  ;;  %9053 = vmatmul.f32.gmra.mxu2 %v16754_v14  ;;  %v8368_v29 = vmul.f32 %v18401_v1, %v8354_v27 }
 0x68b   : > { %v8255_v53 = vmax.f32 %v8226_v24, 0.0  ;;  %v8229_v12 = vpop.f32.mrf.mxu3 }
 0x68c   : > { %v8120_v21 = vpop.f32.mrf.mxu0  ;;  %v8155_v33 = vpop.f32.mrf.mxu1 }
 0x68d   : > { %v8353_v60 = vadd.f32 %v18266_v59, %v8255_v53  ;;  %v8156_v56 = vadd.f32 %v8155_v33, %v8116_v40  ;;  %v8195_v7 = vpop.f32.mrf.mxu2  ;;  %v7961_v59 = vadd.f32 %v18347_v25, %v7923_v55  ;;  %v8121_v9 = vadd.f32 %v8120_v21, %v8083_v62 }
 0x68e   : > { %v8049_v25 = vadd.f32 %v18376_v31, %v16899_v49  ;;  %v7965_v31 = vadd.f32 %v18359_v52, %v7929_v8 }
 0x68f   : > { %v8196_v58 = vadd.f32 %v8195_v7, %v8156_v56  ;;  %8978 = vmatmul.f32.gmra.mxu0 %v16803_v45  ;;  %9016 = vmatmul.f32.gmra.mxu1 %v16745_v10  ;;  %v8367_v6 = vmul.f32 %v18404_v4, %v8353_v60  ;;  %v7995_v18 = vadd.f32 %v18361_v15, %v7961_v59  ;;  %v19918_v59 = vld [vmem:[#allocation5_spill] sm:$0xff] }
 0x690   : > { %9099 = vmatmul.f32.gmra.mxu3 %v16787_v38  ;;  %v7999_v19 = vadd.f32 %v18373_v41, %v7965_v31 }
 0x691   : > { %v8230_v36 = vadd.f32 %v8229_v12, %v8196_v58  ;;  %9058 = vmatmul.f32.gmra.mxu2 %v16777_v30  ;;  %v8374_v51 = vadd.f32 %v8367_v6, %v8366_v26  ;;  %v8286_v20 = vmax.f32 %v7995_v18, 0.0  ;;  %v19917_v26 = vld [vmem:[#allocation4_spill] sm:$0xff]  ;;  %v19919_v18 = vld [vmem:[#allocation9_spill] sm:$0xff] }
 0x692   : > { %v8302_v7 = vmax.f32 %v7999_v19, 0.0 }
 0x693   : > { %v8271_v35 = vmax.f32 %v8230_v36, 0.0  ;;  %8375 = vadd.xlane.f32.xlu2 %v8374_v51  ;;  %v8233_v32 = vpop.f32.mrf.mxu3  ;;  %v8356_v44 = vadd.f32 %v19914_v3, %v8286_v20 }
 0x694   : > { %v8125_v54 = vpop.f32.mrf.mxu0  ;;  %v8161_v5 = vpop.f32.mrf.mxu1  ;;  %v8358_v62 = vadd.f32 %v19918_v59, %v8302_v7 }
 0x695   : > { %v8355_v0 = vadd.f32 %v18273_v34, %v8271_v35  ;;  %v8162_v57 = vadd.f32 %v8161_v5, %v8121_v9  ;;  %v8199_v47 = vpop.f32.mrf.mxu2  ;;  %v8087_v34 = vadd.f32 %v18371_v28, %v8049_v25  ;;  %v8370_v55 = vmul.f32 %v18401_v1, %v8356_v44 }
 0x696   : > { %v8372_v5 = vmul.f32 %v18401_v1, %v8358_v62 }
 0x697   : > { %v8200_v24 = vadd.f32 %v8199_v47, %v8162_v57  ;;  %8986 = vmatmul.f32.gmra.mxu0 %v16814_v48  ;;  %9020 = vmatmul.f32.gmra.mxu1 %v16760_v17  ;;  %v8369_v15 = vmul.f32 %v18404_v4, %v8355_v0  ;;  %v8126_v40 = vadd.f32 %v8125_v54, %v8087_v34  ;;  %v8414_v0 = vld.sshfl [vmem:[#allocation1 + $0x20] sm:$0xff pattern:$0x75316420] }
 0x698   : > { %9105 = vmatmul.f32.gmra.mxu3 %v16806_v46  ;;  %v8438_v57 = vsel %vm336_vm1, %v8414_v0, 0 }
 0x699   : > { %v8234_v61 = vadd.f32 %v8233_v32, %v8200_v24  ;;  %9063 = vmatmul.f32.gmra.mxu2 %v16796_v43  ;;  %v8377_v50 = vadd.f32 %v8369_v15, %v8368_v29  ;;  %v9433_v24 = vand.u32 4294901760, %v8438_v57 }
 0x69b   : > { %v8287_v53 = vmax.f32 %v8234_v61, 0.0  ;;  %8378 = vadd.xlane.f32.xlu2 %v8377_v50  ;;  %v8237_v12 = vpop.f32.mrf.mxu3  ;;  %v9484_v15 = vsub.f32 %v8438_v57, %v9433_v24 }
 0x69c   : > { %v8167_v21 = vpop.f32.mrf.mxu1  ;;  %v8485_v33 = vpop.f32.mrf.mxu0 }
 0x69d   : > { %v8357_v60 = vadd.f32 %v19915_v42, %v8287_v53  ;;  %v8168_v56 = vadd.f32 %v8167_v21, %v8126_v40  ;;  %v8203_v52 = vpop.f32.mrf.mxu2  ;;  %v8486_v63 = vadd.f32 %v8485_v33, %v19916_v39  ;;  %v9485_v61 = vand.u32 4294901760, %v9484_v15 }
 0x69f   : > { %v8204_v28 = vadd.f32 %v8203_v52, %v8168_v56  ;;  %9024 = vmatmul.f32.gmra.mxu1 %v19903_v16  ;;  %9129 = vmatmul.f32.vlgmr.msra.gmra.mxu0 %v16724_v2  ;;  %v8371_v41 = vmul.f32 %v18404_v4, %v8357_v60  ;;  %v9486_v3 = vsub.f32 %v9484_v15, %v9485_v61 }
 0x6a0   : > { %9251 = vmatmul.f32.vlgmr.msra.gmra.mxu3 %v16724_v2  ;;  %9434 = vmatpush.msra.mxu0 %v9433_v24 }
 0x6a1   : > { %v8238_v58 = vadd.f32 %v8237_v12, %v8204_v28  ;;  %9201 = vmatmul.f32.vlgmr.msra.gmra.mxu2 %v19917_v26  ;;  %v8380_v6 = vadd.f32 %v8371_v41, %v8370_v55  ;;  %9561 = vmatpush.msra.mxu3 %v9433_v24  ;;  %v9487_v40 = vand.u32 4294901760, %v9486_v3 }
 0x6a2   : > { %9523 = vmatpush.msra.mxu2 %v9484_v15 }
 0x6a3   : > { %v8303_v36 = vmax.f32 %v8238_v58, 0.0  ;;  %8381 = vadd.xlane.f32.xlu2 %v8380_v6  ;;  %v8610_v51 = vpop.f32.mrf.mxu3  ;;  %v19920_v6 = vld [vmem:[#allocation2_spill] sm:$0xff] }
 0x6a4   : > { %v8493_v11 = vpop.f32.mrf.mxu0  ;;  %v8535_v27 = vpop.f32.mrf.mxu1 }
 0x6a5   : > { %v8359_v9 = vadd.f32 %v19919_v18, %v8303_v36  ;;  %v8536_v35 = vadd.f32 %v8535_v27, %v8486_v63  ;;  %v8571_v32 = vpop.f32.mrf.mxu2  ;;  %v8494_v47 = vadd.f32 %v8493_v11, %v16879_v13  ;;  %v19921_v18 = vld [vmem:[#allocation3_spill] sm:$0xff] }
 0x6a7   : > { %v8572_v54 = vadd.f32 %v8571_v32, %v8536_v35  ;;  %9133 = vmatmul.f32.gmra.mxu0 %v16745_v10  ;;  %9163 = vmatmul.f32.vlgmr.msra.gmra.mxu1 %v16724_v2  ;;  %v8373_v25 = vmul.f32 %v18404_v4, %v8359_v9  ;;  %v8415_v9 = vld.sshfl [vmem:[#allocation1 + $0x28] sm:$0xff pattern:$0x75316420] }
 0x6a8   : > { %9255 = vmatmul.f32.gmra.mxu3 %v16745_v10  ;;  %9488 = vmatpush.msra.mxu1 %v9487_v40  ;;  %v8440_v32 = vsel %vm336_vm1, %v8415_v9, 0 }
 0x6a9   : > { %v18452_v8 = vadd.f32 %v8610_v51, %v8572_v54  ;;  %9209 = vmatmul.f32.gmra.mxu2 %v16784_v37  ;;  %v8383_v20 = vadd.f32 %v8373_v25, %v8372_v5  ;;  %v9672_v54 = vand.u32 4294901760, %v8440_v32 }
 0x6ab   : > { %8384 = vadd.xlane.f32.xlu2 %v8383_v20  ;;  %v8616_v29 = vpop.f32.mrf.mxu3  ;;  %v9723_v25 = vsub.f32 %v8440_v32, %v9672_v54 }
 0x6ac   : > { %v8501_v1 = vpop.f32.mrf.mxu0  ;;  %v8539_v31 = vpop.f32.mrf.mxu1 }
 0x6ad   : > { %v8540_v4 = vadd.f32 %v8539_v31, %v8494_v47  ;;  %v8576_v34 = vpop.f32.mrf.mxu2  ;;  %v8502_v44 = vadd.f32 %v8501_v1, %v16889_v22  ;;  %v9724_v20 = vand.u32 4294901760, %v9723_v25 }
 0x6af   : > { %v8577_v50 = vadd.f32 %v8576_v34, %v8540_v4  ;;  %9137 = vmatmul.f32.gmra.mxu0 %v16760_v17  ;;  %9167 = vmatmul.f32.gmra.mxu1 %v16745_v10  ;;  %v9725_v15 = vsub.f32 %v9723_v25, %v9724_v20 }
 0x6b0   : > { %9259 = vmatmul.f32.gmra.mxu3 %v16760_v17 }
 0x6b1   : > { %v18459_v19 = vadd.f32 %v8616_v29, %v8577_v50  ;;  %9217 = vmatmul.f32.gmra.mxu2 %v16803_v45  ;;  %v9726_v1 = vand.u32 4294901760, %v9725_v15 }
 0x6b3   : > { %v8622_v53 = vpop.f32.mrf.mxu3 }
 0x6b4   : > { %v8509_v12 = vpop.f32.mrf.mxu0  ;;  %v8543_v21 = vpop.f32.mrf.mxu1 }
 0x6b5   : > { %v8544_v33 = vadd.f32 %v8543_v21, %v8502_v44  ;;  %v8581_v42 = vpop.f32.mrf.mxu2  ;;  %v8510_v56 = vadd.f32 %v8509_v12, %v16899_v49 }
 0x6b7   : > { %v8582_v60 = vadd.f32 %v8581_v42, %v8544_v33  ;;  %9141 = vmatmul.f32.gmra.mxu0 %v19903_v16  ;;  %9171 = vmatmul.f32.gmra.mxu1 %v16760_v17 }
 0x6b8   : > { %9263 = vmatmul.f32.gmra.mxu3 %v19903_v16 }
 0x6b9   : > { %v18466_v52 = vadd.f32 %v8622_v53, %v8582_v60  ;;  %9225 = vmatmul.f32.gmra.mxu2 %v16814_v48 }
 0x6bb   : > { %v8628_v7 = vpop.f32.mrf.mxu3 }
 0x6bc   : > { %v8547_v28 = vpop.f32.mrf.mxu1  ;;  %v18469_v55 = vpop.f32.mrf.mxu0 }
 0x6bd   : > { %v8548_v41 = vadd.f32 %v8547_v28, %v8510_v56  ;;  %v8586_v63 = vpop.f32.mrf.mxu2 }
 0x6bf   : > { %v8587_v58 = vadd.f32 %v8586_v63, %v8548_v41  ;;  %9175 = vmatmul.f32.gmra.mxu1 %v19903_v16  ;;  %9287 = vmatmul.f32.vlgmr.msrb.gmra.mxu0 %v19920_v6 }
 0x6c0   : > { %9402 = vmatmul.f32.vlgmr.msrb.gmra.mxu3 %v16724_v2  ;;  %9605 = vmatpush.msrb.mxu0 %v9485_v61 }
 0x6c1   : > { %v18474_v59 = vadd.f32 %v8628_v7, %v8587_v58  ;;  %9368 = vmatmul.f32.vlgmr.msrb.gmra.mxu2 %v16724_v2  ;;  %9727 = vmatpush.msrb.mxu3 %v9726_v1 }
 0x6c2   : > { %9673 = vmatpush.msrb.mxu2 %v9672_v54 }
 0x6c3   : > { %v8774_v62 = vpop.f32.mrf.mxu3 }
 0x6c4   : > { %v18477_v36 = vpop.f32.mrf.mxu0  ;;  %v18479_v51 = vpop.f32.mrf.mxu1 }
 0x6c5   : > { %v8724_v11 = vpop.f32.mrf.mxu2 }
 0x6c6   : > { %v8725_v27 = vadd.f32 %v8724_v11, %v19916_v39 }
 0x6c7   : > { %9292 = vmatmul.f32.gmra.mxu0 %v16754_v14  ;;  %9326 = vmatmul.f32.vlgmr.msrb.gmra.mxu1 %v19921_v18 }
 0x6c8   : > { %v8775_v35 = vadd.f32 %v8774_v62, %v8725_v27  ;;  %9406 = vmatmul.f32.gmra.mxu3 %v16745_v10  ;;  %9639 = vmatpush.msrb.mxu1 %v9433_v24 }
 0x6c9   : > { %9372 = vmatmul.f32.gmra.mxu2 %v16745_v10 }
 0x6cb   : > { %v8778_v5 = vpop.f32.mrf.mxu3 }
 0x6cc   : > { %v18487_v0 = vpop.f32.mrf.mxu0  ;;  %v18489_v57 = vpop.f32.mrf.mxu1 }
 0x6cd   : > { %v8732_v47 = vpop.f32.mrf.mxu2 }
 0x6ce   : > { %v8733_v29 = vadd.f32 %v8732_v47, %v16879_v13 }
 0x6cf   : > { %9297 = vmatmul.f32.gmra.mxu0 %v16777_v30  ;;  %9332 = vmatmul.f32.gmra.mxu1 %v16767_v23 }
 0x6d0   : > { %v8779_v24 = vadd.f32 %v8778_v5, %v8733_v29  ;;  %9410 = vmatmul.f32.gmra.mxu3 %v16760_v17 }
 0x6d1   : > { %9376 = vmatmul.f32.gmra.mxu2 %v16760_v17 }
 0x6d3   : > { %v8782_v31 = vpop.f32.mrf.mxu3 }
 0x6d4   : > { %v18496_v4 = vpop.f32.mrf.mxu0  ;;  %v18498_v34 = vpop.f32.mrf.mxu1 }
 0x6d5   : > { %v8740_v61 = vpop.f32.mrf.mxu2 }
 0x6d6   : > { %v8741_v50 = vadd.f32 %v8740_v61, %v16889_v22 }
 0x6d7   : > { %9302 = vmatmul.f32.gmra.mxu0 %v16796_v43  ;;  %9338 = vmatmul.f32.gmra.mxu1 %v16787_v38 }
 0x6d8   : > { %v8783_v3 = vadd.f32 %v8782_v31, %v8741_v50  ;;  %9414 = vmatmul.f32.gmra.mxu3 %v19903_v16 }
 0x6d9   : > { %9380 = vmatmul.f32.gmra.mxu2 %v19903_v16 }
 0x6db   : > { %v8786_v44 = vpop.f32.mrf.mxu3 }
 0x6dc   : > { %v18505_v40 = vpop.f32.mrf.mxu1  ;;  %v8810_v53 = vpop.f32.mrf.mxu0 }
 0x6dd   : > { %v8748_v12 = vpop.f32.mrf.mxu2  ;;  %v8811_v42 = vadd.f32 %v8810_v53, %v8775_v35 }
 0x6de   : > { %v8749_v21 = vadd.f32 %v8748_v12, %v16899_v49 }
 0x6df   : > { %9344 = vmatmul.f32.gmra.mxu1 %v16806_v46  ;;  %9440 = vmatmul.f32.vlgmr.msra.gmra.mxu0 %v19917_v26 }
 0x6e0   : > { %v8787_v33 = vadd.f32 %v8786_v44, %v8749_v21  ;;  %9565 = vmatmul.f32.vlgmr.msra.gmra.mxu3 %v19921_v18  ;;  %9762 = vmatpush.msra.mxu0 %v9723_v25 }
 0x6e1   : > { %9526 = vmatmul.f32.vlgmr.msra.gmra.mxu2 %v19920_v6  ;;  %9878 = vmatpush.msra.mxu3 %v9672_v54 }
 0x6e2   : > { %9844 = vmatpush.msra.mxu2 %v9724_v20 }
 0x6e3   : > { %v8925_v60 = vpop.f32.mrf.mxu3 }
 0x6e4   : > { %v8815_v56 = vpop.f32.mrf.mxu0  ;;  %v8849_v7 = vpop.f32.mrf.mxu1 }
 0x6e5   : > { %v8850_v28 = vadd.f32 %v8849_v7, %v8811_v42  ;;  %v8891_v41 = vpop.f32.mrf.mxu2  ;;  %v8816_v62 = vadd.f32 %v8815_v56, %v8779_v24 }
 0x6e7   : > { %v8892_v63 = vadd.f32 %v8891_v41, %v8850_v28  ;;  %9448 = vmatmul.f32.gmra.mxu0 %v16784_v37  ;;  %9490 = vmatmul.f32.vlgmr.msra.gmra.mxu1 %v16724_v2 }
 0x6e8   : > { %9571 = vmatmul.f32.gmra.mxu3 %v16767_v23  ;;  %9800 = vmatpush.msra.mxu1 %v9672_v54 }
 0x6e9   : > { %v18515_v58 = vadd.f32 %v8925_v60, %v8892_v63  ;;  %9531 = vmatmul.f32.gmra.mxu2 %v16754_v14 }
 0x6eb   : > { %v8929_v11 = vpop.f32.mrf.mxu3 }
 0x6ec   : > { %v8820_v27 = vpop.f32.mrf.mxu0  ;;  %v8855_v9 = vpop.f32.mrf.mxu1 }
 0x6ed   : > { %v8856_v35 = vadd.f32 %v8855_v9, %v8816_v62  ;;  %v8895_v32 = vpop.f32.mrf.mxu2  ;;  %v8821_v54 = vadd.f32 %v8820_v27, %v8783_v3  ;;  %v8416_v27 = vld.sshfl [vmem:[#allocation1 + $0x30] sm:$0xff pattern:$0x75316420] }
 0x6ee   : > { %v8442_v9 = vsel %vm336_vm1, %v8416_v27, 0 }
 0x6ef   : > { %v8896_v5 = vadd.f32 %v8895_v32, %v8856_v35  ;;  %9456 = vmatmul.f32.gmra.mxu0 %v16803_v45  ;;  %9494 = vmatmul.f32.gmra.mxu1 %v16745_v10  ;;  %v9911_v32 = vand.u32 4294901760, %v8442_v9 }
 0x6f0   : > { %9577 = vmatmul.f32.gmra.mxu3 %v16787_v38 }
 0x6f1   : > { %v18521_v25 = vadd.f32 %v8929_v11, %v8896_v5  ;;  %9536 = vmatmul.f32.gmra.mxu2 %v16777_v30 }
 0x6f3   : > { %v8933_v47 = vpop.f32.mrf.mxu3 }
 0x6f4   : > { %v8825_v20 = vpop.f32.mrf.mxu0  ;;  %v8861_v29 = vpop.f32.mrf.mxu1 }
 0x6f5   : > { %v8862_v15 = vadd.f32 %v8861_v29, %v8821_v54  ;;  %v8899_v24 = vpop.f32.mrf.mxu2  ;;  %v8826_v61 = vadd.f32 %v8825_v20, %v8787_v33  ;;  %v9962_v29 = vsub.f32 %v8442_v9, %v9911_v32 }
 0x6f7   : > { %v8900_v1 = vadd.f32 %v8899_v24, %v8862_v15  ;;  %9464 = vmatmul.f32.gmra.mxu0 %v16814_v48  ;;  %9498 = vmatmul.f32.gmra.mxu1 %v16760_v17  ;;  %v9963_v24 = vand.u32 4294901760, %v9962_v29 }
 0x6f8   : > { %9583 = vmatmul.f32.gmra.mxu3 %v16806_v46 }
 0x6f9   : > { %v18527_v31 = vadd.f32 %v8933_v47, %v8900_v1  ;;  %9541 = vmatmul.f32.gmra.mxu2 %v16796_v43 }
 0x6fb   : > { %v8937_v50 = vpop.f32.mrf.mxu3 }
 0x6fc   : > { %v8867_v44 = vpop.f32.mrf.mxu1  ;;  %v8963_v3 = vpop.f32.mrf.mxu0 }
 0x6fd   : > { %v8868_v53 = vadd.f32 %v8867_v44, %v8826_v61  ;;  %v8903_v12 = vpop.f32.mrf.mxu2  ;;  %v8964_v42 = vadd.f32 %v8963_v3, %v19916_v39 }
 0x6ff   : > { %v8904_v21 = vadd.f32 %v8903_v12, %v8868_v53  ;;  %9502 = vmatmul.f32.gmra.mxu1 %v19903_v16  ;;  %9607 = vmatmul.f32.vlgmr.msrb.gmra.mxu0 %v16724_v2 }
 0x700   : > { %9729 = vmatmul.f32.vlgmr.msrb.gmra.mxu3 %v16724_v2  ;;  %9912 = vmatpush.msrb.mxu0 %v9911_v32 }
 0x701   : > { %v18534_v60 = vadd.f32 %v8937_v50, %v8904_v21  ;;  %9679 = vmatmul.f32.vlgmr.msrb.gmra.mxu2 %v19917_v26  ;;  %10039 = vmatpush.msrb.mxu3 %v9911_v32  ;;  %v9964_v50 = vsub.f32 %v9962_v29, %v9963_v24 }
 0x702   : > { %10001 = vmatpush.msrb.mxu2 %v9962_v29 }
 0x703   : > { %v9088_v56 = vpop.f32.mrf.mxu3  ;;  %v9965_v3 = vand.u32 4294901760, %v9964_v50 }
 0x704   : > { %v8971_v33 = vpop.f32.mrf.mxu0  ;;  %v9013_v7 = vpop.f32.mrf.mxu1 }
 0x705   : > { %v9014_v28 = vadd.f32 %v9013_v7, %v8964_v42  ;;  %v9049_v41 = vpop.f32.mrf.mxu2  ;;  %v8972_v62 = vadd.f32 %v8971_v33, %v16879_v13 }
 0x707   : > { %v9050_v63 = vadd.f32 %v9049_v41, %v9014_v28  ;;  %9611 = vmatmul.f32.gmra.mxu0 %v16745_v10  ;;  %9641 = vmatmul.f32.vlgmr.msrb.gmra.mxu1 %v16724_v2 }
 0x708   : > { %9733 = vmatmul.f32.gmra.mxu3 %v16745_v10  ;;  %9966 = vmatpush.msrb.mxu1 %v9965_v3 }
 0x709   : > { %v9089_v11 = vadd.f32 %v9088_v56, %v9050_v63  ;;  %9687 = vmatmul.f32.gmra.mxu2 %v16784_v37 }
 0x70b   : > { %v9094_v35 = vpop.f32.mrf.mxu3 }
 0x70c   : > { %v8979_v5 = vpop.f32.mrf.mxu0  ;;  %v9017_v54 = vpop.f32.mrf.mxu1 }
 0x70d   : > { %v9018_v47 = vadd.f32 %v9017_v54, %v8972_v62  ;;  %v9054_v20 = vpop.f32.mrf.mxu2  ;;  %v8980_v1 = vadd.f32 %v8979_v5, %v16889_v22 }
 0x70f   : > { %v9055_v15 = vadd.f32 %v9054_v20, %v9018_v47  ;;  %9615 = vmatmul.f32.gmra.mxu0 %v16760_v17  ;;  %9645 = vmatmul.f32.gmra.mxu1 %v16745_v10 }
 0x710   : > { %9737 = vmatmul.f32.gmra.mxu3 %v16760_v17 }
 0x711   : > { %v9095_v61 = vadd.f32 %v9094_v35, %v9055_v15  ;;  %9695 = vmatmul.f32.gmra.mxu2 %v16803_v45  ;;  %v8653_v35 = vadd.f32 %v18469_v55, %v18452_v8  ;;  %v8417_v8 = vld.sshfl [vmem:[#allocation1 + $0x38] sm:$0xff pattern:$0x75316420] }
 0x713   : > { %v9100_v44 = vpop.f32.mrf.mxu3  ;;  %v8687_v54 = vadd.f32 %v18479_v51, %v8653_v35  ;;  %v8444_v51 = vsel %vm336_vm1, %v8417_v8, 0 }
 0x714   : > { %v8987_v53 = vpop.f32.mrf.mxu0  ;;  %v9021_v12 = vpop.f32.mrf.mxu1 }
 0x715   : > { %v9022_v21 = vadd.f32 %v9021_v12, %v8980_v1  ;;  %v9059_v42 = vpop.f32.mrf.mxu2  ;;  %v8988_v33 = vadd.f32 %v8987_v53, %v16899_v49  ;;  %v12286_v3 = vmax.f32 %v8687_v54, 0.0  ;;  %v18574_v12 = vand.u32 4294901760, %v8444_v51 }
 0x717   : > { %v9060_v56 = vadd.f32 %v9059_v42, %v9022_v21  ;;  %9619 = vmatmul.f32.gmra.mxu0 %v19903_v16  ;;  %9649 = vmatmul.f32.gmra.mxu1 %v16760_v17 }
 0x718   : > { %9741 = vmatmul.f32.gmra.mxu3 %v19903_v16 }
 0x719   : > { %v9101_v7 = vadd.f32 %v9100_v44, %v9060_v56  ;;  %9703 = vmatmul.f32.gmra.mxu2 %v16814_v48 }
 0x71b   : > { %v9106_v28 = vpop.f32.mrf.mxu3 }
 0x71c   : > { %v9025_v41 = vpop.f32.mrf.mxu1  ;;  %v9130_v63 = vpop.f32.mrf.mxu0 }
 0x71d   : > { %v9026_v62 = vadd.f32 %v9025_v41, %v8988_v33  ;;  %v9064_v27 = vpop.f32.mrf.mxu2  ;;  %v9131_v47 = vadd.f32 %v9130_v63, %v9089_v11  ;;  %v8657_v11 = vadd.f32 %v18477_v36, %v18459_v19  ;;  %v10201_v33 = vsub.f32 %v8444_v51, %v18574_v12 }
 0x71f   : > { %v9065_v9 = vadd.f32 %v9064_v27, %v9026_v62  ;;  %9653 = vmatmul.f32.gmra.mxu1 %v19903_v16  ;;  %9765 = vmatmul.f32.vlgmr.msra.gmra.mxu0 %v19920_v6  ;;  %v8691_v21 = vadd.f32 %v18489_v57, %v8657_v11  ;;  %v10202_v62 = vand.u32 4294901760, %v10201_v33 }
 0x720   : > { %9880 = vmatmul.f32.vlgmr.msra.gmra.mxu3 %v16724_v2  ;;  %10083 = vmatpush.msra.mxu0 %v9963_v24 }
 0x721   : > { %v18558_v5 = vadd.f32 %v9106_v28, %v9065_v9  ;;  %9846 = vmatmul.f32.vlgmr.msra.gmra.mxu2 %v16724_v2  ;;  %v12302_v36 = vmax.f32 %v8691_v21, 0.0  ;;  %v10203_v57 = vsub.f32 %v10201_v33, %v10202_v62  ;;  %v8661_v9 = vadd.f32 %v18487_v0, %v18466_v52 }
 0x722   : > { %10151 = vmatpush.msra.mxu2 %v18574_v12  ;;  %v8665_v0 = vadd.f32 %v18496_v4, %v18474_v59 }
 0x723   : > { %v9252_v20 = vpop.f32.mrf.mxu3  ;;  %v10204_v54 = vand.u32 4294901760, %v10203_v57 }
 0x724   : > { %v9134_v29 = vpop.f32.mrf.mxu0  ;;  %v9164_v15 = vpop.f32.mrf.mxu1 }
 0x725   : > { %v9165_v1 = vadd.f32 %v9164_v15, %v9131_v47  ;;  %v9202_v50 = vpop.f32.mrf.mxu2  ;;  %v9135_v42 = vadd.f32 %v9134_v29, %v9095_v61  ;;  %v8695_v47 = vadd.f32 %v18498_v34, %v8661_v9  ;;  %10205 = vmatpush.msra.mxu3 %v10204_v54 }
 0x726   : > { %v9203_v44 = vadd.f32 %v9202_v50, %v19916_v39 }
 0x727   : > { %v12288_v53 = vmax.f32 %v9165_v1, 0.0  ;;  %9770 = vmatmul.f32.gmra.mxu0 %v16754_v14  ;;  %9804 = vmatmul.f32.vlgmr.msra.gmra.mxu1 %v19921_v18 }
 0x728   : > { %v18565_v55 = vadd.f32 %v9252_v20, %v9203_v44  ;;  %9884 = vmatmul.f32.gmra.mxu3 %v16745_v10  ;;  %10117 = vmatpush.msra.mxu1 %v9911_v32 }
 0x729   : > { %v18571_v24 = vadd.f32 %v12288_v53, %v12286_v3  ;;  %9850 = vmatmul.f32.gmra.mxu2 %v16745_v10  ;;  %v12318_v53 = vmax.f32 %v8695_v47, 0.0 }
 0x72b   : > { %v9256_v56 = vpop.f32.mrf.mxu3 }
 0x72c   : > { %v9138_v28 = vpop.f32.mrf.mxu0  ;;  %v9168_v41 = vpop.f32.mrf.mxu1 }
 0x72d   : > { %v9169_v32 = vadd.f32 %v9168_v41, %v9135_v42  ;;  %v9210_v63 = vpop.f32.mrf.mxu2  ;;  %v9139_v20 = vadd.f32 %v9138_v28, %v9101_v7  ;;  %v8699_v7 = vadd.f32 %v18505_v40, %v8665_v0 }
 0x72e   : > { %v9211_v19 = vadd.f32 %v9210_v63, %v16879_v13 }
 0x72f   : > { %v12304_v27 = vmax.f32 %v9169_v32, 0.0  ;;  %9775 = vmatmul.f32.gmra.mxu0 %v16777_v30  ;;  %9810 = vmatmul.f32.gmra.mxu1 %v16767_v23  ;;  %v12334_v32 = vmax.f32 %v8699_v7, 0.0 }
 0x730   : > { %v9257_v61 = vadd.f32 %v9256_v56, %v9211_v19  ;;  %9888 = vmatmul.f32.gmra.mxu3 %v16760_v17 }
 0x731   : > { %v18585_v35 = vadd.f32 %v12304_v27, %v12302_v36  ;;  %9854 = vmatmul.f32.gmra.mxu2 %v16760_v17 }
 0x733   : > { %v9260_v29 = vpop.f32.mrf.mxu3 }
 0x734   : > { %v9142_v15 = vpop.f32.mrf.mxu0  ;;  %v9172_v1 = vpop.f32.mrf.mxu1 }
 0x735   : > { %v9173_v50 = vadd.f32 %v9172_v1, %v9139_v20  ;;  %v9218_v44 = vpop.f32.mrf.mxu2  ;;  %v9143_v51 = vadd.f32 %v9142_v15, %v18558_v5 }
 0x736   : > { %v9219_v3 = vadd.f32 %v9218_v44, %v16889_v22 }
 0x737   : > { %v12320_v8 = vmax.f32 %v9173_v50, 0.0  ;;  %9780 = vmatmul.f32.gmra.mxu0 %v16796_v43  ;;  %9816 = vmatmul.f32.gmra.mxu1 %v16787_v38 }
 0x738   : > { %v9261_v52 = vadd.f32 %v9260_v29, %v9219_v3  ;;  %9892 = vmatmul.f32.gmra.mxu3 %v19903_v16 }
 0x739   : > { %v18595_v34 = vadd.f32 %v12320_v8, %v12318_v53  ;;  %9858 = vmatmul.f32.gmra.mxu2 %v19903_v16 }
 0x73b   : > { %v9264_v11 = vpop.f32.mrf.mxu3 }
 0x73c   : > { %v9176_v21 = vpop.f32.mrf.mxu1  ;;  %v9288_v42 = vpop.f32.mrf.mxu0 }
 0x73d   : > { %v9177_v56 = vadd.f32 %v9176_v21, %v9143_v51  ;;  %v9226_v28 = vpop.f32.mrf.mxu2  ;;  %v9289_v40 = vadd.f32 %v9288_v42, %v18565_v55 }
 0x73e   : > { %v9227_v41 = vadd.f32 %v9226_v28, %v16899_v49 }
 0x73f   : > { %v12336_v63 = vmax.f32 %v9177_v56, 0.0  ;;  %9822 = vmatmul.f32.gmra.mxu1 %v16806_v46  ;;  %9918 = vmatmul.f32.vlgmr.msrb.gmra.mxu0 %v19917_v26 }
 0x740   : > { %v9265_v59 = vadd.f32 %v9264_v11, %v9227_v41  ;;  %10043 = vmatmul.f32.vlgmr.msrb.gmra.mxu3 %v19921_v18  ;;  %10240 = vmatpush.msrb.mxu0 %v10201_v33 }
 0x741   : > { %v18604_v4 = vadd.f32 %v12336_v63, %v12334_v32  ;;  %10004 = vmatmul.f32.vlgmr.msrb.gmra.mxu2 %v19920_v6  ;;  %10356 = vmatpush.msrb.mxu3 %v18574_v12 }
 0x742   : > { %10322 = vmatpush.msrb.mxu2 %v10202_v62  ;;  %v12287_v62 = vmax.f32 %v18515_v58, 0.0  ;;  %v12303_v58 = vmax.f32 %v18521_v25, 0.0  ;;  %v12319_v25 = vmax.f32 %v18527_v31, 0.0  ;;  %v12335_v31 = vmax.f32 %v18534_v60, 0.0  ;;  %v16602_v60 = vld [vmem:[%s16739_s29 + $0xa0] sm:$0x77] }
 0x743   : > { %v9403_v5 = vpop.f32.mrf.mxu3  ;;  %8418 = vst [vmem:[#allocation1] ss:$2 sm:$0xff] %v16602_v60 }
 0x744   : > { %v9293_v19 = vpop.f32.mrf.mxu0  ;;  %v9327_v36 = vpop.f32.mrf.mxu1 }
 0x745   : > { %v9328_v27 = vadd.f32 %v9327_v36, %v9289_v40  ;;  %v9369_v57 = vpop.f32.mrf.mxu2  ;;  %v9294_v55 = vadd.f32 %v9293_v19, %v9257_v61 }
 0x747   : > { %v9370_v9 = vadd.f32 %v9369_v57, %v9328_v27  ;;  %9926 = vmatmul.f32.gmra.mxu0 %v16784_v37  ;;  %9968 = vmatmul.f32.vlgmr.msrb.gmra.mxu1 %v16724_v2 }
 0x748   : > { %10049 = vmatmul.f32.gmra.mxu3 %v16767_v23  ;;  %10278 = vmatpush.msrb.mxu1 %v18574_v12 }
 0x749   : > { %v9404_v33 = vadd.f32 %v9403_v5, %v9370_v9  ;;  %10009 = vmatmul.f32.gmra.mxu2 %v16754_v14 }
 0x74b   : > { %v12289_v54 = vmax.f32 %v9404_v33, 0.0  ;;  %v9407_v47 = vpop.f32.mrf.mxu3 }
 0x74c   : > { %v9298_v20 = vpop.f32.mrf.mxu0  ;;  %v9333_v29 = vpop.f32.mrf.mxu1 }
 0x74d   : > { %v18615_v15 = vadd.f32 %v12289_v54, %v12287_v62  ;;  %v9334_v1 = vadd.f32 %v9333_v29, %v9294_v55  ;;  %v9373_v50 = vpop.f32.mrf.mxu2  ;;  %v9299_v61 = vadd.f32 %v9298_v20, %v9261_v52 }
 0x74f   : > { %v9374_v44 = vadd.f32 %v9373_v50, %v9334_v1  ;;  %9934 = vmatmul.f32.gmra.mxu0 %v16803_v45  ;;  %9972 = vmatmul.f32.gmra.mxu1 %v16745_v10 }
 0x750   : > { %10055 = vmatmul.f32.gmra.mxu3 %v16787_v38 }
 0x751   : > { %v9408_v12 = vadd.f32 %v9407_v47, %v9374_v44  ;;  %10014 = vmatmul.f32.gmra.mxu2 %v16777_v30 }
 0x753   : > { %v12305_v3 = vmax.f32 %v9408_v12, 0.0  ;;  %v9411_v53 = vpop.f32.mrf.mxu3 }
 0x754   : > { %v9303_v8 = vpop.f32.mrf.mxu0  ;;  %v9339_v0 = vpop.f32.mrf.mxu1 }
 0x755   : > { %v18622_v7 = vadd.f32 %v12305_v3, %v12303_v58  ;;  %v9340_v51 = vadd.f32 %v9339_v0, %v9299_v61  ;;  %v9377_v11 = vpop.f32.mrf.mxu2  ;;  %v9304_v52 = vadd.f32 %v9303_v8, %v9265_v59  ;;  %v8422_v8 = vld.sshfl [vmem:[#allocation1] sm:$0xff pattern:$0x75316420] }
 0x756   : > { %v8446_v0 = vsel %vm336_vm1, %v8422_v8, 0 }
 0x757   : > { %v9378_v21 = vadd.f32 %v9377_v11, %v9340_v51  ;;  %9942 = vmatmul.f32.gmra.mxu0 %v16814_v48  ;;  %9976 = vmatmul.f32.gmra.mxu1 %v16760_v17  ;;  %v10389_v11 = vand.u32 4294901760, %v8446_v0 }
 0x758   : > { %10061 = vmatmul.f32.gmra.mxu3 %v16806_v46 }
 0x759   : > { %v9412_v42 = vadd.f32 %v9411_v53, %v9378_v21  ;;  %10019 = vmatmul.f32.gmra.mxu2 %v16796_v43 }
 0x75b   : > { %v12321_v56 = vmax.f32 %v9412_v42, 0.0  ;;  %v9415_v28 = vpop.f32.mrf.mxu3 }
 0x75c   : > { %v9345_v41 = vpop.f32.mrf.mxu1  ;;  %v9441_v32 = vpop.f32.mrf.mxu0 }
 0x75d   : > { %v18629_v63 = vadd.f32 %v12321_v56, %v12319_v25  ;;  %v9346_v40 = vadd.f32 %v9345_v41, %v9304_v52  ;;  %v9381_v5 = vpop.f32.mrf.mxu2  ;;  %v9442_v36 = vadd.f32 %v9441_v32, %v19916_v39  ;;  %v10440_v56 = vsub.f32 %v8446_v0, %v10389_v11 }
 0x75f   : > { %v9382_v19 = vadd.f32 %v9381_v5, %v9346_v40  ;;  %9980 = vmatmul.f32.gmra.mxu1 %v19903_v16  ;;  %10085 = vmatmul.f32.vlgmr.msra.gmra.mxu0 %v16724_v2  ;;  %v10441_v41 = vand.u32 4294901760, %v10440_v56 }
 0x760   : > { %10207 = vmatmul.f32.vlgmr.msra.gmra.mxu3 %v16724_v2  ;;  %10390 = vmatpush.msra.mxu0 %v10389_v11 }
 0x761   : > { %v9416_v27 = vadd.f32 %v9415_v28, %v9382_v19  ;;  %10157 = vmatmul.f32.vlgmr.msra.gmra.mxu2 %v19917_v26  ;;  %10517 = vmatpush.msra.mxu3 %v10389_v11  ;;  %v10442_v5 = vsub.f32 %v10440_v56, %v10441_v41 }
 0x762   : > { %10479 = vmatpush.msra.mxu2 %v10440_v56 }
 0x763   : > { %v12337_v59 = vmax.f32 %v9416_v27, 0.0  ;;  %v9566_v57 = vpop.f32.mrf.mxu3 }
 0x764   : > { %v9449_v9 = vpop.f32.mrf.mxu0  ;;  %v9491_v33 = vpop.f32.mrf.mxu1 }
 0x765   : > { %v18637_v62 = vadd.f32 %v12337_v59, %v12335_v31  ;;  %v9492_v55 = vadd.f32 %v9491_v33, %v9442_v36  ;;  %v9527_v54 = vpop.f32.mrf.mxu2  ;;  %v9450_v20 = vadd.f32 %v9449_v9, %v16879_v13  ;;  %v10443_v36 = vand.u32 4294901760, %v10442_v5 }
 0x767   : > { %v9528_v47 = vadd.f32 %v9527_v54, %v9492_v55  ;;  %10089 = vmatmul.f32.gmra.mxu0 %v16745_v10  ;;  %10119 = vmatmul.f32.vlgmr.msra.gmra.mxu1 %v16724_v2 }
 0x768   : > { %10211 = vmatmul.f32.gmra.mxu3 %v16745_v10  ;;  %10444 = vmatpush.msra.mxu1 %v10443_v36 }
 0x769   : > { %v9567_v29 = vadd.f32 %v9566_v57, %v9528_v47  ;;  %10165 = vmatmul.f32.gmra.mxu2 %v16784_v37 }
 0x76b   : > { %v9572_v1 = vpop.f32.mrf.mxu3 }
 0x76c   : > { %v9457_v50 = vpop.f32.mrf.mxu0  ;;  %v9495_v44 = vpop.f32.mrf.mxu1 }
 0x76d   : > { %v9496_v12 = vadd.f32 %v9495_v44, %v9450_v20  ;;  %v9532_v58 = vpop.f32.mrf.mxu2  ;;  %v9458_v3 = vadd.f32 %v9457_v50, %v16889_v22 }
 0x76f   : > { %v9533_v61 = vadd.f32 %v9532_v58, %v9496_v12  ;;  %10093 = vmatmul.f32.gmra.mxu0 %v16760_v17  ;;  %10123 = vmatmul.f32.gmra.mxu1 %v16745_v10  ;;  %v8423_v12 = vld.sshfl [vmem:[#allocation1 + $0x8] sm:$0xff pattern:$0x75316420] }
 0x770   : > { %10215 = vmatmul.f32.gmra.mxu3 %v16760_v17 }
 0x771   : > { %v9573_v53 = vadd.f32 %v9572_v1, %v9533_v61  ;;  %10173 = vmatmul.f32.gmra.mxu2 %v16803_v45  ;;  %v8448_v61 = vsel %vm336_vm1, %v8423_v12, 0 }
 0x773   : > { %v9578_v51 = vpop.f32.mrf.mxu3 }
 0x774   : > { %v9465_v21 = vpop.f32.mrf.mxu0  ;;  %v9499_v42 = vpop.f32.mrf.mxu1 }
 0x775   : > { %v9500_v25 = vadd.f32 %v9499_v42, %v9458_v3  ;;  %v9537_v52 = vpop.f32.mrf.mxu2  ;;  %v9466_v32 = vadd.f32 %v9465_v21, %v16899_v49  ;;  %v10628_v3 = vand.u32 4294901760, %v8448_v61 }
 0x777   : > { %v9538_v28 = vadd.f32 %v9537_v52, %v9500_v25  ;;  %10097 = vmatmul.f32.gmra.mxu0 %v19903_v16  ;;  %10127 = vmatmul.f32.gmra.mxu1 %v16760_v17 }
 0x778   : > { %10219 = vmatmul.f32.gmra.mxu3 %v19903_v16 }
 0x779   : > { %v9579_v40 = vadd.f32 %v9578_v51, %v9538_v28  ;;  %10181 = vmatmul.f32.gmra.mxu2 %v16814_v48  ;;  %v10679_v51 = vsub.f32 %v8448_v61, %v10628_v3 }
 0x77b   : > { %v9584_v19 = vpop.f32.mrf.mxu3  ;;  %v10680_v56 = vand.u32 4294901760, %v10679_v51 }
 0x77c   : > { %v9503_v27 = vpop.f32.mrf.mxu1  ;;  %v9608_v31 = vpop.f32.mrf.mxu0 }
 0x77d   : > { %v9504_v59 = vadd.f32 %v9503_v27, %v9466_v32  ;;  %v9542_v57 = vpop.f32.mrf.mxu2  ;;  %v9609_v55 = vadd.f32 %v9608_v31, %v9567_v29 }
 0x77f   : > { %v9543_v9 = vadd.f32 %v9542_v57, %v9504_v59  ;;  %10131 = vmatmul.f32.gmra.mxu1 %v19903_v16  ;;  %10243 = vmatmul.f32.vlgmr.msrb.gmra.mxu0 %v19920_v6 }
 0x780   : > { %10358 = vmatmul.f32.vlgmr.msrb.gmra.mxu3 %v16724_v2  ;;  %10561 = vmatpush.msrb.mxu0 %v10441_v41 }
 0x781   : > { %v9585_v33 = vadd.f32 %v9584_v19, %v9543_v9  ;;  %10324 = vmatmul.f32.vlgmr.msrb.gmra.mxu2 %v16724_v2 }
 0x782   : > { %10629 = vmatpush.msrb.mxu2 %v10628_v3 }
 0x783   : > { %v9730_v54 = vpop.f32.mrf.mxu3 }
 0x784   : > { %v9612_v47 = vpop.f32.mrf.mxu0  ;;  %v9642_v20 = vpop.f32.mrf.mxu1 }
 0x785   : > { %v9643_v60 = vadd.f32 %v9642_v20, %v9609_v55  ;;  %v9680_v1 = vpop.f32.mrf.mxu2  ;;  %v9613_v8 = vadd.f32 %v9612_v47, %v9573_v53 }
 0x786   : > { %v9681_v50 = vadd.f32 %v9680_v1, %v19916_v39 }
 0x787   : > { %v12290_v44 = vmax.f32 %v9643_v60, 0.0  ;;  %10248 = vmatmul.f32.gmra.mxu0 %v16754_v14  ;;  %10282 = vmatmul.f32.vlgmr.msrb.gmra.mxu1 %v19921_v18 }
 0x788   : > { %v9731_v58 = vadd.f32 %v9730_v54, %v9681_v50  ;;  %10362 = vmatmul.f32.gmra.mxu3 %v16745_v10  ;;  %10595 = vmatpush.msrb.mxu1 %v10389_v11 }
 0x789   : > { %v18666_v29 = vadd.f32 %v18571_v24, %v12290_v44  ;;  %10328 = vmatmul.f32.gmra.mxu2 %v16745_v10  ;;  %v10681_v24 = vsub.f32 %v10679_v51, %v10680_v56 }
 0x78b   : > { %v9734_v0 = vpop.f32.mrf.mxu3  ;;  %v10682_v32 = vand.u32 4294901760, %v10681_v24 }
 0x78c   : > { %v9616_v21 = vpop.f32.mrf.mxu0  ;;  %v9646_v42 = vpop.f32.mrf.mxu1 }
 0x78d   : > { %v9647_v25 = vadd.f32 %v9646_v42, %v9613_v8  ;;  %v9688_v52 = vpop.f32.mrf.mxu2  ;;  %v9617_v5 = vadd.f32 %v9616_v21, %v9579_v40  ;;  %10683 = vmatpush.msrb.mxu3 %v10682_v32 }
 0x78e   : > { %v9689_v28 = vadd.f32 %v9688_v52, %v16879_v13 }
 0x78f   : > { %v12306_v41 = vmax.f32 %v9647_v25, 0.0  ;;  %10253 = vmatmul.f32.gmra.mxu0 %v16777_v30  ;;  %10288 = vmatmul.f32.gmra.mxu1 %v16767_v23 }
 0x790   : > { %v9735_v11 = vadd.f32 %v9734_v0, %v9689_v28  ;;  %10366 = vmatmul.f32.gmra.mxu3 %v16760_v17 }
 0x791   : > { %v18674_v53 = vadd.f32 %v18585_v35, %v12306_v41  ;;  %10332 = vmatmul.f32.gmra.mxu2 %v16760_v17 }
 0x793   : > { %v9738_v19 = vpop.f32.mrf.mxu3 }
 0x794   : > { %v9620_v36 = vpop.f32.mrf.mxu0  ;;  %v9650_v27 = vpop.f32.mrf.mxu1 }
 0x795   : > { %v9651_v31 = vadd.f32 %v9650_v27, %v9617_v5  ;;  %v9696_v59 = vpop.f32.mrf.mxu2  ;;  %v9621_v40 = vadd.f32 %v9620_v36, %v9585_v33 }
 0x796   : > { %v9697_v57 = vadd.f32 %v9696_v59, %v16889_v22 }
 0x797   : > { %v12322_v9 = vmax.f32 %v9651_v31, 0.0  ;;  %10258 = vmatmul.f32.gmra.mxu0 %v16796_v43  ;;  %10294 = vmatmul.f32.gmra.mxu1 %v16787_v38 }
 0x798   : > { %v9739_v55 = vadd.f32 %v9738_v19, %v9697_v57  ;;  %10370 = vmatmul.f32.gmra.mxu3 %v19903_v16 }
 0x799   : > { %v18682_v35 = vadd.f32 %v18595_v34, %v12322_v9  ;;  %10336 = vmatmul.f32.gmra.mxu2 %v19903_v16 }
 0x79b   : > { %v9742_v54 = vpop.f32.mrf.mxu3 }
 0x79c   : > { %v9654_v47 = vpop.f32.mrf.mxu1  ;;  %v9766_v20 = vpop.f32.mrf.mxu0 }
 0x79d   : > { %v9655_v60 = vadd.f32 %v9654_v47, %v9621_v40  ;;  %v9704_v1 = vpop.f32.mrf.mxu2  ;;  %v9767_v33 = vadd.f32 %v9766_v20, %v9731_v58 }
 0x79e   : > { %v9705_v50 = vadd.f32 %v9704_v1, %v16899_v49 }
 0x79f   : > { %v12338_v44 = vmax.f32 %v9655_v60, 0.0  ;;  %10300 = vmatmul.f32.gmra.mxu1 %v16806_v46  ;;  %10396 = vmatmul.f32.vlgmr.msra.gmra.mxu0 %v19917_v26 }
 0x7a0   : > { %v9743_v12 = vadd.f32 %v9742_v54, %v9705_v50  ;;  %10521 = vmatmul.f32.vlgmr.msra.gmra.mxu3 %v19921_v18  ;;  %10718 = vmatpush.msra.mxu0 %v10679_v51 }
 0x7a1   : > { %v18690_v34 = vadd.f32 %v18604_v4, %v12338_v44  ;;  %10482 = vmatmul.f32.vlgmr.msra.gmra.mxu2 %v19920_v6  ;;  %10834 = vmatpush.msra.mxu3 %v10628_v3 }
 0x7a2   : > { %10800 = vmatpush.msra.mxu2 %v10680_v56 }
 0x7a3   : > { %v9881_v61 = vpop.f32.mrf.mxu3 }
 0x7a4   : > { %v9771_v8 = vpop.f32.mrf.mxu0  ;;  %v9805_v0 = vpop.f32.mrf.mxu1 }
 0x7a5   : > { %v9806_v21 = vadd.f32 %v9805_v0, %v9767_v33  ;;  %v9847_v42 = vpop.f32.mrf.mxu2  ;;  %v9772_v51 = vadd.f32 %v9771_v8, %v9735_v11 }
 0x7a7   : > { %v9848_v25 = vadd.f32 %v9847_v42, %v9806_v21  ;;  %10404 = vmatmul.f32.gmra.mxu0 %v16784_v37  ;;  %10446 = vmatmul.f32.vlgmr.msra.gmra.mxu1 %v16724_v2 }
 0x7a8   : > { %10527 = vmatmul.f32.gmra.mxu3 %v16767_v23  ;;  %10756 = vmatpush.msra.mxu1 %v10628_v3 }
 0x7a9   : > { %v9882_v4 = vadd.f32 %v9881_v61, %v9848_v25  ;;  %10487 = vmatmul.f32.gmra.mxu2 %v16754_v14 }
 0x7ab   : > { %v12291_v52 = vmax.f32 %v9882_v4, 0.0  ;;  %v9885_v56 = vpop.f32.mrf.mxu3 }
 0x7ac   : > { %v9776_v58 = vpop.f32.mrf.mxu0  ;;  %v9811_v28 = vpop.f32.mrf.mxu1 }
 0x7ad   : > { %v18698_v41 = vadd.f32 %v18615_v15, %v12291_v52  ;;  %v9812_v24 = vadd.f32 %v9811_v28, %v9772_v51  ;;  %v9851_v32 = vpop.f32.mrf.mxu2  ;;  %v9777_v11 = vadd.f32 %v9776_v58, %v9739_v55 }
 0x7af   : > { %v9852_v5 = vadd.f32 %v9851_v32, %v9812_v24  ;;  %10412 = vmatmul.f32.gmra.mxu0 %v16803_v45  ;;  %10450 = vmatmul.f32.gmra.mxu1 %v16745_v10 }
 0x7b0   : > { %10533 = vmatmul.f32.gmra.mxu3 %v16787_v38 }
 0x7b1   : > { %v9886_v3 = vadd.f32 %v9885_v56, %v9852_v5  ;;  %10492 = vmatmul.f32.gmra.mxu2 %v16777_v30  ;;  %v16603_v56 = vld [vmem:[%s16739_s29 + $0xa8] sm:$0x77] }
 0x7b2   : > { %8419 = vst [vmem:[#allocation1 + $0x10] ss:$2 sm:$0xff] %v16603_v56 }
 0x7b3   : > { %v12307_v19 = vmax.f32 %v9886_v3, 0.0  ;;  %v9889_v36 = vpop.f32.mrf.mxu3 }
 0x7b4   : > { %v9781_v27 = vpop.f32.mrf.mxu0  ;;  %v9817_v31 = vpop.f32.mrf.mxu1 }
 0x7b5   : > { %v18705_v15 = vadd.f32 %v18622_v7, %v12307_v19  ;;  %v9818_v59 = vadd.f32 %v9817_v31, %v9777_v11  ;;  %v9855_v57 = vpop.f32.mrf.mxu2  ;;  %v9782_v55 = vadd.f32 %v9781_v27, %v9743_v12 }
 0x7b7   : > { %v9856_v9 = vadd.f32 %v9855_v57, %v9818_v59  ;;  %10420 = vmatmul.f32.gmra.mxu0 %v16814_v48  ;;  %10454 = vmatmul.f32.gmra.mxu1 %v16760_v17 }
 0x7b8   : > { %10539 = vmatmul.f32.gmra.mxu3 %v16806_v46 }
 0x7b9   : > { %v9890_v40 = vadd.f32 %v9889_v36, %v9856_v9  ;;  %10497 = vmatmul.f32.gmra.mxu2 %v16796_v43  ;;  %v8424_v19 = vld.sshfl [vmem:[#allocation1 + $0x10] sm:$0xff pattern:$0x75316420] }
 0x7ba   : > { %v8450_v36 = vsel %vm336_vm1, %v8424_v19, 0 }
 0x7bb   : > { %v12323_v54 = vmax.f32 %v9890_v40, 0.0  ;;  %v9893_v47 = vpop.f32.mrf.mxu3  ;;  %v10867_v31 = vand.u32 4294901760, %v8450_v36 }
 0x7bc   : > { %v9823_v20 = vpop.f32.mrf.mxu1  ;;  %v9919_v60 = vpop.f32.mrf.mxu0 }
 0x7bd   : > { %v18712_v7 = vadd.f32 %v18629_v63, %v12323_v54  ;;  %v9824_v1 = vadd.f32 %v9823_v20, %v9782_v55  ;;  %v9859_v50 = vpop.f32.mrf.mxu2  ;;  %v9920_v33 = vadd.f32 %v9919_v60, %v19916_v39  ;;  %v10918_v55 = vsub.f32 %v8450_v36, %v10867_v31 }
 0x7bf   : > { %v9860_v44 = vadd.f32 %v9859_v50, %v9824_v1  ;;  %10458 = vmatmul.f32.gmra.mxu1 %v19903_v16  ;;  %10563 = vmatmul.f32.vlgmr.msrb.gmra.mxu0 %v16724_v2 }
 0x7c0   : > { %10685 = vmatmul.f32.vlgmr.msrb.gmra.mxu3 %v16724_v2  ;;  %10868 = vmatpush.msrb.mxu0 %v10867_v31 }
 0x7c1   : > { %v9894_v61 = vadd.f32 %v9893_v47, %v9860_v44  ;;  %10635 = vmatmul.f32.vlgmr.msrb.gmra.mxu2 %v19917_v26  ;;  %10995 = vmatpush.msrb.mxu3 %v10867_v31  ;;  %v10919_v47 = vand.u32 4294901760, %v10918_v55 }
 0x7c2   : > { %10957 = vmatpush.msrb.mxu2 %v10918_v55 }
 0x7c3   : > { %v12339_v12 = vmax.f32 %v9894_v61, 0.0  ;;  %v10044_v8 = vpop.f32.mrf.mxu3  ;;  %v10920_v1 = vsub.f32 %v10918_v55, %v10919_v47 }
 0x7c4   : > { %v9927_v0 = vpop.f32.mrf.mxu0  ;;  %v9969_v63 = vpop.f32.mrf.mxu1 }
 0x7c5   : > { %v18720_v21 = vadd.f32 %v18637_v62, %v12339_v12  ;;  %v9970_v42 = vadd.f32 %v9969_v63, %v9920_v33  ;;  %v10005_v25 = vpop.f32.mrf.mxu2  ;;  %v9928_v51 = vadd.f32 %v9927_v0, %v16879_v13  ;;  %v10921_v44 = vand.u32 4294901760, %v10920_v1 }
 0x7c7   : > { %v10006_v4 = vadd.f32 %v10005_v25, %v9970_v42  ;;  %10567 = vmatmul.f32.gmra.mxu0 %v16745_v10  ;;  %10597 = vmatmul.f32.vlgmr.msrb.gmra.mxu1 %v16724_v2 }
 0x7c8   : > { %10689 = vmatmul.f32.gmra.mxu3 %v16745_v10  ;;  %10922 = vmatpush.msrb.mxu1 %v10921_v44 }
 0x7c9   : > { %v10045_v52 = vadd.f32 %v10044_v8, %v10006_v4  ;;  %10643 = vmatmul.f32.gmra.mxu2 %v16784_v37 }
 0x7cb   : > { %v10050_v58 = vpop.f32.mrf.mxu3 }
 0x7cc   : > { %v9935_v28 = vpop.f32.mrf.mxu0  ;;  %v9973_v62 = vpop.f32.mrf.mxu1 }
 0x7cd   : > { %v9974_v24 = vadd.f32 %v9973_v62, %v9928_v51  ;;  %v10010_v32 = vpop.f32.mrf.mxu2  ;;  %v9936_v3 = vadd.f32 %v9935_v28, %v16889_v22 }
 0x7cf   : > { %v10011_v5 = vadd.f32 %v10010_v32, %v9974_v24  ;;  %10571 = vmatmul.f32.gmra.mxu0 %v16760_v17  ;;  %10601 = vmatmul.f32.gmra.mxu1 %v16745_v10  ;;  %v8425_v24 = vld.sshfl [vmem:[#allocation1 + $0x18] sm:$0xff pattern:$0x75316420] }
 0x7d0   : > { %10693 = vmatmul.f32.gmra.mxu3 %v16760_v17 }
 0x7d1   : > { %v10051_v11 = vadd.f32 %v10050_v58, %v10011_v5  ;;  %10651 = vmatmul.f32.gmra.mxu2 %v16803_v45  ;;  %v8452_v5 = vsel %vm336_vm1, %v8425_v24, 0 }
 0x7d3   : > { %v10056_v27 = vpop.f32.mrf.mxu3 }
 0x7d4   : > { %v9943_v59 = vpop.f32.mrf.mxu0  ;;  %v9977_v57 = vpop.f32.mrf.mxu1 }
 0x7d5   : > { %v9978_v9 = vadd.f32 %v9977_v57, %v9936_v3  ;;  %v10015_v40 = vpop.f32.mrf.mxu2  ;;  %v9944_v20 = vadd.f32 %v9943_v59, %v16899_v49  ;;  %v11106_v3 = vand.u32 4294901760, %v8452_v5 }
 0x7d7   : > { %v10016_v54 = vadd.f32 %v10015_v40, %v9978_v9  ;;  %10575 = vmatmul.f32.gmra.mxu0 %v19903_v16  ;;  %10605 = vmatmul.f32.gmra.mxu1 %v16760_v17 }
 0x7d8   : > { %10697 = vmatmul.f32.gmra.mxu3 %v19903_v16 }
 0x7d9   : > { %v10057_v60 = vadd.f32 %v10056_v27, %v10016_v54  ;;  %10659 = vmatmul.f32.gmra.mxu2 %v16814_v48  ;;  %v11157_v27 = vsub.f32 %v8452_v5, %v11106_v3 }
 0x7db   : > { %v10062_v50 = vpop.f32.mrf.mxu3  ;;  %v11158_v55 = vand.u32 4294901760, %v11157_v27 }
 0x7dc   : > { %v9981_v33 = vpop.f32.mrf.mxu1  ;;  %v10086_v61 = vpop.f32.mrf.mxu0 }
 0x7dd   : > { %v9982_v12 = vadd.f32 %v9981_v33, %v9944_v20  ;;  %v10020_v8 = vpop.f32.mrf.mxu2  ;;  %v10087_v42 = vadd.f32 %v10086_v61, %v10045_v52 }
 0x7df   : > { %v10021_v0 = vadd.f32 %v10020_v8, %v9982_v12  ;;  %10609 = vmatmul.f32.gmra.mxu1 %v19903_v16  ;;  %10721 = vmatmul.f32.vlgmr.msra.gmra.mxu0 %v19920_v6 }
 0x7e0   : > { %10836 = vmatmul.f32.vlgmr.msra.gmra.mxu3 %v16724_v2  ;;  %11039 = vmatpush.msra.mxu0 %v10919_v47 }
 0x7e1   : > { %v10063_v63 = vadd.f32 %v10062_v50, %v10021_v0  ;;  %10802 = vmatmul.f32.vlgmr.msra.gmra.mxu2 %v16724_v2 }
 0x7e2   : > { %11107 = vmatpush.msra.mxu2 %v11106_v3 }
 0x7e3   : > { %v10208_v25 = vpop.f32.mrf.mxu3 }
 0x7e4   : > { %v10090_v4 = vpop.f32.mrf.mxu0  ;;  %v10120_v51 = vpop.f32.mrf.mxu1 }
 0x7e5   : > { %v10121_v56 = vadd.f32 %v10120_v51, %v10087_v42  ;;  %v10158_v58 = vpop.f32.mrf.mxu2  ;;  %v10091_v19 = vadd.f32 %v10090_v4, %v10051_v11 }
 0x7e6   : > { %v10159_v28 = vadd.f32 %v10158_v58, %v19916_v39 }
 0x7e7   : > { %v12292_v62 = vmax.f32 %v10121_v56, 0.0  ;;  %10726 = vmatmul.f32.gmra.mxu0 %v16754_v14  ;;  %10760 = vmatmul.f32.vlgmr.msra.gmra.mxu1 %v19921_v18 }
 0x7e8   : > { %v10209_v32 = vadd.f32 %v10208_v25, %v10159_v28  ;;  %10840 = vmatmul.f32.gmra.mxu3 %v16745_v10  ;;  %11073 = vmatpush.msra.mxu1 %v10867_v31 }
 0x7e9   : > { %v18749_v52 = vadd.f32 %v18666_v29, %v12292_v62  ;;  %10806 = vmatmul.f32.gmra.mxu2 %v16745_v10  ;;  %v11159_v29 = vsub.f32 %v11157_v27, %v11158_v55 }
 0x7eb   : > { %v10212_v36 = vpop.f32.mrf.mxu3  ;;  %v11160_v20 = vand.u32 4294901760, %v11159_v29 }
 0x7ec   : > { %v10094_v59 = vpop.f32.mrf.mxu0  ;;  %v10124_v57 = vpop.f32.mrf.mxu1 }
 0x7ed   : > { %v10125_v9 = vadd.f32 %v10124_v57, %v10091_v19  ;;  %v10166_v40 = vpop.f32.mrf.mxu2  ;;  %v10095_v1 = vadd.f32 %v10094_v59, %v10057_v60  ;;  %11161 = vmatpush.msra.mxu3 %v11160_v20 }
 0x7ee   : > { %v10167_v54 = vadd.f32 %v10166_v40, %v16879_v13 }
 0x7ef   : > { %v12308_v47 = vmax.f32 %v10125_v9, 0.0  ;;  %10731 = vmatmul.f32.gmra.mxu0 %v16777_v30  ;;  %10766 = vmatmul.f32.gmra.mxu1 %v16767_v23 }
 0x7f0   : > { %v10213_v31 = vadd.f32 %v10212_v36, %v10167_v54  ;;  %10844 = vmatmul.f32.gmra.mxu3 %v16760_v17 }
 0x7f1   : > { %v18757_v11 = vadd.f32 %v18674_v53, %v12308_v47  ;;  %10810 = vmatmul.f32.gmra.mxu2 %v16760_v17 }
 0x7f3   : > { %v10216_v50 = vpop.f32.mrf.mxu3 }
 0x7f4   : > { %v10098_v44 = vpop.f32.mrf.mxu0  ;;  %v10128_v33 = vpop.f32.mrf.mxu1 }
 0x7f5   : > { %v10129_v61 = vadd.f32 %v10128_v33, %v10095_v1  ;;  %v10174_v12 = vpop.f32.mrf.mxu2  ;;  %v10099_v60 = vadd.f32 %v10098_v44, %v10063_v63 }
 0x7f6   : > { %v10175_v8 = vadd.f32 %v10174_v12, %v16889_v22 }
 0x7f7   : > { %v12324_v0 = vmax.f32 %v10129_v61, 0.0  ;;  %10736 = vmatmul.f32.gmra.mxu0 %v16796_v43  ;;  %10772 = vmatmul.f32.gmra.mxu1 %v16787_v38 }
 0x7f8   : > { %v10217_v42 = vadd.f32 %v10216_v50, %v10175_v8  ;;  %10848 = vmatmul.f32.gmra.mxu3 %v19903_v16 }
 0x7f9   : > { %v18765_v53 = vadd.f32 %v18682_v35, %v12324_v0  ;;  %10814 = vmatmul.f32.gmra.mxu2 %v19903_v16 }
 0x7fb   : > { %v10220_v25 = vpop.f32.mrf.mxu3 }
 0x7fc   : > { %v10132_v4 = vpop.f32.mrf.mxu1  ;;  %v10244_v51 = vpop.f32.mrf.mxu0 }
 0x7fd   : > { %v10133_v56 = vadd.f32 %v10132_v4, %v10099_v60  ;;  %v10182_v58 = vpop.f32.mrf.mxu2  ;;  %v10245_v63 = vadd.f32 %v10244_v51, %v10209_v32 }
 0x7fe   : > { %v10183_v28 = vadd.f32 %v10182_v58, %v16899_v49 }
 0x7ff   : > { %v12340_v62 = vmax.f32 %v10133_v56, 0.0  ;;  %10778 = vmatmul.f32.gmra.mxu1 %v16806_v46  ;;  %10874 = vmatmul.f32.vlgmr.msrb.gmra.mxu0 %v19917_v26 }
 0x800   : > { %v10221_v24 = vadd.f32 %v10220_v25, %v10183_v28  ;;  %10999 = vmatmul.f32.vlgmr.msrb.gmra.mxu3 %v19921_v18  ;;  %11196 = vmatpush.msrb.mxu0 %v11157_v27 }
 0x801   : > { %v18773_v35 = vadd.f32 %v18690_v34, %v12340_v62  ;;  %10960 = vmatmul.f32.vlgmr.msrb.gmra.mxu2 %v19920_v6  ;;  %11312 = vmatpush.msrb.mxu3 %v11106_v3 }
 0x802   : > { %11278 = vmatpush.msrb.mxu2 %v11158_v55 }
 0x803   : > { %v10359_v5 = vpop.f32.mrf.mxu3 }
 0x804   : > { %v10249_v19 = vpop.f32.mrf.mxu0  ;;  %v10283_v36 = vpop.f32.mrf.mxu1 }
 0x805   : > { %v10284_v59 = vadd.f32 %v10283_v36, %v10245_v63  ;;  %v10325_v57 = vpop.f32.mrf.mxu2  ;;  %v10250_v27 = vadd.f32 %v10249_v19, %v10213_v31 }
 0x807   : > { %v10326_v9 = vadd.f32 %v10325_v57, %v10284_v59  ;;  %10882 = vmatmul.f32.gmra.mxu0 %v16784_v37  ;;  %10924 = vmatmul.f32.vlgmr.msrb.gmra.mxu1 %v16724_v2 }
 0x808   : > { %11005 = vmatmul.f32.gmra.mxu3 %v16767_v23  ;;  %11234 = vmatpush.msrb.mxu1 %v11106_v3 }
 0x809   : > { %v10360_v34 = vadd.f32 %v10359_v5, %v10326_v9  ;;  %10965 = vmatmul.f32.gmra.mxu2 %v16754_v14 }
 0x80b   : > { %v12293_v40 = vmax.f32 %v10360_v34, 0.0  ;;  %v10363_v55 = vpop.f32.mrf.mxu3 }
 0x80c   : > { %v10254_v32 = vpop.f32.mrf.mxu0  ;;  %v10289_v54 = vpop.f32.mrf.mxu1 }
 0x80d   : > { %v18781_v47 = vadd.f32 %v18698_v41, %v12293_v40  ;;  %v10290_v29 = vadd.f32 %v10289_v54, %v10250_v27  ;;  %v10329_v20 = vpop.f32.mrf.mxu2  ;;  %v10255_v31 = vadd.f32 %v10254_v32, %v10217_v42 }
 0x80f   : > { %v10330_v1 = vadd.f32 %v10329_v20, %v10290_v29  ;;  %10890 = vmatmul.f32.gmra.mxu0 %v16803_v45  ;;  %10928 = vmatmul.f32.gmra.mxu1 %v16745_v10 }
 0x810   : > { %11011 = vmatmul.f32.gmra.mxu3 %v16787_v38 }
 0x811   : > { %v10364_v3 = vadd.f32 %v10363_v55, %v10330_v1  ;;  %10970 = vmatmul.f32.gmra.mxu2 %v16777_v30  ;;  %v16604_v55 = vld [vmem:[%s16739_s29 + $0xb0] sm:$0x77] }
 0x812   : > { %8420 = vst [vmem:[#allocation1 + $0x20] ss:$2 sm:$0xff] %v16604_v55 }
 0x813   : > { %v12309_v50 = vmax.f32 %v10364_v3, 0.0  ;;  %v10367_v44 = vpop.f32.mrf.mxu3 }
 0x814   : > { %v10259_v33 = vpop.f32.mrf.mxu0  ;;  %v10295_v61 = vpop.f32.mrf.mxu1 }
 0x815   : > { %v18788_v41 = vadd.f32 %v18705_v15, %v12309_v50  ;;  %v10296_v12 = vadd.f32 %v10295_v61, %v10255_v31  ;;  %v10333_v8 = vpop.f32.mrf.mxu2  ;;  %v10260_v42 = vadd.f32 %v10259_v33, %v10221_v24 }
 0x817   : > { %v10334_v0 = vadd.f32 %v10333_v8, %v10296_v12  ;;  %10898 = vmatmul.f32.gmra.mxu0 %v16814_v48  ;;  %10932 = vmatmul.f32.gmra.mxu1 %v16760_v17 }
 0x818   : > { %11017 = vmatmul.f32.gmra.mxu3 %v16806_v46 }
 0x819   : > { %v10368_v60 = vadd.f32 %v10367_v44, %v10334_v0  ;;  %10975 = vmatmul.f32.gmra.mxu2 %v16796_v43  ;;  %v8426_v50 = vld.sshfl [vmem:[#allocation1 + $0x20] sm:$0xff pattern:$0x75316420] }
 0x81a   : > { %v8454_v44 = vsel %vm336_vm1, %v8426_v50, 0 }
 0x81b   : > { %v12325_v25 = vmax.f32 %v10368_v60, 0.0  ;;  %v10371_v4 = vpop.f32.mrf.mxu3  ;;  %v11345_v61 = vand.u32 4294901760, %v8454_v44 }
 0x81c   : > { %v10301_v51 = vpop.f32.mrf.mxu1  ;;  %v10397_v56 = vpop.f32.mrf.mxu0 }
 0x81d   : > { %v18795_v15 = vadd.f32 %v18712_v7, %v12325_v25  ;;  %v10302_v58 = vadd.f32 %v10301_v51, %v10260_v42  ;;  %v10337_v28 = vpop.f32.mrf.mxu2  ;;  %v10398_v63 = vadd.f32 %v10397_v56, %v19916_v39  ;;  %v11396_v42 = vsub.f32 %v8454_v44, %v11345_v61 }
 0x81f   : > { %v10338_v62 = vadd.f32 %v10337_v28, %v10302_v58  ;;  %10936 = vmatmul.f32.gmra.mxu1 %v19903_v16  ;;  %11041 = vmatmul.f32.vlgmr.msra.gmra.mxu0 %v16724_v2 }
 0x820   : > { %11163 = vmatmul.f32.vlgmr.msra.gmra.mxu3 %v16724_v2  ;;  %11346 = vmatpush.msra.mxu0 %v11345_v61 }
 0x821   : > { %v10372_v5 = vadd.f32 %v10371_v4, %v10338_v62  ;;  %11113 = vmatmul.f32.vlgmr.msra.gmra.mxu2 %v19917_v26  ;;  %11473 = vmatpush.msra.mxu3 %v11345_v61  ;;  %v11397_v4 = vand.u32 4294901760, %v11396_v42 }
 0x822   : > { %11435 = vmatpush.msra.mxu2 %v11396_v42 }
 0x823   : > { %v12341_v24 = vmax.f32 %v10372_v5, 0.0  ;;  %v10522_v19 = vpop.f32.mrf.mxu3  ;;  %v11398_v58 = vsub.f32 %v11396_v42, %v11397_v4 }
 0x824   : > { %v10405_v36 = vpop.f32.mrf.mxu0  ;;  %v10447_v7 = vpop.f32.mrf.mxu1 }
 0x825   : > { %v18803_v59 = vadd.f32 %v18720_v21, %v12341_v24  ;;  %v10448_v57 = vadd.f32 %v10447_v7, %v10398_v63  ;;  %v10483_v9 = vpop.f32.mrf.mxu2  ;;  %v10406_v27 = vadd.f32 %v10405_v36, %v16879_v13  ;;  %v11399_v62 = vand.u32 4294901760, %v11398_v58 }
 0x827   : > { %v10484_v34 = vadd.f32 %v10483_v9, %v10448_v57  ;;  %11045 = vmatmul.f32.gmra.mxu0 %v16745_v10  ;;  %11075 = vmatmul.f32.vlgmr.msra.gmra.mxu1 %v16724_v2 }
 0x828   : > { %11167 = vmatmul.f32.gmra.mxu3 %v16745_v10  ;;  %11400 = vmatpush.msra.mxu1 %v11399_v62 }
 0x829   : > { %v10523_v40 = vadd.f32 %v10522_v19, %v10484_v34  ;;  %11121 = vmatmul.f32.gmra.mxu2 %v16784_v37 }
 0x82b   : > { %v10528_v32 = vpop.f32.mrf.mxu3 }
 0x82c   : > { %v10413_v54 = vpop.f32.mrf.mxu0  ;;  %v10451_v21 = vpop.f32.mrf.mxu1 }
 0x82d   : > { %v10452_v29 = vadd.f32 %v10451_v21, %v10406_v27  ;;  %v10488_v20 = vpop.f32.mrf.mxu2  ;;  %v10414_v3 = vadd.f32 %v10413_v54, %v16889_v22 }
 0x82f   : > { %v10489_v1 = vadd.f32 %v10488_v20, %v10452_v29  ;;  %11049 = vmatmul.f32.gmra.mxu0 %v16760_v17  ;;  %11079 = vmatmul.f32.gmra.mxu1 %v16745_v10  ;;  %v8427_v29 = vld.sshfl [vmem:[#allocation1 + $0x28] sm:$0xff pattern:$0x75316420] }
 0x830   : > { %11171 = vmatmul.f32.gmra.mxu3 %v16760_v17 }
 0x831   : > { %v10529_v31 = vadd.f32 %v10528_v32, %v10489_v1  ;;  %11129 = vmatmul.f32.gmra.mxu2 %v16803_v45  ;;  %v8456_v1 = vsel %vm336_vm1, %v8427_v29, 0 }
 0x833   : > { %v10534_v33 = vpop.f32.mrf.mxu3 }
 0x834   : > { %v10421_v12 = vpop.f32.mrf.mxu0  ;;  %v10455_v8 = vpop.f32.mrf.mxu1 }
 0x835   : > { %v10456_v0 = vadd.f32 %v10455_v8, %v10414_v3  ;;  %v10493_v60 = vpop.f32.mrf.mxu2  ;;  %v10422_v51 = vadd.f32 %v10421_v12, %v16899_v49  ;;  %v11584_v3 = vand.u32 4294901760, %v8456_v1 }
 0x837   : > { %v10494_v25 = vadd.f32 %v10493_v60, %v10456_v0  ;;  %11053 = vmatmul.f32.gmra.mxu0 %v19903_v16  ;;  %11083 = vmatmul.f32.gmra.mxu1 %v16760_v17 }
 0x838   : > { %11175 = vmatmul.f32.gmra.mxu3 %v19903_v16 }
 0x839   : > { %v10535_v56 = vadd.f32 %v10534_v33, %v10494_v25  ;;  %11137 = vmatmul.f32.gmra.mxu2 %v16814_v48  ;;  %v11635_v33 = vsub.f32 %v8456_v1, %v11584_v3 }
 0x83b   : > { %v10540_v28 = vpop.f32.mrf.mxu3  ;;  %v11636_v42 = vand.u32 4294901760, %v11635_v33 }
 0x83c   : > { %v10459_v63 = vpop.f32.mrf.mxu1  ;;  %v10564_v5 = vpop.f32.mrf.mxu0 }
 0x83d   : > { %v10460_v24 = vadd.f32 %v10459_v63, %v10422_v51  ;;  %v10498_v19 = vpop.f32.mrf.mxu2  ;;  %v10565_v57 = vadd.f32 %v10564_v5, %v10523_v40 }
 0x83f   : > { %v10499_v36 = vadd.f32 %v10498_v19, %v10460_v24  ;;  %11087 = vmatmul.f32.gmra.mxu1 %v19903_v16  ;;  %11199 = vmatmul.f32.vlgmr.msrb.gmra.mxu0 %v19920_v6 }
 0x840   : > { %11314 = vmatmul.f32.vlgmr.msrb.gmra.mxu3 %v16724_v2  ;;  %11517 = vmatpush.msrb.mxu0 %v11397_v4 }
 0x841   : > { %v10541_v7 = vadd.f32 %v10540_v28, %v10499_v36  ;;  %11280 = vmatmul.f32.vlgmr.msrb.gmra.mxu2 %v16724_v2 }
 0x842   : > { %11585 = vmatpush.msrb.mxu2 %v11584_v3 }
 0x843   : > { %v10686_v9 = vpop.f32.mrf.mxu3 }
 0x844   : > { %v10568_v34 = vpop.f32.mrf.mxu0  ;;  %v10598_v27 = vpop.f32.mrf.mxu1 }
 0x845   : > { %v10599_v55 = vadd.f32 %v10598_v27, %v10565_v57  ;;  %v10636_v32 = vpop.f32.mrf.mxu2  ;;  %v10569_v50 = vadd.f32 %v10568_v34, %v10529_v31 }
 0x846   : > { %v10637_v54 = vadd.f32 %v10636_v32, %v19916_v39 }
 0x847   : > { %v12294_v21 = vmax.f32 %v10599_v55, 0.0  ;;  %11204 = vmatmul.f32.gmra.mxu0 %v16754_v14  ;;  %11238 = vmatmul.f32.vlgmr.msrb.gmra.mxu1 %v19921_v18 }
 0x848   : > { %v10687_v20 = vadd.f32 %v10686_v9, %v10637_v54  ;;  %11318 = vmatmul.f32.gmra.mxu3 %v16745_v10  ;;  %11551 = vmatpush.msrb.mxu1 %v11345_v61 }
 0x849   : > { %v18832_v40 = vadd.f32 %v18749_v52, %v12294_v21  ;;  %11284 = vmatmul.f32.gmra.mxu2 %v16745_v10  ;;  %v11637_v52 = vsub.f32 %v11635_v33, %v11636_v42 }
 0x84b   : > { %v10690_v44 = vpop.f32.mrf.mxu3  ;;  %v11638_v51 = vand.u32 4294901760, %v11637_v52 }
 0x84c   : > { %v10572_v12 = vpop.f32.mrf.mxu0  ;;  %v10602_v8 = vpop.f32.mrf.mxu1 }
 0x84d   : > { %v10603_v0 = vadd.f32 %v10602_v8, %v10569_v50  ;;  %v10644_v60 = vpop.f32.mrf.mxu2  ;;  %v10573_v58 = vadd.f32 %v10572_v12, %v10535_v56  ;;  %11639 = vmatpush.msrb.mxu3 %v11638_v51 }
 0x84e   : > { %v10645_v25 = vadd.f32 %v10644_v60, %v16879_v13 }
 0x84f   : > { %v12310_v4 = vmax.f32 %v10603_v0, 0.0  ;;  %11209 = vmatmul.f32.gmra.mxu0 %v16777_v30  ;;  %11244 = vmatmul.f32.gmra.mxu1 %v16767_v23 }
 0x850   : > { %v10691_v61 = vadd.f32 %v10690_v44, %v10645_v25  ;;  %11322 = vmatmul.f32.gmra.mxu3 %v16760_v17 }
 0x851   : > { %v18840_v31 = vadd.f32 %v18757_v11, %v12310_v4  ;;  %11288 = vmatmul.f32.gmra.mxu2 %v16760_v17 }
 0x853   : > { %v10694_v28 = vpop.f32.mrf.mxu3 }
 0x854   : > { %v10576_v62 = vpop.f32.mrf.mxu0  ;;  %v10606_v63 = vpop.f32.mrf.mxu1 }
 0x855   : > { %v10607_v5 = vadd.f32 %v10606_v63, %v10573_v58  ;;  %v10652_v24 = vpop.f32.mrf.mxu2  ;;  %v10577_v56 = vadd.f32 %v10576_v62, %v10541_v7 }
 0x856   : > { %v10653_v19 = vadd.f32 %v10652_v24, %v16889_v22 }
 0x857   : > { %v12326_v36 = vmax.f32 %v10607_v5, 0.0  ;;  %11214 = vmatmul.f32.gmra.mxu0 %v16796_v43  ;;  %11250 = vmatmul.f32.gmra.mxu1 %v16787_v38 }
 0x858   : > { %v10695_v57 = vadd.f32 %v10694_v28, %v10653_v19  ;;  %11326 = vmatmul.f32.gmra.mxu3 %v19903_v16 }
 0x859   : > { %v18848_v11 = vadd.f32 %v18765_v53, %v12326_v36  ;;  %11292 = vmatmul.f32.gmra.mxu2 %v19903_v16 }
 0x85b   : > { %v10698_v9 = vpop.f32.mrf.mxu3 }
 0x85c   : > { %v10610_v34 = vpop.f32.mrf.mxu1  ;;  %v10722_v27 = vpop.f32.mrf.mxu0 }
 0x85d   : > { %v10611_v55 = vadd.f32 %v10610_v34, %v10577_v56  ;;  %v10660_v32 = vpop.f32.mrf.mxu2  ;;  %v10723_v7 = vadd.f32 %v10722_v27, %v10687_v20 }
 0x85e   : > { %v10661_v54 = vadd.f32 %v10660_v32, %v16899_v49 }
 0x85f   : > { %v12342_v21 = vmax.f32 %v10611_v55, 0.0  ;;  %11256 = vmatmul.f32.gmra.mxu1 %v16806_v46  ;;  %11352 = vmatmul.f32.vlgmr.msra.gmra.mxu0 %v19917_v26 }
 0x860   : > { %v10699_v29 = vadd.f32 %v10698_v9, %v10661_v54  ;;  %11477 = vmatmul.f32.vlgmr.msra.gmra.mxu3 %v19921_v18  ;;  %11674 = vmatpush.msra.mxu0 %v11635_v33 }
 0x861   : > { %v18856_v53 = vadd.f32 %v18773_v35, %v12342_v21  ;;  %11438 = vmatmul.f32.vlgmr.msra.gmra.mxu2 %v19920_v6  ;;  %11790 = vmatpush.msra.mxu3 %v11584_v3 }
 0x862   : > { %11756 = vmatpush.msra.mxu2 %v11636_v42 }
 0x863   : > { %v10837_v1 = vpop.f32.mrf.mxu3 }
 0x864   : > { %v10727_v50 = vpop.f32.mrf.mxu0  ;;  %v10761_v44 = vpop.f32.mrf.mxu1 }
 0x865   : > { %v10762_v12 = vadd.f32 %v10761_v44, %v10723_v7  ;;  %v10803_v8 = vpop.f32.mrf.mxu2  ;;  %v10728_v33 = vadd.f32 %v10727_v50, %v10691_v61 }
 0x867   : > { %v10804_v0 = vadd.f32 %v10803_v8, %v10762_v12  ;;  %11360 = vmatmul.f32.gmra.mxu0 %v16784_v37  ;;  %11402 = vmatmul.f32.vlgmr.msra.gmra.mxu1 %v16724_v2 }
 0x868   : > { %11483 = vmatmul.f32.gmra.mxu3 %v16767_v23  ;;  %11712 = vmatpush.msra.mxu1 %v11584_v3 }
 0x869   : > { %v10838_v35 = vadd.f32 %v10837_v1, %v10804_v0  ;;  %11443 = vmatmul.f32.gmra.mxu2 %v16754_v14 }
 0x86b   : > { %v12295_v60 = vmax.f32 %v10838_v35, 0.0  ;;  %v10841_v42 = vpop.f32.mrf.mxu3 }
 0x86c   : > { %v10732_v20 = vpop.f32.mrf.mxu0  ;;  %v10767_v25 = vpop.f32.mrf.mxu1 }
 0x86d   : > { %v18864_v4 = vadd.f32 %v18781_v47, %v12295_v60  ;;  %v10768_v52 = vadd.f32 %v10767_v25, %v10728_v33  ;;  %v10807_v51 = vpop.f32.mrf.mxu2  ;;  %v10733_v61 = vadd.f32 %v10732_v20, %v10695_v57 }
 0x86f   : > { %v10808_v58 = vadd.f32 %v10807_v51, %v10768_v52  ;;  %11368 = vmatmul.f32.gmra.mxu0 %v16803_v45  ;;  %11406 = vmatmul.f32.gmra.mxu1 %v16745_v10 }
 0x870   : > { %11489 = vmatmul.f32.gmra.mxu3 %v16787_v38 }
 0x871   : > { %v10842_v3 = vadd.f32 %v10841_v42, %v10808_v58  ;;  %11448 = vmatmul.f32.gmra.mxu2 %v16777_v30  ;;  %v16605_v42 = vld [vmem:[%s16739_s29 + $0xb8] sm:$0x77] }
 0x872   : > { %8421 = vst [vmem:[#allocation1 + $0x30] ss:$2 sm:$0xff] %v16605_v42 }
 0x873   : > { %v12311_v28 = vmax.f32 %v10842_v3, 0.0  ;;  %v10845_v62 = vpop.f32.mrf.mxu3 }
 0x874   : > { %v10737_v63 = vpop.f32.mrf.mxu0  ;;  %v10773_v5 = vpop.f32.mrf.mxu1 }
 0x875   : > { %v18871_v47 = vadd.f32 %v18788_v41, %v12311_v28  ;;  %v10774_v24 = vadd.f32 %v10773_v5, %v10733_v61  ;;  %v10811_v19 = vpop.f32.mrf.mxu2  ;;  %v10738_v57 = vadd.f32 %v10737_v63, %v10699_v29 }
 0x877   : > { %v10812_v36 = vadd.f32 %v10811_v19, %v10774_v24  ;;  %11376 = vmatmul.f32.gmra.mxu0 %v16814_v48  ;;  %11410 = vmatmul.f32.gmra.mxu1 %v16760_v17 }
 0x878   : > { %11495 = vmatmul.f32.gmra.mxu3 %v16806_v46 }
 0x879   : > { %v10846_v56 = vadd.f32 %v10845_v62, %v10812_v36  ;;  %11453 = vmatmul.f32.gmra.mxu2 %v16796_v43  ;;  %v8428_v28 = vld.sshfl [vmem:[#allocation1 + $0x30] sm:$0xff pattern:$0x75316420] }
 0x87a   : > { %v8458_v62 = vsel %vm336_vm1, %v8428_v28, 0 }
 0x87b   : > { %v12327_v9 = vmax.f32 %v10846_v56, 0.0  ;;  %v10849_v34 = vpop.f32.mrf.mxu3  ;;  %v11823_v5 = vand.u32 4294901760, %v8458_v62 }
 0x87c   : > { %v10779_v27 = vpop.f32.mrf.mxu1  ;;  %v10875_v55 = vpop.f32.mrf.mxu0 }
 0x87d   : > { %v18878_v41 = vadd.f32 %v18795_v15, %v12327_v9  ;;  %v10780_v32 = vadd.f32 %v10779_v27, %v10738_v57  ;;  %v10815_v54 = vpop.f32.mrf.mxu2  ;;  %v10876_v7 = vadd.f32 %v10875_v55, %v19916_v39  ;;  %v11874_v57 = vsub.f32 %v8458_v62, %v11823_v5 }
 0x87f   : > { %v10816_v21 = vadd.f32 %v10815_v54, %v10780_v32  ;;  %11414 = vmatmul.f32.gmra.mxu1 %v19903_v16  ;;  %11519 = vmatmul.f32.vlgmr.msrb.gmra.mxu0 %v16724_v2 }
 0x880   : > { %11641 = vmatmul.f32.vlgmr.msrb.gmra.mxu3 %v16724_v2  ;;  %11824 = vmatpush.msrb.mxu0 %v11823_v5 }
 0x881   : > { %v10850_v1 = vadd.f32 %v10849_v34, %v10816_v21  ;;  %11591 = vmatmul.f32.vlgmr.msrb.gmra.mxu2 %v19917_v26  ;;  %11951 = vmatpush.msrb.mxu3 %v11823_v5  ;;  %v11875_v34 = vand.u32 4294901760, %v11874_v57 }
 0x882   : > { %11913 = vmatpush.msrb.mxu2 %v11874_v57 }
 0x883   : > { %v12343_v29 = vmax.f32 %v10850_v1, 0.0  ;;  %v11000_v50 = vpop.f32.mrf.mxu3  ;;  %v11876_v32 = vsub.f32 %v11874_v57, %v11875_v34 }
 0x884   : > { %v10883_v44 = vpop.f32.mrf.mxu0  ;;  %v10925_v15 = vpop.f32.mrf.mxu1 }
 0x885   : > { %v18886_v12 = vadd.f32 %v18803_v59, %v12343_v29  ;;  %v10926_v8 = vadd.f32 %v10925_v15, %v10876_v7  ;;  %v10961_v0 = vpop.f32.mrf.mxu2  ;;  %v10884_v33 = vadd.f32 %v10883_v44, %v16879_v13  ;;  %v11877_v21 = vand.u32 4294901760, %v11876_v32 }
 0x887   : > { %v10962_v35 = vadd.f32 %v10961_v0, %v10926_v8  ;;  %11523 = vmatmul.f32.gmra.mxu0 %v16745_v10  ;;  %11553 = vmatmul.f32.vlgmr.msrb.gmra.mxu1 %v16724_v2 }
 0x888   : > { %11645 = vmatmul.f32.gmra.mxu3 %v16745_v10  ;;  %11878 = vmatpush.msrb.mxu1 %v11877_v21 }
 0x889   : > { %v11001_v60 = vadd.f32 %v11000_v50, %v10962_v35  ;;  %11599 = vmatmul.f32.gmra.mxu2 %v16784_v37 }
 0x88b   : > { %v11006_v20 = vpop.f32.mrf.mxu3 }
 0x88c   : > { %v10891_v25 = vpop.f32.mrf.mxu0  ;;  %v10929_v59 = vpop.f32.mrf.mxu1 }
 0x88d   : > { %v10930_v52 = vadd.f32 %v10929_v59, %v10884_v33  ;;  %v10966_v51 = vpop.f32.mrf.mxu2  ;;  %v10892_v3 = vadd.f32 %v10891_v25, %v16889_v22 }
 0x88f   : > { %v10967_v58 = vadd.f32 %v10966_v51, %v10930_v52  ;;  %11527 = vmatmul.f32.gmra.mxu0 %v16760_v17  ;;  %11557 = vmatmul.f32.gmra.mxu1 %v16745_v10  ;;  %v8429_v52 = vld.sshfl [vmem:[#allocation1 + $0x38] sm:$0xff pattern:$0x75316420] }
 0x890   : > { %11649 = vmatmul.f32.gmra.mxu3 %v16760_v17 }
 0x891   : > { %v11007_v61 = vadd.f32 %v11006_v20, %v10967_v58  ;;  %11607 = vmatmul.f32.gmra.mxu2 %v16803_v45  ;;  %v8460_v58 = vsel %vm336_vm1, %v8429_v52, 0 }
 0x893   : > { %v11012_v63 = vpop.f32.mrf.mxu3 }
 0x894   : > { %v10899_v24 = vpop.f32.mrf.mxu0  ;;  %v10933_v19 = vpop.f32.mrf.mxu1 }
 0x895   : > { %v10934_v36 = vadd.f32 %v10933_v19, %v10892_v3  ;;  %v10971_v56 = vpop.f32.mrf.mxu2  ;;  %v10900_v27 = vadd.f32 %v10899_v24, %v16899_v49  ;;  %v12062_v3 = vand.u32 4294901760, %v8460_v58 }
 0x897   : > { %v10972_v9 = vadd.f32 %v10971_v56, %v10934_v36  ;;  %11531 = vmatmul.f32.gmra.mxu0 %v19903_v16  ;;  %11561 = vmatmul.f32.gmra.mxu1 %v16760_v17 }
 0x898   : > { %11653 = vmatmul.f32.gmra.mxu3 %v19903_v16 }
 0x899   : > { %v11013_v55 = vadd.f32 %v11012_v63, %v10972_v9  ;;  %11615 = vmatmul.f32.gmra.mxu2 %v16814_v48  ;;  %v12113_v63 = vsub.f32 %v8460_v58, %v12062_v3 }
 0x89b   : > { %v11018_v54 = vpop.f32.mrf.mxu3  ;;  %v12114_v57 = vand.u32 4294901760, %v12113_v63 }
 0x89c   : > { %v10937_v7 = vpop.f32.mrf.mxu1  ;;  %v11042_v1 = vpop.f32.mrf.mxu0 }
 0x89d   : > { %v10938_v29 = vadd.f32 %v10937_v7, %v10900_v27  ;;  %v10976_v50 = vpop.f32.mrf.mxu2  ;;  %v11043_v8 = vadd.f32 %v11042_v1, %v11001_v60 }
 0x89f   : > { %v10977_v44 = vadd.f32 %v10976_v50, %v10938_v29  ;;  %11565 = vmatmul.f32.gmra.mxu1 %v19903_v16  ;;  %11677 = vmatmul.f32.vlgmr.msra.gmra.mxu0 %v19920_v6 }
 0x8a0   : > { %11792 = vmatmul.f32.vlgmr.msra.gmra.mxu3 %v16724_v2  ;;  %11995 = vmatpush.msra.mxu0 %v11875_v34 }
 0x8a1   : > { %v11019_v15 = vadd.f32 %v11018_v54, %v10977_v44  ;;  %11758 = vmatmul.f32.vlgmr.msra.gmra.mxu2 %v16724_v2 }
 0x8a2   : > { %12063 = vmatpush.msra.mxu2 %v12062_v3 }
 0x8a3   : > { %v11164_v0 = vpop.f32.mrf.mxu3 }
 0x8a4   : > { %v11046_v35 = vpop.f32.mrf.mxu0  ;;  %v11076_v33 = vpop.f32.mrf.mxu1 }
 0x8a5   : > { %v11077_v42 = vadd.f32 %v11076_v33, %v11043_v8  ;;  %v11114_v20 = vpop.f32.mrf.mxu2  ;;  %v11047_v28 = vadd.f32 %v11046_v35, %v11007_v61 }
 0x8a6   : > { %v11115_v25 = vadd.f32 %v11114_v20, %v19916_v39 }
 0x8a7   : > { %v12296_v59 = vmax.f32 %v11077_v42, 0.0  ;;  %11682 = vmatmul.f32.gmra.mxu0 %v16754_v14  ;;  %11716 = vmatmul.f32.vlgmr.msra.gmra.mxu1 %v19921_v18 }
 0x8a8   : > { %v11165_v51 = vadd.f32 %v11164_v0, %v11115_v25  ;;  %11796 = vmatmul.f32.gmra.mxu3 %v16745_v10  ;;  %12029 = vmatpush.msra.mxu1 %v11823_v5 }
 0x8a9   : > { %v18915_v60 = vadd.f32 %v18832_v40, %v12296_v59  ;;  %11762 = vmatmul.f32.gmra.mxu2 %v16745_v10  ;;  %v12115_v40 = vsub.f32 %v12113_v63, %v12114_v57 }
 0x8ab   : > { %v11168_v62 = vpop.f32.mrf.mxu3  ;;  %v12116_v27 = vand.u32 4294901760, %v12115_v40 }
 0x8ac   : > { %v11050_v24 = vpop.f32.mrf.mxu0  ;;  %v11080_v19 = vpop.f32.mrf.mxu1 }
 0x8ad   : > { %v11081_v36 = vadd.f32 %v11080_v19, %v11047_v28  ;;  %v11122_v56 = vpop.f32.mrf.mxu2  ;;  %v11051_v32 = vadd.f32 %v11050_v24, %v11013_v55  ;;  %12117 = vmatpush.msra.mxu3 %v12116_v27 }
 0x8ae   : > { %v11123_v9 = vadd.f32 %v11122_v56, %v16879_v13 }
 0x8af   : > { %v12312_v34 = vmax.f32 %v11081_v36, 0.0  ;;  %11687 = vmatmul.f32.gmra.mxu0 %v16777_v30  ;;  %11722 = vmatmul.f32.gmra.mxu1 %v16767_v23 }
 0x8b0   : > { %v11169_v5 = vadd.f32 %v11168_v62, %v11123_v9  ;;  %11800 = vmatmul.f32.gmra.mxu3 %v16760_v17 }
 0x8b1   : > { %v18923_v61 = vadd.f32 %v18840_v31, %v12312_v34  ;;  %11766 = vmatmul.f32.gmra.mxu2 %v16760_v17 }
 0x8b3   : > { %v11172_v54 = vpop.f32.mrf.mxu3 }
 0x8b4   : > { %v11054_v21 = vpop.f32.mrf.mxu0  ;;  %v11084_v7 = vpop.f32.mrf.mxu1 }
 0x8b5   : > { %v11085_v1 = vadd.f32 %v11084_v7, %v11051_v32  ;;  %v11130_v29 = vpop.f32.mrf.mxu2  ;;  %v11055_v55 = vadd.f32 %v11054_v21, %v11019_v15 }
 0x8b6   : > { %v11131_v50 = vadd.f32 %v11130_v29, %v16889_v22 }
 0x8b7   : > { %v12328_v44 = vmax.f32 %v11085_v1, 0.0  ;;  %11692 = vmatmul.f32.gmra.mxu0 %v16796_v43  ;;  %11728 = vmatmul.f32.gmra.mxu1 %v16787_v38 }
 0x8b8   : > { %v11173_v8 = vadd.f32 %v11172_v54, %v11131_v50  ;;  %11804 = vmatmul.f32.gmra.mxu3 %v19903_v16 }
 0x8b9   : > { %v18931_v31 = vadd.f32 %v18848_v11, %v12328_v44  ;;  %11770 = vmatmul.f32.gmra.mxu2 %v19903_v16 }
 0x8bb   : > { %v11176_v0 = vpop.f32.mrf.mxu3 }
 0x8bc   : > { %v11088_v35 = vpop.f32.mrf.mxu1  ;;  %v11200_v33 = vpop.f32.mrf.mxu0 }
 0x8bd   : > { %v11089_v42 = vadd.f32 %v11088_v35, %v11055_v55  ;;  %v11138_v20 = vpop.f32.mrf.mxu2  ;;  %v11201_v15 = vadd.f32 %v11200_v33, %v11165_v51 }
 0x8be   : > { %v11139_v25 = vadd.f32 %v11138_v20, %v16899_v49 }
 0x8bf   : > { %v12344_v59 = vmax.f32 %v11089_v42, 0.0  ;;  %11734 = vmatmul.f32.gmra.mxu1 %v16806_v46  ;;  %11830 = vmatmul.f32.vlgmr.msrb.gmra.mxu0 %v19917_v26 }
 0x8c0   : > { %v11177_v52 = vadd.f32 %v11176_v0, %v11139_v25  ;;  %11955 = vmatmul.f32.vlgmr.msrb.gmra.mxu3 %v19921_v18  ;;  %12152 = vmatpush.msrb.mxu0 %v12113_v63 }
 0x8c1   : > { %v18939_v11 = vadd.f32 %v18856_v53, %v12344_v59  ;;  %11916 = vmatmul.f32.vlgmr.msrb.gmra.mxu2 %v19920_v6  ;;  %12268 = vmatpush.msrb.mxu3 %v12062_v3 }
 0x8c2   : > { %12234 = vmatpush.msrb.mxu2 %v12114_v57 }
 0x8c3   : > { %v11315_v58 = vpop.f32.mrf.mxu3 }
 0x8c4   : > { %v11205_v28 = vpop.f32.mrf.mxu0  ;;  %v11239_v62 = vpop.f32.mrf.mxu1 }
 0x8c5   : > { %v11240_v24 = vadd.f32 %v11239_v62, %v11201_v15  ;;  %v11281_v19 = vpop.f32.mrf.mxu2  ;;  %v11206_v63 = vadd.f32 %v11205_v28, %v11169_v5 }
 0x8c7   : > { %v11282_v36 = vadd.f32 %v11281_v19, %v11240_v24  ;;  %11838 = vmatmul.f32.gmra.mxu0 %v16784_v37  ;;  %11880 = vmatmul.f32.vlgmr.msrb.gmra.mxu1 %v16724_v2 }
 0x8c8   : > { %11961 = vmatmul.f32.gmra.mxu3 %v16767_v23  ;;  %12190 = vmatpush.msrb.mxu1 %v12062_v3 }
 0x8c9   : > { %v11316_v53 = vadd.f32 %v11315_v58, %v11282_v36  ;;  %11921 = vmatmul.f32.gmra.mxu2 %v16754_v14 }
 0x8cb   : > { %v12297_v56 = vmax.f32 %v11316_v53, 0.0  ;;  %v11319_v57 = vpop.f32.mrf.mxu3 }
 0x8cc   : > { %v11210_v51 = vpop.f32.mrf.mxu0  ;;  %v11245_v9 = vpop.f32.mrf.mxu1 }
 0x8cd   : > { %v18947_v34 = vadd.f32 %v18864_v4, %v12297_v56  ;;  %v11246_v40 = vadd.f32 %v11245_v9, %v11206_v63  ;;  %v11285_v27 = vpop.f32.mrf.mxu2  ;;  %v11211_v5 = vadd.f32 %v11210_v51, %v11173_v8 }
 0x8cf   : > { %v11286_v32 = vadd.f32 %v11285_v27, %v11246_v40  ;;  %11846 = vmatmul.f32.gmra.mxu0 %v16803_v45  ;;  %11884 = vmatmul.f32.gmra.mxu1 %v16745_v10 }
 0x8d0   : > { %11967 = vmatmul.f32.gmra.mxu3 %v16787_v38 }
 0x8d1   : > { %v11320_v3 = vadd.f32 %v11319_v57, %v11286_v32  ;;  %11926 = vmatmul.f32.gmra.mxu2 %v16777_v30  ;;  %v16606_v57 = vld [vmem:[%s16739_s29 + $0xc0] sm:$0x77] }
 0x8d2   : > { %12449 = vst [vmem:[#allocation1] ss:$2 sm:$0xff] %v16606_v57 }
 0x8d3   : > { %v12313_v54 = vmax.f32 %v11320_v3, 0.0  ;;  %v11323_v21 = vpop.f32.mrf.mxu3 }
 0x8d4   : > { %v11215_v7 = vpop.f32.mrf.mxu0  ;;  %v11251_v1 = vpop.f32.mrf.mxu1 }
 0x8d5   : > { %v18954_v4 = vadd.f32 %v18871_v47, %v12313_v54  ;;  %v11252_v29 = vadd.f32 %v11251_v1, %v11211_v5  ;;  %v11289_v50 = vpop.f32.mrf.mxu2  ;;  %v11216_v8 = vadd.f32 %v11215_v7, %v11177_v52 }
 0x8d7   : > { %v11290_v44 = vadd.f32 %v11289_v50, %v11252_v29  ;;  %11854 = vmatmul.f32.gmra.mxu0 %v16814_v48  ;;  %11888 = vmatmul.f32.gmra.mxu1 %v16760_v17 }
 0x8d8   : > { %11973 = vmatmul.f32.gmra.mxu3 %v16806_v46 }
 0x8d9   : > { %v11324_v55 = vadd.f32 %v11323_v21, %v11290_v44  ;;  %11931 = vmatmul.f32.gmra.mxu2 %v16796_v43  ;;  %v12456_v54 = vld.sshfl [vmem:[#allocation1] sm:$0xff pattern:$0x75316420] }
 0x8da   : > { %v12476_v21 = vsel %vm336_vm1, %v12456_v54, 0 }
 0x8db   : > { %v12329_v0 = vmax.f32 %v11324_v55, 0.0  ;;  %v11327_v35 = vpop.f32.mrf.mxu3  ;;  %v12523_v1 = vand.u32 4294901760, %v12476_v21 }
 0x8dc   : > { %v11257_v33 = vpop.f32.mrf.mxu1  ;;  %v11353_v42 = vpop.f32.mrf.mxu0 }
 0x8dd   : > { %v18961_v47 = vadd.f32 %v18878_v41, %v12329_v0  ;;  %v11258_v20 = vadd.f32 %v11257_v33, %v11216_v8  ;;  %v11293_v25 = vpop.f32.mrf.mxu2  ;;  %v11354_v15 = vadd.f32 %v11353_v42, %v19916_v39  ;;  %v12574_v8 = vsub.f32 %v12476_v21, %v12523_v1 }
 0x8df   : > { %v11294_v59 = vadd.f32 %v11293_v25, %v11258_v20  ;;  %11892 = vmatmul.f32.gmra.mxu1 %v19903_v16  ;;  %11997 = vmatmul.f32.vlgmr.msra.gmra.mxu0 %v16724_v2 }
 0x8e0   : > { %12119 = vmatmul.f32.vlgmr.msra.gmra.mxu3 %v16724_v2  ;;  %12524 = vmatpush.msra.mxu0 %v12523_v1 }
 0x8e1   : > { %v11328_v58 = vadd.f32 %v11327_v35, %v11294_v59  ;;  %12069 = vmatmul.f32.vlgmr.msra.gmra.mxu2 %v19917_v26  ;;  %12651 = vmatpush.msra.mxu3 %v12523_v1  ;;  %v12575_v35 = vand.u32 4294901760, %v12574_v8 }
 0x8e2   : > { %12613 = vmatpush.msra.mxu2 %v12574_v8 }
 0x8e3   : > { %v12345_v52 = vmax.f32 %v11328_v58, 0.0  ;;  %v11478_v28 = vpop.f32.mrf.mxu3  ;;  %v12576_v20 = vsub.f32 %v12574_v8, %v12575_v35 }
 0x8e4   : > { %v11361_v62 = vpop.f32.mrf.mxu0  ;;  %v11403_v41 = vpop.f32.mrf.mxu1 }
 0x8e5   : > { %v18969_v24 = vadd.f32 %v18886_v12, %v12345_v52  ;;  %v11404_v19 = vadd.f32 %v11403_v41, %v11354_v15  ;;  %v11439_v36 = vpop.f32.mrf.mxu2  ;;  %v11362_v63 = vadd.f32 %v11361_v62, %v16879_v13  ;;  %v12577_v59 = vand.u32 4294901760, %v12576_v20 }
 0x8e7   : > { %v11440_v53 = vadd.f32 %v11439_v36, %v11404_v19  ;;  %12001 = vmatmul.f32.gmra.mxu0 %v16745_v10  ;;  %12031 = vmatmul.f32.vlgmr.msra.gmra.mxu1 %v16724_v2 }
 0x8e8   : > { %12123 = vmatmul.f32.gmra.mxu3 %v16745_v10  ;;  %12578 = vmatpush.msra.mxu1 %v12577_v59 }
 0x8e9   : > { %v11479_v56 = vadd.f32 %v11478_v28, %v11440_v53  ;;  %12077 = vmatmul.f32.gmra.mxu2 %v16784_v37 }
 0x8eb   : > { %v11484_v51 = vpop.f32.mrf.mxu3 }
 0x8ec   : > { %v11369_v9 = vpop.f32.mrf.mxu0  ;;  %v11407_v12 = vpop.f32.mrf.mxu1 }
 0x8ed   : > { %v11408_v40 = vadd.f32 %v11407_v12, %v11362_v63  ;;  %v11444_v27 = vpop.f32.mrf.mxu2  ;;  %v11370_v3 = vadd.f32 %v11369_v9, %v16889_v22 }
 0x8ef   : > { %v11445_v32 = vadd.f32 %v11444_v27, %v11408_v40  ;;  %12005 = vmatmul.f32.gmra.mxu0 %v16760_v17  ;;  %12035 = vmatmul.f32.gmra.mxu1 %v16745_v10  ;;  %v12457_v40 = vld.sshfl [vmem:[#allocation1 + $0x8] sm:$0xff pattern:$0x75316420] }
 0x8f0   : > { %12127 = vmatmul.f32.gmra.mxu3 %v16760_v17 }
 0x8f1   : > { %v11485_v5 = vadd.f32 %v11484_v51, %v11445_v32  ;;  %12085 = vmatmul.f32.gmra.mxu2 %v16803_v45  ;;  %v12478_v32 = vsel %vm336_vm1, %v12457_v40, 0 }
 0x8f3   : > { %v11490_v7 = vpop.f32.mrf.mxu3 }
 0x8f4   : > { %v11377_v29 = vpop.f32.mrf.mxu0  ;;  %v11411_v50 = vpop.f32.mrf.mxu1 }
 0x8f5   : > { %v11412_v44 = vadd.f32 %v11411_v50, %v11370_v3  ;;  %v11449_v55 = vpop.f32.mrf.mxu2  ;;  %v11378_v33 = vadd.f32 %v11377_v29, %v16899_v49  ;;  %v12762_v3 = vand.u32 4294901760, %v12478_v32 }
 0x8f7   : > { %v11450_v0 = vadd.f32 %v11449_v55, %v11412_v44  ;;  %12009 = vmatmul.f32.gmra.mxu0 %v19903_v16  ;;  %12039 = vmatmul.f32.gmra.mxu1 %v16760_v17 }
 0x8f8   : > { %12131 = vmatmul.f32.gmra.mxu3 %v19903_v16 }
 0x8f9   : > { %v11491_v42 = vadd.f32 %v11490_v7, %v11450_v0  ;;  %12093 = vmatmul.f32.gmra.mxu2 %v16814_v48  ;;  %v12813_v7 = vsub.f32 %v12478_v32, %v12762_v3 }
 0x8fb   : > { %v11496_v25 = vpop.f32.mrf.mxu3  ;;  %v12814_v8 = vand.u32 4294901760, %v12813_v7 }
 0x8fc   : > { %v11415_v15 = vpop.f32.mrf.mxu1  ;;  %v11520_v58 = vpop.f32.mrf.mxu0 }
 0x8fd   : > { %v11416_v52 = vadd.f32 %v11415_v15, %v11378_v33  ;;  %v11454_v28 = vpop.f32.mrf.mxu2  ;;  %v11521_v19 = vadd.f32 %v11520_v58, %v11479_v56 }
 0x8ff   : > { %v11455_v62 = vadd.f32 %v11454_v28, %v11416_v52  ;;  %12043 = vmatmul.f32.gmra.mxu1 %v19903_v16  ;;  %12155 = vmatmul.f32.vlgmr.msrb.gmra.mxu0 %v19920_v6 }
 0x900   : > { %12270 = vmatmul.f32.vlgmr.msrb.gmra.mxu3 %v16724_v2  ;;  %12695 = vmatpush.msrb.mxu0 %v12575_v35 }
 0x901   : > { %v11497_v41 = vadd.f32 %v11496_v25, %v11455_v62  ;;  %12236 = vmatmul.f32.vlgmr.msrb.gmra.mxu2 %v16724_v2 }
 0x902   : > { %12763 = vmatpush.msrb.mxu2 %v12762_v3 }
 0x903   : > { %v11642_v36 = vpop.f32.mrf.mxu3 }
 0x904   : > { %v11524_v53 = vpop.f32.mrf.mxu0  ;;  %v11554_v63 = vpop.f32.mrf.mxu1 }
 0x905   : > { %v11555_v57 = vadd.f32 %v11554_v63, %v11521_v19  ;;  %v11592_v51 = vpop.f32.mrf.mxu2  ;;  %v11525_v54 = vadd.f32 %v11524_v53, %v11485_v5 }
 0x906   : > { %v11593_v9 = vadd.f32 %v11592_v51, %v19916_v39 }
 0x907   : > { %v12298_v12 = vmax.f32 %v11555_v57, 0.0  ;;  %12160 = vmatmul.f32.gmra.mxu0 %v16754_v14  ;;  %12194 = vmatmul.f32.vlgmr.msrb.gmra.mxu1 %v19921_v18 }
 0x908   : > { %v11643_v27 = vadd.f32 %v11642_v36, %v11593_v9  ;;  %12274 = vmatmul.f32.gmra.mxu3 %v16745_v10  ;;  %12729 = vmatpush.msrb.mxu1 %v12523_v1 }
 0x909   : > { %v18998_v56 = vadd.f32 %v18915_v60, %v12298_v12  ;;  %12240 = vmatmul.f32.gmra.mxu2 %v16745_v10  ;;  %v12815_v60 = vsub.f32 %v12813_v7, %v12814_v8 }
 0x90b   : > { %v11646_v21 = vpop.f32.mrf.mxu3  ;;  %v12816_v33 = vand.u32 4294901760, %v12815_v60 }
 0x90c   : > { %v11528_v29 = vpop.f32.mrf.mxu0  ;;  %v11558_v50 = vpop.f32.mrf.mxu1 }
 0x90d   : > { %v11559_v44 = vadd.f32 %v11558_v50, %v11525_v54  ;;  %v11600_v55 = vpop.f32.mrf.mxu2  ;;  %v11529_v20 = vadd.f32 %v11528_v29, %v11491_v42  ;;  %12817 = vmatpush.msrb.mxu3 %v12816_v33 }
 0x90e   : > { %v11601_v0 = vadd.f32 %v11600_v55, %v16879_v13 }
 0x90f   : > { %v12314_v35 = vmax.f32 %v11559_v44, 0.0  ;;  %12165 = vmatmul.f32.gmra.mxu0 %v16777_v30  ;;  %12200 = vmatmul.f32.gmra.mxu1 %v16767_v23 }
 0x910   : > { %v11647_v1 = vadd.f32 %v11646_v21, %v11601_v0  ;;  %12278 = vmatmul.f32.gmra.mxu3 %v16760_v17 }
 0x911   : > { %v19006_v5 = vadd.f32 %v18923_v61, %v12314_v35  ;;  %12244 = vmatmul.f32.gmra.mxu2 %v16760_v17 }
 0x913   : > { %v11650_v25 = vpop.f32.mrf.mxu3 }
 0x914   : > { %v11532_v59 = vpop.f32.mrf.mxu0  ;;  %v11562_v15 = vpop.f32.mrf.mxu1 }
 0x915   : > { %v11563_v58 = vadd.f32 %v11562_v15, %v11529_v20  ;;  %v11608_v52 = vpop.f32.mrf.mxu2  ;;  %v11533_v42 = vadd.f32 %v11532_v59, %v11497_v41 }
 0x916   : > { %v11609_v28 = vadd.f32 %v11608_v52, %v16889_v22 }
 0x917   : > { %v12330_v62 = vmax.f32 %v11563_v58, 0.0  ;;  %12170 = vmatmul.f32.gmra.mxu0 %v16796_v43  ;;  %12206 = vmatmul.f32.gmra.mxu1 %v16787_v38 }
 0x918   : > { %v11651_v19 = vadd.f32 %v11650_v25, %v11609_v28  ;;  %12282 = vmatmul.f32.gmra.mxu3 %v19903_v16 }
 0x919   : > { %v19014_v61 = vadd.f32 %v18931_v31, %v12330_v62  ;;  %12248 = vmatmul.f32.gmra.mxu2 %v19903_v16 }
 0x91b   : > { %19922 = vst [vmem:[#allocation8_spill] sm:$0xff] %v19014_v61  ;;  %v11654_v36 = vpop.f32.mrf.mxu3 }
 0x91c   : > { %v11566_v53 = vpop.f32.mrf.mxu1  ;;  %v11678_v63 = vpop.f32.mrf.mxu0 }
 0x91d   : > { %v11567_v57 = vadd.f32 %v11566_v53, %v11533_v42  ;;  %v11616_v51 = vpop.f32.mrf.mxu2  ;;  %v11679_v41 = vadd.f32 %v11678_v63, %v11643_v27 }
 0x91e   : > { %v11617_v9 = vadd.f32 %v11616_v51, %v16899_v49 }
 0x91f   : > { %v12346_v12 = vmax.f32 %v11567_v57, 0.0  ;;  %12212 = vmatmul.f32.gmra.mxu1 %v16806_v46  ;;  %12530 = vmatmul.f32.vlgmr.msra.gmra.mxu0 %v19917_v26 }
 0x920   : > { %v11655_v40 = vadd.f32 %v11654_v36, %v11617_v9  ;;  %12655 = vmatmul.f32.vlgmr.msra.gmra.mxu3 %v19921_v18  ;;  %12852 = vmatpush.msra.mxu0 %v12813_v7 }
 0x921   : > { %v19022_v31 = vadd.f32 %v18939_v11, %v12346_v12  ;;  %12616 = vmatmul.f32.vlgmr.msra.gmra.mxu2 %v19920_v6  ;;  %12968 = vmatpush.msra.mxu3 %v12762_v3 }
 0x922   : > { %12934 = vmatpush.msra.mxu2 %v12814_v8 }
 0x923   : > { %19923 = vst [vmem:[#allocation7_spill] sm:$0xff] %v19022_v31  ;;  %v11793_v32 = vpop.f32.mrf.mxu3 }
 0x924   : > { %v11683_v54 = vpop.f32.mrf.mxu0  ;;  %v11717_v21 = vpop.f32.mrf.mxu1 }
 0x925   : > { %v11718_v29 = vadd.f32 %v11717_v21, %v11679_v41  ;;  %v11759_v50 = vpop.f32.mrf.mxu2  ;;  %v11684_v7 = vadd.f32 %v11683_v54, %v11647_v1 }
 0x927   : > { %v11760_v44 = vadd.f32 %v11759_v50, %v11718_v29  ;;  %12538 = vmatmul.f32.gmra.mxu0 %v16784_v37  ;;  %12580 = vmatmul.f32.vlgmr.msra.gmra.mxu1 %v16724_v2  ;;  %v16607_v50 = vld [vmem:[%s16739_s29 + $0xc8] sm:$0x77] }
 0x928   : > { %12661 = vmatmul.f32.gmra.mxu3 %v16767_v23  ;;  %12890 = vmatpush.msra.mxu1 %v12762_v3  ;;  %12451 = vst [vmem:[#allocation1 + $0x10] ss:$2 sm:$0xff] %v16607_v50 }
 0x929   : > { %v11794_v11 = vadd.f32 %v11793_v32, %v11760_v44  ;;  %12621 = vmatmul.f32.gmra.mxu2 %v16754_v14 }
 0x92b   : > { %v12299_v55 = vmax.f32 %v11794_v11, 0.0  ;;  %v11797_v8 = vpop.f32.mrf.mxu3 }
 0x92c   : > { %v11688_v27 = vpop.f32.mrf.mxu0  ;;  %v11723_v0 = vpop.f32.mrf.mxu1 }
 0x92d   : > { %v19030_v35 = vadd.f32 %v18947_v34, %v12299_v55  ;;  %v11724_v60 = vadd.f32 %v11723_v0, %v11684_v7  ;;  %v11763_v33 = vpop.f32.mrf.mxu2  ;;  %v11689_v1 = vadd.f32 %v11688_v27, %v11651_v19 }
 0x92f   : > { %v11764_v20 = vadd.f32 %v11763_v33, %v11724_v60  ;;  %12546 = vmatmul.f32.gmra.mxu0 %v16803_v45  ;;  %12584 = vmatmul.f32.gmra.mxu1 %v16745_v10  ;;  %v12458_v55 = vld.sshfl [vmem:[#allocation1 + $0x10] sm:$0xff pattern:$0x75316420] }
 0x930   : > { %12667 = vmatmul.f32.gmra.mxu3 %v16787_v38 }
 0x931   : > { %v11798_v3 = vadd.f32 %v11797_v8, %v11764_v20  ;;  %12626 = vmatmul.f32.gmra.mxu2 %v16777_v30  ;;  %v12480_v8 = vsel %vm336_vm1, %v12458_v55, 0 }
 0x932   : > { %v13001_v0 = vand.u32 4294901760, %v12480_v8 }
 0x933   : > { %v12315_v25 = vmax.f32 %v11798_v3, 0.0  ;;  %v11801_v59 = vpop.f32.mrf.mxu3 }
 0x934   : > { %v11693_v15 = vpop.f32.mrf.mxu0  ;;  %v11729_v58 = vpop.f32.mrf.mxu1  ;;  %v13052_v3 = vsub.f32 %v12480_v8, %v13001_v0 }
 0x935   : > { %v19037_v34 = vadd.f32 %v18954_v4, %v12315_v25  ;;  %v11730_v52 = vadd.f32 %v11729_v58, %v11689_v1  ;;  %v11767_v28 = vpop.f32.mrf.mxu2  ;;  %v11694_v19 = vadd.f32 %v11693_v15, %v11655_v40 }
 0x936   : > { %v13053_v1 = vand.u32 4294901760, %v13052_v3 }
 0x937   : > { %v11768_v62 = vadd.f32 %v11767_v28, %v11730_v52  ;;  %12554 = vmatmul.f32.gmra.mxu0 %v16814_v48  ;;  %12588 = vmatmul.f32.gmra.mxu1 %v16760_v17 }
 0x938   : > { %12673 = vmatmul.f32.gmra.mxu3 %v16806_v46  ;;  %v13054_v25 = vsub.f32 %v13052_v3, %v13053_v1 }
 0x939   : > { %v11802_v42 = vadd.f32 %v11801_v59, %v11768_v62  ;;  %12631 = vmatmul.f32.gmra.mxu2 %v16796_v43 }
 0x93a   : > { %v13055_v15 = vand.u32 4294901760, %v13054_v25 }
 0x93b   : > { %v12331_v36 = vmax.f32 %v11802_v42, 0.0  ;;  %v11805_v53 = vpop.f32.mrf.mxu3 }
 0x93c   : > { %v11735_v63 = vpop.f32.mrf.mxu1  ;;  %v19043_v57 = vpop.f32.mrf.mxu0 }
 0x93d   : > { %v19046_v4 = vadd.f32 %v18961_v47, %v12331_v36  ;;  %v11736_v51 = vadd.f32 %v11735_v63, %v11694_v19  ;;  %v11771_v9 = vpop.f32.mrf.mxu2 }
 0x93f   : > { %19924 = vst [vmem:[#allocation5_spill] sm:$0xff] %v19046_v4  ;;  %v11772_v12 = vadd.f32 %v11771_v9, %v11736_v51  ;;  %12592 = vmatmul.f32.gmra.mxu1 %v19903_v16  ;;  %12697 = vmatmul.f32.vlgmr.msrb.gmra.mxu0 %v16724_v2 }
 0x940   : > { %12819 = vmatmul.f32.vlgmr.msrb.gmra.mxu3 %v16724_v2  ;;  %13002 = vmatpush.msrb.mxu0 %v13001_v0 }
 0x941   : > { %v11806_v41 = vadd.f32 %v11805_v53, %v11772_v12  ;;  %12769 = vmatmul.f32.vlgmr.msrb.gmra.mxu2 %v19917_v26  ;;  %13129 = vmatpush.msrb.mxu3 %v13001_v0  ;;  %v12459_v53 = vld.sshfl [vmem:[#allocation1 + $0x18] sm:$0xff pattern:$0x75316420] }
 0x942   : > { %13091 = vmatpush.msrb.mxu2 %v13052_v3  ;;  %v12482_v63 = vsel %vm336_vm1, %v12459_v53, 0  ;;  %v11832_v3 = vadd.f32 %v19043_v57, %v19916_v39 }
 0x943   : > { %v12347_v40 = vmax.f32 %v11806_v41, 0.0  ;;  %v19052_v32 = vpop.f32.mrf.mxu3  ;;  %v13240_v51 = vand.u32 4294901760, %v12482_v63 }
 0x944   : > { %v19054_v54 = vpop.f32.mrf.mxu0  ;;  %v19056_v47 = vpop.f32.mrf.mxu1 }
 0x945   : > { %v19059_v21 = vadd.f32 %v18969_v24, %v12347_v40  ;;  %v19061_v29 = vpop.f32.mrf.mxu2  ;;  %v13291_v12 = vsub.f32 %v12482_v63, %v13240_v51  ;;  %v11882_v63 = vadd.f32 %v19056_v47, %v11832_v3 }
 0x947   : > { %19925 = vst [vmem:[#allocation9_spill] sm:$0xff] %v19059_v21  ;;  %12701 = vmatmul.f32.gmra.mxu0 %v16745_v10  ;;  %12731 = vmatmul.f32.vlgmr.msrb.gmra.mxu1 %v16724_v2  ;;  %v13292_v55 = vand.u32 4294901760, %v13291_v12  ;;  %v11918_v57 = vadd.f32 %v19061_v29, %v11882_v63 }
 0x948   : > { %12823 = vmatmul.f32.gmra.mxu3 %v16745_v10  ;;  %13056 = vmatpush.msrb.mxu1 %v13055_v15 }
 0x949   : > { %12777 = vmatmul.f32.gmra.mxu2 %v16784_v37  ;;  %v13293_v8 = vsub.f32 %v13291_v12, %v13292_v55  ;;  %v11957_v4 = vadd.f32 %v19052_v32, %v11918_v57 }
 0x94b   : > { %v19068_v44 = vpop.f32.mrf.mxu3 }
 0x94c   : > { %v19070_v11 = vpop.f32.mrf.mxu0  ;;  %v19072_v7 = vpop.f32.mrf.mxu1 }
 0x94d   : > { %v19074_v24 = vpop.f32.mrf.mxu2 }
 0x94f   : > { %12705 = vmatmul.f32.gmra.mxu0 %v16760_v17  ;;  %12735 = vmatmul.f32.gmra.mxu1 %v16745_v10 }
 0x950   : > { %12827 = vmatmul.f32.gmra.mxu3 %v16760_v17 }
 0x951   : > { %12785 = vmatmul.f32.gmra.mxu2 %v16803_v45 }
 0x953   : > { %v19081_v27 = vpop.f32.mrf.mxu3 }
 0x954   : > { %v19083_v60 = vpop.f32.mrf.mxu0  ;;  %v19085_v33 = vpop.f32.mrf.mxu1 }
 0x955   : > { %v19087_v20 = vpop.f32.mrf.mxu2 }
 0x957   : > { %12709 = vmatmul.f32.gmra.mxu0 %v19903_v16  ;;  %12739 = vmatmul.f32.gmra.mxu1 %v16760_v17 }
 0x958   : > { %12831 = vmatmul.f32.gmra.mxu3 %v19903_v16 }
 0x959   : > { %12793 = vmatmul.f32.gmra.mxu2 %v16814_v48 }
 0x95b   : > { %v19093_v59 = vpop.f32.mrf.mxu3 }
 0x95c   : > { %v19095_v58 = vpop.f32.mrf.mxu1  ;;  %v11998_v52 = vpop.f32.mrf.mxu0 }
 0x95d   : > { %v19097_v28 = vpop.f32.mrf.mxu2  ;;  %v11999_v29 = vadd.f32 %v11998_v52, %v11957_v4 }
 0x95f   : > { %12743 = vmatmul.f32.gmra.mxu1 %v19903_v16  ;;  %12855 = vmatmul.f32.vlgmr.msra.gmra.mxu0 %v19920_v6 }
 0x960   : > { %12970 = vmatmul.f32.vlgmr.msra.gmra.mxu3 %v16724_v2  ;;  %13173 = vmatpush.msra.mxu0 %v13053_v1 }
 0x961   : > { %12936 = vmatmul.f32.vlgmr.msra.gmra.mxu2 %v16724_v2 }
 0x962   : > { %13241 = vmatpush.msra.mxu2 %v13240_v51 }
 0x963   : > { %v12120_v62 = vpop.f32.mrf.mxu3 }
 0x964   : > { %v19103_v42 = vpop.f32.mrf.mxu0  ;;  %v12032_v19 = vpop.f32.mrf.mxu1 }
 0x965   : > { %v12070_v36 = vpop.f32.mrf.mxu2  ;;  %v12033_v63 = vadd.f32 %v12032_v19, %v11999_v29 }
 0x966   : > { %v12071_v47 = vadd.f32 %v12070_v36, %v19916_v39  ;;  %v11848_v36 = vadd.f32 %v19070_v11, %v16889_v22 }
 0x967   : > { %12860 = vmatmul.f32.gmra.mxu0 %v16754_v14  ;;  %12894 = vmatmul.f32.vlgmr.msra.gmra.mxu1 %v19921_v18 }
 0x968   : > { %12974 = vmatmul.f32.gmra.mxu3 %v16745_v10  ;;  %13207 = vmatpush.msra.mxu1 %v13001_v0  ;;  %v13294_v0 = vand.u32 4294901760, %v13293_v8  ;;  %v11840_v8 = vadd.f32 %v19054_v54, %v16879_v13  ;;  %v12121_v54 = vadd.f32 %v12120_v62, %v12071_v47  ;;  %v11890_v62 = vadd.f32 %v19085_v33, %v11848_v36 }
 0x969   : > { %12940 = vmatmul.f32.gmra.mxu2 %v16745_v10  ;;  %v12300_v47 = vmax.f32 %v12033_v63, 0.0  ;;  %v11856_v33 = vadd.f32 %v19083_v60, %v16899_v49 }
 0x96a   : > { %13295 = vmatpush.msra.mxu3 %v13294_v0  ;;  %v11886_v61 = vadd.f32 %v19072_v7, %v11840_v8 }
 0x96b   : > { %v19110_v9 = vpop.f32.mrf.mxu3  ;;  %v12398_v19 = vadd.f32 %v18998_v56, %v12300_v47 }
 0x96c   : > { %v19112_v41 = vpop.f32.mrf.mxu0  ;;  %v19114_v40 = vpop.f32.mrf.mxu1  ;;  %v11923_v32 = vadd.f32 %v19074_v24, %v11886_v61 }
 0x96d   : > { %v12078_v50 = vpop.f32.mrf.mxu2 }
 0x96e   : > { %v12079_v4 = vadd.f32 %v12078_v50, %v16879_v13  ;;  %v11963_v39 = vadd.f32 %v19068_v44, %v11923_v32  ;;  %v11928_v44 = vadd.f32 %v19087_v20, %v11890_v62 }
 0x96f   : > { %12865 = vmatmul.f32.gmra.mxu0 %v16777_v30  ;;  %12900 = vmatmul.f32.gmra.mxu1 %v16767_v23 }
 0x970   : > { %12978 = vmatmul.f32.gmra.mxu3 %v16760_v17  ;;  %v11969_v20 = vadd.f32 %v19081_v27, %v11928_v44  ;;  %v19926_v44 = vld [vmem:[#allocation8_spill] sm:$0xff] }
 0x971   : > { %12944 = vmatmul.f32.gmra.mxu2 %v16760_v17 }
 0x973   : > { %v19122_v1 = vpop.f32.mrf.mxu3 }
 0x974   : > { %v19124_v25 = vpop.f32.mrf.mxu0  ;;  %v19126_v15 = vpop.f32.mrf.mxu1 }
 0x975   : > { %v12086_v53 = vpop.f32.mrf.mxu2 }
 0x977   : > { %12870 = vmatmul.f32.gmra.mxu0 %v16796_v43  ;;  %12906 = vmatmul.f32.gmra.mxu1 %v16787_v38 }
 0x978   : > { %12982 = vmatmul.f32.gmra.mxu3 %v19903_v16 }
 0x979   : > { %12948 = vmatmul.f32.gmra.mxu2 %v19903_v16 }
 0x97b   : > { %v19136_v0 = vpop.f32.mrf.mxu3 }
 0x97c   : > { %v19138_v21 = vpop.f32.mrf.mxu1  ;;  %v12156_v31 = vpop.f32.mrf.mxu0 }
 0x97d   : > { %v19141_v3 = vpop.f32.mrf.mxu2  ;;  %v12157_v7 = vadd.f32 %v12156_v31, %v12121_v54  ;;  %v12003_v31 = vadd.f32 %v19103_v42, %v11963_v39  ;;  %v12087_v54 = vadd.f32 %v12086_v53, %v16889_v22 }
 0x97f   : > { %12912 = vmatmul.f32.gmra.mxu1 %v16806_v46  ;;  %13008 = vmatmul.f32.vlgmr.msrb.gmra.mxu0 %v19917_v26  ;;  %v12129_v53 = vadd.f32 %v19122_v1, %v12087_v54  ;;  %v19927_v54 = vld [vmem:[#allocation5_spill] sm:$0xff] }
 0x980   : > { %13133 = vmatmul.f32.vlgmr.msrb.gmra.mxu3 %v19921_v18  ;;  %13330 = vmatpush.msrb.mxu0 %v13291_v12  ;;  %v16647_v18 = vld [vmem:[%s17607_s21] sm:$0xff] }
 0x981   : > { %13094 = vmatmul.f32.vlgmr.msrb.gmra.mxu2 %v19920_v6  ;;  %13446 = vmatpush.msrb.mxu3 %v13240_v51  ;;  %v12406_v6 = vperm.slane %v16647_v18, 2  ;;  %v12407_v61 = vperm.slane %v16647_v18, 6  ;;  %v12037_v18 = vadd.f32 %v19114_v40, %v12003_v31 }
 0x982   : > { %13412 = vmatpush.msrb.mxu2 %v13292_v55 }
 0x983   : > { %v12271_v57 = vpop.f32.mrf.mxu3  ;;  %v19166_v50 = vperm.slane %v12406_v6, 2  ;;  %v19169_v39 = vperm.slane %v12407_v61, 2  ;;  %v11894_v6 = vadd.f32 %v19095_v58, %v11856_v33  ;;  %v12316_v56 = vmax.f32 %v12037_v18, 0.0 }
 0x984   : > { %v12161_v8 = vpop.f32.mrf.mxu0  ;;  %v12195_v26 = vpop.f32.mrf.mxu1 }
 0x985   : > { %v12196_v52 = vadd.f32 %v12195_v26, %v12157_v7  ;;  %v12237_v12 = vpop.f32.mrf.mxu2  ;;  %v12125_v26 = vadd.f32 %v19110_v9, %v12079_v4  ;;  %v12412_v40 = vmul.f32 %v19166_v50, %v12398_v19  ;;  %v11933_v58 = vadd.f32 %v19097_v28, %v11894_v6  ;;  %v19928_v6 = vld [vmem:[#allocation6_spill] sm:$0xff] }
 0x987   : > { %v12238_v11 = vadd.f32 %v12237_v12, %v12196_v52  ;;  %13016 = vmatmul.f32.gmra.mxu0 %v16784_v37  ;;  %13058 = vmatmul.f32.vlgmr.msrb.gmra.mxu1 %v16724_v2  ;;  %v12162_v55 = vadd.f32 %v12161_v8, %v12125_v26  ;;  %v12400_v8 = vadd.f32 %v19006_v5, %v12316_v56 }
 0x988   : > { %13139 = vmatmul.f32.gmra.mxu3 %v16767_v23  ;;  %13368 = vmatpush.msrb.mxu1 %v13240_v51  ;;  %v11975_v26 = vadd.f32 %v19093_v59, %v11933_v58 }
 0x989   : > { %v12272_v24 = vadd.f32 %v12271_v57, %v12238_v11  ;;  %13099 = vmatmul.f32.gmra.mxu2 %v16754_v14  ;;  %v12414_v5 = vmul.f32 %v19166_v50, %v12400_v8 }
 0x98b   : > { %v12301_v51 = vmax.f32 %v12272_v24, 0.0  ;;  %v12275_v29 = vpop.f32.mrf.mxu3 }
 0x98c   : > { %v12166_v42 = vpop.f32.mrf.mxu0  ;;  %v12201_v9 = vpop.f32.mrf.mxu1 }
 0x98d   : > { %v12399_v36 = vadd.f32 %v19030_v35, %v12301_v51  ;;  %v12202_v60 = vadd.f32 %v12201_v9, %v12162_v55  ;;  %v12241_v63 = vpop.f32.mrf.mxu2  ;;  %v12007_v35 = vadd.f32 %v19112_v41, %v11969_v20  ;;  %v12167_v52 = vadd.f32 %v12166_v42, %v12129_v53 }
 0x98e   : > { %v12095_v41 = vadd.f32 %v19141_v3, %v16899_v49  ;;  %v12011_v3 = vadd.f32 %v19124_v25, %v11975_v26 }
 0x98f   : > { %v12242_v32 = vadd.f32 %v12241_v63, %v12202_v60  ;;  %13024 = vmatmul.f32.gmra.mxu0 %v16803_v45  ;;  %13062 = vmatmul.f32.gmra.mxu1 %v16745_v10  ;;  %v12413_v7 = vmul.f32 %v19169_v39, %v12399_v36  ;;  %v12041_v4 = vadd.f32 %v19126_v15, %v12007_v35  ;;  %v19930_v35 = vld [vmem:[#allocation7_spill] sm:$0xff] }
 0x990   : > { %13145 = vmatmul.f32.gmra.mxu3 %v16787_v38  ;;  %v12045_v18 = vadd.f32 %v19138_v21, %v12011_v3 }
 0x991   : > { %v12276_v57 = vadd.f32 %v12275_v29, %v12242_v32  ;;  %13104 = vmatmul.f32.gmra.mxu2 %v16777_v30  ;;  %v12420_v27 = vadd.f32 %v12413_v7, %v12412_v40  ;;  %v12332_v28 = vmax.f32 %v12041_v4, 0.0  ;;  %v19929_v40 = vld [vmem:[#allocation4_spill] sm:$0xff]  ;;  %v19931_v4 = vld [vmem:[#allocation9_spill] sm:$0xff] }
 0x992   : > { %v12348_v63 = vmax.f32 %v12045_v18, 0.0 }
 0x993   : > { %v12317_v12 = vmax.f32 %v12276_v57, 0.0  ;;  %12421 = vadd.xlane.f32.xlu2 %v12420_v27  ;;  %v12279_v62 = vpop.f32.mrf.mxu3  ;;  %v12402_v19 = vadd.f32 %v19926_v44, %v12332_v28 }
 0x994   : > { %v12171_v47 = vpop.f32.mrf.mxu0  ;;  %v12207_v11 = vpop.f32.mrf.mxu1  ;;  %v12404_v53 = vadd.f32 %v19930_v35, %v12348_v63  ;;  %v19932_v35 = vld [vmem:[#allocation2_spill] sm:$0xff] }
 0x995   : > { %v12401_v1 = vadd.f32 %v19037_v34, %v12317_v12  ;;  %v12208_v61 = vadd.f32 %v12207_v11, %v12167_v52  ;;  %v12245_v31 = vpop.f32.mrf.mxu2  ;;  %v12133_v34 = vadd.f32 %v19136_v0, %v12095_v41  ;;  %v12416_v20 = vmul.f32 %v19166_v50, %v12402_v19 }
 0x996   : > { %v12418_v11 = vmul.f32 %v19166_v50, %v12404_v53 }
 0x997   : > { %v12246_v24 = vadd.f32 %v12245_v31, %v12208_v61  ;;  %13032 = vmatmul.f32.gmra.mxu0 %v16814_v48  ;;  %13066 = vmatmul.f32.gmra.mxu1 %v16760_v17  ;;  %v12415_v15 = vmul.f32 %v19169_v39, %v12401_v1  ;;  %v12172_v55 = vadd.f32 %v12171_v47, %v12133_v34  ;;  %v16608_v1 = vld [vmem:[%s16739_s29 + $0xd0] sm:$0x77] }
 0x998   : > { %13151 = vmatmul.f32.gmra.mxu3 %v16806_v46  ;;  %12453 = vst [vmem:[#allocation1 + $0x20] ss:$2 sm:$0xff] %v16608_v1 }
 0x999   : > { %v12280_v33 = vadd.f32 %v12279_v62, %v12246_v24  ;;  %13109 = vmatmul.f32.gmra.mxu2 %v16796_v43  ;;  %v12423_v59 = vadd.f32 %v12415_v15, %v12414_v5 }
 0x99b   : > { %v12333_v51 = vmax.f32 %v12280_v33, 0.0  ;;  %12424 = vadd.xlane.f32.xlu2 %v12423_v59  ;;  %v12283_v29 = vpop.f32.mrf.mxu3 }
 0x99c   : > { %v12213_v42 = vpop.f32.mrf.mxu1  ;;  %v12531_v9 = vpop.f32.mrf.mxu0 }
 0x99d   : > { %v12403_v36 = vadd.f32 %v19927_v54, %v12333_v51  ;;  %v12214_v60 = vadd.f32 %v12213_v42, %v12172_v55  ;;  %v12249_v25 = vpop.f32.mrf.mxu2  ;;  %v12532_v56 = vadd.f32 %v12531_v9, %v19928_v6 }
 0x99f   : > { %v12250_v0 = vadd.f32 %v12249_v25, %v12214_v60  ;;  %13070 = vmatmul.f32.gmra.mxu1 %v19903_v16  ;;  %13175 = vmatmul.f32.vlgmr.msra.gmra.mxu0 %v16724_v2  ;;  %v12417_v21 = vmul.f32 %v19169_v39, %v12403_v36 }
 0x9a0   : > { %13297 = vmatmul.f32.vlgmr.msra.gmra.mxu3 %v16724_v2 }
 0x9a1   : > { %v12284_v32 = vadd.f32 %v12283_v29, %v12250_v0  ;;  %13247 = vmatmul.f32.vlgmr.msra.gmra.mxu2 %v19929_v40  ;;  %v12426_v7 = vadd.f32 %v12417_v21, %v12416_v20 }
 0x9a3   : > { %v12349_v57 = vmax.f32 %v12284_v32, 0.0  ;;  %12427 = vadd.xlane.f32.xlu0 %v12426_v7  ;;  %v12656_v27 = vpop.f32.mrf.mxu3 }
 0x9a4   : > { %v12539_v58 = vpop.f32.mrf.mxu0  ;;  %v12581_v8 = vpop.f32.mrf.mxu1 }
 0x9a5   : > { %v12405_v52 = vadd.f32 %v19931_v4, %v12349_v57  ;;  %v12582_v12 = vadd.f32 %v12581_v8, %v12532_v56  ;;  %v12617_v62 = vpop.f32.mrf.mxu2  ;;  %v12540_v61 = vadd.f32 %v12539_v58, %v16879_v13 }
 0x9a7   : > { %v12618_v47 = vadd.f32 %v12617_v62, %v12582_v12  ;;  %13179 = vmatmul.f32.gmra.mxu0 %v16745_v10  ;;  %13209 = vmatmul.f32.vlgmr.msra.gmra.mxu1 %v16724_v2  ;;  %v12419_v41 = vmul.f32 %v19169_v39, %v12405_v52  ;;  %v12460_v39 = vld.sshfl [vmem:[#allocation1 + $0x20] sm:$0xff pattern:$0x75316420]  ;;  %v19933_v52 = vld [vmem:[#allocation3_spill] sm:$0xff] }
 0x9a8   : > { %13301 = vmatmul.f32.gmra.mxu3 %v16745_v10  ;;  %v12484_v34 = vsel %vm336_vm1, %v12460_v39, 0  ;;  %v12461_v12 = vld.sshfl [vmem:[#allocation1 + $0x28] sm:$0xff pattern:$0x75316420] }
 0x9a9   : > { %v19217_v31 = vadd.f32 %v12656_v27, %v12618_v47  ;;  %13255 = vmatmul.f32.gmra.mxu2 %v16784_v37  ;;  %v12429_v26 = vadd.f32 %v12419_v41, %v12418_v11  ;;  %v13479_v44 = vand.u32 4294901760, %v12484_v34  ;;  %v12486_v47 = vsel %vm336_vm1, %v12461_v12, 0 }
 0x9aa   : > { %v13718_v11 = vand.u32 4294901760, %v12486_v47 }
 0x9ab   : > { %12430 = vadd.xlane.f32.xlu1 %v12429_v26  ;;  %v12662_v28 = vpop.f32.mrf.mxu3  ;;  %v13530_v18 = vsub.f32 %v12484_v34, %v13479_v44  ;;  %13480 = vmatpush.msra.mxu0 %v13479_v44 }
 0x9ac   : > { %v12547_v24 = vpop.f32.mrf.mxu0  ;;  %v12585_v5 = vpop.f32.mrf.mxu1  ;;  %13607 = vmatpush.msra.mxu3 %v13479_v44  ;;  %v13769_v1 = vsub.f32 %v12486_v47, %v13718_v11 }
 0x9ad   : > { %v12586_v15 = vadd.f32 %v12585_v5, %v12540_v61  ;;  %v12622_v3 = vpop.f32.mrf.mxu2  ;;  %v12548_v33 = vadd.f32 %v12547_v24, %v16889_v22  ;;  %13569 = vmatpush.msra.mxu2 %v13530_v18  ;;  %v13531_v9 = vand.u32 4294901760, %v13530_v18 }
 0x9ae   : > { %v13770_v24 = vand.u32 4294901760, %v13769_v1 }
 0x9af   : > { %v12623_v50 = vadd.f32 %v12622_v3, %v12586_v15  ;;  %13183 = vmatmul.f32.gmra.mxu0 %v16760_v17  ;;  %13213 = vmatmul.f32.gmra.mxu1 %v16745_v10  ;;  %v13532_v36 = vsub.f32 %v13530_v18, %v13531_v9 }
 0x9b0   : > { %13305 = vmatmul.f32.gmra.mxu3 %v16760_v17  ;;  %v13771_v15 = vsub.f32 %v13769_v1, %v13770_v24 }
 0x9b1   : > { %v19225_v59 = vadd.f32 %v12662_v28, %v12623_v50  ;;  %13263 = vmatmul.f32.gmra.mxu2 %v16803_v45  ;;  %v13533_v63 = vand.u32 4294901760, %v13532_v36 }
 0x9b2   : > { %v13772_v50 = vand.u32 4294901760, %v13771_v15 }
 0x9b3   : > { %v12668_v19 = vpop.f32.mrf.mxu3  ;;  %13534 = vmatpush.msra.mxu1 %v13533_v63 }
 0x9b4   : > { %v12555_v55 = vpop.f32.mrf.mxu0  ;;  %v12589_v51 = vpop.f32.mrf.mxu1 }
 0x9b5   : > { %v12590_v29 = vadd.f32 %v12589_v51, %v12548_v33  ;;  %v12627_v42 = vpop.f32.mrf.mxu2  ;;  %v12556_v60 = vadd.f32 %v12555_v55, %v16899_v49 }
 0x9b7   : > { %v12628_v54 = vadd.f32 %v12627_v42, %v12590_v29  ;;  %13187 = vmatmul.f32.gmra.mxu0 %v19903_v16  ;;  %13217 = vmatmul.f32.gmra.mxu1 %v16760_v17 }
 0x9b8   : > { %13309 = vmatmul.f32.gmra.mxu3 %v19903_v16 }
 0x9b9   : > { %v19232_v25 = vadd.f32 %v12668_v19, %v12628_v54  ;;  %13271 = vmatmul.f32.gmra.mxu2 %v16814_v48 }
 0x9bb   : > { %v12674_v0 = vpop.f32.mrf.mxu3 }
 0x9bc   : > { %v12593_v20 = vpop.f32.mrf.mxu1  ;;  %v19235_v21 = vpop.f32.mrf.mxu0 }
 0x9bd   : > { %v12594_v56 = vadd.f32 %v12593_v20, %v12556_v60  ;;  %v12632_v32 = vpop.f32.mrf.mxu2 }
 0x9bf   : > { %v12633_v7 = vadd.f32 %v12632_v32, %v12594_v56  ;;  %13221 = vmatmul.f32.gmra.mxu1 %v19903_v16  ;;  %13333 = vmatmul.f32.vlgmr.msrb.gmra.mxu0 %v19932_v35 }
 0x9c0   : > { %13448 = vmatmul.f32.vlgmr.msrb.gmra.mxu3 %v16724_v2  ;;  %13651 = vmatpush.msrb.mxu0 %v13531_v9 }
 0x9c1   : > { %v19240_v53 = vadd.f32 %v12674_v0, %v12633_v7  ;;  %13414 = vmatmul.f32.vlgmr.msrb.gmra.mxu2 %v16724_v2  ;;  %13773 = vmatpush.msrb.mxu3 %v13772_v50 }
 0x9c2   : > { %13719 = vmatpush.msrb.mxu2 %v13718_v11 }
 0x9c3   : > { %v12820_v57 = vpop.f32.mrf.mxu3 }
 0x9c4   : > { %v19243_v27 = vpop.f32.mrf.mxu0  ;;  %v19245_v58 = vpop.f32.mrf.mxu1 }
 0x9c5   : > { %v12770_v8 = vpop.f32.mrf.mxu2 }
 0x9c6   : > { %v12771_v4 = vadd.f32 %v12770_v8, %v19928_v6 }
 0x9c7   : > { %13338 = vmatmul.f32.gmra.mxu0 %v16754_v14  ;;  %13372 = vmatmul.f32.vlgmr.msrb.gmra.mxu1 %v19933_v52 }
 0x9c8   : > { %v12821_v62 = vadd.f32 %v12820_v57, %v12771_v4  ;;  %13452 = vmatmul.f32.gmra.mxu3 %v16745_v10  ;;  %13685 = vmatpush.msrb.mxu1 %v13479_v44 }
 0x9c9   : > { %13418 = vmatmul.f32.gmra.mxu2 %v16745_v10 }
 0x9cb   : > { %v12824_v41 = vpop.f32.mrf.mxu3 }
 0x9cc   : > { %v19253_v61 = vpop.f32.mrf.mxu0  ;;  %v19255_v26 = vpop.f32.mrf.mxu1 }
 0x9cd   : > { %v12778_v28 = vpop.f32.mrf.mxu2 }
 0x9ce   : > { %v12779_v5 = vadd.f32 %v12778_v28, %v16879_v13 }
 0x9cf   : > { %13343 = vmatmul.f32.gmra.mxu0 %v16777_v30  ;;  %13378 = vmatmul.f32.gmra.mxu1 %v16767_v23 }
 0x9d0   : > { %v12825_v3 = vadd.f32 %v12824_v41, %v12779_v5  ;;  %13456 = vmatmul.f32.gmra.mxu3 %v16760_v17 }
 0x9d1   : > { %13422 = vmatmul.f32.gmra.mxu2 %v16760_v17 }
 0x9d3   : > { %v12828_v39 = vpop.f32.mrf.mxu3 }
 0x9d4   : > { %v19262_v34 = vpop.f32.mrf.mxu0  ;;  %v19264_v33 = vpop.f32.mrf.mxu1 }
 0x9d5   : > { %v12786_v44 = vpop.f32.mrf.mxu2 }
 0x9d6   : > { %v12787_v19 = vadd.f32 %v12786_v44, %v16889_v22 }
 0x9d7   : > { %13348 = vmatmul.f32.gmra.mxu0 %v16796_v43  ;;  %13384 = vmatmul.f32.gmra.mxu1 %v16787_v38 }
 0x9d8   : > { %v12829_v18 = vadd.f32 %v12828_v39, %v12787_v19  ;;  %13460 = vmatmul.f32.gmra.mxu3 %v19903_v16 }
 0x9d9   : > { %13426 = vmatmul.f32.gmra.mxu2 %v19903_v16 }
 0x9db   : > { %v12832_v55 = vpop.f32.mrf.mxu3 }
 0x9dc   : > { %v19271_v51 = vpop.f32.mrf.mxu1  ;;  %v12856_v29 = vpop.f32.mrf.mxu0 }
 0x9dd   : > { %v12794_v42 = vpop.f32.mrf.mxu2  ;;  %v12857_v36 = vadd.f32 %v12856_v29, %v12821_v62 }
 0x9de   : > { %v12795_v9 = vadd.f32 %v12794_v42, %v16899_v49 }
 0x9df   : > { %13390 = vmatmul.f32.gmra.mxu1 %v16806_v46  ;;  %13486 = vmatmul.f32.vlgmr.msra.gmra.mxu0 %v19929_v40 }
 0x9e0   : > { %v12833_v54 = vadd.f32 %v12832_v55, %v12795_v9  ;;  %13611 = vmatmul.f32.vlgmr.msra.gmra.mxu3 %v19933_v52  ;;  %13808 = vmatpush.msra.mxu0 %v13769_v1 }
 0x9e1   : > { %13572 = vmatmul.f32.vlgmr.msra.gmra.mxu2 %v19932_v35  ;;  %13924 = vmatpush.msra.mxu3 %v13718_v11 }
 0x9e2   : > { %13890 = vmatpush.msra.mxu2 %v13770_v24 }
 0x9e3   : > { %v12971_v60 = vpop.f32.mrf.mxu3 }
 0x9e4   : > { %v12861_v63 = vpop.f32.mrf.mxu0  ;;  %v12895_v0 = vpop.f32.mrf.mxu1 }
 0x9e5   : > { %v12896_v20 = vadd.f32 %v12895_v0, %v12857_v36  ;;  %v12937_v56 = vpop.f32.mrf.mxu2  ;;  %v12862_v57 = vadd.f32 %v12861_v63, %v12825_v3 }
 0x9e7   : > { %v12938_v32 = vadd.f32 %v12937_v56, %v12896_v20  ;;  %13494 = vmatmul.f32.gmra.mxu0 %v16784_v37  ;;  %13536 = vmatmul.f32.vlgmr.msra.gmra.mxu1 %v16724_v2 }
 0x9e8   : > { %13617 = vmatmul.f32.gmra.mxu3 %v16767_v23  ;;  %13846 = vmatpush.msra.mxu1 %v13718_v11 }
 0x9e9   : > { %v19281_v7 = vadd.f32 %v12971_v60, %v12938_v32  ;;  %13577 = vmatmul.f32.gmra.mxu2 %v16754_v14 }
 0x9eb   : > { %v12975_v8 = vpop.f32.mrf.mxu3 }
 0x9ec   : > { %v12866_v4 = vpop.f32.mrf.mxu0  ;;  %v12901_v12 = vpop.f32.mrf.mxu1 }
 0x9ed   : > { %v12902_v62 = vadd.f32 %v12901_v12, %v12862_v57  ;;  %v12941_v47 = vpop.f32.mrf.mxu2  ;;  %v12867_v11 = vadd.f32 %v12866_v4, %v12829_v18  ;;  %v16609_v4 = vld [vmem:[%s16739_s29 + $0xd8] sm:$0x77] }
 0x9ee   : > { %12455 = vst [vmem:[#allocation1 + $0x30] ss:$2 sm:$0xff] %v16609_v4 }
 0x9ef   : > { %v12942_v41 = vadd.f32 %v12941_v47, %v12902_v62  ;;  %13502 = vmatmul.f32.gmra.mxu0 %v16803_v45  ;;  %13540 = vmatmul.f32.gmra.mxu1 %v16745_v10 }
 0x9f0   : > { %13623 = vmatmul.f32.gmra.mxu3 %v16787_v38 }
 0x9f1   : > { %v19287_v1 = vadd.f32 %v12975_v8, %v12942_v41  ;;  %13582 = vmatmul.f32.gmra.mxu2 %v16777_v30 }
 0x9f3   : > { %v12979_v28 = vpop.f32.mrf.mxu3 }
 0x9f4   : > { %v12871_v24 = vpop.f32.mrf.mxu0  ;;  %v12907_v5 = vpop.f32.mrf.mxu1 }
 0x9f5   : > { %v12908_v15 = vadd.f32 %v12907_v5, %v12867_v11  ;;  %v12945_v3 = vpop.f32.mrf.mxu2  ;;  %v12872_v44 = vadd.f32 %v12871_v24, %v12833_v54 }
 0x9f7   : > { %v12946_v50 = vadd.f32 %v12945_v3, %v12908_v15  ;;  %13510 = vmatmul.f32.gmra.mxu0 %v16814_v48  ;;  %13544 = vmatmul.f32.gmra.mxu1 %v16760_v17  ;;  %v12462_v15 = vld.sshfl [vmem:[#allocation1 + $0x30] sm:$0xff pattern:$0x75316420] }
 0x9f8   : > { %13629 = vmatmul.f32.gmra.mxu3 %v16806_v46  ;;  %v12488_v3 = vsel %vm336_vm1, %v12462_v15, 0 }
 0x9f9   : > { %v19293_v39 = vadd.f32 %v12979_v28, %v12946_v50  ;;  %13587 = vmatmul.f32.gmra.mxu2 %v16796_v43 }
 0x9fb   : > { %v12983_v19 = vpop.f32.mrf.mxu3 }
 0x9fc   : > { %v12913_v55 = vpop.f32.mrf.mxu1  ;;  %v13009_v18 = vpop.f32.mrf.mxu0 }
 0x9fd   : > { %v12914_v29 = vadd.f32 %v12913_v55, %v12872_v44  ;;  %v12949_v42 = vpop.f32.mrf.mxu2  ;;  %v13010_v36 = vadd.f32 %v13009_v18, %v19928_v6  ;;  %v13957_v44 = vand.u32 4294901760, %v12488_v3 }
 0x9ff   : > { %v12950_v9 = vadd.f32 %v12949_v42, %v12914_v29  ;;  %13548 = vmatmul.f32.gmra.mxu1 %v19903_v16  ;;  %13653 = vmatmul.f32.vlgmr.msrb.gmra.mxu0 %v16724_v2  ;;  %v14008_v42 = vsub.f32 %v12488_v3, %v13957_v44 }
 0xa00   : > { %13775 = vmatmul.f32.vlgmr.msrb.gmra.mxu3 %v16724_v2  ;;  %13958 = vmatpush.msrb.mxu0 %v13957_v44 }
 0xa01   : > { %v19300_v60 = vadd.f32 %v12983_v19, %v12950_v9  ;;  %13725 = vmatmul.f32.vlgmr.msrb.gmra.mxu2 %v19929_v40  ;;  %14085 = vmatpush.msrb.mxu3 %v13957_v44 }
 0xa02   : > { %14047 = vmatpush.msrb.mxu2 %v14008_v42 }
 0xa03   : > { %v13134_v54 = vpop.f32.mrf.mxu3 }
 0xa04   : > { %v13017_v63 = vpop.f32.mrf.mxu0  ;;  %v13059_v0 = vpop.f32.mrf.mxu1 }
 0xa05   : > { %v13060_v20 = vadd.f32 %v13059_v0, %v13010_v36  ;;  %v13095_v56 = vpop.f32.mrf.mxu2  ;;  %v13018_v57 = vadd.f32 %v13017_v63, %v16879_v13  ;;  %v14009_v36 = vand.u32 4294901760, %v14008_v42 }
 0xa07   : > { %v13096_v32 = vadd.f32 %v13095_v56, %v13060_v20  ;;  %13657 = vmatmul.f32.gmra.mxu0 %v16745_v10  ;;  %13687 = vmatmul.f32.vlgmr.msrb.gmra.mxu1 %v16724_v2  ;;  %v14010_v0 = vsub.f32 %v14008_v42, %v14009_v36 }
 0xa08   : > { %13779 = vmatmul.f32.gmra.mxu3 %v16745_v10 }
 0xa09   : > { %v13135_v8 = vadd.f32 %v13134_v54, %v13096_v32  ;;  %13733 = vmatmul.f32.gmra.mxu2 %v16784_v37  ;;  %v14011_v56 = vand.u32 4294901760, %v14010_v0 }
 0xa0b   : > { %v13140_v12 = vpop.f32.mrf.mxu3  ;;  %14012 = vmatpush.msrb.mxu1 %v14011_v56 }
 0xa0c   : > { %v13025_v62 = vpop.f32.mrf.mxu0  ;;  %v13063_v47 = vpop.f32.mrf.mxu1 }
 0xa0d   : > { %v13064_v41 = vadd.f32 %v13063_v47, %v13018_v57  ;;  %v13100_v11 = vpop.f32.mrf.mxu2  ;;  %v13026_v24 = vadd.f32 %v13025_v62, %v16889_v22  ;;  %v12699_v47 = vadd.f32 %v19235_v21, %v19217_v31  ;;  %v12463_v31 = vld.sshfl [vmem:[#allocation1 + $0x38] sm:$0xff pattern:$0x75316420] }
 0xa0f   : > { %v13101_v28 = vadd.f32 %v13100_v11, %v13064_v41  ;;  %13661 = vmatmul.f32.gmra.mxu0 %v16760_v17  ;;  %13691 = vmatmul.f32.gmra.mxu1 %v16745_v10  ;;  %v12733_v11 = vadd.f32 %v19245_v58, %v12699_v47  ;;  %v12490_v58 = vsel %vm336_vm1, %v12463_v31, 0 }
 0xa10   : > { %13783 = vmatmul.f32.gmra.mxu3 %v16760_v17 }
 0xa11   : > { %v13141_v5 = vadd.f32 %v13140_v12, %v13101_v28  ;;  %13741 = vmatmul.f32.gmra.mxu2 %v16803_v45 }
 0xa13   : > { %v13146_v50 = vpop.f32.mrf.mxu3 }
 0xa14   : > { %v13033_v19 = vpop.f32.mrf.mxu0  ;;  %v13067_v55 = vpop.f32.mrf.mxu1 }
 0xa15   : > { %v13068_v18 = vadd.f32 %v13067_v55, %v13026_v24  ;;  %v13105_v29 = vpop.f32.mrf.mxu2  ;;  %v13034_v54 = vadd.f32 %v13033_v19, %v16899_v49 }
 0xa17   : > { %v13106_v9 = vadd.f32 %v13105_v29, %v13068_v18  ;;  %13665 = vmatmul.f32.gmra.mxu0 %v19903_v16  ;;  %13695 = vmatmul.f32.gmra.mxu1 %v16760_v17  ;;  %v16332_v18 = vmax.f32 %v12733_v11, 0.0 }
 0xa18   : > { %13787 = vmatmul.f32.gmra.mxu3 %v19903_v16 }
 0xa19   : > { %v13147_v63 = vadd.f32 %v13146_v50, %v13106_v9  ;;  %13749 = vmatmul.f32.gmra.mxu2 %v16814_v48  ;;  %v19341_v9 = vand.u32 4294901760, %v12490_v58 }
 0xa1b   : > { %v13152_v20 = vpop.f32.mrf.mxu3 }
 0xa1c   : > { %v13071_v32 = vpop.f32.mrf.mxu1  ;;  %v13176_v57 = vpop.f32.mrf.mxu0 }
 0xa1d   : > { %v13072_v4 = vadd.f32 %v13071_v32, %v13034_v54  ;;  %v13110_v12 = vpop.f32.mrf.mxu2  ;;  %v13177_v28 = vadd.f32 %v13176_v57, %v13135_v8  ;;  %v12703_v8 = vadd.f32 %v19243_v27, %v19225_v59 }
 0xa1f   : > { %v13111_v62 = vadd.f32 %v13110_v12, %v13072_v4  ;;  %13699 = vmatmul.f32.gmra.mxu1 %v19903_v16  ;;  %13811 = vmatmul.f32.vlgmr.msra.gmra.mxu0 %v19932_v35 }
 0xa20   : > { %13926 = vmatmul.f32.vlgmr.msra.gmra.mxu3 %v16724_v2  ;;  %14129 = vmatpush.msra.mxu0 %v14009_v36  ;;  %v12737_v36 = vadd.f32 %v19255_v26, %v12703_v8 }
 0xa21   : > { %v19325_v41 = vadd.f32 %v13152_v20, %v13111_v62  ;;  %13892 = vmatmul.f32.vlgmr.msra.gmra.mxu2 %v16724_v2  ;;  %v14247_v20 = vsub.f32 %v12490_v58, %v19341_v9  ;;  %v12707_v62 = vadd.f32 %v19253_v61, %v19232_v25  ;;  %v12711_v61 = vadd.f32 %v19262_v34, %v19240_v53 }
 0xa22   : > { %14197 = vmatpush.msra.mxu2 %v19341_v9  ;;  %v16348_v27 = vmax.f32 %v12737_v36, 0.0 }
 0xa23   : > { %v13298_v24 = vpop.f32.mrf.mxu3  ;;  %v14248_v4 = vand.u32 4294901760, %v14247_v20 }
 0xa24   : > { %v13180_v15 = vpop.f32.mrf.mxu0  ;;  %v13210_v3 = vpop.f32.mrf.mxu1 }
 0xa25   : > { %v13211_v50 = vadd.f32 %v13210_v3, %v13177_v28  ;;  %v13248_v19 = vpop.f32.mrf.mxu2  ;;  %v13181_v54 = vadd.f32 %v13180_v15, %v13141_v5  ;;  %v14249_v26 = vsub.f32 %v14247_v20, %v14248_v4  ;;  %v12741_v28 = vadd.f32 %v19264_v33, %v12707_v62 }
 0xa26   : > { %v13249_v55 = vadd.f32 %v13248_v19, %v19928_v6 }
 0xa27   : > { %v16334_v29 = vmax.f32 %v13211_v50, 0.0  ;;  %13816 = vmatmul.f32.gmra.mxu0 %v16754_v14  ;;  %13850 = vmatmul.f32.vlgmr.msra.gmra.mxu1 %v19933_v52  ;;  %v14250_v11 = vand.u32 4294901760, %v14249_v26 }
 0xa28   : > { %v19332_v21 = vadd.f32 %v13298_v24, %v13249_v55  ;;  %13930 = vmatmul.f32.gmra.mxu3 %v16745_v10  ;;  %14163 = vmatpush.msra.mxu1 %v13957_v44 }
 0xa29   : > { %v19338_v42 = vadd.f32 %v16334_v29, %v16332_v18  ;;  %13896 = vmatmul.f32.gmra.mxu2 %v16745_v10  ;;  %14251 = vmatpush.msra.mxu3 %v14250_v11  ;;  %v16364_v29 = vmax.f32 %v12741_v28, 0.0 }
 0xa2b   : > { %v13302_v0 = vpop.f32.mrf.mxu3 }
 0xa2c   : > { %v13184_v56 = vpop.f32.mrf.mxu0  ;;  %v13214_v32 = vpop.f32.mrf.mxu1 }
 0xa2d   : > { %v13215_v44 = vadd.f32 %v13214_v32, %v13181_v54  ;;  %v13256_v57 = vpop.f32.mrf.mxu2  ;;  %v13185_v24 = vadd.f32 %v13184_v56, %v13147_v63  ;;  %v12745_v63 = vadd.f32 %v19271_v51, %v12711_v61 }
 0xa2e   : > { %v13257_v59 = vadd.f32 %v13256_v57, %v16879_v13 }
 0xa2f   : > { %v16350_v12 = vmax.f32 %v13215_v44, 0.0  ;;  %13821 = vmatmul.f32.gmra.mxu0 %v16777_v30  ;;  %13856 = vmatmul.f32.gmra.mxu1 %v16767_v23  ;;  %v16380_v44 = vmax.f32 %v12745_v63, 0.0 }
 0xa30   : > { %v13303_v5 = vadd.f32 %v13302_v0, %v13257_v59  ;;  %13934 = vmatmul.f32.gmra.mxu3 %v16760_v17 }
 0xa31   : > { %v19352_v47 = vadd.f32 %v16350_v12, %v16348_v27  ;;  %13900 = vmatmul.f32.gmra.mxu2 %v16760_v17 }
 0xa33   : > { %v13306_v15 = vpop.f32.mrf.mxu3 }
 0xa34   : > { %v13188_v3 = vpop.f32.mrf.mxu0  ;;  %v13218_v50 = vpop.f32.mrf.mxu1 }
 0xa35   : > { %v13219_v19 = vadd.f32 %v13218_v50, %v13185_v24  ;;  %v13264_v55 = vpop.f32.mrf.mxu2  ;;  %v13189_v58 = vadd.f32 %v13188_v3, %v19325_v41 }
 0xa36   : > { %v13265_v18 = vadd.f32 %v13264_v55, %v16889_v22 }
 0xa37   : > { %v16366_v31 = vmax.f32 %v13219_v19, 0.0  ;;  %13826 = vmatmul.f32.gmra.mxu0 %v16796_v43  ;;  %13862 = vmatmul.f32.gmra.mxu1 %v16787_v38 }
 0xa38   : > { %v13307_v25 = vadd.f32 %v13306_v15, %v13265_v18  ;;  %13938 = vmatmul.f32.gmra.mxu3 %v19903_v16 }
 0xa39   : > { %v19362_v33 = vadd.f32 %v16366_v31, %v16364_v29  ;;  %13904 = vmatmul.f32.gmra.mxu2 %v19903_v16 }
 0xa3b   : > { %v13310_v8 = vpop.f32.mrf.mxu3 }
 0xa3c   : > { %v13222_v36 = vpop.f32.mrf.mxu1  ;;  %v13334_v54 = vpop.f32.mrf.mxu0 }
 0xa3d   : > { %v13223_v0 = vadd.f32 %v13222_v36, %v13189_v58  ;;  %v13272_v56 = vpop.f32.mrf.mxu2  ;;  %v13335_v51 = vadd.f32 %v13334_v54, %v19332_v21 }
 0xa3e   : > { %v13273_v32 = vadd.f32 %v13272_v56, %v16899_v49 }
 0xa3f   : > { %v16382_v57 = vmax.f32 %v13223_v0, 0.0  ;;  %13868 = vmatmul.f32.gmra.mxu1 %v16806_v46  ;;  %13964 = vmatmul.f32.vlgmr.msrb.gmra.mxu0 %v19929_v40 }
 0xa40   : > { %v13311_v53 = vadd.f32 %v13310_v8, %v13273_v32  ;;  %14089 = vmatmul.f32.vlgmr.msrb.gmra.mxu3 %v19933_v52  ;;  %14286 = vmatpush.msrb.mxu0 %v14247_v20 }
 0xa41   : > { %v19371_v34 = vadd.f32 %v16382_v57, %v16380_v44  ;;  %14050 = vmatmul.f32.vlgmr.msrb.gmra.mxu2 %v19932_v35  ;;  %14402 = vmatpush.msrb.mxu3 %v19341_v9 }
 0xa42   : > { %14368 = vmatpush.msrb.mxu2 %v14248_v4  ;;  %v16333_v4 = vmax.f32 %v19281_v7, 0.0  ;;  %v16349_v7 = vmax.f32 %v19287_v1, 0.0  ;;  %v16365_v1 = vmax.f32 %v19293_v39, 0.0  ;;  %v16381_v39 = vmax.f32 %v19300_v60, 0.0  ;;  %v16610_v60 = vld [vmem:[%s16739_s29 + $0xe0] sm:$0x77] }
 0xa43   : > { %v13449_v41 = vpop.f32.mrf.mxu3  ;;  %12464 = vst [vmem:[#allocation1] ss:$2 sm:$0xff] %v16610_v60 }
 0xa44   : > { %v13339_v59 = vpop.f32.mrf.mxu0  ;;  %v13373_v27 = vpop.f32.mrf.mxu1 }
 0xa45   : > { %v13374_v12 = vadd.f32 %v13373_v27, %v13335_v51  ;;  %v13415_v26 = vpop.f32.mrf.mxu2  ;;  %v13340_v21 = vadd.f32 %v13339_v59, %v13303_v5 }
 0xa47   : > { %v13416_v62 = vadd.f32 %v13415_v26, %v13374_v12  ;;  %13972 = vmatmul.f32.gmra.mxu0 %v16784_v37  ;;  %14014 = vmatmul.f32.vlgmr.msrb.gmra.mxu1 %v16724_v2 }
 0xa48   : > { %14095 = vmatmul.f32.gmra.mxu3 %v16767_v23  ;;  %14324 = vmatpush.msrb.mxu1 %v19341_v9 }
 0xa49   : > { %v13450_v20 = vadd.f32 %v13449_v41, %v13416_v62  ;;  %14055 = vmatmul.f32.gmra.mxu2 %v16754_v14 }
 0xa4b   : > { %v16335_v11 = vmax.f32 %v13450_v20, 0.0  ;;  %v13453_v28 = vpop.f32.mrf.mxu3 }
 0xa4c   : > { %v13344_v24 = vpop.f32.mrf.mxu0  ;;  %v13379_v15 = vpop.f32.mrf.mxu1 }
 0xa4d   : > { %v19382_v3 = vadd.f32 %v16335_v11, %v16333_v4  ;;  %v13380_v50 = vadd.f32 %v13379_v15, %v13340_v21  ;;  %v13419_v19 = vpop.f32.mrf.mxu2  ;;  %v13345_v5 = vadd.f32 %v13344_v24, %v13307_v25 }
 0xa4f   : > { %v13420_v55 = vadd.f32 %v13419_v19, %v13380_v50  ;;  %13980 = vmatmul.f32.gmra.mxu0 %v16803_v45  ;;  %14018 = vmatmul.f32.gmra.mxu1 %v16745_v10 }
 0xa50   : > { %14101 = vmatmul.f32.gmra.mxu3 %v16787_v38 }
 0xa51   : > { %v13454_v9 = vadd.f32 %v13453_v28, %v13420_v55  ;;  %14060 = vmatmul.f32.gmra.mxu2 %v16777_v30 }
 0xa53   : > { %v16351_v18 = vmax.f32 %v13454_v9, 0.0  ;;  %v13457_v29 = vpop.f32.mrf.mxu3 }
 0xa54   : > { %v13349_v31 = vpop.f32.mrf.mxu0  ;;  %v13385_v61 = vpop.f32.mrf.mxu1 }
 0xa55   : > { %v19389_v63 = vadd.f32 %v16351_v18, %v16349_v7  ;;  %v13386_v58 = vadd.f32 %v13385_v61, %v13345_v5  ;;  %v13423_v8 = vpop.f32.mrf.mxu2  ;;  %v13350_v25 = vadd.f32 %v13349_v31, %v13311_v53  ;;  %v12468_v31 = vld.sshfl [vmem:[#allocation1] sm:$0xff pattern:$0x75316420] }
 0xa56   : > { %v12492_v61 = vsel %vm336_vm1, %v12468_v31, 0 }
 0xa57   : > { %v13424_v36 = vadd.f32 %v13423_v8, %v13386_v58  ;;  %13988 = vmatmul.f32.gmra.mxu0 %v16814_v48  ;;  %14022 = vmatmul.f32.gmra.mxu1 %v16760_v17  ;;  %v14435_v8 = vand.u32 4294901760, %v12492_v61 }
 0xa58   : > { %14107 = vmatmul.f32.gmra.mxu3 %v16806_v46 }
 0xa59   : > { %v13458_v54 = vadd.f32 %v13457_v29, %v13424_v36  ;;  %14065 = vmatmul.f32.gmra.mxu2 %v16796_v43 }
 0xa5b   : > { %v16367_v0 = vmax.f32 %v13458_v54, 0.0  ;;  %v13461_v56 = vpop.f32.mrf.mxu3 }
 0xa5c   : > { %v13391_v32 = vpop.f32.mrf.mxu1  ;;  %v13487_v44 = vpop.f32.mrf.mxu0 }
 0xa5d   : > { %v19396_v57 = vadd.f32 %v16367_v0, %v16365_v1  ;;  %v13392_v51 = vadd.f32 %v13391_v32, %v13350_v25  ;;  %v13427_v41 = vpop.f32.mrf.mxu2  ;;  %v13488_v27 = vadd.f32 %v13487_v44, %v19928_v6  ;;  %v14486_v0 = vsub.f32 %v12492_v61, %v14435_v8 }
 0xa5f   : > { %v13428_v59 = vadd.f32 %v13427_v41, %v13392_v51  ;;  %14026 = vmatmul.f32.gmra.mxu1 %v19903_v16  ;;  %14131 = vmatmul.f32.vlgmr.msra.gmra.mxu0 %v16724_v2  ;;  %v14487_v32 = vand.u32 4294901760, %v14486_v0 }
 0xa60   : > { %14253 = vmatmul.f32.vlgmr.msra.gmra.mxu3 %v16724_v2  ;;  %14436 = vmatpush.msra.mxu0 %v14435_v8 }
 0xa61   : > { %v13462_v12 = vadd.f32 %v13461_v56, %v13428_v59  ;;  %14203 = vmatmul.f32.vlgmr.msra.gmra.mxu2 %v19929_v40  ;;  %14563 = vmatpush.msra.mxu3 %v14435_v8  ;;  %v14488_v41 = vsub.f32 %v14486_v0, %v14487_v32 }
 0xa62   : > { %14525 = vmatpush.msra.mxu2 %v14486_v0 }
 0xa63   : > { %v16383_v53 = vmax.f32 %v13462_v12, 0.0  ;;  %v13612_v26 = vpop.f32.mrf.mxu3 }
 0xa64   : > { %v13495_v62 = vpop.f32.mrf.mxu0  ;;  %v13537_v20 = vpop.f32.mrf.mxu1 }
 0xa65   : > { %v19404_v4 = vadd.f32 %v16383_v53, %v16381_v39  ;;  %v13538_v21 = vadd.f32 %v13537_v20, %v13488_v27  ;;  %v13573_v11 = vpop.f32.mrf.mxu2  ;;  %v13496_v24 = vadd.f32 %v13495_v62, %v16879_v13  ;;  %v14489_v27 = vand.u32 4294901760, %v14488_v41 }
 0xa67   : > { %v13574_v28 = vadd.f32 %v13573_v11, %v13538_v21  ;;  %14135 = vmatmul.f32.gmra.mxu0 %v16745_v10  ;;  %14165 = vmatmul.f32.vlgmr.msra.gmra.mxu1 %v16724_v2 }
 0xa68   : > { %14257 = vmatmul.f32.gmra.mxu3 %v16745_v10  ;;  %14490 = vmatpush.msra.mxu1 %v14489_v27 }
 0xa69   : > { %v13613_v15 = vadd.f32 %v13612_v26, %v13574_v28  ;;  %14211 = vmatmul.f32.gmra.mxu2 %v16784_v37 }
 0xa6b   : > { %v13618_v50 = vpop.f32.mrf.mxu3 }
 0xa6c   : > { %v13503_v19 = vpop.f32.mrf.mxu0  ;;  %v13541_v55 = vpop.f32.mrf.mxu1 }
 0xa6d   : > { %v13542_v9 = vadd.f32 %v13541_v55, %v13496_v24  ;;  %v13578_v7 = vpop.f32.mrf.mxu2  ;;  %v13504_v18 = vadd.f32 %v13503_v19, %v16889_v22 }
 0xa6f   : > { %v13579_v5 = vadd.f32 %v13578_v7, %v13542_v9  ;;  %14139 = vmatmul.f32.gmra.mxu0 %v16760_v17  ;;  %14169 = vmatmul.f32.gmra.mxu1 %v16745_v10  ;;  %v12469_v9 = vld.sshfl [vmem:[#allocation1 + $0x8] sm:$0xff pattern:$0x75316420] }
 0xa70   : > { %14261 = vmatmul.f32.gmra.mxu3 %v16760_v17 }
 0xa71   : > { %v13619_v29 = vadd.f32 %v13618_v50, %v13579_v5  ;;  %14219 = vmatmul.f32.gmra.mxu2 %v16803_v45  ;;  %v12494_v5 = vsel %vm336_vm1, %v12469_v9, 0 }
 0xa73   : > { %v13624_v58 = vpop.f32.mrf.mxu3 }
 0xa74   : > { %v13511_v36 = vpop.f32.mrf.mxu0  ;;  %v13545_v54 = vpop.f32.mrf.mxu1 }
 0xa75   : > { %v13546_v1 = vadd.f32 %v13545_v54, %v13504_v18  ;;  %v13583_v25 = vpop.f32.mrf.mxu2  ;;  %v13512_v44 = vadd.f32 %v13511_v36, %v16899_v49  ;;  %v14674_v18 = vand.u32 4294901760, %v12494_v5 }
 0xa77   : > { %v13584_v56 = vadd.f32 %v13583_v25, %v13546_v1  ;;  %14143 = vmatmul.f32.gmra.mxu0 %v19903_v16  ;;  %14173 = vmatmul.f32.gmra.mxu1 %v16760_v17 }
 0xa78   : > { %14265 = vmatmul.f32.gmra.mxu3 %v19903_v16 }
 0xa79   : > { %v13625_v51 = vadd.f32 %v13624_v58, %v13584_v56  ;;  %14227 = vmatmul.f32.gmra.mxu2 %v16814_v48  ;;  %v14725_v58 = vsub.f32 %v12494_v5, %v14674_v18 }
 0xa7b   : > { %v13630_v59 = vpop.f32.mrf.mxu3  ;;  %v14726_v0 = vand.u32 4294901760, %v14725_v58 }
 0xa7c   : > { %v13549_v12 = vpop.f32.mrf.mxu1  ;;  %v13654_v39 = vpop.f32.mrf.mxu0 }
 0xa7d   : > { %v13550_v53 = vadd.f32 %v13549_v12, %v13512_v44  ;;  %v13588_v26 = vpop.f32.mrf.mxu2  ;;  %v13655_v21 = vadd.f32 %v13654_v39, %v13613_v15 }
 0xa7f   : > { %v13589_v62 = vadd.f32 %v13588_v26, %v13550_v53  ;;  %14177 = vmatmul.f32.gmra.mxu1 %v19903_v16  ;;  %14289 = vmatmul.f32.vlgmr.msrb.gmra.mxu0 %v19932_v35 }
 0xa80   : > { %14404 = vmatmul.f32.vlgmr.msrb.gmra.mxu3 %v16724_v2  ;;  %14607 = vmatpush.msrb.mxu0 %v14487_v32 }
 0xa81   : > { %v13631_v20 = vadd.f32 %v13630_v59, %v13589_v62  ;;  %14370 = vmatmul.f32.vlgmr.msrb.gmra.mxu2 %v16724_v2 }
 0xa82   : > { %14675 = vmatpush.msrb.mxu2 %v14674_v18 }
 0xa83   : > { %v13776_v11 = vpop.f32.mrf.mxu3 }
 0xa84   : > { %v13658_v28 = vpop.f32.mrf.mxu0  ;;  %v13688_v24 = vpop.f32.mrf.mxu1 }
 0xa85   : > { %v13689_v60 = vadd.f32 %v13688_v24, %v13655_v21  ;;  %v13726_v50 = vpop.f32.mrf.mxu2  ;;  %v13659_v31 = vadd.f32 %v13658_v28, %v13619_v29 }
 0xa86   : > { %v13727_v19 = vadd.f32 %v13726_v50, %v19928_v6 }
 0xa87   : > { %v16336_v55 = vmax.f32 %v13689_v60, 0.0  ;;  %14294 = vmatmul.f32.gmra.mxu0 %v16754_v14  ;;  %14328 = vmatmul.f32.vlgmr.msrb.gmra.mxu1 %v19933_v52 }
 0xa88   : > { %v13777_v7 = vadd.f32 %v13776_v11, %v13727_v19  ;;  %14408 = vmatmul.f32.gmra.mxu3 %v16745_v10  ;;  %14641 = vmatpush.msrb.mxu1 %v14435_v8 }
 0xa89   : > { %v19433_v15 = vadd.f32 %v19338_v42, %v16336_v55  ;;  %14374 = vmatmul.f32.gmra.mxu2 %v16745_v10  ;;  %v14727_v42 = vsub.f32 %v14725_v58, %v14726_v0 }
 0xa8b   : > { %v13780_v61 = vpop.f32.mrf.mxu3  ;;  %v14728_v44 = vand.u32 4294901760, %v14727_v42 }
 0xa8c   : > { %v13662_v36 = vpop.f32.mrf.mxu0  ;;  %v13692_v54 = vpop.f32.mrf.mxu1 }
 0xa8d   : > { %v13693_v1 = vadd.f32 %v13692_v54, %v13659_v31  ;;  %v13734_v25 = vpop.f32.mrf.mxu2  ;;  %v13663_v41 = vadd.f32 %v13662_v36, %v13625_v51  ;;  %14729 = vmatpush.msrb.mxu3 %v14728_v44 }
 0xa8e   : > { %v13735_v56 = vadd.f32 %v13734_v25, %v16879_v13 }
 0xa8f   : > { %v16352_v32 = vmax.f32 %v13693_v1, 0.0  ;;  %14299 = vmatmul.f32.gmra.mxu0 %v16777_v30  ;;  %14334 = vmatmul.f32.gmra.mxu1 %v16767_v23 }
 0xa90   : > { %v13781_v8 = vadd.f32 %v13780_v61, %v13735_v56  ;;  %14412 = vmatmul.f32.gmra.mxu3 %v16760_v17 }
 0xa91   : > { %v19441_v29 = vadd.f32 %v19352_v47, %v16352_v32  ;;  %14378 = vmatmul.f32.gmra.mxu2 %v16760_v17 }
 0xa93   : > { %v13784_v59 = vpop.f32.mrf.mxu3 }
 0xa94   : > { %v13666_v27 = vpop.f32.mrf.mxu0  ;;  %v13696_v12 = vpop.f32.mrf.mxu1 }
 0xa95   : > { %v13697_v39 = vadd.f32 %v13696_v12, %v13663_v41  ;;  %v13742_v53 = vpop.f32.mrf.mxu2  ;;  %v13667_v51 = vadd.f32 %v13666_v27, %v13631_v20 }
 0xa96   : > { %v13743_v26 = vadd.f32 %v13742_v53, %v16889_v22 }
 0xa97   : > { %v16368_v62 = vmax.f32 %v13697_v39, 0.0  ;;  %14304 = vmatmul.f32.gmra.mxu0 %v16796_v43  ;;  %14340 = vmatmul.f32.gmra.mxu1 %v16787_v38 }
 0xa98   : > { %v13785_v21 = vadd.f32 %v13784_v59, %v13743_v26  ;;  %14416 = vmatmul.f32.gmra.mxu3 %v19903_v16 }
 0xa99   : > { %v19449_v47 = vadd.f32 %v19362_v33, %v16368_v62  ;;  %14382 = vmatmul.f32.gmra.mxu2 %v19903_v16 }
 0xa9b   : > { %v13788_v11 = vpop.f32.mrf.mxu3 }
 0xa9c   : > { %v13700_v28 = vpop.f32.mrf.mxu1  ;;  %v13812_v24 = vpop.f32.mrf.mxu0 }
 0xa9d   : > { %v13701_v60 = vadd.f32 %v13700_v28, %v13667_v51  ;;  %v13750_v50 = vpop.f32.mrf.mxu2  ;;  %v13813_v20 = vadd.f32 %v13812_v24, %v13777_v7 }
 0xa9e   : > { %v13751_v19 = vadd.f32 %v13750_v50, %v16899_v49 }
 0xa9f   : > { %v16384_v55 = vmax.f32 %v13701_v60, 0.0  ;;  %14346 = vmatmul.f32.gmra.mxu1 %v16806_v46  ;;  %14442 = vmatmul.f32.vlgmr.msra.gmra.mxu0 %v19929_v40 }
 0xaa0   : > { %v13789_v9 = vadd.f32 %v13788_v11, %v13751_v19  ;;  %14567 = vmatmul.f32.vlgmr.msra.gmra.mxu3 %v19933_v52  ;;  %14764 = vmatpush.msra.mxu0 %v14725_v58 }
 0xaa1   : > { %v19457_v33 = vadd.f32 %v19371_v34, %v16384_v55  ;;  %14528 = vmatmul.f32.vlgmr.msra.gmra.mxu2 %v19932_v35  ;;  %14880 = vmatpush.msra.mxu3 %v14674_v18 }
 0xaa2   : > { %14846 = vmatpush.msra.mxu2 %v14726_v0 }
 0xaa3   : > { %v13927_v5 = vpop.f32.mrf.mxu3 }
 0xaa4   : > { %v13817_v31 = vpop.f32.mrf.mxu0  ;;  %v13851_v61 = vpop.f32.mrf.mxu1 }
 0xaa5   : > { %v13852_v36 = vadd.f32 %v13851_v61, %v13813_v20  ;;  %v13893_v54 = vpop.f32.mrf.mxu2  ;;  %v13818_v58 = vadd.f32 %v13817_v31, %v13781_v8 }
 0xaa7   : > { %v13894_v1 = vadd.f32 %v13893_v54, %v13852_v36  ;;  %14450 = vmatmul.f32.gmra.mxu0 %v16784_v37  ;;  %14492 = vmatmul.f32.vlgmr.msra.gmra.mxu1 %v16724_v2 }
 0xaa8   : > { %14573 = vmatmul.f32.gmra.mxu3 %v16767_v23  ;;  %14802 = vmatpush.msra.mxu1 %v14674_v18 }
 0xaa9   : > { %v13928_v34 = vadd.f32 %v13927_v5, %v13894_v1  ;;  %14533 = vmatmul.f32.gmra.mxu2 %v16754_v14 }
 0xaab   : > { %v16337_v25 = vmax.f32 %v13928_v34, 0.0  ;;  %v13931_v0 = vpop.f32.mrf.mxu3 }
 0xaac   : > { %v13822_v7 = vpop.f32.mrf.mxu0  ;;  %v13857_v56 = vpop.f32.mrf.mxu1 }
 0xaad   : > { %v19465_v32 = vadd.f32 %v19382_v3, %v16337_v25  ;;  %v13858_v42 = vadd.f32 %v13857_v56, %v13818_v58  ;;  %v13897_v44 = vpop.f32.mrf.mxu2  ;;  %v13823_v8 = vadd.f32 %v13822_v7, %v13785_v21 }
 0xaaf   : > { %v13898_v41 = vadd.f32 %v13897_v44, %v13858_v42  ;;  %14458 = vmatmul.f32.gmra.mxu0 %v16803_v45  ;;  %14496 = vmatmul.f32.gmra.mxu1 %v16745_v10 }
 0xab0   : > { %14579 = vmatmul.f32.gmra.mxu3 %v16787_v38 }
 0xab1   : > { %v13932_v18 = vadd.f32 %v13931_v0, %v13898_v41  ;;  %14538 = vmatmul.f32.gmra.mxu2 %v16777_v30  ;;  %v16611_v0 = vld [vmem:[%s16739_s29 + $0xe8] sm:$0x77] }
 0xab2   : > { %12465 = vst [vmem:[#allocation1 + $0x10] ss:$2 sm:$0xff] %v16611_v0 }
 0xab3   : > { %v16353_v59 = vmax.f32 %v13932_v18, 0.0  ;;  %v13935_v27 = vpop.f32.mrf.mxu3 }
 0xab4   : > { %v13827_v12 = vpop.f32.mrf.mxu0  ;;  %v13863_v39 = vpop.f32.mrf.mxu1 }
 0xab5   : > { %v19472_v3 = vadd.f32 %v19389_v63, %v16353_v59  ;;  %v13864_v53 = vadd.f32 %v13863_v39, %v13823_v8  ;;  %v13901_v26 = vpop.f32.mrf.mxu2  ;;  %v13828_v21 = vadd.f32 %v13827_v12, %v13789_v9 }
 0xab7   : > { %v13902_v62 = vadd.f32 %v13901_v26, %v13864_v53  ;;  %14466 = vmatmul.f32.gmra.mxu0 %v16814_v48  ;;  %14500 = vmatmul.f32.gmra.mxu1 %v16760_v17 }
 0xab8   : > { %14585 = vmatmul.f32.gmra.mxu3 %v16806_v46 }
 0xab9   : > { %v13936_v51 = vadd.f32 %v13935_v27, %v13902_v62  ;;  %14543 = vmatmul.f32.gmra.mxu2 %v16796_v43  ;;  %v12470_v59 = vld.sshfl [vmem:[#allocation1 + $0x10] sm:$0xff pattern:$0x75316420] }
 0xaba   : > { %v12496_v27 = vsel %vm336_vm1, %v12470_v59, 0 }
 0xabb   : > { %v16369_v11 = vmax.f32 %v13936_v51, 0.0  ;;  %v13939_v28 = vpop.f32.mrf.mxu3  ;;  %v14913_v39 = vand.u32 4294901760, %v12496_v27 }
 0xabc   : > { %v13869_v24 = vpop.f32.mrf.mxu1  ;;  %v13965_v60 = vpop.f32.mrf.mxu0 }
 0xabd   : > { %v19479_v63 = vadd.f32 %v19396_v57, %v16369_v11  ;;  %v13870_v50 = vadd.f32 %v13869_v24, %v13828_v21  ;;  %v13905_v19 = vpop.f32.mrf.mxu2  ;;  %v13966_v20 = vadd.f32 %v13965_v60, %v19928_v6  ;;  %v14964_v21 = vsub.f32 %v12496_v27, %v14913_v39 }
 0xabf   : > { %v13906_v55 = vadd.f32 %v13905_v19, %v13870_v50  ;;  %14504 = vmatmul.f32.gmra.mxu1 %v19903_v16  ;;  %14609 = vmatmul.f32.vlgmr.msrb.gmra.mxu0 %v16724_v2 }
 0xac0   : > { %14731 = vmatmul.f32.vlgmr.msrb.gmra.mxu3 %v16724_v2  ;;  %14914 = vmatpush.msrb.mxu0 %v14913_v39 }
 0xac1   : > { %v13940_v5 = vadd.f32 %v13939_v28, %v13906_v55  ;;  %14681 = vmatmul.f32.vlgmr.msrb.gmra.mxu2 %v19929_v40  ;;  %15041 = vmatpush.msrb.mxu3 %v14913_v39  ;;  %v14965_v28 = vand.u32 4294901760, %v14964_v21 }
 0xac2   : > { %15003 = vmatpush.msrb.mxu2 %v14964_v21 }
 0xac3   : > { %v16385_v9 = vmax.f32 %v13940_v5, 0.0  ;;  %v14090_v31 = vpop.f32.mrf.mxu3  ;;  %v14966_v50 = vsub.f32 %v14964_v21, %v14965_v28 }
 0xac4   : > { %v13973_v61 = vpop.f32.mrf.mxu0  ;;  %v14015_v57 = vpop.f32.mrf.mxu1 }
 0xac5   : > { %v19487_v36 = vadd.f32 %v19404_v4, %v16385_v9  ;;  %v14016_v54 = vadd.f32 %v14015_v57, %v13966_v20  ;;  %v14051_v1 = vpop.f32.mrf.mxu2  ;;  %v13974_v58 = vadd.f32 %v13973_v61, %v16879_v13  ;;  %v14967_v55 = vand.u32 4294901760, %v14966_v50 }
 0xac7   : > { %v14052_v34 = vadd.f32 %v14051_v1, %v14016_v54  ;;  %14613 = vmatmul.f32.gmra.mxu0 %v16745_v10  ;;  %14643 = vmatmul.f32.vlgmr.msrb.gmra.mxu1 %v16724_v2 }
 0xac8   : > { %14735 = vmatmul.f32.gmra.mxu3 %v16745_v10  ;;  %14968 = vmatpush.msrb.mxu1 %v14967_v55 }
 0xac9   : > { %v14091_v25 = vadd.f32 %v14090_v31, %v14052_v34  ;;  %14689 = vmatmul.f32.gmra.mxu2 %v16784_v37 }
 0xacb   : > { %v14096_v7 = vpop.f32.mrf.mxu3 }
 0xacc   : > { %v13981_v56 = vpop.f32.mrf.mxu0  ;;  %v14019_v4 = vpop.f32.mrf.mxu1 }
 0xacd   : > { %v14020_v42 = vadd.f32 %v14019_v4, %v13974_v58  ;;  %v14056_v44 = vpop.f32.mrf.mxu2  ;;  %v13982_v18 = vadd.f32 %v13981_v56, %v16889_v22 }
 0xacf   : > { %v14057_v41 = vadd.f32 %v14056_v44, %v14020_v42  ;;  %14617 = vmatmul.f32.gmra.mxu0 %v16760_v17  ;;  %14647 = vmatmul.f32.gmra.mxu1 %v16745_v10  ;;  %v12471_v42 = vld.sshfl [vmem:[#allocation1 + $0x18] sm:$0xff pattern:$0x75316420] }
 0xad0   : > { %14739 = vmatmul.f32.gmra.mxu3 %v16760_v17 }
 0xad1   : > { %v14097_v8 = vadd.f32 %v14096_v7, %v14057_v41  ;;  %14697 = vmatmul.f32.gmra.mxu2 %v16803_v45  ;;  %v12498_v41 = vsel %vm336_vm1, %v12471_v42, 0 }
 0xad3   : > { %v14102_v12 = vpop.f32.mrf.mxu3 }
 0xad4   : > { %v13989_v53 = vpop.f32.mrf.mxu0  ;;  %v14023_v26 = vpop.f32.mrf.mxu1 }
 0xad5   : > { %v14024_v62 = vadd.f32 %v14023_v26, %v13982_v18  ;;  %v14061_v51 = vpop.f32.mrf.mxu2  ;;  %v13990_v24 = vadd.f32 %v13989_v53, %v16899_v49  ;;  %v15152_v18 = vand.u32 4294901760, %v12498_v41 }
 0xad7   : > { %v14062_v11 = vadd.f32 %v14061_v51, %v14024_v62  ;;  %14621 = vmatmul.f32.gmra.mxu0 %v19903_v16  ;;  %14651 = vmatmul.f32.gmra.mxu1 %v16760_v17 }
 0xad8   : > { %14743 = vmatmul.f32.gmra.mxu3 %v19903_v16 }
 0xad9   : > { %v14103_v60 = vadd.f32 %v14102_v12, %v14062_v11  ;;  %14705 = vmatmul.f32.gmra.mxu2 %v16814_v48  ;;  %v15203_v12 = vsub.f32 %v12498_v41, %v15152_v18 }
 0xadb   : > { %v14108_v19 = vpop.f32.mrf.mxu3  ;;  %v15204_v21 = vand.u32 4294901760, %v15203_v12 }
 0xadc   : > { %v14027_v20 = vpop.f32.mrf.mxu1  ;;  %v14132_v5 = vpop.f32.mrf.mxu0 }
 0xadd   : > { %v14028_v9 = vadd.f32 %v14027_v20, %v13990_v24  ;;  %v14066_v31 = vpop.f32.mrf.mxu2  ;;  %v14133_v54 = vadd.f32 %v14132_v5, %v14091_v25 }
 0xadf   : > { %v14067_v61 = vadd.f32 %v14066_v31, %v14028_v9  ;;  %14655 = vmatmul.f32.gmra.mxu1 %v19903_v16  ;;  %14767 = vmatmul.f32.vlgmr.msra.gmra.mxu0 %v19932_v35 }
 0xae0   : > { %14882 = vmatmul.f32.vlgmr.msra.gmra.mxu3 %v16724_v2  ;;  %15085 = vmatpush.msra.mxu0 %v14965_v28 }
 0xae1   : > { %v14109_v57 = vadd.f32 %v14108_v19, %v14067_v61  ;;  %14848 = vmatmul.f32.vlgmr.msra.gmra.mxu2 %v16724_v2 }
 0xae2   : > { %15153 = vmatpush.msra.mxu2 %v15152_v18 }
 0xae3   : > { %v14254_v1 = vpop.f32.mrf.mxu3 }
 0xae4   : > { %v14136_v34 = vpop.f32.mrf.mxu0  ;;  %v14166_v58 = vpop.f32.mrf.mxu1 }
 0xae5   : > { %v14167_v0 = vadd.f32 %v14166_v58, %v14133_v54  ;;  %v14204_v7 = vpop.f32.mrf.mxu2  ;;  %v14137_v59 = vadd.f32 %v14136_v34, %v14097_v8 }
 0xae6   : > { %v14205_v56 = vadd.f32 %v14204_v7, %v19928_v6 }
 0xae7   : > { %v16338_v4 = vmax.f32 %v14167_v0, 0.0  ;;  %14772 = vmatmul.f32.gmra.mxu0 %v16754_v14  ;;  %14806 = vmatmul.f32.vlgmr.msra.gmra.mxu1 %v19933_v52 }
 0xae8   : > { %v14255_v44 = vadd.f32 %v14254_v1, %v14205_v56  ;;  %14886 = vmatmul.f32.gmra.mxu3 %v16745_v10  ;;  %15119 = vmatpush.msra.mxu1 %v14913_v39 }
 0xae9   : > { %v19516_v25 = vadd.f32 %v19433_v15, %v16338_v4  ;;  %14852 = vmatmul.f32.gmra.mxu2 %v16745_v10  ;;  %v15205_v15 = vsub.f32 %v15203_v12, %v15204_v21 }
 0xaeb   : > { %v14258_v27 = vpop.f32.mrf.mxu3  ;;  %v15206_v24 = vand.u32 4294901760, %v15205_v15 }
 0xaec   : > { %v14140_v53 = vpop.f32.mrf.mxu0  ;;  %v14170_v26 = vpop.f32.mrf.mxu1 }
 0xaed   : > { %v14171_v62 = vadd.f32 %v14170_v26, %v14137_v59  ;;  %v14212_v51 = vpop.f32.mrf.mxu2  ;;  %v14141_v50 = vadd.f32 %v14140_v53, %v14103_v60  ;;  %15207 = vmatpush.msra.mxu3 %v15206_v24 }
 0xaee   : > { %v14213_v11 = vadd.f32 %v14212_v51, %v16879_v13 }
 0xaef   : > { %v16354_v28 = vmax.f32 %v14171_v62, 0.0  ;;  %14777 = vmatmul.f32.gmra.mxu0 %v16777_v30  ;;  %14812 = vmatmul.f32.gmra.mxu1 %v16767_v23 }
 0xaf0   : > { %v14259_v39 = vadd.f32 %v14258_v27, %v14213_v11  ;;  %14890 = vmatmul.f32.gmra.mxu3 %v16760_v17 }
 0xaf1   : > { %v19524_v8 = vadd.f32 %v19441_v29, %v16354_v28  ;;  %14856 = vmatmul.f32.gmra.mxu2 %v16760_v17 }
 0xaf3   : > { %v14262_v19 = vpop.f32.mrf.mxu3 }
 0xaf4   : > { %v14144_v55 = vpop.f32.mrf.mxu0  ;;  %v14174_v20 = vpop.f32.mrf.mxu1 }
 0xaf5   : > { %v14175_v5 = vadd.f32 %v14174_v20, %v14141_v50  ;;  %v14220_v9 = vpop.f32.mrf.mxu2  ;;  %v14145_v60 = vadd.f32 %v14144_v55, %v14109_v57 }
 0xaf6   : > { %v14221_v31 = vadd.f32 %v14220_v9, %v16889_v22 }
 0xaf7   : > { %v16370_v61 = vmax.f32 %v14175_v5, 0.0  ;;  %14782 = vmatmul.f32.gmra.mxu0 %v16796_v43  ;;  %14818 = vmatmul.f32.gmra.mxu1 %v16787_v38 }
 0xaf8   : > { %v14263_v54 = vadd.f32 %v14262_v19, %v14221_v31  ;;  %14894 = vmatmul.f32.gmra.mxu3 %v19903_v16 }
 0xaf9   : > { %v19532_v29 = vadd.f32 %v19449_v47, %v16370_v61  ;;  %14860 = vmatmul.f32.gmra.mxu2 %v19903_v16 }
 0xafb   : > { %v14266_v1 = vpop.f32.mrf.mxu3 }
 0xafc   : > { %v14178_v34 = vpop.f32.mrf.mxu1  ;;  %v14290_v58 = vpop.f32.mrf.mxu0 }
 0xafd   : > { %v14179_v0 = vadd.f32 %v14178_v34, %v14145_v60  ;;  %v14228_v7 = vpop.f32.mrf.mxu2  ;;  %v14291_v57 = vadd.f32 %v14290_v58, %v14255_v44 }
 0xafe   : > { %v14229_v56 = vadd.f32 %v14228_v7, %v16899_v49 }
 0xaff   : > { %v16386_v4 = vmax.f32 %v14179_v0, 0.0  ;;  %14824 = vmatmul.f32.gmra.mxu1 %v16806_v46  ;;  %14920 = vmatmul.f32.vlgmr.msrb.gmra.mxu0 %v19929_v40 }
 0xb00   : > { %v14267_v42 = vadd.f32 %v14266_v1, %v14229_v56  ;;  %15045 = vmatmul.f32.vlgmr.msrb.gmra.mxu3 %v19933_v52  ;;  %15242 = vmatpush.msrb.mxu0 %v15203_v12 }
 0xb01   : > { %v19540_v47 = vadd.f32 %v19457_v33, %v16386_v4  ;;  %15006 = vmatmul.f32.vlgmr.msrb.gmra.mxu2 %v19932_v35  ;;  %15358 = vmatpush.msrb.mxu3 %v15152_v18 }
 0xb02   : > { %15324 = vmatpush.msrb.mxu2 %v15204_v21 }
 0xb03   : > { %v14405_v41 = vpop.f32.mrf.mxu3 }
 0xb04   : > { %v14295_v59 = vpop.f32.mrf.mxu0  ;;  %v14329_v27 = vpop.f32.mrf.mxu1 }
 0xb05   : > { %v14330_v53 = vadd.f32 %v14329_v27, %v14291_v57  ;;  %v14371_v26 = vpop.f32.mrf.mxu2  ;;  %v14296_v12 = vadd.f32 %v14295_v59, %v14259_v39 }
 0xb07   : > { %v14372_v62 = vadd.f32 %v14371_v26, %v14330_v53  ;;  %14928 = vmatmul.f32.gmra.mxu0 %v16784_v37  ;;  %14970 = vmatmul.f32.vlgmr.msrb.gmra.mxu1 %v16724_v2 }
 0xb08   : > { %15051 = vmatmul.f32.gmra.mxu3 %v16767_v23  ;;  %15280 = vmatpush.msrb.mxu1 %v15152_v18 }
 0xb09   : > { %v14406_v33 = vadd.f32 %v14405_v41, %v14372_v62  ;;  %15011 = vmatmul.f32.gmra.mxu2 %v16754_v14 }
 0xb0b   : > { %v16339_v51 = vmax.f32 %v14406_v33, 0.0  ;;  %v14409_v21 = vpop.f32.mrf.mxu3 }
 0xb0c   : > { %v14300_v44 = vpop.f32.mrf.mxu0  ;;  %v14335_v11 = vpop.f32.mrf.mxu1 }
 0xb0d   : > { %v19548_v28 = vadd.f32 %v19465_v32, %v16339_v51  ;;  %v14336_v15 = vadd.f32 %v14335_v11, %v14296_v12  ;;  %v14375_v24 = vpop.f32.mrf.mxu2  ;;  %v14301_v39 = vadd.f32 %v14300_v44, %v14263_v54 }
 0xb0f   : > { %v14376_v50 = vadd.f32 %v14375_v24, %v14336_v15  ;;  %14936 = vmatmul.f32.gmra.mxu0 %v16803_v45  ;;  %14974 = vmatmul.f32.gmra.mxu1 %v16745_v10 }
 0xb10   : > { %15057 = vmatmul.f32.gmra.mxu3 %v16787_v38 }
 0xb11   : > { %v14410_v18 = vadd.f32 %v14409_v21, %v14376_v50  ;;  %15016 = vmatmul.f32.gmra.mxu2 %v16777_v30  ;;  %v16612_v21 = vld [vmem:[%s16739_s29 + $0xf0] sm:$0x77] }
 0xb12   : > { %12466 = vst [vmem:[#allocation1 + $0x20] ss:$2 sm:$0xff] %v16612_v21 }
 0xb13   : > { %v16355_v19 = vmax.f32 %v14410_v18, 0.0  ;;  %v14413_v55 = vpop.f32.mrf.mxu3 }
 0xb14   : > { %v14305_v20 = vpop.f32.mrf.mxu0  ;;  %v14341_v5 = vpop.f32.mrf.mxu1 }
 0xb15   : > { %v19555_v32 = vadd.f32 %v19472_v3, %v16355_v19  ;;  %v14342_v9 = vadd.f32 %v14341_v5, %v14301_v39  ;;  %v14379_v31 = vpop.f32.mrf.mxu2  ;;  %v14306_v54 = vadd.f32 %v14305_v20, %v14267_v42 }
 0xb17   : > { %v14380_v61 = vadd.f32 %v14379_v31, %v14342_v9  ;;  %14944 = vmatmul.f32.gmra.mxu0 %v16814_v48  ;;  %14978 = vmatmul.f32.gmra.mxu1 %v16760_v17 }
 0xb18   : > { %15063 = vmatmul.f32.gmra.mxu3 %v16806_v46 }
 0xb19   : > { %v14414_v60 = vadd.f32 %v14413_v55, %v14380_v61  ;;  %15021 = vmatmul.f32.gmra.mxu2 %v16796_v43  ;;  %v12472_v19 = vld.sshfl [vmem:[#allocation1 + $0x20] sm:$0xff pattern:$0x75316420] }
 0xb1a   : > { %v12500_v55 = vsel %vm336_vm1, %v12472_v19, 0 }
 0xb1b   : > { %v16371_v1 = vmax.f32 %v14414_v60, 0.0  ;;  %v14417_v34 = vpop.f32.mrf.mxu3  ;;  %v15391_v5 = vand.u32 4294901760, %v12500_v55 }
 0xb1c   : > { %v14347_v58 = vpop.f32.mrf.mxu1  ;;  %v14443_v0 = vpop.f32.mrf.mxu0 }
 0xb1d   : > { %v19562_v3 = vadd.f32 %v19479_v63, %v16371_v1  ;;  %v14348_v7 = vadd.f32 %v14347_v58, %v14306_v54  ;;  %v14383_v56 = vpop.f32.mrf.mxu2  ;;  %v14444_v57 = vadd.f32 %v14443_v0, %v19928_v6  ;;  %v15442_v54 = vsub.f32 %v12500_v55, %v15391_v5 }
 0xb1f   : > { %v14384_v4 = vadd.f32 %v14383_v56, %v14348_v7  ;;  %14982 = vmatmul.f32.gmra.mxu1 %v19903_v16  ;;  %15087 = vmatmul.f32.vlgmr.msra.gmra.mxu0 %v16724_v2 }
 0xb20   : > { %15209 = vmatmul.f32.vlgmr.msra.gmra.mxu3 %v16724_v2  ;;  %15392 = vmatpush.msra.mxu0 %v15391_v5 }
 0xb21   : > { %v14418_v41 = vadd.f32 %v14417_v34, %v14384_v4  ;;  %15159 = vmatmul.f32.vlgmr.msra.gmra.mxu2 %v19929_v40  ;;  %15519 = vmatpush.msra.mxu3 %v15391_v5  ;;  %v15443_v34 = vand.u32 4294901760, %v15442_v54 }
 0xb22   : > { %15481 = vmatpush.msra.mxu2 %v15442_v54 }
 0xb23   : > { %v16387_v42 = vmax.f32 %v14418_v41, 0.0  ;;  %v14568_v59 = vpop.f32.mrf.mxu3  ;;  %v15444_v7 = vsub.f32 %v15442_v54, %v15443_v34 }
 0xb24   : > { %v14451_v27 = vpop.f32.mrf.mxu0  ;;  %v14493_v63 = vpop.f32.mrf.mxu1 }
 0xb25   : > { %v19570_v53 = vadd.f32 %v19487_v36, %v16387_v42  ;;  %v14494_v26 = vadd.f32 %v14493_v63, %v14444_v57  ;;  %v14529_v62 = vpop.f32.mrf.mxu2  ;;  %v14452_v12 = vadd.f32 %v14451_v27, %v16879_v13  ;;  %v15445_v4 = vand.u32 4294901760, %v15444_v7 }
 0xb27   : > { %v14530_v33 = vadd.f32 %v14529_v62, %v14494_v26  ;;  %15091 = vmatmul.f32.gmra.mxu0 %v16745_v10  ;;  %15121 = vmatmul.f32.vlgmr.msra.gmra.mxu1 %v16724_v2 }
 0xb28   : > { %15213 = vmatmul.f32.gmra.mxu3 %v16745_v10  ;;  %15446 = vmatpush.msra.mxu1 %v15445_v4 }
 0xb29   : > { %v14569_v51 = vadd.f32 %v14568_v59, %v14530_v33  ;;  %15167 = vmatmul.f32.gmra.mxu2 %v16784_v37 }
 0xb2b   : > { %v14574_v44 = vpop.f32.mrf.mxu3 }
 0xb2c   : > { %v14459_v11 = vpop.f32.mrf.mxu0  ;;  %v14497_v36 = vpop.f32.mrf.mxu1 }
 0xb2d   : > { %v14498_v15 = vadd.f32 %v14497_v36, %v14452_v12  ;;  %v14534_v24 = vpop.f32.mrf.mxu2  ;;  %v14460_v18 = vadd.f32 %v14459_v11, %v16889_v22 }
 0xb2f   : > { %v14535_v50 = vadd.f32 %v14534_v24, %v14498_v15  ;;  %15095 = vmatmul.f32.gmra.mxu0 %v16760_v17  ;;  %15125 = vmatmul.f32.gmra.mxu1 %v16745_v10  ;;  %v12473_v15 = vld.sshfl [vmem:[#allocation1 + $0x28] sm:$0xff pattern:$0x75316420] }
 0xb30   : > { %15217 = vmatmul.f32.gmra.mxu3 %v16760_v17 }
 0xb31   : > { %v14575_v39 = vadd.f32 %v14574_v44, %v14535_v50  ;;  %15175 = vmatmul.f32.gmra.mxu2 %v16803_v45  ;;  %v12502_v50 = vsel %vm336_vm1, %v12473_v15, 0 }
 0xb33   : > { %v14580_v20 = vpop.f32.mrf.mxu3 }
 0xb34   : > { %v14467_v9 = vpop.f32.mrf.mxu0  ;;  %v14501_v31 = vpop.f32.mrf.mxu1 }
 0xb35   : > { %v14502_v61 = vadd.f32 %v14501_v31, %v14460_v18  ;;  %v14539_v60 = vpop.f32.mrf.mxu2  ;;  %v14468_v58 = vadd.f32 %v14467_v9, %v16899_v49  ;;  %v15630_v18 = vand.u32 4294901760, %v12502_v50 }
 0xb37   : > { %v14540_v1 = vadd.f32 %v14539_v60, %v14502_v61  ;;  %15099 = vmatmul.f32.gmra.mxu0 %v19903_v16  ;;  %15129 = vmatmul.f32.gmra.mxu1 %v16760_v17 }
 0xb38   : > { %15221 = vmatmul.f32.gmra.mxu3 %v19903_v16 }
 0xb39   : > { %v14581_v0 = vadd.f32 %v14580_v20, %v14540_v1  ;;  %15183 = vmatmul.f32.gmra.mxu2 %v16814_v48  ;;  %v15681_v20 = vsub.f32 %v12502_v50, %v15630_v18 }
 0xb3b   : > { %v14586_v56 = vpop.f32.mrf.mxu3  ;;  %v15682_v54 = vand.u32 4294901760, %v15681_v20 }
 0xb3c   : > { %v14505_v57 = vpop.f32.mrf.mxu1  ;;  %v14610_v41 = vpop.f32.mrf.mxu0 }
 0xb3d   : > { %v14506_v42 = vadd.f32 %v14505_v57, %v14468_v58  ;;  %v14544_v59 = vpop.f32.mrf.mxu2  ;;  %v14611_v26 = vadd.f32 %v14610_v41, %v14569_v51 }
 0xb3f   : > { %v14545_v27 = vadd.f32 %v14544_v59, %v14506_v42  ;;  %15133 = vmatmul.f32.gmra.mxu1 %v19903_v16  ;;  %15245 = vmatmul.f32.vlgmr.msrb.gmra.mxu0 %v19932_v35 }
 0xb40   : > { %15360 = vmatmul.f32.vlgmr.msrb.gmra.mxu3 %v16724_v2  ;;  %15563 = vmatpush.msrb.mxu0 %v15443_v34 }
 0xb41   : > { %v14587_v63 = vadd.f32 %v14586_v56, %v14545_v27  ;;  %15326 = vmatmul.f32.vlgmr.msrb.gmra.mxu2 %v16724_v2 }
 0xb42   : > { %15631 = vmatpush.msrb.mxu2 %v15630_v18 }
 0xb43   : > { %v14732_v62 = vpop.f32.mrf.mxu3 }
 0xb44   : > { %v14614_v33 = vpop.f32.mrf.mxu0  ;;  %v14644_v12 = vpop.f32.mrf.mxu1 }
 0xb45   : > { %v14645_v21 = vadd.f32 %v14644_v12, %v14611_v26  ;;  %v14682_v44 = vpop.f32.mrf.mxu2  ;;  %v14615_v19 = vadd.f32 %v14614_v33, %v14575_v39 }
 0xb46   : > { %v14683_v11 = vadd.f32 %v14682_v44, %v19928_v6 }
 0xb47   : > { %v16340_v36 = vmax.f32 %v14645_v21, 0.0  ;;  %15250 = vmatmul.f32.gmra.mxu0 %v16754_v14  ;;  %15284 = vmatmul.f32.vlgmr.msrb.gmra.mxu1 %v19933_v52 }
 0xb48   : > { %v14733_v24 = vadd.f32 %v14732_v62, %v14683_v11  ;;  %15364 = vmatmul.f32.gmra.mxu3 %v16745_v10  ;;  %15597 = vmatpush.msrb.mxu1 %v15391_v5 }
 0xb49   : > { %v19599_v51 = vadd.f32 %v19516_v25, %v16340_v36  ;;  %15330 = vmatmul.f32.gmra.mxu2 %v16745_v10  ;;  %v15683_v25 = vsub.f32 %v15681_v20, %v15682_v54 }
 0xb4b   : > { %v14736_v55 = vpop.f32.mrf.mxu3  ;;  %v15684_v58 = vand.u32 4294901760, %v15683_v25 }
 0xb4c   : > { %v14618_v9 = vpop.f32.mrf.mxu0  ;;  %v14648_v31 = vpop.f32.mrf.mxu1 }
 0xb4d   : > { %v14649_v61 = vadd.f32 %v14648_v31, %v14615_v19  ;;  %v14690_v60 = vpop.f32.mrf.mxu2  ;;  %v14619_v7 = vadd.f32 %v14618_v9, %v14581_v0  ;;  %15685 = vmatpush.msrb.mxu3 %v15684_v58 }
 0xb4e   : > { %v14691_v1 = vadd.f32 %v14690_v60, %v16879_v13 }
 0xb4f   : > { %v16356_v34 = vmax.f32 %v14649_v61, 0.0  ;;  %15255 = vmatmul.f32.gmra.mxu0 %v16777_v30  ;;  %15290 = vmatmul.f32.gmra.mxu1 %v16767_v23 }
 0xb50   : > { %v14737_v5 = vadd.f32 %v14736_v55, %v14691_v1  ;;  %15368 = vmatmul.f32.gmra.mxu3 %v16760_v17 }
 0xb51   : > { %v19607_v39 = vadd.f32 %v19524_v8, %v16356_v34  ;;  %15334 = vmatmul.f32.gmra.mxu2 %v16760_v17 }
 0xb53   : > { %v14740_v56 = vpop.f32.mrf.mxu3 }
 0xb54   : > { %v14622_v4 = vpop.f32.mrf.mxu0  ;;  %v14652_v57 = vpop.f32.mrf.mxu1 }
 0xb55   : > { %v14653_v41 = vadd.f32 %v14652_v57, %v14619_v7  ;;  %v14698_v42 = vpop.f32.mrf.mxu2  ;;  %v14623_v0 = vadd.f32 %v14622_v4, %v14587_v63 }
 0xb56   : > { %v14699_v59 = vadd.f32 %v14698_v42, %v16889_v22 }
 0xb57   : > { %v16372_v27 = vmax.f32 %v14653_v41, 0.0  ;;  %15260 = vmatmul.f32.gmra.mxu0 %v16796_v43  ;;  %15296 = vmatmul.f32.gmra.mxu1 %v16787_v38 }
 0xb58   : > { %v14741_v26 = vadd.f32 %v14740_v56, %v14699_v59  ;;  %15372 = vmatmul.f32.gmra.mxu3 %v19903_v16 }
 0xb59   : > { %v19615_v8 = vadd.f32 %v19532_v29, %v16372_v27  ;;  %15338 = vmatmul.f32.gmra.mxu2 %v19903_v16 }
 0xb5b   : > { %v14744_v62 = vpop.f32.mrf.mxu3 }
 0xb5c   : > { %v14656_v33 = vpop.f32.mrf.mxu1  ;;  %v14768_v12 = vpop.f32.mrf.mxu0 }
 0xb5d   : > { %v14657_v21 = vadd.f32 %v14656_v33, %v14623_v0  ;;  %v14706_v44 = vpop.f32.mrf.mxu2  ;;  %v14769_v63 = vadd.f32 %v14768_v12, %v14733_v24 }
 0xb5e   : > { %v14707_v11 = vadd.f32 %v14706_v44, %v16899_v49 }
 0xb5f   : > { %v16388_v36 = vmax.f32 %v14657_v21, 0.0  ;;  %15302 = vmatmul.f32.gmra.mxu1 %v16806_v46  ;;  %15398 = vmatmul.f32.vlgmr.msra.gmra.mxu0 %v19929_v40 }
 0xb60   : > { %v14745_v15 = vadd.f32 %v14744_v62, %v14707_v11  ;;  %15523 = vmatmul.f32.vlgmr.msra.gmra.mxu3 %v19933_v52  ;;  %15720 = vmatpush.msra.mxu0 %v15681_v20 }
 0xb61   : > { %v19623_v29 = vadd.f32 %v19540_v47, %v16388_v36  ;;  %15484 = vmatmul.f32.vlgmr.msra.gmra.mxu2 %v19932_v35  ;;  %15836 = vmatpush.msra.mxu3 %v15630_v18 }
 0xb62   : > { %15802 = vmatpush.msra.mxu2 %v15682_v54 }
 0xb63   : > { %v14883_v50 = vpop.f32.mrf.mxu3 }
 0xb64   : > { %v14773_v19 = vpop.f32.mrf.mxu0  ;;  %v14807_v55 = vpop.f32.mrf.mxu1 }
 0xb65   : > { %v14808_v9 = vadd.f32 %v14807_v55, %v14769_v63  ;;  %v14849_v31 = vpop.f32.mrf.mxu2  ;;  %v14774_v20 = vadd.f32 %v14773_v19, %v14737_v5 }
 0xb67   : > { %v14850_v61 = vadd.f32 %v14849_v31, %v14808_v9  ;;  %15406 = vmatmul.f32.gmra.mxu0 %v16784_v37  ;;  %15448 = vmatmul.f32.vlgmr.msra.gmra.mxu1 %v16724_v2 }
 0xb68   : > { %15529 = vmatmul.f32.gmra.mxu3 %v16767_v23  ;;  %15758 = vmatpush.msra.mxu1 %v15630_v18 }
 0xb69   : > { %v14884_v47 = vadd.f32 %v14883_v50, %v14850_v61  ;;  %15489 = vmatmul.f32.gmra.mxu2 %v16754_v14 }
 0xb6b   : > { %v16341_v60 = vmax.f32 %v14884_v47, 0.0  ;;  %v14887_v54 = vpop.f32.mrf.mxu3 }
 0xb6c   : > { %v14778_v24 = vpop.f32.mrf.mxu0  ;;  %v14813_v1 = vpop.f32.mrf.mxu1 }
 0xb6d   : > { %v19631_v34 = vadd.f32 %v19548_v28, %v16341_v60  ;;  %v14814_v25 = vadd.f32 %v14813_v1, %v14774_v20  ;;  %v14853_v58 = vpop.f32.mrf.mxu2  ;;  %v14779_v5 = vadd.f32 %v14778_v24, %v14741_v26 }
 0xb6f   : > { %v14854_v7 = vadd.f32 %v14853_v58, %v14814_v25  ;;  %15414 = vmatmul.f32.gmra.mxu0 %v16803_v45  ;;  %15452 = vmatmul.f32.gmra.mxu1 %v16745_v10 }
 0xb70   : > { %15535 = vmatmul.f32.gmra.mxu3 %v16787_v38 }
 0xb71   : > { %v14888_v18 = vadd.f32 %v14887_v54, %v14854_v7  ;;  %15494 = vmatmul.f32.gmra.mxu2 %v16777_v30  ;;  %v16613_v54 = vld [vmem:[%s16739_s29 + $0xf8] sm:$0x77] }
 0xb72   : > { %12467 = vst [vmem:[#allocation1 + $0x30] ss:$2 sm:$0xff] %v16613_v54 }
 0xb73   : > { %v16357_v56 = vmax.f32 %v14888_v18, 0.0  ;;  %v14891_v4 = vpop.f32.mrf.mxu3 }
 0xb74   : > { %v14783_v57 = vpop.f32.mrf.mxu0  ;;  %v14819_v41 = vpop.f32.mrf.mxu1 }
 0xb75   : > { %v19638_v28 = vadd.f32 %v19555_v32, %v16357_v56  ;;  %v14820_v42 = vadd.f32 %v14819_v41, %v14779_v5  ;;  %v14857_v59 = vpop.f32.mrf.mxu2  ;;  %v14784_v26 = vadd.f32 %v14783_v57, %v14745_v15 }
 0xb77   : > { %v14858_v27 = vadd.f32 %v14857_v59, %v14820_v42  ;;  %15422 = vmatmul.f32.gmra.mxu0 %v16814_v48  ;;  %15456 = vmatmul.f32.gmra.mxu1 %v16760_v17 }
 0xb78   : > { %15541 = vmatmul.f32.gmra.mxu3 %v16806_v46 }
 0xb79   : > { %v14892_v0 = vadd.f32 %v14891_v4, %v14858_v27  ;;  %15499 = vmatmul.f32.gmra.mxu2 %v16796_v43  ;;  %v12474_v56 = vld.sshfl [vmem:[#allocation1 + $0x30] sm:$0xff pattern:$0x75316420] }
 0xb7a   : > { %v12504_v4 = vsel %vm336_vm1, %v12474_v56, 0 }
 0xb7b   : > { %v16373_v62 = vmax.f32 %v14892_v0, 0.0  ;;  %v14895_v33 = vpop.f32.mrf.mxu3  ;;  %v15869_v41 = vand.u32 4294901760, %v12504_v4 }
 0xb7c   : > { %v14825_v12 = vpop.f32.mrf.mxu1  ;;  %v14921_v21 = vpop.f32.mrf.mxu0 }
 0xb7d   : > { %v19645_v32 = vadd.f32 %v19562_v3, %v16373_v62  ;;  %v14826_v44 = vadd.f32 %v14825_v12, %v14784_v26  ;;  %v14861_v11 = vpop.f32.mrf.mxu2  ;;  %v14922_v63 = vadd.f32 %v14921_v21, %v19928_v6  ;;  %v15920_v26 = vsub.f32 %v12504_v4, %v15869_v41 }
 0xb7f   : > { %v14862_v36 = vadd.f32 %v14861_v11, %v14826_v44  ;;  %15460 = vmatmul.f32.gmra.mxu1 %v19903_v16  ;;  %15565 = vmatmul.f32.vlgmr.msrb.gmra.mxu0 %v16724_v2 }
 0xb80   : > { %15687 = vmatmul.f32.vlgmr.msrb.gmra.mxu3 %v16724_v2  ;;  %15870 = vmatpush.msrb.mxu0 %v15869_v41 }
 0xb81   : > { %v14896_v50 = vadd.f32 %v14895_v33, %v14862_v36  ;;  %15637 = vmatmul.f32.vlgmr.msrb.gmra.mxu2 %v19929_v40  ;;  %15997 = vmatpush.msrb.mxu3 %v15869_v41  ;;  %v15921_v33 = vand.u32 4294901760, %v15920_v26 }
 0xb82   : > { %15959 = vmatpush.msrb.mxu2 %v15920_v26 }
 0xb83   : > { %v16389_v15 = vmax.f32 %v14896_v50, 0.0  ;;  %v15046_v19 = vpop.f32.mrf.mxu3  ;;  %v15922_v44 = vsub.f32 %v15920_v26, %v15921_v33 }
 0xb84   : > { %v14929_v55 = vpop.f32.mrf.mxu0  ;;  %v14971_v3 = vpop.f32.mrf.mxu1 }
 0xb85   : > { %v19653_v9 = vadd.f32 %v19570_v53, %v16389_v15  ;;  %v14972_v31 = vadd.f32 %v14971_v3, %v14922_v63  ;;  %v15007_v61 = vpop.f32.mrf.mxu2  ;;  %v14930_v20 = vadd.f32 %v14929_v55, %v16879_v13  ;;  %v15923_v36 = vand.u32 4294901760, %v15922_v44 }
 0xb87   : > { %v15008_v47 = vadd.f32 %v15007_v61, %v14972_v31  ;;  %15569 = vmatmul.f32.gmra.mxu0 %v16745_v10  ;;  %15599 = vmatmul.f32.vlgmr.msrb.gmra.mxu1 %v16724_v2 }
 0xb88   : > { %15691 = vmatmul.f32.gmra.mxu3 %v16745_v10  ;;  %15924 = vmatpush.msrb.mxu1 %v15923_v36 }
 0xb89   : > { %v15047_v60 = vadd.f32 %v15046_v19, %v15008_v47  ;;  %15645 = vmatmul.f32.gmra.mxu2 %v16784_v37 }
 0xb8b   : > { %v15052_v24 = vpop.f32.mrf.mxu3 }
 0xb8c   : > { %v14937_v1 = vpop.f32.mrf.mxu0  ;;  %v14975_v53 = vpop.f32.mrf.mxu1 }
 0xb8d   : > { %v14976_v25 = vadd.f32 %v14975_v53, %v14930_v20  ;;  %v15012_v58 = vpop.f32.mrf.mxu2  ;;  %v14938_v18 = vadd.f32 %v14937_v1, %v16889_v22 }
 0xb8f   : > { %v15013_v7 = vadd.f32 %v15012_v58, %v14976_v25  ;;  %15573 = vmatmul.f32.gmra.mxu0 %v16760_v17  ;;  %15603 = vmatmul.f32.gmra.mxu1 %v16745_v10  ;;  %v12475_v25 = vld.sshfl [vmem:[#allocation1 + $0x38] sm:$0xff pattern:$0x75316420] }
 0xb90   : > { %15695 = vmatmul.f32.gmra.mxu3 %v16760_v17 }
 0xb91   : > { %v15053_v5 = vadd.f32 %v15052_v24, %v15013_v7  ;;  %15653 = vmatmul.f32.gmra.mxu2 %v16803_v45  ;;  %v12506_v7 = vsel %vm336_vm1, %v12475_v25, 0 }
 0xb93   : > { %v15058_v57 = vpop.f32.mrf.mxu3 }
 0xb94   : > { %v14945_v42 = vpop.f32.mrf.mxu0  ;;  %v14979_v59 = vpop.f32.mrf.mxu1 }
 0xb95   : > { %v14980_v27 = vadd.f32 %v14979_v59, %v14938_v18  ;;  %v15017_v0 = vpop.f32.mrf.mxu2  ;;  %v14946_v12 = vadd.f32 %v14945_v42, %v16899_v49  ;;  %v16108_v18 = vand.u32 4294901760, %v12506_v7 }
 0xb97   : > { %v15018_v62 = vadd.f32 %v15017_v0, %v14980_v27  ;;  %15577 = vmatmul.f32.gmra.mxu0 %v19903_v16  ;;  %15607 = vmatmul.f32.gmra.mxu1 %v16760_v17 }
 0xb98   : > { %15699 = vmatmul.f32.gmra.mxu3 %v19903_v16 }
 0xb99   : > { %v15059_v21 = vadd.f32 %v15058_v57, %v15018_v62  ;;  %15661 = vmatmul.f32.gmra.mxu2 %v16814_v48  ;;  %v16159_v57 = vsub.f32 %v12506_v7, %v16108_v18 }
 0xb9b   : > { %v15064_v11 = vpop.f32.mrf.mxu3  ;;  %v16160_v26 = vand.u32 4294901760, %v16159_v57 }
 0xb9c   : > { %v14983_v63 = vpop.f32.mrf.mxu1  ;;  %v15088_v50 = vpop.f32.mrf.mxu0 }
 0xb9d   : > { %v14984_v15 = vadd.f32 %v14983_v63, %v14946_v12  ;;  %v15022_v19 = vpop.f32.mrf.mxu2  ;;  %v15089_v31 = vadd.f32 %v15088_v50, %v15047_v60 }
 0xb9f   : > { %v15023_v55 = vadd.f32 %v15022_v19, %v14984_v15  ;;  %15611 = vmatmul.f32.gmra.mxu1 %v19903_v16  ;;  %15723 = vmatmul.f32.vlgmr.msra.gmra.mxu0 %v19932_v35 }
 0xba0   : > { %15838 = vmatmul.f32.vlgmr.msra.gmra.mxu3 %v16724_v2  ;;  %16041 = vmatpush.msra.mxu0 %v15921_v33 }
 0xba1   : > { %v15065_v3 = vadd.f32 %v15064_v11, %v15023_v55  ;;  %15804 = vmatmul.f32.vlgmr.msra.gmra.mxu2 %v16724_v2 }
 0xba2   : > { %16109 = vmatpush.msra.mxu2 %v16108_v18 }
 0xba3   : > { %v15210_v61 = vpop.f32.mrf.mxu3 }
 0xba4   : > { %v15092_v47 = vpop.f32.mrf.mxu0  ;;  %v15122_v20 = vpop.f32.mrf.mxu1 }
 0xba5   : > { %v15123_v54 = vadd.f32 %v15122_v20, %v15089_v31  ;;  %v15160_v24 = vpop.f32.mrf.mxu2  ;;  %v15093_v56 = vadd.f32 %v15092_v47, %v15053_v5 }
 0xba6   : > { %v15161_v1 = vadd.f32 %v15160_v24, %v19928_v6 }
 0xba7   : > { %v16342_v53 = vmax.f32 %v15123_v54, 0.0  ;;  %15728 = vmatmul.f32.gmra.mxu0 %v16754_v14  ;;  %15762 = vmatmul.f32.vlgmr.msra.gmra.mxu1 %v19933_v52 }
 0xba8   : > { %v15211_v58 = vadd.f32 %v15210_v61, %v15161_v1  ;;  %15842 = vmatmul.f32.gmra.mxu3 %v16745_v10  ;;  %16075 = vmatpush.msra.mxu1 %v15869_v41 }
 0xba9   : > { %v19682_v60 = vadd.f32 %v19599_v51, %v16342_v53  ;;  %15808 = vmatmul.f32.gmra.mxu2 %v16745_v10  ;;  %v16161_v51 = vsub.f32 %v16159_v57, %v16160_v26 }
 0xbab   : > { %v15214_v4 = vpop.f32.mrf.mxu3  ;;  %v16162_v12 = vand.u32 4294901760, %v16161_v51 }
 0xbac   : > { %v15096_v42 = vpop.f32.mrf.mxu0  ;;  %v15126_v59 = vpop.f32.mrf.mxu1 }
 0xbad   : > { %v15127_v27 = vadd.f32 %v15126_v59, %v15093_v56  ;;  %v15168_v0 = vpop.f32.mrf.mxu2  ;;  %v15097_v44 = vadd.f32 %v15096_v42, %v15059_v21  ;;  %16163 = vmatpush.msra.mxu3 %v16162_v12 }
 0xbae   : > { %v15169_v62 = vadd.f32 %v15168_v0, %v16879_v13 }
 0xbaf   : > { %v16358_v33 = vmax.f32 %v15127_v27, 0.0  ;;  %15733 = vmatmul.f32.gmra.mxu0 %v16777_v30  ;;  %15768 = vmatmul.f32.gmra.mxu1 %v16767_v23 }
 0xbb0   : > { %v15215_v41 = vadd.f32 %v15214_v4, %v15169_v62  ;;  %15846 = vmatmul.f32.gmra.mxu3 %v16760_v17 }
 0xbb1   : > { %v19690_v5 = vadd.f32 %v19607_v39, %v16358_v33  ;;  %15812 = vmatmul.f32.gmra.mxu2 %v16760_v17 }
 0xbb3   : > { %v15218_v11 = vpop.f32.mrf.mxu3 }
 0xbb4   : > { %v15100_v36 = vpop.f32.mrf.mxu0  ;;  %v15130_v63 = vpop.f32.mrf.mxu1 }
 0xbb5   : > { %v15131_v50 = vadd.f32 %v15130_v63, %v15097_v44  ;;  %v15176_v15 = vpop.f32.mrf.mxu2  ;;  %v15101_v21 = vadd.f32 %v15100_v36, %v15065_v3 }
 0xbb6   : > { %v15177_v19 = vadd.f32 %v15176_v15, %v16889_v22 }
 0xbb7   : > { %v16374_v55 = vmax.f32 %v15131_v50, 0.0  ;;  %15738 = vmatmul.f32.gmra.mxu0 %v16796_v43  ;;  %15774 = vmatmul.f32.gmra.mxu1 %v16787_v38 }
 0xbb8   : > { %v15219_v31 = vadd.f32 %v15218_v11, %v15177_v19  ;;  %15850 = vmatmul.f32.gmra.mxu3 %v19903_v16 }
 0xbb9   : > { %v19698_v39 = vadd.f32 %v19615_v8, %v16374_v55  ;;  %15816 = vmatmul.f32.gmra.mxu2 %v19903_v16 }
 0xbbb   : > { %v15222_v61 = vpop.f32.mrf.mxu3 }
 0xbbc   : > { %v15134_v47 = vpop.f32.mrf.mxu1  ;;  %v15246_v20 = vpop.f32.mrf.mxu0 }
 0xbbd   : > { %v15135_v54 = vadd.f32 %v15134_v47, %v15101_v21  ;;  %v15184_v24 = vpop.f32.mrf.mxu2  ;;  %v15247_v3 = vadd.f32 %v15246_v20, %v15211_v58 }
 0xbbe   : > { %v15185_v1 = vadd.f32 %v15184_v24, %v16899_v49 }
 0xbbf   : > { %v16390_v53 = vmax.f32 %v15135_v54, 0.0  ;;  %15780 = vmatmul.f32.gmra.mxu1 %v16806_v46  ;;  %15876 = vmatmul.f32.vlgmr.msrb.gmra.mxu0 %v19929_v40 }
 0xbc0   : > { %v15223_v25 = vadd.f32 %v15222_v61, %v15185_v1  ;;  %16001 = vmatmul.f32.vlgmr.msrb.gmra.mxu3 %v19933_v52  ;;  %16198 = vmatpush.msrb.mxu0 %v16159_v57 }
 0xbc1   : > { %v19706_v8 = vadd.f32 %v19623_v29, %v16390_v53  ;;  %15962 = vmatmul.f32.vlgmr.msrb.gmra.mxu2 %v19932_v35  ;;  %16314 = vmatpush.msrb.mxu3 %v16108_v18 }
 0xbc2   : > { %16280 = vmatpush.msrb.mxu2 %v16160_v26 }
 0xbc3   : > { %v15361_v7 = vpop.f32.mrf.mxu3 }
 0xbc4   : > { %v15251_v56 = vpop.f32.mrf.mxu0  ;;  %v15285_v4 = vpop.f32.mrf.mxu1 }
 0xbc5   : > { %v15286_v42 = vadd.f32 %v15285_v4, %v15247_v3  ;;  %v15327_v59 = vpop.f32.mrf.mxu2  ;;  %v15252_v57 = vadd.f32 %v15251_v56, %v15215_v41 }
 0xbc7   : > { %v15328_v27 = vadd.f32 %v15327_v59, %v15286_v42  ;;  %15884 = vmatmul.f32.gmra.mxu0 %v16784_v37  ;;  %15926 = vmatmul.f32.vlgmr.msrb.gmra.mxu1 %v16724_v2 }
 0xbc8   : > { %16007 = vmatmul.f32.gmra.mxu3 %v16767_v23  ;;  %16236 = vmatpush.msrb.mxu1 %v16108_v18 }
 0xbc9   : > { %v15362_v29 = vadd.f32 %v15361_v7, %v15328_v27  ;;  %15967 = vmatmul.f32.gmra.mxu2 %v16754_v14 }
 0xbcb   : > { %v16343_v0 = vmax.f32 %v15362_v29, 0.0  ;;  %v15365_v26 = vpop.f32.mrf.mxu3 }
 0xbcc   : > { %v15256_v58 = vpop.f32.mrf.mxu0  ;;  %v15291_v62 = vpop.f32.mrf.mxu1 }
 0xbcd   : > { %v19714_v33 = vadd.f32 %v19631_v34, %v16343_v0  ;;  %v15292_v51 = vadd.f32 %v15291_v62, %v15252_v57  ;;  %v15331_v12 = vpop.f32.mrf.mxu2  ;;  %v15257_v41 = vadd.f32 %v15256_v58, %v15219_v31 }
 0xbcf   : > { %v15332_v44 = vadd.f32 %v15331_v12, %v15292_v51  ;;  %15892 = vmatmul.f32.gmra.mxu0 %v16803_v45  ;;  %15930 = vmatmul.f32.gmra.mxu1 %v16745_v10 }
 0xbd0   : > { %16013 = vmatmul.f32.gmra.mxu3 %v16787_v38 }
 0xbd1   : > { %v15366_v18 = vadd.f32 %v15365_v26, %v15332_v44  ;;  %15972 = vmatmul.f32.gmra.mxu2 %v16777_v30 }
 0xbd3   : > { %v16359_v11 = vmax.f32 %v15366_v18, 0.0  ;;  %v15369_v36 = vpop.f32.mrf.mxu3 }
 0xbd4   : > { %v15261_v63 = vpop.f32.mrf.mxu0  ;;  %v15297_v50 = vpop.f32.mrf.mxu1 }
 0xbd5   : > { %v19721_v34 = vadd.f32 %v19638_v28, %v16359_v11  ;;  %v15298_v15 = vadd.f32 %v15297_v50, %v15257_v41  ;;  %v15335_v19 = vpop.f32.mrf.mxu2  ;;  %v15262_v31 = vadd.f32 %v15261_v63, %v15223_v25 }
 0xbd7   : > { %v15336_v55 = vadd.f32 %v15335_v19, %v15298_v15  ;;  %15900 = vmatmul.f32.gmra.mxu0 %v16814_v48  ;;  %15934 = vmatmul.f32.gmra.mxu1 %v16760_v17 }
 0xbd8   : > { %16019 = vmatmul.f32.gmra.mxu3 %v16806_v46 }
 0xbd9   : > { %v15370_v21 = vadd.f32 %v15369_v36, %v15336_v55  ;;  %15977 = vmatmul.f32.gmra.mxu2 %v16796_v43 }
 0xbdb   : > { %v16375_v61 = vmax.f32 %v15370_v21, 0.0  ;;  %v15373_v47 = vpop.f32.mrf.mxu3 }
 0xbdc   : > { %v15303_v20 = vpop.f32.mrf.mxu1  ;;  %v15399_v54 = vpop.f32.mrf.mxu0 }
 0xbdd   : > { %v19728_v28 = vadd.f32 %v19645_v32, %v16375_v61  ;;  %v15304_v24 = vadd.f32 %v15303_v20, %v15262_v31  ;;  %v15339_v1 = vpop.f32.mrf.mxu2  ;;  %v15400_v3 = vadd.f32 %v15399_v54, %v19928_v6 }
 0xbdf   : > { %v15340_v53 = vadd.f32 %v15339_v1, %v15304_v24  ;;  %15938 = vmatmul.f32.gmra.mxu1 %v19903_v16  ;;  %16043 = vmatmul.f32.vlgmr.msra.gmra.mxu0 %v16724_v2 }
 0xbe0   : > { %16165 = vmatmul.f32.vlgmr.msra.gmra.mxu3 %v16724_v2 }
 0xbe1   : > { %v15374_v7 = vadd.f32 %v15373_v47, %v15340_v53  ;;  %16115 = vmatmul.f32.vlgmr.msra.gmra.mxu2 %v19929_v40 }
 0xbe3   : > { %v16391_v25 = vmax.f32 %v15374_v7, 0.0  ;;  %v15524_v56 = vpop.f32.mrf.mxu3 }
 0xbe4   : > { %v15407_v4 = vpop.f32.mrf.mxu0  ;;  %v15449_v42 = vpop.f32.mrf.mxu1 }
 0xbe5   : > { %v19736_v32 = vadd.f32 %v19653_v9, %v16391_v25  ;;  %v15450_v59 = vadd.f32 %v15449_v42, %v15400_v3  ;;  %v15485_v27 = vpop.f32.mrf.mxu2  ;;  %v15408_v57 = vadd.f32 %v15407_v4, %v16879_v13 }
 0xbe7   : > { %v15486_v29 = vadd.f32 %v15485_v27, %v15450_v59  ;;  %16047 = vmatmul.f32.gmra.mxu0 %v16745_v10  ;;  %16077 = vmatmul.f32.vlgmr.msra.gmra.mxu1 %v16724_v2 }
 0xbe8   : > { %16169 = vmatmul.f32.gmra.mxu3 %v16745_v10 }
 0xbe9   : > { %v15525_v0 = vadd.f32 %v15524_v56, %v15486_v29  ;;  %16123 = vmatmul.f32.gmra.mxu2 %v16784_v37 }
 0xbeb   : > { %v15530_v40 = vpop.f32.mrf.mxu3 }
 0xbec   : > { %v15415_v26 = vpop.f32.mrf.mxu0  ;;  %v15453_v58 = vpop.f32.mrf.mxu1 }
 0xbed   : > { %v15454_v62 = vadd.f32 %v15453_v58, %v15408_v57  ;;  %v15490_v9 = vpop.f32.mrf.mxu2  ;;  %v15416_v12 = vadd.f32 %v15415_v26, %v16889_v22 }
 0xbef   : > { %v15491_v51 = vadd.f32 %v15490_v9, %v15454_v62  ;;  %16051 = vmatmul.f32.gmra.mxu0 %v16760_v17  ;;  %16081 = vmatmul.f32.gmra.mxu1 %v16745_v10 }
 0xbf0   : > { %16173 = vmatmul.f32.gmra.mxu3 %v16760_v17 }
 0xbf1   : > { %v15531_v44 = vadd.f32 %v15530_v40, %v15491_v51  ;;  %16131 = vmatmul.f32.gmra.mxu2 %v16803_v45 }
 0xbf3   : > { %v15536_v18 = vpop.f32.mrf.mxu3 }
 0xbf4   : > { %v15423_v41 = vpop.f32.mrf.mxu0  ;;  %v15457_v37 = vpop.f32.mrf.mxu1 }
 0xbf5   : > { %v15458_v11 = vadd.f32 %v15457_v37, %v15416_v12  ;;  %v15495_v36 = vpop.f32.mrf.mxu2  ;;  %v15424_v50 = vadd.f32 %v15423_v41, %v16899_v49 }
 0xbf7   : > { %v15496_v63 = vadd.f32 %v15495_v36, %v15458_v11  ;;  %16055 = vmatmul.f32.gmra.mxu0 %v19903_v16  ;;  %16085 = vmatmul.f32.gmra.mxu1 %v16760_v17 }
 0xbf8   : > { %16177 = vmatmul.f32.gmra.mxu3 %v19903_v16 }
 0xbf9   : > { %v15537_v15 = vadd.f32 %v15536_v18, %v15496_v63  ;;  %16139 = vmatmul.f32.gmra.mxu2 %v16814_v48 }
 0xbfb   : > { %v15542_v19 = vpop.f32.mrf.mxu3 }
 0xbfc   : > { %v15461_v55 = vpop.f32.mrf.mxu1  ;;  %v15566_v45 = vpop.f32.mrf.mxu0 }
 0xbfd   : > { %v15462_v21 = vadd.f32 %v15461_v55, %v15424_v50  ;;  %v15500_v31 = vpop.f32.mrf.mxu2  ;;  %v15567_v61 = vadd.f32 %v15566_v45, %v15525_v0 }
 0xbff   : > { %v15501_v47 = vadd.f32 %v15500_v31, %v15462_v21  ;;  %16089 = vmatmul.f32.gmra.mxu1 %v19903_v16  ;;  %16201 = vmatmul.f32.vlgmr.msrb.gmra.mxu0 %v19932_v35 }
 0xc00   : > { %16316 = vmatmul.f32.vlgmr.msrb.gmra.mxu3 %v16724_v2 }
 0xc01   : > { %v15543_v20 = vadd.f32 %v15542_v19, %v15501_v47  ;;  %16282 = vmatmul.f32.vlgmr.msrb.gmra.mxu2 %v16724_v2 }
 0xc03   : > { %v15688_v54 = vpop.f32.mrf.mxu3 }
 0xc04   : > { %v15570_v24 = vpop.f32.mrf.mxu0  ;;  %v15600_v1 = vpop.f32.mrf.mxu1 }
 0xc05   : > { %v15571_v48 = vadd.f32 %v15570_v24, %v15531_v44  ;;  %v15601_v53 = vadd.f32 %v15600_v1, %v15567_v61  ;;  %v15638_v3 = vpop.f32.mrf.mxu2 }
 0xc06   : > { %v15639_v7 = vadd.f32 %v15638_v3, %v19928_v6 }
 0xc07   : > { %v16344_v25 = vmax.f32 %v15601_v53, 0.0  ;;  %16206 = vmatmul.f32.gmra.mxu0 %v16754_v14  ;;  %16240 = vmatmul.f32.vlgmr.msrb.gmra.mxu1 %v19933_v52 }
 0xc08   : > { %v15689_v56 = vadd.f32 %v15688_v54, %v15639_v7  ;;  %16320 = vmatmul.f32.gmra.mxu3 %v16745_v10 }
 0xc09   : > { %v19762_v35 = vadd.f32 %v19682_v60, %v16344_v25  ;;  %16286 = vmatmul.f32.gmra.mxu2 %v16745_v10 }
 0xc0b   : > { %v15692_v2 = vpop.f32.mrf.mxu3 }
 0xc0c   : > { %v15574_v4 = vpop.f32.mrf.mxu0  ;;  %v15604_v42 = vpop.f32.mrf.mxu1 }
 0xc0d   : > { %v15575_v59 = vadd.f32 %v15574_v4, %v15537_v15  ;;  %v15605_v27 = vadd.f32 %v15604_v42, %v15571_v48  ;;  %v15646_v29 = vpop.f32.mrf.mxu2 }
 0xc0e   : > { %v15647_v57 = vadd.f32 %v15646_v29, %v16879_v13 }
 0xc0f   : > { %v16360_v0 = vmax.f32 %v15605_v27, 0.0  ;;  %16211 = vmatmul.f32.gmra.mxu0 %v16777_v30  ;;  %16246 = vmatmul.f32.gmra.mxu1 %v16767_v23 }
 0xc10   : > { %v15693_v14 = vadd.f32 %v15692_v2, %v15647_v57  ;;  %16324 = vmatmul.f32.gmra.mxu3 %v16760_v17 }
 0xc11   : > { %v19770_v52 = vadd.f32 %v19690_v5, %v16360_v0  ;;  %16290 = vmatmul.f32.gmra.mxu2 %v16760_v17 }
 0xc13   : > { %v15696_v10 = vpop.f32.mrf.mxu3 }
 0xc14   : > { %v15578_v60 = vpop.f32.mrf.mxu0  ;;  %v15608_v40 = vpop.f32.mrf.mxu1 }
 0xc15   : > { %v15579_v26 = vadd.f32 %v15578_v60, %v15543_v20  ;;  %v15609_v58 = vadd.f32 %v15608_v40, %v15575_v59  ;;  %v15654_v62 = vpop.f32.mrf.mxu2 }
 0xc16   : > { %v15655_v9 = vadd.f32 %v15654_v62, %v16889_v22 }
 0xc17   : > { %v16376_v51 = vmax.f32 %v15609_v58, 0.0  ;;  %16216 = vmatmul.f32.gmra.mxu0 %v16796_v43  ;;  %16252 = vmatmul.f32.gmra.mxu1 %v16787_v38 }
 0xc18   : > { %v15697_v23 = vadd.f32 %v15696_v10, %v15655_v9  ;;  %16328 = vmatmul.f32.gmra.mxu3 %v19903_v16 }
 0xc19   : > { %v19778_v30 = vadd.f32 %v19698_v39, %v16376_v51  ;;  %16294 = vmatmul.f32.gmra.mxu2 %v19903_v16 }
 0xc1b   : > { %v15700_v17 = vpop.f32.mrf.mxu3 }
 0xc1c   : > { %v15612_v5 = vpop.f32.mrf.mxu1  ;;  %v15724_v12 = vpop.f32.mrf.mxu0 }
 0xc1d   : > { %v15613_v44 = vadd.f32 %v15612_v5, %v15579_v26  ;;  %v15662_v18 = vpop.f32.mrf.mxu2  ;;  %v15725_v41 = vadd.f32 %v15724_v12, %v15689_v56 }
 0xc1e   : > { %v15663_v37 = vadd.f32 %v15662_v18, %v16899_v49 }
 0xc1f   : > { %v16392_v11 = vmax.f32 %v15613_v44, 0.0  ;;  %16258 = vmatmul.f32.gmra.mxu1 %v16806_v46 }
 0xc20   : > { %v15701_v38 = vadd.f32 %v15700_v17, %v15663_v37 }
 0xc21   : > { %v19784_v43 = vadd.f32 %v19706_v8, %v16392_v11 }
 0xc23   : > { %v15839_v36 = vpop.f32.mrf.mxu3 }
 0xc24   : > { %v15729_v39 = vpop.f32.mrf.mxu0  ;;  %v15763_v63 = vpop.f32.mrf.mxu1 }
 0xc25   : > { %v15730_v50 = vadd.f32 %v15729_v39, %v15693_v14  ;;  %v15764_v16 = vadd.f32 %v15763_v63, %v15725_v41  ;;  %v15805_v15 = vpop.f32.mrf.mxu2 }
 0xc27   : > { %v15806_v19 = vadd.f32 %v15805_v15, %v15764_v16 }
 0xc29   : > { %v15840_v55 = vadd.f32 %v15839_v36, %v15806_v19 }
 0xc2b   : > { %v16345_v45 = vmax.f32 %v15840_v55, 0.0  ;;  %v15843_v21 = vpop.f32.mrf.mxu3 }
 0xc2c   : > { %v15734_v31 = vpop.f32.mrf.mxu0  ;;  %v15769_v61 = vpop.f32.mrf.mxu1 }
 0xc2d   : > { %v19787_v47 = vadd.f32 %v19714_v33, %v16345_v45  ;;  %v15735_v46 = vadd.f32 %v15734_v31, %v15697_v23  ;;  %v15770_v20 = vadd.f32 %v15769_v61, %v15730_v50  ;;  %v15809_v54 = vpop.f32.mrf.mxu2 }
 0xc2f   : > { %v15810_v8 = vadd.f32 %v15809_v54, %v15770_v20 }
 0xc31   : > { %v15844_v24 = vadd.f32 %v15843_v21, %v15810_v8 }
 0xc33   : > { %v16361_v1 = vmax.f32 %v15844_v24, 0.0  ;;  %v15847_v48 = vpop.f32.mrf.mxu3 }
 0xc34   : > { %v15739_v53 = vpop.f32.mrf.mxu0  ;;  %v15775_v3 = vpop.f32.mrf.mxu1 }
 0xc35   : > { %v19790_v7 = vadd.f32 %v19721_v34, %v16361_v1  ;;  %v15740_v25 = vadd.f32 %v15739_v53, %v15701_v38  ;;  %v15776_v56 = vadd.f32 %v15775_v3, %v15735_v46  ;;  %v15813_v2 = vpop.f32.mrf.mxu2 }
 0xc37   : > { %v15814_v4 = vadd.f32 %v15813_v2, %v15776_v56 }
 0xc39   : > { %v15848_v42 = vadd.f32 %v15847_v48, %v15814_v4 }
 0xc3b   : > { %v16377_v59 = vmax.f32 %v15848_v42, 0.0  ;;  %v15851_v33 = vpop.f32.mrf.mxu3 }
 0xc3c   : > { %v15781_v27 = vpop.f32.mrf.mxu1  ;;  %v15877_v29 = vpop.f32.mrf.mxu0 }
 0xc3d   : > { %v19793_v57 = vadd.f32 %v19728_v28, %v16377_v59  ;;  %v15782_v0 = vadd.f32 %v15781_v27, %v15740_v25  ;;  %v15817_v14 = vpop.f32.mrf.mxu2  ;;  %v15878_v55 = vadd.f32 %v15877_v29, %v19928_v6 }
 0xc3f   : > { %v15818_v10 = vadd.f32 %v15817_v14, %v15782_v0 }
 0xc41   : > { %v15852_v60 = vadd.f32 %v15851_v33, %v15818_v10 }
 0xc43   : > { %v16393_v40 = vmax.f32 %v15852_v60, 0.0  ;;  %v16002_v26 = vpop.f32.mrf.mxu3 }
 0xc44   : > { %v15885_v34 = vpop.f32.mrf.mxu0  ;;  %v15927_v58 = vpop.f32.mrf.mxu1 }
 0xc45   : > { %v19796_v62 = vadd.f32 %v19736_v32, %v16393_v40  ;;  %v15963_v9 = vpop.f32.mrf.mxu2  ;;  %v15928_v46 = vadd.f32 %v15927_v58, %v15878_v55  ;;  %v15886_v1 = vadd.f32 %v15885_v34, %v16879_v13  ;;  %v16648_v34 = vld [vmem:[%s17607_s21] sm:$0xff] }
 0xc47   : > { %v15964_v20 = vadd.f32 %v15963_v9, %v15928_v46 }
 0xc49   : > { %v16003_v3 = vadd.f32 %v16002_v26, %v15964_v20  ;;  %v16452_v26 = vperm.slane %v16648_v34, 3 }
 0xc4b   : > { %v16008_v51 = vpop.f32.mrf.mxu3  ;;  %v19820_v55 = vperm.slane %v16452_v26, 3 }
 0xc4c   : > { %v15893_v23 = vpop.f32.mrf.mxu0  ;;  %v15931_v17 = vpop.f32.mrf.mxu1 }
 0xc4d   : > { %v15968_v5 = vpop.f32.mrf.mxu2  ;;  %v15932_v25 = vadd.f32 %v15931_v17, %v15886_v1  ;;  %v15894_v4 = vadd.f32 %v15893_v23, %v16889_v22  ;;  %v16453_v17 = vperm.slane %v16648_v34, 7 }
 0xc4f   : > { %v15969_v59 = vadd.f32 %v15968_v5, %v15932_v25  ;;  %v16457_v20 = vperm.slane %v16453_v17, 3 }
 0xc51   : > { %v16009_v58 = vadd.f32 %v16008_v51, %v15969_v59 }
 0xc53   : > { %v19798_v12 = vpop.f32.mrf.mxu3 }
 0xc54   : > { %v15901_v28 = vpop.f32.mrf.mxu0  ;;  %v15935_v44 = vpop.f32.mrf.mxu1 }
 0xc55   : > { %v15973_v18 = vpop.f32.mrf.mxu2  ;;  %v15936_v40 = vadd.f32 %v15935_v44, %v15894_v4  ;;  %v15902_v5 = vadd.f32 %v15901_v28, %v16899_v49 }
 0xc5b   : > { %v19800_v41 = vpop.f32.mrf.mxu3 }
 0xc5c   : > { %v19802_v37 = vpop.f32.mrf.mxu1  ;;  %v16044_v11 = vpop.f32.mrf.mxu0 }
 0xc5d   : > { %v19804_v38 = vpop.f32.mrf.mxu2  ;;  %v16045_v56 = vadd.f32 %v16044_v11, %v16003_v3  ;;  %v15940_v28 = vadd.f32 %v19802_v37, %v15902_v5 }
 0xc63   : > { %v16166_v36 = vpop.f32.mrf.mxu3 }
 0xc64   : > { %v16048_v32 = vpop.f32.mrf.mxu0  ;;  %v16078_v39 = vpop.f32.mrf.mxu1 }
 0xc65   : > { %v16116_v63 = vpop.f32.mrf.mxu2  ;;  %v16079_v42 = vadd.f32 %v16078_v39, %v16045_v56  ;;  %v16049_v11 = vadd.f32 %v16048_v32, %v16009_v58  ;;  %v15974_v39 = vadd.f32 %v15973_v18, %v15936_v40 }
 0xc66   : > { %v16117_v48 = vadd.f32 %v16116_v63, %v19928_v6 }
 0xc67   : > { %v16346_v6 = vmax.f32 %v16079_v42, 0.0 }
 0xc68   : > { %v16167_v2 = vadd.f32 %v16166_v36, %v16117_v48  ;;  %v16015_v48 = vadd.f32 %v19798_v12, %v15974_v39 }
 0xc69   : > { %v16444_v63 = vadd.f32 %v19762_v35, %v16346_v6 }
 0xc6b   : > { %v16170_v50 = vpop.f32.mrf.mxu3 }
 0xc6c   : > { %v16052_v16 = vpop.f32.mrf.mxu0  ;;  %v16082_v15 = vpop.f32.mrf.mxu1 }
 0xc6d   : > { %v16124_v19 = vpop.f32.mrf.mxu2  ;;  %v16053_v56 = vadd.f32 %v16052_v16, %v16015_v48  ;;  %v4336_v48 = vpop.xlane.xlu0 %4335 }
 0xc6e   : > { %v16125_v14 = vadd.f32 %v16124_v19, %v16879_v13  ;;  %v16083_v13 = vadd.f32 %v16082_v15, %v16049_v11  ;;  %v16458_v15 = vmul.f32 %v19820_v55, %v16444_v63 }
 0xc70   : > { %v16171_v36 = vadd.f32 %v16170_v50, %v16125_v14  ;;  %v16362_v35 = vmax.f32 %v16083_v13, 0.0 }
 0xc73   : > { %v16174_v45 = vpop.f32.mrf.mxu3 }
 0xc74   : > { %v19807_v21 = vpop.f32.mrf.mxu0  ;;  %v16086_v31 = vpop.f32.mrf.mxu1 }
 0xc75   : > { %v16132_v61 = vpop.f32.mrf.mxu2 }
 0xc76   : > { %v16133_v51 = vadd.f32 %v16132_v61, %v16889_v22  ;;  %v15979_v22 = vadd.f32 %v19804_v38, %v15940_v28  ;;  %v16087_v61 = vadd.f32 %v16086_v31, %v16053_v56 }
 0xc78   : > { %v16021_v16 = vadd.f32 %v19800_v41, %v15979_v22 }
 0xc7a   : > { %v16057_v31 = vadd.f32 %v19807_v21, %v16021_v16 }
 0xc7b   : > { %v19809_v54 = vpop.f32.mrf.mxu3 }
 0xc7c   : > { %v19811_v8 = vpop.f32.mrf.mxu1  ;;  %v16202_v24 = vpop.f32.mrf.mxu0 }
 0xc7d   : > { %v16140_v53 = vpop.f32.mrf.mxu2  ;;  %v16203_v33 = vadd.f32 %v16202_v24, %v16167_v2  ;;  %v16175_v2 = vadd.f32 %v16174_v45, %v16133_v51  ;;  %v16378_v45 = vmax.f32 %v16087_v61, 0.0 }
 0xc83   : > { %v16317_v27 = vpop.f32.mrf.mxu3 }
 0xc84   : > { %v16207_v29 = vpop.f32.mrf.mxu0  ;;  %v16241_v0 = vpop.f32.mrf.mxu1 }
 0xc85   : > { %v16242_v10 = vadd.f32 %v16241_v0, %v16203_v33  ;;  %v16283_v60 = vpop.f32.mrf.mxu2  ;;  %v16208_v19 = vadd.f32 %v16207_v29, %v16171_v36 }
 0xc87   : > { %v16284_v9 = vadd.f32 %v16283_v60, %v16242_v10 }
 0xc89   : > { %v16318_v23 = vadd.f32 %v16317_v27, %v16284_v9  ;;  %v16141_v27 = vadd.f32 %v16140_v53, %v16899_v49  ;;  %v16448_v49 = vadd.f32 %v19778_v30, %v16378_v45 }
 0xc8b   : > { %v16347_v46 = vmax.f32 %v16318_v23, 0.0  ;;  %v16321_v44 = vpop.f32.mrf.mxu3  ;;  %v16179_v40 = vadd.f32 %v19809_v54, %v16141_v27  ;;  %v16462_v21 = vmul.f32 %v19820_v55, %v16448_v49 }
 0xc8c   : > { %v16247_v24 = vpop.f32.mrf.mxu1  ;;  %v16212_v18 = vpop.f32.mrf.mxu0 }
 0xc8d   : > { %v16445_v1 = vadd.f32 %v19787_v47, %v16347_v46  ;;  %v16248_v32 = vadd.f32 %v16247_v24, %v16208_v19  ;;  %v16287_v50 = vpop.f32.mrf.mxu2  ;;  %v16446_v47 = vadd.f32 %v19770_v52, %v16362_v35  ;;  %v16213_v59 = vadd.f32 %v16212_v18, %v16175_v2  ;;  %v4330_v46 = vpop.xlane.xlu2 %4329 }
 0xc8f   : > { %v16288_v3 = vadd.f32 %v16287_v50, %v16248_v32  ;;  %v16459_v25 = vmul.f32 %v16457_v20, %v16445_v1  ;;  %v16460_v38 = vmul.f32 %v19820_v55, %v16446_v47 }
 0xc91   : > { %v16322_v4 = vadd.f32 %v16321_v44, %v16288_v3  ;;  %v16466_v42 = vadd.f32 %v16459_v25, %v16458_v15 }
 0xc93   : > { %v16363_v33 = vmax.f32 %v16322_v4, 0.0  ;;  %16467 = vadd.xlane.f32.xlu2 %v16466_v42  ;;  %v16325_v37 = vpop.f32.mrf.mxu3 }
 0xc94   : > { %v16253_v12 = vpop.f32.mrf.mxu1  ;;  %v16217_v52 = vpop.f32.mrf.mxu0 }
 0xc95   : > { %v16447_v29 = vadd.f32 %v19790_v7, %v16363_v33  ;;  %v16254_v0 = vadd.f32 %v16253_v12, %v16213_v59  ;;  %v16291_v14 = vpop.f32.mrf.mxu2  ;;  %v16091_v7 = vadd.f32 %v19811_v8, %v16057_v31  ;;  %v16218_v53 = vadd.f32 %v16217_v52, %v16179_v40  ;;  %v4333_v44 = vpop.xlane.xlu2 %4332 }
 0xc97   : > { %v16292_v10 = vadd.f32 %v16291_v14, %v16254_v0  ;;  %v16461_v60 = vmul.f32 %v16457_v20, %v16447_v29  ;;  %v16394_v36 = vmax.f32 %v16091_v7, 0.0 }
 0xc99   : > { %v16326_v6 = vadd.f32 %v16325_v37, %v16292_v10  ;;  %v16469_v34 = vadd.f32 %v16461_v60, %v16460_v38  ;;  %v16450_v30 = vadd.f32 %v19784_v43, %v16394_v36  ;;  %v4339_v43 = vpop.xlane.xlu1 %4338 }
 0xc9b   : > { %v16379_v26 = vmax.f32 %v16326_v6, 0.0  ;;  %16470 = vadd.xlane.f32.xlu0 %v16469_v34  ;;  %v16329_v11 = vpop.f32.mrf.mxu3  ;;  %v16464_v13 = vmul.f32 %v19820_v55, %v16450_v30 }
 0xc9c   : > { %v16259_v41 = vpop.f32.mrf.mxu1 }
 0xc9d   : > { %v16449_v58 = vadd.f32 %v19793_v57, %v16379_v26  ;;  %v16260_v9 = vadd.f32 %v16259_v41, %v16218_v53  ;;  %v16295_v17 = vpop.f32.mrf.mxu2  ;;  %v8376_v24 = vpop.xlane.xlu2 %8375 }
 0xc9f   : > { %v16296_v23 = vadd.f32 %v16295_v17, %v16260_v9  ;;  %v16463_v54 = vmul.f32 %v16457_v20, %v16449_v58 }
 0xca1   : > { %v16330_v5 = vadd.f32 %v16329_v11, %v16296_v23  ;;  %v16472_v39 = vadd.f32 %v16463_v54, %v16462_v21  ;;  %v12431_v25 = vpop.xlane.xlu1 %12430 }
 0xca3   : > { %v16395_v63 = vmax.f32 %v16330_v5, 0.0  ;;  %16473 = vadd.xlane.f32.xlu1 %v16472_v39 }
 0xca5   : > { %v16451_v8 = vadd.f32 %v19796_v62, %v16395_v63  ;;  %v8379_v51 = vpop.xlane.xlu2 %8378  ;;  %v16479_v62 = vsel %vm16478_vm2, %v4330_v46, %v8376_v24 }
 0xca6   : > { %v16480_v3 = vsel %vm16478_vm2, %v4333_v44, %v8379_v51 }
 0xca7   : > { %v16465_v57 = vmul.f32 %v16457_v20, %v16451_v8  ;;  %v12428_v20 = vpop.xlane.xlu0 %12427 }
 0xca9   : > { %v16475_v19 = vadd.f32 %v16465_v57, %v16464_v13 }
 0xcab   : > { %16476 = vadd.xlane.f32.xlu2 %v16475_v19 }
 0xcad   : > { %v8382_v1 = vpop.xlane.xlu2 %8381 }
 0xcae   : > { %v16481_v4 = vsel %vm16478_vm2, %v4336_v48, %v8382_v1 }
 0xcaf   : > { %v16486_v42 = vsel %vm16483_vm3, %v16481_v4, %v12428_v20 }
 0xcb5   : > { %v8385_v32 = vpop.xlane.xlu2 %8384 }
 0xcb6   : > { %v16482_v61 = vsel %vm16478_vm2, %v4339_v43, %v8385_v32 }
 0xcb7   : > { %v16487_v59 = vsel %vm16483_vm3, %v16482_v61, %v12431_v25 }
 0xcbd   : > { %v12422_v50 = vpop.xlane.xlu2 %12421 }
 0xcbe   : > { %v16484_v55 = vsel %vm16483_vm3, %v16479_v62, %v12422_v50 }
 0xcc5   : > { %v12425_v28 = vpop.xlane.xlu2 %12424 }
 0xcc6   : > { %v16485_v15 = vsel %vm16483_vm3, %v16480_v3, %v12425_v28 }
 0xd06   : > { %v16468_v18 = vpop.xlane.xlu2 %16467 }
 0xd07   : > { %v16488_v35 = vsel %vm323_vm0, %v16484_v55, %v16468_v18 }
 0xd08   : > { %16493 = vst.msk [vmem:[%s250_s25] sm:$0xff] %vm16492_vm4, %v16488_v35 }
 0xd0e   : > { %v16471_v56 = vpop.xlane.xlu0 %16470 }
 0xd0f   : > { %v16489_v2 = vsel %vm323_vm0, %v16485_v15, %v16471_v56 }
 0xd10   : > { %16494 = vst.msk [vmem:[%s250_s25 + $0x8] sm:$0xff] %vm16492_vm4, %v16489_v2 }
 0xd16   : > { %v16474_v22 = vpop.xlane.xlu1 %16473 }
 0xd17   : > { %v16490_v47 = vsel %vm323_vm0, %v16486_v42, %v16474_v22 }
 0xd18   : > { %16495 = vst.msk [vmem:[%s250_s25 + $0x10] sm:$0xff] %vm16492_vm4, %v16490_v47 }
 0xd1e   : > { %v16477_v33 = vpop.xlane.xlu2 %16476 }
 0xd1f   : > { %v16491_v12 = vsel %vm323_vm0, %v16487_v59, %v16477_v33 }
 0xd20   : > { %16496 = vst.msk [vmem:[%s250_s25 + $0x18] sm:$0xff] %vm16492_vm4, %v16491_v12 }
 0xd21 PF: > { %s14_s17 = sadd.s32 1, %s16671_s17   ;;  %s19934_s15 = smov %s16667_s16 }
 0xd22   : > { %p11_p6 = scmp.ge.s32.totalorder %s14_s17, 4   ;;  %s19935_s16 = smov %s19937_s18 }
 0xd24   :  { %13 = sbr.rel (!%p11_p6) target bundleno = 2 (0x2), region = 84 }

</bundles_post_ra>
